<compile_context>
chip_gen: v7x
topology: tpu7x:2x2x1
jax: 0.10.0
libtpu: 0.0.40
codegen_flags: <defaults>
</compile_context>

<pallas_src>
import functools

import jax
import jax.numpy as jnp
from jax import lax
from jax.experimental import pallas as pl
from jax.experimental.pallas import tpu as pltpu


def _round_up(x, m):
    return (x + m - 1) // m * m


def _vmem_capacity_bytes():
    try:
        info = pltpu.get_tpu_info()
        return int(getattr(info, "vmem_capacity_bytes", 64 * 1024 * 1024))
    except Exception:
        return 64 * 1024 * 1024


def gru_stack_kernel(x_ref, wih_ref, whh_ref, o_ref,
                     h_ref, gx_ref, act_ref,
                     *, tt, bt, hp, n_layers):
    """All GRU layers over one (Tt, Bt, Hp) time tile.

    grid    : (B/Bt [parallel], T/Tt [arbitrary, sequential in time])
    x_ref   : (Tt, Bt, Hp)   bf16 input tile, time-major
    wih_ref : (L, Hp, 3Hp)   bf16 fused input->hidden weights  [r | z | n]
    whh_ref : (L, Hp, 3Hp)   bf16 fused hidden->hidden weights [r | z | n]
    o_ref   : (Tt, Bt, Hp)   bf16 output hidden states (last layer)
    h_ref   : (L, Bt, Hp)    f32 hidden states, persist across time tiles
    gx_ref  : (Tt, Bt, 3Hp)  bf16 hoisted input-projection gates (per layer)
    act_ref : (Tt, Bt, Hp)   bf16 inter-layer activation tile
    """
    t_tile = pl.program_id(1)

    @pl.when(t_tile == 0)
    def _():
        h_ref[...] = jnp.zeros_like(h_ref)

    hb = bt // 2                       # two independent batch sub-streams
    unroll = True if tt <= 32 else 8   # expose cross-iteration slack to LLO

    def gates(gx_t, gh, h_prev):
        i_r = gx_t[:, 0:hp]
        i_z = gx_t[:, hp:2 * hp]
        i_n = gx_t[:, 2 * hp:3 * hp]
        h_r = gh[:, 0:hp]
        h_z = gh[:, hp:2 * hp]
        h_n = gh[:, 2 * hp:3 * hp]
        r = jax.nn.sigmoid(i_r + h_r)
        z = jax.nn.sigmoid(i_z + h_z)
        n = jnp.tanh(i_n + r * h_n)
        return (1.0 - z) * n + z * h_prev      # f32 gate math

    for layer in range(n_layers):
        src = x_ref if layer == 0 else act_ref
        dst = o_ref if layer == n_layers - 1 else act_ref

        # ---- Hoisted input projection: one big bf16 MXU matmul per tile ----
        cur = src[...].reshape(tt * bt, hp)                     # bf16
        gx = jnp.dot(cur, wih_ref[layer],
                     preferred_element_type=jnp.float32)
        gx_ref[...] = gx.reshape(tt, bt, 3 * hp).astype(jnp.bfloat16)

        whh = whh_ref[layer]                                    # (Hp, 3Hp) bf16

        h0 = h_ref[layer]                                       # (Bt, Hp) f32
        carry0 = (h0[:hb, :], h0[hb:, :])

        # ---- Sequential recurrence: two fused h @ W_hh matmuls per step ----
        def step(t, carry):
            h_a, h_b = carry
            gx_t = gx_ref[t].astype(jnp.float32)                # (Bt, 3Hp)
            # Independent sub-streams: stream B's matmul push hides stream A's
            # EUP/VPU gate latency.
            gh_a = jnp.dot(h_a.astype(jnp.bfloat16), whh,
                           preferred_element_type=jnp.float32)
            gh_b = jnp.dot(h_b.astype(jnp.bfloat16), whh,
                           preferred_element_type=jnp.float32)
            h_a_new = gates(gx_t[:hb], gh_a, h_a)
            h_b_new = gates(gx_t[hb:], gh_b, h_b)
            dst[t] = jnp.concatenate([h_a_new, h_b_new],
                                     axis=0).astype(dst.dtype)
            return (h_a_new, h_b_new)

        h_a_fin, h_b_fin = lax.fori_loop(0, tt, step, carry0, unroll=unroll)
        h_ref[layer] = jnp.concatenate([h_a_fin, h_b_fin], axis=0)


def _fuse_pad_weight(w, H, Hp):
    """(3H, H) torch nn.GRU weight [r; z; n] -> (Hp, 3Hp) bf16, so gates = x @ W."""
    w3 = w.reshape(3, H, H)
    wt = jnp.transpose(w3, (0, 2, 1))                      # gate_g = x @ wt[g]
    wt = jnp.pad(wt, ((0, 0), (0, Hp - H), (0, Hp - H)))   # zero-pad both dims
    wf = jnp.concatenate([wt[0], wt[1], wt[2]], axis=1)    # (Hp, 3Hp) = [r|z|n]
    return wf.astype(jnp.bfloat16)


def gru4rec_forward(seqs, raw_params, *, time_tile=None):
    """seqs: (B, T, H) batch_first (matches PyTorch). Returns log_feats (B, T, H).

    raw_params: list of (w_ih, w_hh) with torch shapes (3H, H), rows [r; z; n].
    """
    B, T, H = seqs.shape
    L = len(raw_params)
    out_dtype = seqs.dtype

    Hp = _round_up(H, 128)
    Bp = _round_up(B, 16)               # 16: bf16 sublane packing

    # --- batch tile: fill MXU M-dim, and give nb>=2 when batch allows (v7x) ---
    if Bp >= 512:
        bt = 256
    elif Bp >= 256:
        bt = 128
    else:
        bt = Bp
    bt = max(16, _round_up(bt, 16))
    Bp = _round_up(Bp, bt)
    nb = Bp // bt

    # --- generation-aware VMEM budget and time tile --------------------------
    vmem_cap = _vmem_capacity_bytes()
    budget = min(int(vmem_cap * 0.85), 110 * 1024 * 1024)
    # double-buffered bf16 weights (2 tensors) + f32 hidden-state scratch
    fixed = 24 * L * Hp * Hp + 4 * L * bt * Hp
    # per-timestep bytes: double-buffered x/o tiles, gx + act scratch (bf16),
    # plus f32/bf16 temporaries of the hoisted projection
    per_tt = 32 * bt * Hp
    tt_cap = max(1, (budget - fixed) // per_tt) if budget > fixed else 1
    tt = 64 if time_tile is None else time_tile
    tt = int(max(1, min(tt, tt_cap, T)))
    Tp = _round_up(T, tt)
    nt = Tp // tt

    # --- fuse / pad / stack weights ------------------------------------------
    wih_all = jnp.stack([_fuse_pad_weight(w_ih, H, Hp) for (w_ih, _) in raw_params])
    whh_all = jnp.stack([_fuse_pad_weight(w_hh, H, Hp) for (_, w_hh) in raw_params])

    # --- pad input, time-major, bf16 ------------------------------------------
    x = jnp.transpose(seqs, (1, 0, 2)).astype(jnp.bfloat16)     # (T, B, H)
    x = jnp.pad(x, ((0, Tp - T), (0, Bp - B), (0, Hp - H)))     # (Tp, Bp, Hp)

    flops = 12 * L * Tp * Bp * Hp * Hp                 # x@Wih + h@Whh per layer
    transcendentals = 3 * L * Tp * Bp * Hp             # 2 sigmoid + 1 tanh
    bytes_accessed = 2 * (Tp * Bp * Hp * 2) + 2 * (L * 3 * Hp * Hp * 2)

    kernel = functools.partial(gru_stack_kernel, tt=tt, bt=bt, hp=Hp, n_layers=L)

    out = pl.pallas_call(
        kernel,
        out_shape=jax.ShapeDtypeStruct((Tp, Bp, Hp), jnp.bfloat16),
        grid_spec=pltpu.PrefetchScalarGridSpec(
            num_scalar_prefetch=0,
            grid=(nb, nt),
            in_specs=[
                pl.BlockSpec((tt, bt, Hp), lambda b, t: (t, b, 0)),
                # Weight-resident inputs; constant index maps => DMA'd once.
                pl.BlockSpec((L, Hp, 3 * Hp), lambda b, t: (0, 0, 0)),
                pl.BlockSpec((L, Hp, 3 * Hp), lambda b, t: (0, 0, 0)),
            ],
            out_specs=pl.BlockSpec((tt, bt, Hp), lambda b, t: (t, b, 0)),
            scratch_shapes=[
                pltpu.VMEM((L, bt, Hp), jnp.float32),        # hidden states
                pltpu.VMEM((tt, bt, 3 * Hp), jnp.bfloat16),  # hoisted input gates
                pltpu.VMEM((tt, bt, Hp), jnp.bfloat16),      # inter-layer tile
            ],
        ),
        compiler_params=pltpu.CompilerParams(
            dimension_semantics=("parallel", "arbitrary"),
            vmem_limit_bytes=int(budget),
        ),
        cost_estimate=pl.CostEstimate(
            flops=int(flops),
            transcendentals=int(transcendentals),
            bytes_accessed=int(bytes_accessed),
        ),
    )(x, wih_all, whh_all)

    out = out[:T, :B, :H].astype(out_dtype)
    return jnp.transpose(out, (1, 0, 2))                        # (B, T, H)


def gru4rec_reference(seqs, raw_params, emulate_kernel=True):
    """Pure-JAX reference identical to torch.nn.GRU(bias=False, batch_first=True).

    With emulate_kernel=True it reproduces the kernel numerics: bf16 matmul
    inputs with f32 accumulation, bf16-stored input-projection gates, bf16
    layer outputs; the hidden-state carry and gate math stay f32.
    """
    def mm(a, b):
        if emulate_kernel:
            a = a.astype(jnp.bfloat16)
            b = b.astype(jnp.bfloat16)
        return jnp.dot(a, b, preferred_element_type=jnp.float32)

    def rnd(v):
        return v.astype(jnp.bfloat16).astype(jnp.float32) if emulate_kernel else v

    x = seqs.astype(jnp.float32)
    for (w_ih, w_hh) in raw_params:
        B, T, H = x.shape
        wih_t = jnp.transpose(w_ih.reshape(3, H, H), (0, 2, 1))
        whh_t = jnp.transpose(w_hh.reshape(3, H, H), (0, 2, 1))

        def step(h, xt):
            i_r = rnd(mm(xt, wih_t[0]))
            i_z = rnd(mm(xt, wih_t[1]))
            i_n = rnd(mm(xt, wih_t[2]))
            h_r = mm(h, whh_t[0])
            h_z = mm(h, whh_t[1])
            h_n = mm(h, whh_t[2])
            r = jax.nn.sigmoid(i_r + h_r)
            z = jax.nn.sigmoid(i_z + h_z)
            n = jnp.tanh(i_n + r * h_n)
            h_new = (1.0 - z) * n + z * h
            return h_new, h_new

        h0 = jnp.zeros((B, H), jnp.float32)
        _, ys = lax.scan(step, h0, jnp.transpose(x, (1, 0, 2)))
        x = jnp.transpose(ys, (1, 0, 2))
        x = rnd(x)   # layer outputs are carried in bf16 by the kernel
    return x


def init_gru_params(key, hidden_size, num_layers):
    """Deterministic init matching nn.GRU shapes: weight_ih_l / weight_hh_l = (3H, H)."""
    params = []
    k = 1.0 / jnp.sqrt(hidden_size)
    for _ in range(num_layers):
        key, k1, k2 = jax.random.split(key, 3)
        w_ih = jax.random.uniform(k1, (3 * hidden_size, hidden_size),
                                  jnp.float32, minval=-k, maxval=k)
        w_hh = jax.random.uniform(k2, (3 * hidden_size, hidden_size),
                                  jnp.float32, minval=-k, maxval=k)
        params.append((w_ih, w_hh))
    return params


if __name__ == "__main__":
    B, T, H, L = 2, 8, 32, 2

    key = jax.random.PRNGKey(0)
    key, kx = jax.random.split(key)
    seqs = jax.random.normal(kx, (B, T, H), dtype=jnp.float32)
    params = init_gru_params(key, H, L)

    out = jax.block_until_ready(gru4rec_forward(seqs, params))
    ref = jax.block_until_ready(gru4rec_reference(seqs, params, emulate_kernel=True))

    assert out.shape == (B, T, H)
    max_diff = float(jnp.max(jnp.abs(out - ref)))
    assert jnp.allclose(out, ref, atol=1e-2, rtol=1e-2), f"mismatch, max diff={max_diff}"

    print("KERNEL_OK")
</pallas_src>

<mosaic_0001>
module attributes {stable_mosaic.version = 11 : i64} {
  func.func @gru_stack_kernel(%arg0: i32, %arg1: i32, %arg2: memref<8x16x128xbf16, #tpu.memory_space<vmem>>, %arg3: memref<2x128x384xbf16, #tpu.memory_space<vmem>>, %arg4: memref<2x128x384xbf16, #tpu.memory_space<vmem>>, %arg5: memref<8x16x128xbf16, #tpu.memory_space<vmem>>, %arg6: memref<2x16x128xf32, #tpu.memory_space<vmem>>, %arg7: memref<8x16x384xbf16, #tpu.memory_space<vmem>>, %arg8: memref<8x16x128xbf16, #tpu.memory_space<vmem>>) attributes {dimension_semantics = [#tpu.dimension_semantics<parallel>, #tpu.dimension_semantics<arbitrary>], iteration_bounds = array<i64: 1, 1>, scalar_prefetch = 0 : i64, scratch_operands = 3 : i64, tpu.core_type = #tpu.core_type<tc>, window_params = [{transform_indices = @transform_0, window_bounds = array<i64: 8, 16, 128>}, {pipeline_mode = #tpu.pipeline_mode<synchronous>, transform_indices = @transform_1, window_bounds = array<i64: 2, 128, 384>}, {pipeline_mode = #tpu.pipeline_mode<synchronous>, transform_indices = @transform_2, window_bounds = array<i64: 2, 128, 384>}, {transform_indices = @transform_3, window_bounds = array<i64: 8, 16, 128>}]} {
    %c0_i32 = arith.constant 0 : i32
    %0 = arith.cmpi eq, %arg1, %c0_i32 : i32
    %1 = arith.extui %0 : i1 to i32
    %c0_i32_0 = arith.constant 0 : i32
    %2 = arith.cmpi ne, %1, %c0_i32_0 : i32
    scf.if %2 {
      %cst_238 = arith.constant 0.000000e+00 : f32
      %1127 = vector.broadcast %cst_238 : f32 to vector<2x16x128xf32>
      %c0_239 = arith.constant 0 : index
      %c0_240 = arith.constant 0 : index
      %c0_241 = arith.constant 0 : index
      %1128 = vector.load %arg6[%c0_239, %c0_240, %c0_241] : memref<2x16x128xf32, #tpu.memory_space<vmem>>, vector<2x16x128xf32>
      tpu.vector_store %arg6[%c0_239, %c0_240, %c0_241], %1127 {strides = array<i32>} : memref<2x16x128xf32, #tpu.memory_space<vmem>>, vector<2x16x128xf32>,
    } else {
    }
    %c0 = arith.constant 0 : index
    %c0_1 = arith.constant 0 : index
    %c0_2 = arith.constant 0 : index
    %3 = vector.load %arg2[%c0, %c0_1, %c0_2] : memref<8x16x128xbf16, #tpu.memory_space<vmem>>, vector<8x16x128xbf16>
    %4 = vector.shape_cast %3 : vector<8x16x128xbf16> to vector<128x128xbf16>
    %c0_3 = arith.constant 0 : index
    %c0_4 = arith.constant 0 : index
    %c0_5 = arith.constant 0 : index
    %5 = vector.load %arg3[%c0_3, %c0_4, %c0_5] : memref<2x128x384xbf16, #tpu.memory_space<vmem>>, vector<1x128x384xbf16>
    %6 = vector.shape_cast %5 : vector<1x128x384xbf16> to vector<128x384xbf16>
    %cst = arith.constant dense<0.000000e+00> : vector<128x384xf32>
    %7 = tpu.matmul %4, %6, %cst {dimension_numbers = #tpu.dot_dimension_numbers<[1], [0], [0], [1], [0, 0, 1, 1], [], []>} : vector<128x128xbf16>, vector<128x384xbf16>, vector<128x384xf32> -> vector<128x384xf32>
    %8 = vector.shape_cast %7 : vector<128x384xf32> to vector<8x16x384xf32>
    %9 = arith.truncf %8 : vector<8x16x384xf32> to vector<8x16x384xbf16>
    %c0_6 = arith.constant 0 : index
    %c0_7 = arith.constant 0 : index
    %c0_8 = arith.constant 0 : index
    %10 = vector.load %arg7[%c0_6, %c0_7, %c0_8] : memref<8x16x384xbf16, #tpu.memory_space<vmem>>, vector<8x16x384xbf16>
    tpu.vector_store %arg7[%c0_6, %c0_7, %c0_8], %9 {strides = array<i32>} : memref<8x16x384xbf16, #tpu.memory_space<vmem>>, vector<8x16x384xbf16>,
    %c0_9 = arith.constant 0 : index
    %c0_10 = arith.constant 0 : index
    %c0_11 = arith.constant 0 : index
    %11 = vector.load %arg4[%c0_9, %c0_10, %c0_11] : memref<2x128x384xbf16, #tpu.memory_space<vmem>>, vector<1x128x384xbf16>
    %12 = vector.shape_cast %11 : vector<1x128x384xbf16> to vector<128x384xbf16>
    %c0_12 = arith.constant 0 : index
    %c0_13 = arith.constant 0 : index
    %c0_14 = arith.constant 0 : index
    %13 = vector.load %arg6[%c0_12, %c0_13, %c0_14] : memref<2x16x128xf32, #tpu.memory_space<vmem>>, vector<1x16x128xf32>
    %14 = vector.shape_cast %13 : vector<1x16x128xf32> to vector<16x128xf32>
    %15 = vector.extract_strided_slice %14 {offsets = [0, 0], sizes = [8, 128], strides = [1, 1]} : vector<16x128xf32> to vector<8x128xf32>
    %16 = vector.extract_strided_slice %14 {offsets = [8, 0], sizes = [8, 128], strides = [1, 1]} : vector<16x128xf32> to vector<8x128xf32>
    %c0_i32_15 = arith.constant 0 : i32
    %17 = arith.index_cast %c0_i32_15 : i32 to index
    %c0_16 = arith.constant 0 : index
    %c0_17 = arith.constant 0 : index
    %18 = vector.load %arg7[%17, %c0_16, %c0_17] : memref<8x16x384xbf16, #tpu.memory_space<vmem>>, vector<1x16x384xbf16>
    %19 = vector.shape_cast %18 : vector<1x16x384xbf16> to vector<16x384xbf16>
    %20 = arith.extf %19 : vector<16x384xbf16> to vector<16x384xf32>
    %21 = arith.truncf %15 : vector<8x128xf32> to vector<8x128xbf16>
    %cst_18 = arith.constant dense<0.000000e+00> : vector<8x384xf32>
    %22 = tpu.matmul %21, %12, %cst_18 {dimension_numbers = #tpu.dot_dimension_numbers<[1], [0], [0], [1], [0, 0, 1, 1], [], []>} : vector<8x128xbf16>, vector<128x384xbf16>, vector<8x384xf32> -> vector<8x384xf32>
    %23 = arith.truncf %16 : vector<8x128xf32> to vector<8x128xbf16>
    %cst_19 = arith.constant dense<0.000000e+00> : vector<8x384xf32>
    %24 = tpu.matmul %23, %12, %cst_19 {dimension_numbers = #tpu.dot_dimension_numbers<[1], [0], [0], [1], [0, 0, 1, 1], [], []>} : vector<8x128xbf16>, vector<128x384xbf16>, vector<8x384xf32> -> vector<8x384xf32>
    %25 = vector.extract_strided_slice %20 {offsets = [0, 0], sizes = [8, 384], strides = [1, 1]} : vector<16x384xf32> to vector<8x384xf32>
    %26 = vector.extract_strided_slice %25 {offsets = [0, 0], sizes = [8, 128], strides = [1, 1]} : vector<8x384xf32> to vector<8x128xf32>
    %27 = vector.extract_strided_slice %25 {offsets = [0, 128], sizes = [8, 128], strides = [1, 1]} : vector<8x384xf32> to vector<8x128xf32>
    %28 = vector.extract_strided_slice %25 {offsets = [0, 256], sizes = [8, 128], strides = [1, 1]} : vector<8x384xf32> to vector<8x128xf32>
    %29 = vector.extract_strided_slice %22 {offsets = [0, 0], sizes = [8, 128], strides = [1, 1]} : vector<8x384xf32> to vector<8x128xf32>
    %30 = vector.extract_strided_slice %22 {offsets = [0, 128], sizes = [8, 128], strides = [1, 1]} : vector<8x384xf32> to vector<8x128xf32>
    %31 = vector.extract_strided_slice %22 {offsets = [0, 256], sizes = [8, 128], strides = [1, 1]} : vector<8x384xf32> to vector<8x128xf32>
    %32 = arith.addf %26, %29 : vector<8x128xf32>
    %33 = arith.negf %32 : vector<8x128xf32>
    %34 = math.exp %33 : vector<8x128xf32>
    %cst_20 = arith.constant 1.000000e+00 : f32
    %35 = vector.broadcast %cst_20 : f32 to vector<8x128xf32>
    %36 = arith.addf %35, %34 : vector<8x128xf32>
    %37 = arith.divf %35, %36 : vector<8x128xf32>
    %38 = arith.addf %27, %30 : vector<8x128xf32>
    %39 = arith.negf %38 : vector<8x128xf32>
    %40 = math.exp %39 : vector<8x128xf32>
    %cst_21 = arith.constant 1.000000e+00 : f32
    %41 = vector.broadcast %cst_21 : f32 to vector<8x128xf32>
    %42 = arith.addf %41, %40 : vector<8x128xf32>
    %43 = arith.divf %41, %42 : vector<8x128xf32>
    %44 = arith.mulf %37, %31 : vector<8x128xf32>
    %45 = arith.addf %28, %44 : vector<8x128xf32>
    %46 = math.tanh %45 : vector<8x128xf32>
    %cst_22 = arith.constant 1.000000e+00 : f32
    %47 = vector.broadcast %cst_22 : f32 to vector<8x128xf32>
    %48 = arith.subf %47, %43 : vector<8x128xf32>
    %49 = arith.mulf %48, %46 : vector<8x128xf32>
    %50 = arith.mulf %43, %15 : vector<8x128xf32>
    %51 = arith.addf %49, %50 : vector<8x128xf32>
    %52 = vector.extract_strided_slice %20 {offsets = [8, 0], sizes = [8, 384], strides = [1, 1]} : vector<16x384xf32> to vector<8x384xf32>
    %53 = vector.extract_strided_slice %52 {offsets = [0, 0], sizes = [8, 128], strides = [1, 1]} : vector<8x384xf32> to vector<8x128xf32>
    %54 = vector.extract_strided_slice %52 {offsets = [0, 128], sizes = [8, 128], strides = [1, 1]} : vector<8x384xf32> to vector<8x128xf32>
    %55 = vector.extract_strided_slice %52 {offsets = [0, 256], sizes = [8, 128], strides = [1, 1]} : vector<8x384xf32> to vector<8x128xf32>
    %56 = vector.extract_strided_slice %24 {offsets = [0, 0], sizes = [8, 128], strides = [1, 1]} : vector<8x384xf32> to vector<8x128xf32>
    %57 = vector.extract_strided_slice %24 {offsets = [0, 128], sizes = [8, 128], strides = [1, 1]} : vector<8x384xf32> to vector<8x128xf32>
    %58 = vector.extract_strided_slice %24 {offsets = [0, 256], sizes = [8, 128], strides = [1, 1]} : vector<8x384xf32> to vector<8x128xf32>
    %59 = arith.addf %53, %56 : vector<8x128xf32>
    %60 = arith.negf %59 : vector<8x128xf32>
    %61 = math.exp %60 : vector<8x128xf32>
    %cst_23 = arith.constant 1.000000e+00 : f32
    %62 = vector.broadcast %cst_23 : f32 to vector<8x128xf32>
    %63 = arith.addf %62, %61 : vector<8x128xf32>
    %64 = arith.divf %62, %63 : vector<8x128xf32>
    %65 = arith.addf %54, %57 : vector<8x128xf32>
    %66 = arith.negf %65 : vector<8x128xf32>
    %67 = math.exp %66 : vector<8x128xf32>
    %cst_24 = arith.constant 1.000000e+00 : f32
    %68 = vector.broadcast %cst_24 : f32 to vector<8x128xf32>
    %69 = arith.addf %68, %67 : vector<8x128xf32>
    %70 = arith.divf %68, %69 : vector<8x128xf32>
    %71 = arith.mulf %64, %58 : vector<8x128xf32>
    %72 = arith.addf %55, %71 : vector<8x128xf32>
    %73 = math.tanh %72 : vector<8x128xf32>
    %cst_25 = arith.constant 1.000000e+00 : f32
    %74 = vector.broadcast %cst_25 : f32 to vector<8x128xf32>
    %75 = arith.subf %74, %70 : vector<8x128xf32>
    %76 = arith.mulf %75, %73 : vector<8x128xf32>
    %77 = arith.mulf %70, %16 : vector<8x128xf32>
    %78 = arith.addf %76, %77 : vector<8x128xf32>
    %79 = tpu.concatenate %51, %78 in 0 : vector<8x128xf32>, vector<8x128xf32> -> vector<16x128xf32>
    %80 = arith.truncf %79 : vector<16x128xf32> to vector<16x128xbf16>
    %81 = arith.index_cast %c0_i32_15 : i32 to index
    %c0_26 = arith.constant 0 : index
    %c0_27 = arith.constant 0 : index
    %82 = vector.load %arg8[%81, %c0_26, %c0_27] : memref<8x16x128xbf16, #tpu.memory_space<vmem>>, vector<1x16x128xbf16>
    %83 = vector.shape_cast %82 : vector<1x16x128xbf16> to vector<16x128xbf16>
    %84 = vector.shape_cast %80 : vector<16x128xbf16> to vector<1x16x128xbf16>
    tpu.vector_store %arg8[%81, %c0_26, %c0_27], %84 {strides = array<i32>} : memref<8x16x128xbf16, #tpu.memory_space<vmem>>, vector<1x16x128xbf16>,
    %c1_i32 = arith.constant 1 : i32
    %85 = arith.index_cast %c1_i32 : i32 to index
    %c0_28 = arith.constant 0 : index
    %c0_29 = arith.constant 0 : index
    %86 = vector.load %arg7[%85, %c0_28, %c0_29] : memref<8x16x384xbf16, #tpu.memory_space<vmem>>, vector<1x16x384xbf16>
    %87 = vector.shape_cast %86 : vector<1x16x384xbf16> to vector<16x384xbf16>
    %88 = arith.extf %87 : vector<16x384xbf16> to vector<16x384xf32>
    %89 = arith.truncf %51 : vector<8x128xf32> to vector<8x128xbf16>
    %cst_30 = arith.constant dense<0.000000e+00> : vector<8x384xf32>
    %90 = tpu.matmul %89, %12, %cst_30 {dimension_numbers = #tpu.dot_dimension_numbers<[1], [0], [0], [1], [0, 0, 1, 1], [], []>} : vector<8x128xbf16>, vector<128x384xbf16>, vector<8x384xf32> -> vector<8x384xf32>
    %91 = arith.truncf %78 : vector<8x128xf32> to vector<8x128xbf16>
    %cst_31 = arith.constant dense<0.000000e+00> : vector<8x384xf32>
    %92 = tpu.matmul %91, %12, %cst_31 {dimension_numbers = #tpu.dot_dimension_numbers<[1], [0], [0], [1], [0, 0, 1, 1], [], []>} : vector<8x128xbf16>, vector<128x384xbf16>, vector<8x384xf32> -> vector<8x384xf32>
    %93 = vector.extract_strided_slice %88 {offsets = [0, 0], sizes = [8, 384], strides = [1, 1]} : vector<16x384xf32> to vector<8x384xf32>
    %94 = vector.extract_strided_slice %93 {offsets = [0, 0], sizes = [8, 128], strides = [1, 1]} : vector<8x384xf32> to vector<8x128xf32>
    %95 = vector.extract_strided_slice %93 {offsets = [0, 128], sizes = [8, 128], strides = [1, 1]} : vector<8x384xf32> to vector<8x128xf32>
    %96 = vector.extract_strided_slice %93 {offsets = [0, 256], sizes = [8, 128], strides = [1, 1]} : vector<8x384xf32> to vector<8x128xf32>
    %97 = vector.extract_strided_slice %90 {offsets = [0, 0], sizes = [8, 128], strides = [1, 1]} : vector<8x384xf32> to vector<8x128xf32>
    %98 = vector.extract_strided_slice %90 {offsets = [0, 128], sizes = [8, 128], strides = [1, 1]} : vector<8x384xf32> to vector<8x128xf32>
    %99 = vector.extract_strided_slice %90 {offsets = [0, 256], sizes = [8, 128], strides = [1, 1]} : vector<8x384xf32> to vector<8x128xf32>
    %100 = arith.addf %94, %97 : vector<8x128xf32>
    %101 = arith.negf %100 : vector<8x128xf32>
    %102 = math.exp %101 : vector<8x128xf32>
    %cst_32 = arith.constant 1.000000e+00 : f32
    %103 = vector.broadcast %cst_32 : f32 to vector<8x128xf32>
    %104 = arith.addf %103, %102 : vector<8x128xf32>
    %105 = arith.divf %103, %104 : vector<8x128xf32>
    %106 = arith.addf %95, %98 : vector<8x128xf32>
    %107 = arith.negf %106 : vector<8x128xf32>
    %108 = math.exp %107 : vector<8x128xf32>
    %cst_33 = arith.constant 1.000000e+00 : f32
    %109 = vector.broadcast %cst_33 : f32 to vector<8x128xf32>
    %110 = arith.addf %109, %108 : vector<8x128xf32>
    %111 = arith.divf %109, %110 : vector<8x128xf32>
    %112 = arith.mulf %105, %99 : vector<8x128xf32>
    %113 = arith.addf %96, %112 : vector<8x128xf32>
    %114 = math.tanh %113 : vector<8x128xf32>
    %cst_34 = arith.constant 1.000000e+00 : f32
    %115 = vector.broadcast %cst_34 : f32 to vector<8x128xf32>
    %116 = arith.subf %115, %111 : vector<8x128xf32>
    %117 = arith.mulf %116, %114 : vector<8x128xf32>
    %118 = arith.mulf %111, %51 : vector<8x128xf32>
    %119 = arith.addf %117, %118 : vector<8x128xf32>
    %120 = vector.extract_strided_slice %88 {offsets = [8, 0], sizes = [8, 384], strides = [1, 1]} : vector<16x384xf32> to vector<8x384xf32>
    %121 = vector.extract_strided_slice %120 {offsets = [0, 0], sizes = [8, 128], strides = [1, 1]} : vector<8x384xf32> to vector<8x128xf32>
    %122 = vector.extract_strided_slice %120 {offsets = [0, 128], sizes = [8, 128], strides = [1, 1]} : vector<8x384xf32> to vector<8x128xf32>
    %123 = vector.extract_strided_slice %120 {offsets = [0, 256], sizes = [8, 128], strides = [1, 1]} : vector<8x384xf32> to vector<8x128xf32>
    %124 = vector.extract_strided_slice %92 {offsets = [0, 0], sizes = [8, 128], strides = [1, 1]} : vector<8x384xf32> to vector<8x128xf32>
    %125 = vector.extract_strided_slice %92 {offsets = [0, 128], sizes = [8, 128], strides = [1, 1]} : vector<8x384xf32> to vector<8x128xf32>
    %126 = vector.extract_strided_slice %92 {offsets = [0, 256], sizes = [8, 128], strides = [1, 1]} : vector<8x384xf32> to vector<8x128xf32>
    %127 = arith.addf %121, %124 : vector<8x128xf32>
    %128 = arith.negf %127 : vector<8x128xf32>
    %129 = math.exp %128 : vector<8x128xf32>
    %cst_35 = arith.constant 1.000000e+00 : f32
    %130 = vector.broadcast %cst_35 : f32 to vector<8x128xf32>
    %131 = arith.addf %130, %129 : vector<8x128xf32>
    %132 = arith.divf %130, %131 : vector<8x128xf32>
    %133 = arith.addf %122, %125 : vector<8x128xf32>
    %134 = arith.negf %133 : vector<8x128xf32>
    %135 = math.exp %134 : vector<8x128xf32>
    %cst_36 = arith.constant 1.000000e+00 : f32
    %136 = vector.broadcast %cst_36 : f32 to vector<8x128xf32>
    %137 = arith.addf %136, %135 : vector<8x128xf32>
    %138 = arith.divf %136, %137 : vector<8x128xf32>
    %139 = arith.mulf %132, %126 : vector<8x128xf32>
    %140 = arith.addf %123, %139 : vector<8x128xf32>
    %141 = math.tanh %140 : vector<8x128xf32>
    %cst_37 = arith.constant 1.000000e+00 : f32
    %142 = vector.broadcast %cst_37 : f32 to vector<8x128xf32>
    %143 = arith.subf %142, %138 : vector<8x128xf32>
    %144 = arith.mulf %143, %141 : vector<8x128xf32>
    %145 = arith.mulf %138, %78 : vector<8x128xf32>
    %146 = arith.addf %144, %145 : vector<8x128xf32>
    %147 = tpu.concatenate %119, %146 in 0 : vector<8x128xf32>, vector<8x128xf32> -> vector<16x128xf32>
    %148 = arith.truncf %147 : vector<16x128xf32> to vector<16x128xbf16>
    %149 = arith.index_cast %c1_i32 : i32 to index
    %c0_38 = arith.constant 0 : index
    %c0_39 = arith.constant 0 : index
    %150 = vector.load %arg8[%149, %c0_38, %c0_39] : memref<8x16x128xbf16, #tpu.memory_space<vmem>>, vector<1x16x128xbf16>
    %151 = vector.shape_cast %150 : vector<1x16x128xbf16> to vector<16x128xbf16>
    %152 = vector.shape_cast %148 : vector<16x128xbf16> to vector<1x16x128xbf16>
    tpu.vector_store %arg8[%149, %c0_38, %c0_39], %152 {strides = array<i32>} : memref<8x16x128xbf16, #tpu.memory_space<vmem>>, vector<1x16x128xbf16>,
    %c2_i32 = arith.constant 2 : i32
    %153 = arith.index_cast %c2_i32 : i32 to index
    %c0_40 = arith.constant 0 : index
    %c0_41 = arith.constant 0 : index
    %154 = vector.load %arg7[%153, %c0_40, %c0_41] : memref<8x16x384xbf16, #tpu.memory_space<vmem>>, vector<1x16x384xbf16>
    %155 = vector.shape_cast %154 : vector<1x16x384xbf16> to vector<16x384xbf16>
    %156 = arith.extf %155 : vector<16x384xbf16> to vector<16x384xf32>
    %157 = arith.truncf %119 : vector<8x128xf32> to vector<8x128xbf16>
    %cst_42 = arith.constant dense<0.000000e+00> : vector<8x384xf32>
    %158 = tpu.matmul %157, %12, %cst_42 {dimension_numbers = #tpu.dot_dimension_numbers<[1], [0], [0], [1], [0, 0, 1, 1], [], []>} : vector<8x128xbf16>, vector<128x384xbf16>, vector<8x384xf32> -> vector<8x384xf32>
    %159 = arith.truncf %146 : vector<8x128xf32> to vector<8x128xbf16>
    %cst_43 = arith.constant dense<0.000000e+00> : vector<8x384xf32>
    %160 = tpu.matmul %159, %12, %cst_43 {dimension_numbers = #tpu.dot_dimension_numbers<[1], [0], [0], [1], [0, 0, 1, 1], [], []>} : vector<8x128xbf16>, vector<128x384xbf16>, vector<8x384xf32> -> vector<8x384xf32>
    %161 = vector.extract_strided_slice %156 {offsets = [0, 0], sizes = [8, 384], strides = [1, 1]} : vector<16x384xf32> to vector<8x384xf32>
    %162 = vector.extract_strided_slice %161 {offsets = [0, 0], sizes = [8, 128], strides = [1, 1]} : vector<8x384xf32> to vector<8x128xf32>
    %163 = vector.extract_strided_slice %161 {offsets = [0, 128], sizes = [8, 128], strides = [1, 1]} : vector<8x384xf32> to vector<8x128xf32>
    %164 = vector.extract_strided_slice %161 {offsets = [0, 256], sizes = [8, 128], strides = [1, 1]} : vector<8x384xf32> to vector<8x128xf32>
    %165 = vector.extract_strided_slice %158 {offsets = [0, 0], sizes = [8, 128], strides = [1, 1]} : vector<8x384xf32> to vector<8x128xf32>
    %166 = vector.extract_strided_slice %158 {offsets = [0, 128], sizes = [8, 128], strides = [1, 1]} : vector<8x384xf32> to vector<8x128xf32>
    %167 = vector.extract_strided_slice %158 {offsets = [0, 256], sizes = [8, 128], strides = [1, 1]} : vector<8x384xf32> to vector<8x128xf32>
    %168 = arith.addf %162, %165 : vector<8x128xf32>
    %169 = arith.negf %168 : vector<8x128xf32>
    %170 = math.exp %169 : vector<8x128xf32>
    %cst_44 = arith.constant 1.000000e+00 : f32
    %171 = vector.broadcast %cst_44 : f32 to vector<8x128xf32>
    %172 = arith.addf %171, %170 : vector<8x128xf32>
    %173 = arith.divf %171, %172 : vector<8x128xf32>
    %174 = arith.addf %163, %166 : vector<8x128xf32>
    %175 = arith.negf %174 : vector<8x128xf32>
    %176 = math.exp %175 : vector<8x128xf32>
    %cst_45 = arith.constant 1.000000e+00 : f32
    %177 = vector.broadcast %cst_45 : f32 to vector<8x128xf32>
    %178 = arith.addf %177, %176 : vector<8x128xf32>
    %179 = arith.divf %177, %178 : vector<8x128xf32>
    %180 = arith.mulf %173, %167 : vector<8x128xf32>
    %181 = arith.addf %164, %180 : vector<8x128xf32>
    %182 = math.tanh %181 : vector<8x128xf32>
    %cst_46 = arith.constant 1.000000e+00 : f32
    %183 = vector.broadcast %cst_46 : f32 to vector<8x128xf32>
    %184 = arith.subf %183, %179 : vector<8x128xf32>
    %185 = arith.mulf %184, %182 : vector<8x128xf32>
    %186 = arith.mulf %179, %119 : vector<8x128xf32>
    %187 = arith.addf %185, %186 : vector<8x128xf32>
    %188 = vector.extract_strided_slice %156 {offsets = [8, 0], sizes = [8, 384], strides = [1, 1]} : vector<16x384xf32> to vector<8x384xf32>
    %189 = vector.extract_strided_slice %188 {offsets = [0, 0], sizes = [8, 128], strides = [1, 1]} : vector<8x384xf32> to vector<8x128xf32>
    %190 = vector.extract_strided_slice %188 {offsets = [0, 128], sizes = [8, 128], strides = [1, 1]} : vector<8x384xf32> to vector<8x128xf32>
    %191 = vector.extract_strided_slice %188 {offsets = [0, 256], sizes = [8, 128], strides = [1, 1]} : vector<8x384xf32> to vector<8x128xf32>
    %192 = vector.extract_strided_slice %160 {offsets = [0, 0], sizes = [8, 128], strides = [1, 1]} : vector<8x384xf32> to vector<8x128xf32>
    %193 = vector.extract_strided_slice %160 {offsets = [0, 128], sizes = [8, 128], strides = [1, 1]} : vector<8x384xf32> to vector<8x128xf32>
    %194 = vector.extract_strided_slice %160 {offsets = [0, 256], sizes = [8, 128], strides = [1, 1]} : vector<8x384xf32> to vector<8x128xf32>
    %195 = arith.addf %189, %192 : vector<8x128xf32>
    %196 = arith.negf %195 : vector<8x128xf32>
    %197 = math.exp %196 : vector<8x128xf32>
    %cst_47 = arith.constant 1.000000e+00 : f32
    %198 = vector.broadcast %cst_47 : f32 to vector<8x128xf32>
    %199 = arith.addf %198, %197 : vector<8x128xf32>
    %200 = arith.divf %198, %199 : vector<8x128xf32>
    %201 = arith.addf %190, %193 : vector<8x128xf32>
    %202 = arith.negf %201 : vector<8x128xf32>
    %203 = math.exp %202 : vector<8x128xf32>
    %cst_48 = arith.constant 1.000000e+00 : f32
    %204 = vector.broadcast %cst_48 : f32 to vector<8x128xf32>
    %205 = arith.addf %204, %203 : vector<8x128xf32>
    %206 = arith.divf %204, %205 : vector<8x128xf32>
    %207 = arith.mulf %200, %194 : vector<8x128xf32>
    %208 = arith.addf %191, %207 : vector<8x128xf32>
    %209 = math.tanh %208 : vector<8x128xf32>
    %cst_49 = arith.constant 1.000000e+00 : f32
    %210 = vector.broadcast %cst_49 : f32 to vector<8x128xf32>
    %211 = arith.subf %210, %206 : vector<8x128xf32>
    %212 = arith.mulf %211, %209 : vector<8x128xf32>
    %213 = arith.mulf %206, %146 : vector<8x128xf32>
    %214 = arith.addf %212, %213 : vector<8x128xf32>
    %215 = tpu.concatenate %187, %214 in 0 : vector<8x128xf32>, vector<8x128xf32> -> vector<16x128xf32>
    %216 = arith.truncf %215 : vector<16x128xf32> to vector<16x128xbf16>
    %217 = arith.index_cast %c2_i32 : i32 to index
    %c0_50 = arith.constant 0 : index
    %c0_51 = arith.constant 0 : index
    %218 = vector.load %arg8[%217, %c0_50, %c0_51] : memref<8x16x128xbf16, #tpu.memory_space<vmem>>, vector<1x16x128xbf16>
    %219 = vector.shape_cast %218 : vector<1x16x128xbf16> to vector<16x128xbf16>
    %220 = vector.shape_cast %216 : vector<16x128xbf16> to vector<1x16x128xbf16>
    tpu.vector_store %arg8[%217, %c0_50, %c0_51], %220 {strides = array<i32>} : memref<8x16x128xbf16, #tpu.memory_space<vmem>>, vector<1x16x128xbf16>,
    %c3_i32 = arith.constant 3 : i32
    %221 = arith.index_cast %c3_i32 : i32 to index
    %c0_52 = arith.constant 0 : index
    %c0_53 = arith.constant 0 : index
    %222 = vector.load %arg7[%221, %c0_52, %c0_53] : memref<8x16x384xbf16, #tpu.memory_space<vmem>>, vector<1x16x384xbf16>
    %223 = vector.shape_cast %222 : vector<1x16x384xbf16> to vector<16x384xbf16>
    %224 = arith.extf %223 : vector<16x384xbf16> to vector<16x384xf32>
    %225 = arith.truncf %187 : vector<8x128xf32> to vector<8x128xbf16>
    %cst_54 = arith.constant dense<0.000000e+00> : vector<8x384xf32>
    %226 = tpu.matmul %225, %12, %cst_54 {dimension_numbers = #tpu.dot_dimension_numbers<[1], [0], [0], [1], [0, 0, 1, 1], [], []>} : vector<8x128xbf16>, vector<128x384xbf16>, vector<8x384xf32> -> vector<8x384xf32>
    %227 = arith.truncf %214 : vector<8x128xf32> to vector<8x128xbf16>
    %cst_55 = arith.constant dense<0.000000e+00> : vector<8x384xf32>
    %228 = tpu.matmul %227, %12, %cst_55 {dimension_numbers = #tpu.dot_dimension_numbers<[1], [0], [0], [1], [0, 0, 1, 1], [], []>} : vector<8x128xbf16>, vector<128x384xbf16>, vector<8x384xf32> -> vector<8x384xf32>
    %229 = vector.extract_strided_slice %224 {offsets = [0, 0], sizes = [8, 384], strides = [1, 1]} : vector<16x384xf32> to vector<8x384xf32>
    %230 = vector.extract_strided_slice %229 {offsets = [0, 0], sizes = [8, 128], strides = [1, 1]} : vector<8x384xf32> to vector<8x128xf32>
    %231 = vector.extract_strided_slice %229 {offsets = [0, 128], sizes = [8, 128], strides = [1, 1]} : vector<8x384xf32> to vector<8x128xf32>
    %232 = vector.extract_strided_slice %229 {offsets = [0, 256], sizes = [8, 128], strides = [1, 1]} : vector<8x384xf32> to vector<8x128xf32>
    %233 = vector.extract_strided_slice %226 {offsets = [0, 0], sizes = [8, 128], strides = [1, 1]} : vector<8x384xf32> to vector<8x128xf32>
    %234 = vector.extract_strided_slice %226 {offsets = [0, 128], sizes = [8, 128], strides = [1, 1]} : vector<8x384xf32> to vector<8x128xf32>
    %235 = vector.extract_strided_slice %226 {offsets = [0, 256], sizes = [8, 128], strides = [1, 1]} : vector<8x384xf32> to vector<8x128xf32>
    %236 = arith.addf %230, %233 : vector<8x128xf32>
    %237 = arith.negf %236 : vector<8x128xf32>
    %238 = math.exp %237 : vector<8x128xf32>
    %cst_56 = arith.constant 1.000000e+00 : f32
    %239 = vector.broadcast %cst_56 : f32 to vector<8x128xf32>
    %240 = arith.addf %239, %238 : vector<8x128xf32>
    %241 = arith.divf %239, %240 : vector<8x128xf32>
    %242 = arith.addf %231, %234 : vector<8x128xf32>
    %243 = arith.negf %242 : vector<8x128xf32>
    %244 = math.exp %243 : vector<8x128xf32>
    %cst_57 = arith.constant 1.000000e+00 : f32
    %245 = vector.broadcast %cst_57 : f32 to vector<8x128xf32>
    %246 = arith.addf %245, %244 : vector<8x128xf32>
    %247 = arith.divf %245, %246 : vector<8x128xf32>
    %248 = arith.mulf %241, %235 : vector<8x128xf32>
    %249 = arith.addf %232, %248 : vector<8x128xf32>
    %250 = math.tanh %249 : vector<8x128xf32>
    %cst_58 = arith.constant 1.000000e+00 : f32
    %251 = vector.broadcast %cst_58 : f32 to vector<8x128xf32>
    %252 = arith.subf %251, %247 : vector<8x128xf32>
    %253 = arith.mulf %252, %250 : vector<8x128xf32>
    %254 = arith.mulf %247, %187 : vector<8x128xf32>
    %255 = arith.addf %253, %254 : vector<8x128xf32>
    %256 = vector.extract_strided_slice %224 {offsets = [8, 0], sizes = [8, 384], strides = [1, 1]} : vector<16x384xf32> to vector<8x384xf32>
    %257 = vector.extract_strided_slice %256 {offsets = [0, 0], sizes = [8, 128], strides = [1, 1]} : vector<8x384xf32> to vector<8x128xf32>
    %258 = vector.extract_strided_slice %256 {offsets = [0, 128], sizes = [8, 128], strides = [1, 1]} : vector<8x384xf32> to vector<8x128xf32>
    %259 = vector.extract_strided_slice %256 {offsets = [0, 256], sizes = [8, 128], strides = [1, 1]} : vector<8x384xf32> to vector<8x128xf32>
    %260 = vector.extract_strided_slice %228 {offsets = [0, 0], sizes = [8, 128], strides = [1, 1]} : vector<8x384xf32> to vector<8x128xf32>
    %261 = vector.extract_strided_slice %228 {offsets = [0, 128], sizes = [8, 128], strides = [1, 1]} : vector<8x384xf32> to vector<8x128xf32>
    %262 = vector.extract_strided_slice %228 {offsets = [0, 256], sizes = [8, 128], strides = [1, 1]} : vector<8x384xf32> to vector<8x128xf32>
    %263 = arith.addf %257, %260 : vector<8x128xf32>
    %264 = arith.negf %263 : vector<8x128xf32>
    %265 = math.exp %264 : vector<8x128xf32>
    %cst_59 = arith.constant 1.000000e+00 : f32
    %266 = vector.broadcast %cst_59 : f32 to vector<8x128xf32>
    %267 = arith.addf %266, %265 : vector<8x128xf32>
    %268 = arith.divf %266, %267 : vector<8x128xf32>
    %269 = arith.addf %258, %261 : vector<8x128xf32>
    %270 = arith.negf %269 : vector<8x128xf32>
    %271 = math.exp %270 : vector<8x128xf32>
    %cst_60 = arith.constant 1.000000e+00 : f32
    %272 = vector.broadcast %cst_60 : f32 to vector<8x128xf32>
    %273 = arith.addf %272, %271 : vector<8x128xf32>
    %274 = arith.divf %272, %273 : vector<8x128xf32>
    %275 = arith.mulf %268, %262 : vector<8x128xf32>
    %276 = arith.addf %259, %275 : vector<8x128xf32>
    %277 = math.tanh %276 : vector<8x128xf32>
    %cst_61 = arith.constant 1.000000e+00 : f32
    %278 = vector.broadcast %cst_61 : f32 to vector<8x128xf32>
    %279 = arith.subf %278, %274 : vector<8x128xf32>
    %280 = arith.mulf %279, %277 : vector<8x128xf32>
    %281 = arith.mulf %274, %214 : vector<8x128xf32>
    %282 = arith.addf %280, %281 : vector<8x128xf32>
    %283 = tpu.concatenate %255, %282 in 0 : vector<8x128xf32>, vector<8x128xf32> -> vector<16x128xf32>
    %284 = arith.truncf %283 : vector<16x128xf32> to vector<16x128xbf16>
    %285 = arith.index_cast %c3_i32 : i32 to index
    %c0_62 = arith.constant 0 : index
    %c0_63 = arith.constant 0 : index
    %286 = vector.load %arg8[%285, %c0_62, %c0_63] : memref<8x16x128xbf16, #tpu.memory_space<vmem>>, vector<1x16x128xbf16>
    %287 = vector.shape_cast %286 : vector<1x16x128xbf16> to vector<16x128xbf16>
    %288 = vector.shape_cast %284 : vector<16x128xbf16> to vector<1x16x128xbf16>
    tpu.vector_store %arg8[%285, %c0_62, %c0_63], %288 {strides = array<i32>} : memref<8x16x128xbf16, #tpu.memory_space<vmem>>, vector<1x16x128xbf16>,
    %c4_i32 = arith.constant 4 : i32
    %289 = arith.index_cast %c4_i32 : i32 to index
    %c0_64 = arith.constant 0 : index
    %c0_65 = arith.constant 0 : index
    %290 = vector.load %arg7[%289, %c0_64, %c0_65] : memref<8x16x384xbf16, #tpu.memory_space<vmem>>, vector<1x16x384xbf16>
    %291 = vector.shape_cast %290 : vector<1x16x384xbf16> to vector<16x384xbf16>
    %292 = arith.extf %291 : vector<16x384xbf16> to vector<16x384xf32>
    %293 = arith.truncf %255 : vector<8x128xf32> to vector<8x128xbf16>
    %cst_66 = arith.constant dense<0.000000e+00> : vector<8x384xf32>
    %294 = tpu.matmul %293, %12, %cst_66 {dimension_numbers = #tpu.dot_dimension_numbers<[1], [0], [0], [1], [0, 0, 1, 1], [], []>} : vector<8x128xbf16>, vector<128x384xbf16>, vector<8x384xf32> -> vector<8x384xf32>
    %295 = arith.truncf %282 : vector<8x128xf32> to vector<8x128xbf16>
    %cst_67 = arith.constant dense<0.000000e+00> : vector<8x384xf32>
    %296 = tpu.matmul %295, %12, %cst_67 {dimension_numbers = #tpu.dot_dimension_numbers<[1], [0], [0], [1], [0, 0, 1, 1], [], []>} : vector<8x128xbf16>, vector<128x384xbf16>, vector<8x384xf32> -> vector<8x384xf32>
    %297 = vector.extract_strided_slice %292 {offsets = [0, 0], sizes = [8, 384], strides = [1, 1]} : vector<16x384xf32> to vector<8x384xf32>
    %298 = vector.extract_strided_slice %297 {offsets = [0, 0], sizes = [8, 128], strides = [1, 1]} : vector<8x384xf32> to vector<8x128xf32>
    %299 = vector.extract_strided_slice %297 {offsets = [0, 128], sizes = [8, 128], strides = [1, 1]} : vector<8x384xf32> to vector<8x128xf32>
    %300 = vector.extract_strided_slice %297 {offsets = [0, 256], sizes = [8, 128], strides = [1, 1]} : vector<8x384xf32> to vector<8x128xf32>
    %301 = vector.extract_strided_slice %294 {offsets = [0, 0], sizes = [8, 128], strides = [1, 1]} : vector<8x384xf32> to vector<8x128xf32>
    %302 = vector.extract_strided_slice %294 {offsets = [0, 128], sizes = [8, 128], strides = [1, 1]} : vector<8x384xf32> to vector<8x128xf32>
    %303 = vector.extract_strided_slice %294 {offsets = [0, 256], sizes = [8, 128], strides = [1, 1]} : vector<8x384xf32> to vector<8x128xf32>
    %304 = arith.addf %298, %301 : vector<8x128xf32>
    %305 = arith.negf %304 : vector<8x128xf32>
    %306 = math.exp %305 : vector<8x128xf32>
    %cst_68 = arith.constant 1.000000e+00 : f32
    %307 = vector.broadcast %cst_68 : f32 to vector<8x128xf32>
    %308 = arith.addf %307, %306 : vector<8x128xf32>
    %309 = arith.divf %307, %308 : vector<8x128xf32>
    %310 = arith.addf %299, %302 : vector<8x128xf32>
    %311 = arith.negf %310 : vector<8x128xf32>
    %312 = math.exp %311 : vector<8x128xf32>
    %cst_69 = arith.constant 1.000000e+00 : f32
    %313 = vector.broadcast %cst_69 : f32 to vector<8x128xf32>
    %314 = arith.addf %313, %312 : vector<8x128xf32>
    %315 = arith.divf %313, %314 : vector<8x128xf32>
    %316 = arith.mulf %309, %303 : vector<8x128xf32>
    %317 = arith.addf %300, %316 : vector<8x128xf32>
    %318 = math.tanh %317 : vector<8x128xf32>
    %cst_70 = arith.constant 1.000000e+00 : f32
    %319 = vector.broadcast %cst_70 : f32 to vector<8x128xf32>
    %320 = arith.subf %319, %315 : vector<8x128xf32>
    %321 = arith.mulf %320, %318 : vector<8x128xf32>
    %322 = arith.mulf %315, %255 : vector<8x128xf32>
    %323 = arith.addf %321, %322 : vector<8x128xf32>
    %324 = vector.extract_strided_slice %292 {offsets = [8, 0], sizes = [8, 384], strides = [1, 1]} : vector<16x384xf32> to vector<8x384xf32>
    %325 = vector.extract_strided_slice %324 {offsets = [0, 0], sizes = [8, 128], strides = [1, 1]} : vector<8x384xf32> to vector<8x128xf32>
    %326 = vector.extract_strided_slice %324 {offsets = [0, 128], sizes = [8, 128], strides = [1, 1]} : vector<8x384xf32> to vector<8x128xf32>
    %327 = vector.extract_strided_slice %324 {offsets = [0, 256], sizes = [8, 128], strides = [1, 1]} : vector<8x384xf32> to vector<8x128xf32>
    %328 = vector.extract_strided_slice %296 {offsets = [0, 0], sizes = [8, 128], strides = [1, 1]} : vector<8x384xf32> to vector<8x128xf32>
    %329 = vector.extract_strided_slice %296 {offsets = [0, 128], sizes = [8, 128], strides = [1, 1]} : vector<8x384xf32> to vector<8x128xf32>
    %330 = vector.extract_strided_slice %296 {offsets = [0, 256], sizes = [8, 128], strides = [1, 1]} : vector<8x384xf32> to vector<8x128xf32>
    %331 = arith.addf %325, %328 : vector<8x128xf32>
    %332 = arith.negf %331 : vector<8x128xf32>
    %333 = math.exp %332 : vector<8x128xf32>
    %cst_71 = arith.constant 1.000000e+00 : f32
    %334 = vector.broadcast %cst_71 : f32 to vector<8x128xf32>
    %335 = arith.addf %334, %333 : vector<8x128xf32>
    %336 = arith.divf %334, %335 : vector<8x128xf32>
    %337 = arith.addf %326, %329 : vector<8x128xf32>
    %338 = arith.negf %337 : vector<8x128xf32>
    %339 = math.exp %338 : vector<8x128xf32>
    %cst_72 = arith.constant 1.000000e+00 : f32
    %340 = vector.broadcast %cst_72 : f32 to vector<8x128xf32>
    %341 = arith.addf %340, %339 : vector<8x128xf32>
    %342 = arith.divf %340, %341 : vector<8x128xf32>
    %343 = arith.mulf %336, %330 : vector<8x128xf32>
    %344 = arith.addf %327, %343 : vector<8x128xf32>
    %345 = math.tanh %344 : vector<8x128xf32>
    %cst_73 = arith.constant 1.000000e+00 : f32
    %346 = vector.broadcast %cst_73 : f32 to vector<8x128xf32>
    %347 = arith.subf %346, %342 : vector<8x128xf32>
    %348 = arith.mulf %347, %345 : vector<8x128xf32>
    %349 = arith.mulf %342, %282 : vector<8x128xf32>
    %350 = arith.addf %348, %349 : vector<8x128xf32>
    %351 = tpu.concatenate %323, %350 in 0 : vector<8x128xf32>, vector<8x128xf32> -> vector<16x128xf32>
    %352 = arith.truncf %351 : vector<16x128xf32> to vector<16x128xbf16>
    %353 = arith.index_cast %c4_i32 : i32 to index
    %c0_74 = arith.constant 0 : index
    %c0_75 = arith.constant 0 : index
    %354 = vector.load %arg8[%353, %c0_74, %c0_75] : memref<8x16x128xbf16, #tpu.memory_space<vmem>>, vector<1x16x128xbf16>
    %355 = vector.shape_cast %354 : vector<1x16x128xbf16> to vector<16x128xbf16>
    %356 = vector.shape_cast %352 : vector<16x128xbf16> to vector<1x16x128xbf16>
    tpu.vector_store %arg8[%353, %c0_74, %c0_75], %356 {strides = array<i32>} : memref<8x16x128xbf16, #tpu.memory_space<vmem>>, vector<1x16x128xbf16>,
    %c5_i32 = arith.constant 5 : i32
    %357 = arith.index_cast %c5_i32 : i32 to index
    %c0_76 = arith.constant 0 : index
    %c0_77 = arith.constant 0 : index
    %358 = vector.load %arg7[%357, %c0_76, %c0_77] : memref<8x16x384xbf16, #tpu.memory_space<vmem>>, vector<1x16x384xbf16>
    %359 = vector.shape_cast %358 : vector<1x16x384xbf16> to vector<16x384xbf16>
    %360 = arith.extf %359 : vector<16x384xbf16> to vector<16x384xf32>
    %361 = arith.truncf %323 : vector<8x128xf32> to vector<8x128xbf16>
    %cst_78 = arith.constant dense<0.000000e+00> : vector<8x384xf32>
    %362 = tpu.matmul %361, %12, %cst_78 {dimension_numbers = #tpu.dot_dimension_numbers<[1], [0], [0], [1], [0, 0, 1, 1], [], []>} : vector<8x128xbf16>, vector<128x384xbf16>, vector<8x384xf32> -> vector<8x384xf32>
    %363 = arith.truncf %350 : vector<8x128xf32> to vector<8x128xbf16>
    %cst_79 = arith.constant dense<0.000000e+00> : vector<8x384xf32>
    %364 = tpu.matmul %363, %12, %cst_79 {dimension_numbers = #tpu.dot_dimension_numbers<[1], [0], [0], [1], [0, 0, 1, 1], [], []>} : vector<8x128xbf16>, vector<128x384xbf16>, vector<8x384xf32> -> vector<8x384xf32>
    %365 = vector.extract_strided_slice %360 {offsets = [0, 0], sizes = [8, 384], strides = [1, 1]} : vector<16x384xf32> to vector<8x384xf32>
    %366 = vector.extract_strided_slice %365 {offsets = [0, 0], sizes = [8, 128], strides = [1, 1]} : vector<8x384xf32> to vector<8x128xf32>
    %367 = vector.extract_strided_slice %365 {offsets = [0, 128], sizes = [8, 128], strides = [1, 1]} : vector<8x384xf32> to vector<8x128xf32>
    %368 = vector.extract_strided_slice %365 {offsets = [0, 256], sizes = [8, 128], strides = [1, 1]} : vector<8x384xf32> to vector<8x128xf32>
    %369 = vector.extract_strided_slice %362 {offsets = [0, 0], sizes = [8, 128], strides = [1, 1]} : vector<8x384xf32> to vector<8x128xf32>
    %370 = vector.extract_strided_slice %362 {offsets = [0, 128], sizes = [8, 128], strides = [1, 1]} : vector<8x384xf32> to vector<8x128xf32>
    %371 = vector.extract_strided_slice %362 {offsets = [0, 256], sizes = [8, 128], strides = [1, 1]} : vector<8x384xf32> to vector<8x128xf32>
    %372 = arith.addf %366, %369 : vector<8x128xf32>
    %373 = arith.negf %372 : vector<8x128xf32>
    %374 = math.exp %373 : vector<8x128xf32>
    %cst_80 = arith.constant 1.000000e+00 : f32
    %375 = vector.broadcast %cst_80 : f32 to vector<8x128xf32>
    %376 = arith.addf %375, %374 : vector<8x128xf32>
    %377 = arith.divf %375, %376 : vector<8x128xf32>
    %378 = arith.addf %367, %370 : vector<8x128xf32>
    %379 = arith.negf %378 : vector<8x128xf32>
    %380 = math.exp %379 : vector<8x128xf32>
    %cst_81 = arith.constant 1.000000e+00 : f32
    %381 = vector.broadcast %cst_81 : f32 to vector<8x128xf32>
    %382 = arith.addf %381, %380 : vector<8x128xf32>
    %383 = arith.divf %381, %382 : vector<8x128xf32>
    %384 = arith.mulf %377, %371 : vector<8x128xf32>
    %385 = arith.addf %368, %384 : vector<8x128xf32>
    %386 = math.tanh %385 : vector<8x128xf32>
    %cst_82 = arith.constant 1.000000e+00 : f32
    %387 = vector.broadcast %cst_82 : f32 to vector<8x128xf32>
    %388 = arith.subf %387, %383 : vector<8x128xf32>
    %389 = arith.mulf %388, %386 : vector<8x128xf32>
    %390 = arith.mulf %383, %323 : vector<8x128xf32>
    %391 = arith.addf %389, %390 : vector<8x128xf32>
    %392 = vector.extract_strided_slice %360 {offsets = [8, 0], sizes = [8, 384], strides = [1, 1]} : vector<16x384xf32> to vector<8x384xf32>
    %393 = vector.extract_strided_slice %392 {offsets = [0, 0], sizes = [8, 128], strides = [1, 1]} : vector<8x384xf32> to vector<8x128xf32>
    %394 = vector.extract_strided_slice %392 {offsets = [0, 128], sizes = [8, 128], strides = [1, 1]} : vector<8x384xf32> to vector<8x128xf32>
    %395 = vector.extract_strided_slice %392 {offsets = [0, 256], sizes = [8, 128], strides = [1, 1]} : vector<8x384xf32> to vector<8x128xf32>
    %396 = vector.extract_strided_slice %364 {offsets = [0, 0], sizes = [8, 128], strides = [1, 1]} : vector<8x384xf32> to vector<8x128xf32>
    %397 = vector.extract_strided_slice %364 {offsets = [0, 128], sizes = [8, 128], strides = [1, 1]} : vector<8x384xf32> to vector<8x128xf32>
    %398 = vector.extract_strided_slice %364 {offsets = [0, 256], sizes = [8, 128], strides = [1, 1]} : vector<8x384xf32> to vector<8x128xf32>
    %399 = arith.addf %393, %396 : vector<8x128xf32>
    %400 = arith.negf %399 : vector<8x128xf32>
    %401 = math.exp %400 : vector<8x128xf32>
    %cst_83 = arith.constant 1.000000e+00 : f32
    %402 = vector.broadcast %cst_83 : f32 to vector<8x128xf32>
    %403 = arith.addf %402, %401 : vector<8x128xf32>
    %404 = arith.divf %402, %403 : vector<8x128xf32>
    %405 = arith.addf %394, %397 : vector<8x128xf32>
    %406 = arith.negf %405 : vector<8x128xf32>
    %407 = math.exp %406 : vector<8x128xf32>
    %cst_84 = arith.constant 1.000000e+00 : f32
    %408 = vector.broadcast %cst_84 : f32 to vector<8x128xf32>
    %409 = arith.addf %408, %407 : vector<8x128xf32>
    %410 = arith.divf %408, %409 : vector<8x128xf32>
    %411 = arith.mulf %404, %398 : vector<8x128xf32>
    %412 = arith.addf %395, %411 : vector<8x128xf32>
    %413 = math.tanh %412 : vector<8x128xf32>
    %cst_85 = arith.constant 1.000000e+00 : f32
    %414 = vector.broadcast %cst_85 : f32 to vector<8x128xf32>
    %415 = arith.subf %414, %410 : vector<8x128xf32>
    %416 = arith.mulf %415, %413 : vector<8x128xf32>
    %417 = arith.mulf %410, %350 : vector<8x128xf32>
    %418 = arith.addf %416, %417 : vector<8x128xf32>
    %419 = tpu.concatenate %391, %418 in 0 : vector<8x128xf32>, vector<8x128xf32> -> vector<16x128xf32>
    %420 = arith.truncf %419 : vector<16x128xf32> to vector<16x128xbf16>
    %421 = arith.index_cast %c5_i32 : i32 to index
    %c0_86 = arith.constant 0 : index
    %c0_87 = arith.constant 0 : index
    %422 = vector.load %arg8[%421, %c0_86, %c0_87] : memref<8x16x128xbf16, #tpu.memory_space<vmem>>, vector<1x16x128xbf16>
    %423 = vector.shape_cast %422 : vector<1x16x128xbf16> to vector<16x128xbf16>
    %424 = vector.shape_cast %420 : vector<16x128xbf16> to vector<1x16x128xbf16>
    tpu.vector_store %arg8[%421, %c0_86, %c0_87], %424 {strides = array<i32>} : memref<8x16x128xbf16, #tpu.memory_space<vmem>>, vector<1x16x128xbf16>,
    %c6_i32 = arith.constant 6 : i32
    %425 = arith.index_cast %c6_i32 : i32 to index
    %c0_88 = arith.constant 0 : index
    %c0_89 = arith.constant 0 : index
    %426 = vector.load %arg7[%425, %c0_88, %c0_89] : memref<8x16x384xbf16, #tpu.memory_space<vmem>>, vector<1x16x384xbf16>
    %427 = vector.shape_cast %426 : vector<1x16x384xbf16> to vector<16x384xbf16>
    %428 = arith.extf %427 : vector<16x384xbf16> to vector<16x384xf32>
    %429 = arith.truncf %391 : vector<8x128xf32> to vector<8x128xbf16>
    %cst_90 = arith.constant dense<0.000000e+00> : vector<8x384xf32>
    %430 = tpu.matmul %429, %12, %cst_90 {dimension_numbers = #tpu.dot_dimension_numbers<[1], [0], [0], [1], [0, 0, 1, 1], [], []>} : vector<8x128xbf16>, vector<128x384xbf16>, vector<8x384xf32> -> vector<8x384xf32>
    %431 = arith.truncf %418 : vector<8x128xf32> to vector<8x128xbf16>
    %cst_91 = arith.constant dense<0.000000e+00> : vector<8x384xf32>
    %432 = tpu.matmul %431, %12, %cst_91 {dimension_numbers = #tpu.dot_dimension_numbers<[1], [0], [0], [1], [0, 0, 1, 1], [], []>} : vector<8x128xbf16>, vector<128x384xbf16>, vector<8x384xf32> -> vector<8x384xf32>
    %433 = vector.extract_strided_slice %428 {offsets = [0, 0], sizes = [8, 384], strides = [1, 1]} : vector<16x384xf32> to vector<8x384xf32>
    %434 = vector.extract_strided_slice %433 {offsets = [0, 0], sizes = [8, 128], strides = [1, 1]} : vector<8x384xf32> to vector<8x128xf32>
    %435 = vector.extract_strided_slice %433 {offsets = [0, 128], sizes = [8, 128], strides = [1, 1]} : vector<8x384xf32> to vector<8x128xf32>
    %436 = vector.extract_strided_slice %433 {offsets = [0, 256], sizes = [8, 128], strides = [1, 1]} : vector<8x384xf32> to vector<8x128xf32>
    %437 = vector.extract_strided_slice %430 {offsets = [0, 0], sizes = [8, 128], strides = [1, 1]} : vector<8x384xf32> to vector<8x128xf32>
    %438 = vector.extract_strided_slice %430 {offsets = [0, 128], sizes = [8, 128], strides = [1, 1]} : vector<8x384xf32> to vector<8x128xf32>
    %439 = vector.extract_strided_slice %430 {offsets = [0, 256], sizes = [8, 128], strides = [1, 1]} : vector<8x384xf32> to vector<8x128xf32>
    %440 = arith.addf %434, %437 : vector<8x128xf32>
    %441 = arith.negf %440 : vector<8x128xf32>
    %442 = math.exp %441 : vector<8x128xf32>
    %cst_92 = arith.constant 1.000000e+00 : f32
    %443 = vector.broadcast %cst_92 : f32 to vector<8x128xf32>
    %444 = arith.addf %443, %442 : vector<8x128xf32>
    %445 = arith.divf %443, %444 : vector<8x128xf32>
    %446 = arith.addf %435, %438 : vector<8x128xf32>
    %447 = arith.negf %446 : vector<8x128xf32>
    %448 = math.exp %447 : vector<8x128xf32>
    %cst_93 = arith.constant 1.000000e+00 : f32
    %449 = vector.broadcast %cst_93 : f32 to vector<8x128xf32>
    %450 = arith.addf %449, %448 : vector<8x128xf32>
    %451 = arith.divf %449, %450 : vector<8x128xf32>
    %452 = arith.mulf %445, %439 : vector<8x128xf32>
    %453 = arith.addf %436, %452 : vector<8x128xf32>
    %454 = math.tanh %453 : vector<8x128xf32>
    %cst_94 = arith.constant 1.000000e+00 : f32
    %455 = vector.broadcast %cst_94 : f32 to vector<8x128xf32>
    %456 = arith.subf %455, %451 : vector<8x128xf32>
    %457 = arith.mulf %456, %454 : vector<8x128xf32>
    %458 = arith.mulf %451, %391 : vector<8x128xf32>
    %459 = arith.addf %457, %458 : vector<8x128xf32>
    %460 = vector.extract_strided_slice %428 {offsets = [8, 0], sizes = [8, 384], strides = [1, 1]} : vector<16x384xf32> to vector<8x384xf32>
    %461 = vector.extract_strided_slice %460 {offsets = [0, 0], sizes = [8, 128], strides = [1, 1]} : vector<8x384xf32> to vector<8x128xf32>
    %462 = vector.extract_strided_slice %460 {offsets = [0, 128], sizes = [8, 128], strides = [1, 1]} : vector<8x384xf32> to vector<8x128xf32>
    %463 = vector.extract_strided_slice %460 {offsets = [0, 256], sizes = [8, 128], strides = [1, 1]} : vector<8x384xf32> to vector<8x128xf32>
    %464 = vector.extract_strided_slice %432 {offsets = [0, 0], sizes = [8, 128], strides = [1, 1]} : vector<8x384xf32> to vector<8x128xf32>
    %465 = vector.extract_strided_slice %432 {offsets = [0, 128], sizes = [8, 128], strides = [1, 1]} : vector<8x384xf32> to vector<8x128xf32>
    %466 = vector.extract_strided_slice %432 {offsets = [0, 256], sizes = [8, 128], strides = [1, 1]} : vector<8x384xf32> to vector<8x128xf32>
    %467 = arith.addf %461, %464 : vector<8x128xf32>
    %468 = arith.negf %467 : vector<8x128xf32>
    %469 = math.exp %468 : vector<8x128xf32>
    %cst_95 = arith.constant 1.000000e+00 : f32
    %470 = vector.broadcast %cst_95 : f32 to vector<8x128xf32>
    %471 = arith.addf %470, %469 : vector<8x128xf32>
    %472 = arith.divf %470, %471 : vector<8x128xf32>
    %473 = arith.addf %462, %465 : vector<8x128xf32>
    %474 = arith.negf %473 : vector<8x128xf32>
    %475 = math.exp %474 : vector<8x128xf32>
    %cst_96 = arith.constant 1.000000e+00 : f32
    %476 = vector.broadcast %cst_96 : f32 to vector<8x128xf32>
    %477 = arith.addf %476, %475 : vector<8x128xf32>
    %478 = arith.divf %476, %477 : vector<8x128xf32>
    %479 = arith.mulf %472, %466 : vector<8x128xf32>
    %480 = arith.addf %463, %479 : vector<8x128xf32>
    %481 = math.tanh %480 : vector<8x128xf32>
    %cst_97 = arith.constant 1.000000e+00 : f32
    %482 = vector.broadcast %cst_97 : f32 to vector<8x128xf32>
    %483 = arith.subf %482, %478 : vector<8x128xf32>
    %484 = arith.mulf %483, %481 : vector<8x128xf32>
    %485 = arith.mulf %478, %418 : vector<8x128xf32>
    %486 = arith.addf %484, %485 : vector<8x128xf32>
    %487 = tpu.concatenate %459, %486 in 0 : vector<8x128xf32>, vector<8x128xf32> -> vector<16x128xf32>
    %488 = arith.truncf %487 : vector<16x128xf32> to vector<16x128xbf16>
    %489 = arith.index_cast %c6_i32 : i32 to index
    %c0_98 = arith.constant 0 : index
    %c0_99 = arith.constant 0 : index
    %490 = vector.load %arg8[%489, %c0_98, %c0_99] : memref<8x16x128xbf16, #tpu.memory_space<vmem>>, vector<1x16x128xbf16>
    %491 = vector.shape_cast %490 : vector<1x16x128xbf16> to vector<16x128xbf16>
    %492 = vector.shape_cast %488 : vector<16x128xbf16> to vector<1x16x128xbf16>
    tpu.vector_store %arg8[%489, %c0_98, %c0_99], %492 {strides = array<i32>} : memref<8x16x128xbf16, #tpu.memory_space<vmem>>, vector<1x16x128xbf16>,
    %c7_i32 = arith.constant 7 : i32
    %493 = arith.index_cast %c7_i32 : i32 to index
    %c0_100 = arith.constant 0 : index
    %c0_101 = arith.constant 0 : index
    %494 = vector.load %arg7[%493, %c0_100, %c0_101] : memref<8x16x384xbf16, #tpu.memory_space<vmem>>, vector<1x16x384xbf16>
    %495 = vector.shape_cast %494 : vector<1x16x384xbf16> to vector<16x384xbf16>
    %496 = arith.extf %495 : vector<16x384xbf16> to vector<16x384xf32>
    %497 = arith.truncf %459 : vector<8x128xf32> to vector<8x128xbf16>
    %cst_102 = arith.constant dense<0.000000e+00> : vector<8x384xf32>
    %498 = tpu.matmul %497, %12, %cst_102 {dimension_numbers = #tpu.dot_dimension_numbers<[1], [0], [0], [1], [0, 0, 1, 1], [], []>} : vector<8x128xbf16>, vector<128x384xbf16>, vector<8x384xf32> -> vector<8x384xf32>
    %499 = arith.truncf %486 : vector<8x128xf32> to vector<8x128xbf16>
    %cst_103 = arith.constant dense<0.000000e+00> : vector<8x384xf32>
    %500 = tpu.matmul %499, %12, %cst_103 {dimension_numbers = #tpu.dot_dimension_numbers<[1], [0], [0], [1], [0, 0, 1, 1], [], []>} : vector<8x128xbf16>, vector<128x384xbf16>, vector<8x384xf32> -> vector<8x384xf32>
    %501 = vector.extract_strided_slice %496 {offsets = [0, 0], sizes = [8, 384], strides = [1, 1]} : vector<16x384xf32> to vector<8x384xf32>
    %502 = vector.extract_strided_slice %501 {offsets = [0, 0], sizes = [8, 128], strides = [1, 1]} : vector<8x384xf32> to vector<8x128xf32>
    %503 = vector.extract_strided_slice %501 {offsets = [0, 128], sizes = [8, 128], strides = [1, 1]} : vector<8x384xf32> to vector<8x128xf32>
    %504 = vector.extract_strided_slice %501 {offsets = [0, 256], sizes = [8, 128], strides = [1, 1]} : vector<8x384xf32> to vector<8x128xf32>
    %505 = vector.extract_strided_slice %498 {offsets = [0, 0], sizes = [8, 128], strides = [1, 1]} : vector<8x384xf32> to vector<8x128xf32>
    %506 = vector.extract_strided_slice %498 {offsets = [0, 128], sizes = [8, 128], strides = [1, 1]} : vector<8x384xf32> to vector<8x128xf32>
    %507 = vector.extract_strided_slice %498 {offsets = [0, 256], sizes = [8, 128], strides = [1, 1]} : vector<8x384xf32> to vector<8x128xf32>
    %508 = arith.addf %502, %505 : vector<8x128xf32>
    %509 = arith.negf %508 : vector<8x128xf32>
    %510 = math.exp %509 : vector<8x128xf32>
    %cst_104 = arith.constant 1.000000e+00 : f32
    %511 = vector.broadcast %cst_104 : f32 to vector<8x128xf32>
    %512 = arith.addf %511, %510 : vector<8x128xf32>
    %513 = arith.divf %511, %512 : vector<8x128xf32>
    %514 = arith.addf %503, %506 : vector<8x128xf32>
    %515 = arith.negf %514 : vector<8x128xf32>
    %516 = math.exp %515 : vector<8x128xf32>
    %cst_105 = arith.constant 1.000000e+00 : f32
    %517 = vector.broadcast %cst_105 : f32 to vector<8x128xf32>
    %518 = arith.addf %517, %516 : vector<8x128xf32>
    %519 = arith.divf %517, %518 : vector<8x128xf32>
    %520 = arith.mulf %513, %507 : vector<8x128xf32>
    %521 = arith.addf %504, %520 : vector<8x128xf32>
    %522 = math.tanh %521 : vector<8x128xf32>
    %cst_106 = arith.constant 1.000000e+00 : f32
    %523 = vector.broadcast %cst_106 : f32 to vector<8x128xf32>
    %524 = arith.subf %523, %519 : vector<8x128xf32>
    %525 = arith.mulf %524, %522 : vector<8x128xf32>
    %526 = arith.mulf %519, %459 : vector<8x128xf32>
    %527 = arith.addf %525, %526 : vector<8x128xf32>
    %528 = vector.extract_strided_slice %496 {offsets = [8, 0], sizes = [8, 384], strides = [1, 1]} : vector<16x384xf32> to vector<8x384xf32>
    %529 = vector.extract_strided_slice %528 {offsets = [0, 0], sizes = [8, 128], strides = [1, 1]} : vector<8x384xf32> to vector<8x128xf32>
    %530 = vector.extract_strided_slice %528 {offsets = [0, 128], sizes = [8, 128], strides = [1, 1]} : vector<8x384xf32> to vector<8x128xf32>
    %531 = vector.extract_strided_slice %528 {offsets = [0, 256], sizes = [8, 128], strides = [1, 1]} : vector<8x384xf32> to vector<8x128xf32>
    %532 = vector.extract_strided_slice %500 {offsets = [0, 0], sizes = [8, 128], strides = [1, 1]} : vector<8x384xf32> to vector<8x128xf32>
    %533 = vector.extract_strided_slice %500 {offsets = [0, 128], sizes = [8, 128], strides = [1, 1]} : vector<8x384xf32> to vector<8x128xf32>
    %534 = vector.extract_strided_slice %500 {offsets = [0, 256], sizes = [8, 128], strides = [1, 1]} : vector<8x384xf32> to vector<8x128xf32>
    %535 = arith.addf %529, %532 : vector<8x128xf32>
    %536 = arith.negf %535 : vector<8x128xf32>
    %537 = math.exp %536 : vector<8x128xf32>
    %cst_107 = arith.constant 1.000000e+00 : f32
    %538 = vector.broadcast %cst_107 : f32 to vector<8x128xf32>
    %539 = arith.addf %538, %537 : vector<8x128xf32>
    %540 = arith.divf %538, %539 : vector<8x128xf32>
    %541 = arith.addf %530, %533 : vector<8x128xf32>
    %542 = arith.negf %541 : vector<8x128xf32>
    %543 = math.exp %542 : vector<8x128xf32>
    %cst_108 = arith.constant 1.000000e+00 : f32
    %544 = vector.broadcast %cst_108 : f32 to vector<8x128xf32>
    %545 = arith.addf %544, %543 : vector<8x128xf32>
    %546 = arith.divf %544, %545 : vector<8x128xf32>
    %547 = arith.mulf %540, %534 : vector<8x128xf32>
    %548 = arith.addf %531, %547 : vector<8x128xf32>
    %549 = math.tanh %548 : vector<8x128xf32>
    %cst_109 = arith.constant 1.000000e+00 : f32
    %550 = vector.broadcast %cst_109 : f32 to vector<8x128xf32>
    %551 = arith.subf %550, %546 : vector<8x128xf32>
    %552 = arith.mulf %551, %549 : vector<8x128xf32>
    %553 = arith.mulf %546, %486 : vector<8x128xf32>
    %554 = arith.addf %552, %553 : vector<8x128xf32>
    %555 = tpu.concatenate %527, %554 in 0 : vector<8x128xf32>, vector<8x128xf32> -> vector<16x128xf32>
    %556 = arith.truncf %555 : vector<16x128xf32> to vector<16x128xbf16>
    %557 = arith.index_cast %c7_i32 : i32 to index
    %c0_110 = arith.constant 0 : index
    %c0_111 = arith.constant 0 : index
    %558 = vector.load %arg8[%557, %c0_110, %c0_111] : memref<8x16x128xbf16, #tpu.memory_space<vmem>>, vector<1x16x128xbf16>
    %559 = vector.shape_cast %558 : vector<1x16x128xbf16> to vector<16x128xbf16>
    %560 = vector.shape_cast %556 : vector<16x128xbf16> to vector<1x16x128xbf16>
    tpu.vector_store %arg8[%557, %c0_110, %c0_111], %560 {strides = array<i32>} : memref<8x16x128xbf16, #tpu.memory_space<vmem>>, vector<1x16x128xbf16>,
    %c8_i32 = arith.constant 8 : i32
    %561 = tpu.concatenate %527, %554 in 0 : vector<8x128xf32>, vector<8x128xf32> -> vector<16x128xf32>
    %c0_112 = arith.constant 0 : index
    %c0_113 = arith.constant 0 : index
    %c0_114 = arith.constant 0 : index
    %562 = vector.load %arg6[%c0_112, %c0_113, %c0_114] : memref<2x16x128xf32, #tpu.memory_space<vmem>>, vector<1x16x128xf32>
    %563 = vector.shape_cast %562 : vector<1x16x128xf32> to vector<16x128xf32>
    %564 = vector.shape_cast %561 : vector<16x128xf32> to vector<1x16x128xf32>
    tpu.vector_store %arg6[%c0_112, %c0_113, %c0_114], %564 {strides = array<i32>} : memref<2x16x128xf32, #tpu.memory_space<vmem>>, vector<1x16x128xf32>,
    %c0_115 = arith.constant 0 : index
    %c0_116 = arith.constant 0 : index
    %c0_117 = arith.constant 0 : index
    %565 = vector.load %arg8[%c0_115, %c0_116, %c0_117] : memref<8x16x128xbf16, #tpu.memory_space<vmem>>, vector<8x16x128xbf16>
    %566 = vector.shape_cast %565 : vector<8x16x128xbf16> to vector<128x128xbf16>
    %c1 = arith.constant 1 : index
    %c0_118 = arith.constant 0 : index
    %c0_119 = arith.constant 0 : index
    %567 = vector.load %arg3[%c1, %c0_118, %c0_119] : memref<2x128x384xbf16, #tpu.memory_space<vmem>>, vector<1x128x384xbf16>
    %568 = vector.shape_cast %567 : vector<1x128x384xbf16> to vector<128x384xbf16>
    %cst_120 = arith.constant dense<0.000000e+00> : vector<128x384xf32>
    %569 = tpu.matmul %566, %568, %cst_120 {dimension_numbers = #tpu.dot_dimension_numbers<[1], [0], [0], [1], [0, 0, 1, 1], [], []>} : vector<128x128xbf16>, vector<128x384xbf16>, vector<128x384xf32> -> vector<128x384xf32>
    %570 = vector.shape_cast %569 : vector<128x384xf32> to vector<8x16x384xf32>
    %571 = arith.truncf %570 : vector<8x16x384xf32> to vector<8x16x384xbf16>
    %c0_121 = arith.constant 0 : index
    %c0_122 = arith.constant 0 : index
    %c0_123 = arith.constant 0 : index
    %572 = vector.load %arg7[%c0_121, %c0_122, %c0_123] : memref<8x16x384xbf16, #tpu.memory_space<vmem>>, vector<8x16x384xbf16>
    tpu.vector_store %arg7[%c0_121, %c0_122, %c0_123], %571 {strides = array<i32>} : memref<8x16x384xbf16, #tpu.memory_space<vmem>>, vector<8x16x384xbf16>,
    %c1_124 = arith.constant 1 : index
    %c0_125 = arith.constant 0 : index
    %c0_126 = arith.constant 0 : index
    %573 = vector.load %arg4[%c1_124, %c0_125, %c0_126] : memref<2x128x384xbf16, #tpu.memory_space<vmem>>, vector<1x128x384xbf16>
    %574 = vector.shape_cast %573 : vector<1x128x384xbf16> to vector<128x384xbf16>
    %c1_127 = arith.constant 1 : index
    %c0_128 = arith.constant 0 : index
    %c0_129 = arith.constant 0 : index
    %575 = vector.load %arg6[%c1_127, %c0_128, %c0_129] : memref<2x16x128xf32, #tpu.memory_space<vmem>>, vector<1x16x128xf32>
    %576 = vector.shape_cast %575 : vector<1x16x128xf32> to vector<16x128xf32>
    %577 = vector.extract_strided_slice %576 {offsets = [0, 0], sizes = [8, 128], strides = [1, 1]} : vector<16x128xf32> to vector<8x128xf32>
    %578 = vector.extract_strided_slice %576 {offsets = [8, 0], sizes = [8, 128], strides = [1, 1]} : vector<16x128xf32> to vector<8x128xf32>
    %c0_i32_130 = arith.constant 0 : i32
    %579 = arith.index_cast %c0_i32_130 : i32 to index
    %c0_131 = arith.constant 0 : index
    %c0_132 = arith.constant 0 : index
    %580 = vector.load %arg7[%579, %c0_131, %c0_132] : memref<8x16x384xbf16, #tpu.memory_space<vmem>>, vector<1x16x384xbf16>
    %581 = vector.shape_cast %580 : vector<1x16x384xbf16> to vector<16x384xbf16>
    %582 = arith.extf %581 : vector<16x384xbf16> to vector<16x384xf32>
    %583 = arith.truncf %577 : vector<8x128xf32> to vector<8x128xbf16>
    %cst_133 = arith.constant dense<0.000000e+00> : vector<8x384xf32>
    %584 = tpu.matmul %583, %574, %cst_133 {dimension_numbers = #tpu.dot_dimension_numbers<[1], [0], [0], [1], [0, 0, 1, 1], [], []>} : vector<8x128xbf16>, vector<128x384xbf16>, vector<8x384xf32> -> vector<8x384xf32>
    %585 = arith.truncf %578 : vector<8x128xf32> to vector<8x128xbf16>
    %cst_134 = arith.constant dense<0.000000e+00> : vector<8x384xf32>
    %586 = tpu.matmul %585, %574, %cst_134 {dimension_numbers = #tpu.dot_dimension_numbers<[1], [0], [0], [1], [0, 0, 1, 1], [], []>} : vector<8x128xbf16>, vector<128x384xbf16>, vector<8x384xf32> -> vector<8x384xf32>
    %587 = vector.extract_strided_slice %582 {offsets = [0, 0], sizes = [8, 384], strides = [1, 1]} : vector<16x384xf32> to vector<8x384xf32>
    %588 = vector.extract_strided_slice %587 {offsets = [0, 0], sizes = [8, 128], strides = [1, 1]} : vector<8x384xf32> to vector<8x128xf32>
    %589 = vector.extract_strided_slice %587 {offsets = [0, 128], sizes = [8, 128], strides = [1, 1]} : vector<8x384xf32> to vector<8x128xf32>
    %590 = vector.extract_strided_slice %587 {offsets = [0, 256], sizes = [8, 128], strides = [1, 1]} : vector<8x384xf32> to vector<8x128xf32>
    %591 = vector.extract_strided_slice %584 {offsets = [0, 0], sizes = [8, 128], strides = [1, 1]} : vector<8x384xf32> to vector<8x128xf32>
    %592 = vector.extract_strided_slice %584 {offsets = [0, 128], sizes = [8, 128], strides = [1, 1]} : vector<8x384xf32> to vector<8x128xf32>
    %593 = vector.extract_strided_slice %584 {offsets = [0, 256], sizes = [8, 128], strides = [1, 1]} : vector<8x384xf32> to vector<8x128xf32>
    %594 = arith.addf %588, %591 : vector<8x128xf32>
    %595 = arith.negf %594 : vector<8x128xf32>
    %596 = math.exp %595 : vector<8x128xf32>
    %cst_135 = arith.constant 1.000000e+00 : f32
    %597 = vector.broadcast %cst_135 : f32 to vector<8x128xf32>
    %598 = arith.addf %597, %596 : vector<8x128xf32>
    %599 = arith.divf %597, %598 : vector<8x128xf32>
    %600 = arith.addf %589, %592 : vector<8x128xf32>
    %601 = arith.negf %600 : vector<8x128xf32>
    %602 = math.exp %601 : vector<8x128xf32>
    %cst_136 = arith.constant 1.000000e+00 : f32
    %603 = vector.broadcast %cst_136 : f32 to vector<8x128xf32>
    %604 = arith.addf %603, %602 : vector<8x128xf32>
    %605 = arith.divf %603, %604 : vector<8x128xf32>
    %606 = arith.mulf %599, %593 : vector<8x128xf32>
    %607 = arith.addf %590, %606 : vector<8x128xf32>
    %608 = math.tanh %607 : vector<8x128xf32>
    %cst_137 = arith.constant 1.000000e+00 : f32
    %609 = vector.broadcast %cst_137 : f32 to vector<8x128xf32>
    %610 = arith.subf %609, %605 : vector<8x128xf32>
    %611 = arith.mulf %610, %608 : vector<8x128xf32>
    %612 = arith.mulf %605, %577 : vector<8x128xf32>
    %613 = arith.addf %611, %612 : vector<8x128xf32>
    %614 = vector.extract_strided_slice %582 {offsets = [8, 0], sizes = [8, 384], strides = [1, 1]} : vector<16x384xf32> to vector<8x384xf32>
    %615 = vector.extract_strided_slice %614 {offsets = [0, 0], sizes = [8, 128], strides = [1, 1]} : vector<8x384xf32> to vector<8x128xf32>
    %616 = vector.extract_strided_slice %614 {offsets = [0, 128], sizes = [8, 128], strides = [1, 1]} : vector<8x384xf32> to vector<8x128xf32>
    %617 = vector.extract_strided_slice %614 {offsets = [0, 256], sizes = [8, 128], strides = [1, 1]} : vector<8x384xf32> to vector<8x128xf32>
    %618 = vector.extract_strided_slice %586 {offsets = [0, 0], sizes = [8, 128], strides = [1, 1]} : vector<8x384xf32> to vector<8x128xf32>
    %619 = vector.extract_strided_slice %586 {offsets = [0, 128], sizes = [8, 128], strides = [1, 1]} : vector<8x384xf32> to vector<8x128xf32>
    %620 = vector.extract_strided_slice %586 {offsets = [0, 256], sizes = [8, 128], strides = [1, 1]} : vector<8x384xf32> to vector<8x128xf32>
    %621 = arith.addf %615, %618 : vector<8x128xf32>
    %622 = arith.negf %621 : vector<8x128xf32>
    %623 = math.exp %622 : vector<8x128xf32>
    %cst_138 = arith.constant 1.000000e+00 : f32
    %624 = vector.broadcast %cst_138 : f32 to vector<8x128xf32>
    %625 = arith.addf %624, %623 : vector<8x128xf32>
    %626 = arith.divf %624, %625 : vector<8x128xf32>
    %627 = arith.addf %616, %619 : vector<8x128xf32>
    %628 = arith.negf %627 : vector<8x128xf32>
    %629 = math.exp %628 : vector<8x128xf32>
    %cst_139 = arith.constant 1.000000e+00 : f32
    %630 = vector.broadcast %cst_139 : f32 to vector<8x128xf32>
    %631 = arith.addf %630, %629 : vector<8x128xf32>
    %632 = arith.divf %630, %631 : vector<8x128xf32>
    %633 = arith.mulf %626, %620 : vector<8x128xf32>
    %634 = arith.addf %617, %633 : vector<8x128xf32>
    %635 = math.tanh %634 : vector<8x128xf32>
    %cst_140 = arith.constant 1.000000e+00 : f32
    %636 = vector.broadcast %cst_140 : f32 to vector<8x128xf32>
    %637 = arith.subf %636, %632 : vector<8x128xf32>
    %638 = arith.mulf %637, %635 : vector<8x128xf32>
    %639 = arith.mulf %632, %578 : vector<8x128xf32>
    %640 = arith.addf %638, %639 : vector<8x128xf32>
    %641 = tpu.concatenate %613, %640 in 0 : vector<8x128xf32>, vector<8x128xf32> -> vector<16x128xf32>
    %642 = arith.truncf %641 : vector<16x128xf32> to vector<16x128xbf16>
    %643 = arith.index_cast %c0_i32_130 : i32 to index
    %c0_141 = arith.constant 0 : index
    %c0_142 = arith.constant 0 : index
    %644 = vector.load %arg5[%643, %c0_141, %c0_142] : memref<8x16x128xbf16, #tpu.memory_space<vmem>>, vector<1x16x128xbf16>
    %645 = vector.shape_cast %644 : vector<1x16x128xbf16> to vector<16x128xbf16>
    %646 = vector.shape_cast %642 : vector<16x128xbf16> to vector<1x16x128xbf16>
    tpu.vector_store %arg5[%643, %c0_141, %c0_142], %646 {strides = array<i32>} : memref<8x16x128xbf16, #tpu.memory_space<vmem>>, vector<1x16x128xbf16>,
    %c1_i32_143 = arith.constant 1 : i32
    %647 = arith.index_cast %c1_i32_143 : i32 to index
    %c0_144 = arith.constant 0 : index
    %c0_145 = arith.constant 0 : index
    %648 = vector.load %arg7[%647, %c0_144, %c0_145] : memref<8x16x384xbf16, #tpu.memory_space<vmem>>, vector<1x16x384xbf16>
    %649 = vector.shape_cast %648 : vector<1x16x384xbf16> to vector<16x384xbf16>
    %650 = arith.extf %649 : vector<16x384xbf16> to vector<16x384xf32>
    %651 = arith.truncf %613 : vector<8x128xf32> to vector<8x128xbf16>
    %cst_146 = arith.constant dense<0.000000e+00> : vector<8x384xf32>
    %652 = tpu.matmul %651, %574, %cst_146 {dimension_numbers = #tpu.dot_dimension_numbers<[1], [0], [0], [1], [0, 0, 1, 1], [], []>} : vector<8x128xbf16>, vector<128x384xbf16>, vector<8x384xf32> -> vector<8x384xf32>
    %653 = arith.truncf %640 : vector<8x128xf32> to vector<8x128xbf16>
    %cst_147 = arith.constant dense<0.000000e+00> : vector<8x384xf32>
    %654 = tpu.matmul %653, %574, %cst_147 {dimension_numbers = #tpu.dot_dimension_numbers<[1], [0], [0], [1], [0, 0, 1, 1], [], []>} : vector<8x128xbf16>, vector<128x384xbf16>, vector<8x384xf32> -> vector<8x384xf32>
    %655 = vector.extract_strided_slice %650 {offsets = [0, 0], sizes = [8, 384], strides = [1, 1]} : vector<16x384xf32> to vector<8x384xf32>
    %656 = vector.extract_strided_slice %655 {offsets = [0, 0], sizes = [8, 128], strides = [1, 1]} : vector<8x384xf32> to vector<8x128xf32>
    %657 = vector.extract_strided_slice %655 {offsets = [0, 128], sizes = [8, 128], strides = [1, 1]} : vector<8x384xf32> to vector<8x128xf32>
    %658 = vector.extract_strided_slice %655 {offsets = [0, 256], sizes = [8, 128], strides = [1, 1]} : vector<8x384xf32> to vector<8x128xf32>
    %659 = vector.extract_strided_slice %652 {offsets = [0, 0], sizes = [8, 128], strides = [1, 1]} : vector<8x384xf32> to vector<8x128xf32>
    %660 = vector.extract_strided_slice %652 {offsets = [0, 128], sizes = [8, 128], strides = [1, 1]} : vector<8x384xf32> to vector<8x128xf32>
    %661 = vector.extract_strided_slice %652 {offsets = [0, 256], sizes = [8, 128], strides = [1, 1]} : vector<8x384xf32> to vector<8x128xf32>
    %662 = arith.addf %656, %659 : vector<8x128xf32>
    %663 = arith.negf %662 : vector<8x128xf32>
    %664 = math.exp %663 : vector<8x128xf32>
    %cst_148 = arith.constant 1.000000e+00 : f32
    %665 = vector.broadcast %cst_148 : f32 to vector<8x128xf32>
    %666 = arith.addf %665, %664 : vector<8x128xf32>
    %667 = arith.divf %665, %666 : vector<8x128xf32>
    %668 = arith.addf %657, %660 : vector<8x128xf32>
    %669 = arith.negf %668 : vector<8x128xf32>
    %670 = math.exp %669 : vector<8x128xf32>
    %cst_149 = arith.constant 1.000000e+00 : f32
    %671 = vector.broadcast %cst_149 : f32 to vector<8x128xf32>
    %672 = arith.addf %671, %670 : vector<8x128xf32>
    %673 = arith.divf %671, %672 : vector<8x128xf32>
    %674 = arith.mulf %667, %661 : vector<8x128xf32>
    %675 = arith.addf %658, %674 : vector<8x128xf32>
    %676 = math.tanh %675 : vector<8x128xf32>
    %cst_150 = arith.constant 1.000000e+00 : f32
    %677 = vector.broadcast %cst_150 : f32 to vector<8x128xf32>
    %678 = arith.subf %677, %673 : vector<8x128xf32>
    %679 = arith.mulf %678, %676 : vector<8x128xf32>
    %680 = arith.mulf %673, %613 : vector<8x128xf32>
    %681 = arith.addf %679, %680 : vector<8x128xf32>
    %682 = vector.extract_strided_slice %650 {offsets = [8, 0], sizes = [8, 384], strides = [1, 1]} : vector<16x384xf32> to vector<8x384xf32>
    %683 = vector.extract_strided_slice %682 {offsets = [0, 0], sizes = [8, 128], strides = [1, 1]} : vector<8x384xf32> to vector<8x128xf32>
    %684 = vector.extract_strided_slice %682 {offsets = [0, 128], sizes = [8, 128], strides = [1, 1]} : vector<8x384xf32> to vector<8x128xf32>
    %685 = vector.extract_strided_slice %682 {offsets = [0, 256], sizes = [8, 128], strides = [1, 1]} : vector<8x384xf32> to vector<8x128xf32>
    %686 = vector.extract_strided_slice %654 {offsets = [0, 0], sizes = [8, 128], strides = [1, 1]} : vector<8x384xf32> to vector<8x128xf32>
    %687 = vector.extract_strided_slice %654 {offsets = [0, 128], sizes = [8, 128], strides = [1, 1]} : vector<8x384xf32> to vector<8x128xf32>
    %688 = vector.extract_strided_slice %654 {offsets = [0, 256], sizes = [8, 128], strides = [1, 1]} : vector<8x384xf32> to vector<8x128xf32>
    %689 = arith.addf %683, %686 : vector<8x128xf32>
    %690 = arith.negf %689 : vector<8x128xf32>
    %691 = math.exp %690 : vector<8x128xf32>
    %cst_151 = arith.constant 1.000000e+00 : f32
    %692 = vector.broadcast %cst_151 : f32 to vector<8x128xf32>
    %693 = arith.addf %692, %691 : vector<8x128xf32>
    %694 = arith.divf %692, %693 : vector<8x128xf32>
    %695 = arith.addf %684, %687 : vector<8x128xf32>
    %696 = arith.negf %695 : vector<8x128xf32>
    %697 = math.exp %696 : vector<8x128xf32>
    %cst_152 = arith.constant 1.000000e+00 : f32
    %698 = vector.broadcast %cst_152 : f32 to vector<8x128xf32>
    %699 = arith.addf %698, %697 : vector<8x128xf32>
    %700 = arith.divf %698, %699 : vector<8x128xf32>
    %701 = arith.mulf %694, %688 : vector<8x128xf32>
    %702 = arith.addf %685, %701 : vector<8x128xf32>
    %703 = math.tanh %702 : vector<8x128xf32>
    %cst_153 = arith.constant 1.000000e+00 : f32
    %704 = vector.broadcast %cst_153 : f32 to vector<8x128xf32>
    %705 = arith.subf %704, %700 : vector<8x128xf32>
    %706 = arith.mulf %705, %703 : vector<8x128xf32>
    %707 = arith.mulf %700, %640 : vector<8x128xf32>
    %708 = arith.addf %706, %707 : vector<8x128xf32>
    %709 = tpu.concatenate %681, %708 in 0 : vector<8x128xf32>, vector<8x128xf32> -> vector<16x128xf32>
    %710 = arith.truncf %709 : vector<16x128xf32> to vector<16x128xbf16>
    %711 = arith.index_cast %c1_i32_143 : i32 to index
    %c0_154 = arith.constant 0 : index
    %c0_155 = arith.constant 0 : index
    %712 = vector.load %arg5[%711, %c0_154, %c0_155] : memref<8x16x128xbf16, #tpu.memory_space<vmem>>, vector<1x16x128xbf16>
    %713 = vector.shape_cast %712 : vector<1x16x128xbf16> to vector<16x128xbf16>
    %714 = vector.shape_cast %710 : vector<16x128xbf16> to vector<1x16x128xbf16>
    tpu.vector_store %arg5[%711, %c0_154, %c0_155], %714 {strides = array<i32>} : memref<8x16x128xbf16, #tpu.memory_space<vmem>>, vector<1x16x128xbf16>,
    %c2_i32_156 = arith.constant 2 : i32
    %715 = arith.index_cast %c2_i32_156 : i32 to index
    %c0_157 = arith.constant 0 : index
    %c0_158 = arith.constant 0 : index
    %716 = vector.load %arg7[%715, %c0_157, %c0_158] : memref<8x16x384xbf16, #tpu.memory_space<vmem>>, vector<1x16x384xbf16>
    %717 = vector.shape_cast %716 : vector<1x16x384xbf16> to vector<16x384xbf16>
    %718 = arith.extf %717 : vector<16x384xbf16> to vector<16x384xf32>
    %719 = arith.truncf %681 : vector<8x128xf32> to vector<8x128xbf16>
    %cst_159 = arith.constant dense<0.000000e+00> : vector<8x384xf32>
    %720 = tpu.matmul %719, %574, %cst_159 {dimension_numbers = #tpu.dot_dimension_numbers<[1], [0], [0], [1], [0, 0, 1, 1], [], []>} : vector<8x128xbf16>, vector<128x384xbf16>, vector<8x384xf32> -> vector<8x384xf32>
    %721 = arith.truncf %708 : vector<8x128xf32> to vector<8x128xbf16>
    %cst_160 = arith.constant dense<0.000000e+00> : vector<8x384xf32>
    %722 = tpu.matmul %721, %574, %cst_160 {dimension_numbers = #tpu.dot_dimension_numbers<[1], [0], [0], [1], [0, 0, 1, 1], [], []>} : vector<8x128xbf16>, vector<128x384xbf16>, vector<8x384xf32> -> vector<8x384xf32>
    %723 = vector.extract_strided_slice %718 {offsets = [0, 0], sizes = [8, 384], strides = [1, 1]} : vector<16x384xf32> to vector<8x384xf32>
    %724 = vector.extract_strided_slice %723 {offsets = [0, 0], sizes = [8, 128], strides = [1, 1]} : vector<8x384xf32> to vector<8x128xf32>
    %725 = vector.extract_strided_slice %723 {offsets = [0, 128], sizes = [8, 128], strides = [1, 1]} : vector<8x384xf32> to vector<8x128xf32>
    %726 = vector.extract_strided_slice %723 {offsets = [0, 256], sizes = [8, 128], strides = [1, 1]} : vector<8x384xf32> to vector<8x128xf32>
    %727 = vector.extract_strided_slice %720 {offsets = [0, 0], sizes = [8, 128], strides = [1, 1]} : vector<8x384xf32> to vector<8x128xf32>
    %728 = vector.extract_strided_slice %720 {offsets = [0, 128], sizes = [8, 128], strides = [1, 1]} : vector<8x384xf32> to vector<8x128xf32>
    %729 = vector.extract_strided_slice %720 {offsets = [0, 256], sizes = [8, 128], strides = [1, 1]} : vector<8x384xf32> to vector<8x128xf32>
    %730 = arith.addf %724, %727 : vector<8x128xf32>
    %731 = arith.negf %730 : vector<8x128xf32>
    %732 = math.exp %731 : vector<8x128xf32>
    %cst_161 = arith.constant 1.000000e+00 : f32
    %733 = vector.broadcast %cst_161 : f32 to vector<8x128xf32>
    %734 = arith.addf %733, %732 : vector<8x128xf32>
    %735 = arith.divf %733, %734 : vector<8x128xf32>
    %736 = arith.addf %725, %728 : vector<8x128xf32>
    %737 = arith.negf %736 : vector<8x128xf32>
    %738 = math.exp %737 : vector<8x128xf32>
    %cst_162 = arith.constant 1.000000e+00 : f32
    %739 = vector.broadcast %cst_162 : f32 to vector<8x128xf32>
    %740 = arith.addf %739, %738 : vector<8x128xf32>
    %741 = arith.divf %739, %740 : vector<8x128xf32>
    %742 = arith.mulf %735, %729 : vector<8x128xf32>
    %743 = arith.addf %726, %742 : vector<8x128xf32>
    %744 = math.tanh %743 : vector<8x128xf32>
    %cst_163 = arith.constant 1.000000e+00 : f32
    %745 = vector.broadcast %cst_163 : f32 to vector<8x128xf32>
    %746 = arith.subf %745, %741 : vector<8x128xf32>
    %747 = arith.mulf %746, %744 : vector<8x128xf32>
    %748 = arith.mulf %741, %681 : vector<8x128xf32>
    %749 = arith.addf %747, %748 : vector<8x128xf32>
    %750 = vector.extract_strided_slice %718 {offsets = [8, 0], sizes = [8, 384], strides = [1, 1]} : vector<16x384xf32> to vector<8x384xf32>
    %751 = vector.extract_strided_slice %750 {offsets = [0, 0], sizes = [8, 128], strides = [1, 1]} : vector<8x384xf32> to vector<8x128xf32>
    %752 = vector.extract_strided_slice %750 {offsets = [0, 128], sizes = [8, 128], strides = [1, 1]} : vector<8x384xf32> to vector<8x128xf32>
    %753 = vector.extract_strided_slice %750 {offsets = [0, 256], sizes = [8, 128], strides = [1, 1]} : vector<8x384xf32> to vector<8x128xf32>
    %754 = vector.extract_strided_slice %722 {offsets = [0, 0], sizes = [8, 128], strides = [1, 1]} : vector<8x384xf32> to vector<8x128xf32>
    %755 = vector.extract_strided_slice %722 {offsets = [0, 128], sizes = [8, 128], strides = [1, 1]} : vector<8x384xf32> to vector<8x128xf32>
    %756 = vector.extract_strided_slice %722 {offsets = [0, 256], sizes = [8, 128], strides = [1, 1]} : vector<8x384xf32> to vector<8x128xf32>
    %757 = arith.addf %751, %754 : vector<8x128xf32>
    %758 = arith.negf %757 : vector<8x128xf32>
    %759 = math.exp %758 : vector<8x128xf32>
    %cst_164 = arith.constant 1.000000e+00 : f32
    %760 = vector.broadcast %cst_164 : f32 to vector<8x128xf32>
    %761 = arith.addf %760, %759 : vector<8x128xf32>
    %762 = arith.divf %760, %761 : vector<8x128xf32>
    %763 = arith.addf %752, %755 : vector<8x128xf32>
    %764 = arith.negf %763 : vector<8x128xf32>
    %765 = math.exp %764 : vector<8x128xf32>
    %cst_165 = arith.constant 1.000000e+00 : f32
    %766 = vector.broadcast %cst_165 : f32 to vector<8x128xf32>
    %767 = arith.addf %766, %765 : vector<8x128xf32>
    %768 = arith.divf %766, %767 : vector<8x128xf32>
    %769 = arith.mulf %762, %756 : vector<8x128xf32>
    %770 = arith.addf %753, %769 : vector<8x128xf32>
    %771 = math.tanh %770 : vector<8x128xf32>
    %cst_166 = arith.constant 1.000000e+00 : f32
    %772 = vector.broadcast %cst_166 : f32 to vector<8x128xf32>
    %773 = arith.subf %772, %768 : vector<8x128xf32>
    %774 = arith.mulf %773, %771 : vector<8x128xf32>
    %775 = arith.mulf %768, %708 : vector<8x128xf32>
    %776 = arith.addf %774, %775 : vector<8x128xf32>
    %777 = tpu.concatenate %749, %776 in 0 : vector<8x128xf32>, vector<8x128xf32> -> vector<16x128xf32>
    %778 = arith.truncf %777 : vector<16x128xf32> to vector<16x128xbf16>
    %779 = arith.index_cast %c2_i32_156 : i32 to index
    %c0_167 = arith.constant 0 : index
    %c0_168 = arith.constant 0 : index
    %780 = vector.load %arg5[%779, %c0_167, %c0_168] : memref<8x16x128xbf16, #tpu.memory_space<vmem>>, vector<1x16x128xbf16>
    %781 = vector.shape_cast %780 : vector<1x16x128xbf16> to vector<16x128xbf16>
    %782 = vector.shape_cast %778 : vector<16x128xbf16> to vector<1x16x128xbf16>
    tpu.vector_store %arg5[%779, %c0_167, %c0_168], %782 {strides = array<i32>} : memref<8x16x128xbf16, #tpu.memory_space<vmem>>, vector<1x16x128xbf16>,
    %c3_i32_169 = arith.constant 3 : i32
    %783 = arith.index_cast %c3_i32_169 : i32 to index
    %c0_170 = arith.constant 0 : index
    %c0_171 = arith.constant 0 : index
    %784 = vector.load %arg7[%783, %c0_170, %c0_171] : memref<8x16x384xbf16, #tpu.memory_space<vmem>>, vector<1x16x384xbf16>
    %785 = vector.shape_cast %784 : vector<1x16x384xbf16> to vector<16x384xbf16>
    %786 = arith.extf %785 : vector<16x384xbf16> to vector<16x384xf32>
    %787 = arith.truncf %749 : vector<8x128xf32> to vector<8x128xbf16>
    %cst_172 = arith.constant dense<0.000000e+00> : vector<8x384xf32>
    %788 = tpu.matmul %787, %574, %cst_172 {dimension_numbers = #tpu.dot_dimension_numbers<[1], [0], [0], [1], [0, 0, 1, 1], [], []>} : vector<8x128xbf16>, vector<128x384xbf16>, vector<8x384xf32> -> vector<8x384xf32>
    %789 = arith.truncf %776 : vector<8x128xf32> to vector<8x128xbf16>
    %cst_173 = arith.constant dense<0.000000e+00> : vector<8x384xf32>
    %790 = tpu.matmul %789, %574, %cst_173 {dimension_numbers = #tpu.dot_dimension_numbers<[1], [0], [0], [1], [0, 0, 1, 1], [], []>} : vector<8x128xbf16>, vector<128x384xbf16>, vector<8x384xf32> -> vector<8x384xf32>
    %791 = vector.extract_strided_slice %786 {offsets = [0, 0], sizes = [8, 384], strides = [1, 1]} : vector<16x384xf32> to vector<8x384xf32>
    %792 = vector.extract_strided_slice %791 {offsets = [0, 0], sizes = [8, 128], strides = [1, 1]} : vector<8x384xf32> to vector<8x128xf32>
    %793 = vector.extract_strided_slice %791 {offsets = [0, 128], sizes = [8, 128], strides = [1, 1]} : vector<8x384xf32> to vector<8x128xf32>
    %794 = vector.extract_strided_slice %791 {offsets = [0, 256], sizes = [8, 128], strides = [1, 1]} : vector<8x384xf32> to vector<8x128xf32>
    %795 = vector.extract_strided_slice %788 {offsets = [0, 0], sizes = [8, 128], strides = [1, 1]} : vector<8x384xf32> to vector<8x128xf32>
    %796 = vector.extract_strided_slice %788 {offsets = [0, 128], sizes = [8, 128], strides = [1, 1]} : vector<8x384xf32> to vector<8x128xf32>
    %797 = vector.extract_strided_slice %788 {offsets = [0, 256], sizes = [8, 128], strides = [1, 1]} : vector<8x384xf32> to vector<8x128xf32>
    %798 = arith.addf %792, %795 : vector<8x128xf32>
    %799 = arith.negf %798 : vector<8x128xf32>
    %800 = math.exp %799 : vector<8x128xf32>
    %cst_174 = arith.constant 1.000000e+00 : f32
    %801 = vector.broadcast %cst_174 : f32 to vector<8x128xf32>
    %802 = arith.addf %801, %800 : vector<8x128xf32>
    %803 = arith.divf %801, %802 : vector<8x128xf32>
    %804 = arith.addf %793, %796 : vector<8x128xf32>
    %805 = arith.negf %804 : vector<8x128xf32>
    %806 = math.exp %805 : vector<8x128xf32>
    %cst_175 = arith.constant 1.000000e+00 : f32
    %807 = vector.broadcast %cst_175 : f32 to vector<8x128xf32>
    %808 = arith.addf %807, %806 : vector<8x128xf32>
    %809 = arith.divf %807, %808 : vector<8x128xf32>
    %810 = arith.mulf %803, %797 : vector<8x128xf32>
    %811 = arith.addf %794, %810 : vector<8x128xf32>
    %812 = math.tanh %811 : vector<8x128xf32>
    %cst_176 = arith.constant 1.000000e+00 : f32
    %813 = vector.broadcast %cst_176 : f32 to vector<8x128xf32>
    %814 = arith.subf %813, %809 : vector<8x128xf32>
    %815 = arith.mulf %814, %812 : vector<8x128xf32>
    %816 = arith.mulf %809, %749 : vector<8x128xf32>
    %817 = arith.addf %815, %816 : vector<8x128xf32>
    %818 = vector.extract_strided_slice %786 {offsets = [8, 0], sizes = [8, 384], strides = [1, 1]} : vector<16x384xf32> to vector<8x384xf32>
    %819 = vector.extract_strided_slice %818 {offsets = [0, 0], sizes = [8, 128], strides = [1, 1]} : vector<8x384xf32> to vector<8x128xf32>
    %820 = vector.extract_strided_slice %818 {offsets = [0, 128], sizes = [8, 128], strides = [1, 1]} : vector<8x384xf32> to vector<8x128xf32>
    %821 = vector.extract_strided_slice %818 {offsets = [0, 256], sizes = [8, 128], strides = [1, 1]} : vector<8x384xf32> to vector<8x128xf32>
    %822 = vector.extract_strided_slice %790 {offsets = [0, 0], sizes = [8, 128], strides = [1, 1]} : vector<8x384xf32> to vector<8x128xf32>
    %823 = vector.extract_strided_slice %790 {offsets = [0, 128], sizes = [8, 128], strides = [1, 1]} : vector<8x384xf32> to vector<8x128xf32>
    %824 = vector.extract_strided_slice %790 {offsets = [0, 256], sizes = [8, 128], strides = [1, 1]} : vector<8x384xf32> to vector<8x128xf32>
    %825 = arith.addf %819, %822 : vector<8x128xf32>
    %826 = arith.negf %825 : vector<8x128xf32>
    %827 = math.exp %826 : vector<8x128xf32>
    %cst_177 = arith.constant 1.000000e+00 : f32
    %828 = vector.broadcast %cst_177 : f32 to vector<8x128xf32>
    %829 = arith.addf %828, %827 : vector<8x128xf32>
    %830 = arith.divf %828, %829 : vector<8x128xf32>
    %831 = arith.addf %820, %823 : vector<8x128xf32>
    %832 = arith.negf %831 : vector<8x128xf32>
    %833 = math.exp %832 : vector<8x128xf32>
    %cst_178 = arith.constant 1.000000e+00 : f32
    %834 = vector.broadcast %cst_178 : f32 to vector<8x128xf32>
    %835 = arith.addf %834, %833 : vector<8x128xf32>
    %836 = arith.divf %834, %835 : vector<8x128xf32>
    %837 = arith.mulf %830, %824 : vector<8x128xf32>
    %838 = arith.addf %821, %837 : vector<8x128xf32>
    %839 = math.tanh %838 : vector<8x128xf32>
    %cst_179 = arith.constant 1.000000e+00 : f32
    %840 = vector.broadcast %cst_179 : f32 to vector<8x128xf32>
    %841 = arith.subf %840, %836 : vector<8x128xf32>
    %842 = arith.mulf %841, %839 : vector<8x128xf32>
    %843 = arith.mulf %836, %776 : vector<8x128xf32>
    %844 = arith.addf %842, %843 : vector<8x128xf32>
    %845 = tpu.concatenate %817, %844 in 0 : vector<8x128xf32>, vector<8x128xf32> -> vector<16x128xf32>
    %846 = arith.truncf %845 : vector<16x128xf32> to vector<16x128xbf16>
    %847 = arith.index_cast %c3_i32_169 : i32 to index
    %c0_180 = arith.constant 0 : index
    %c0_181 = arith.constant 0 : index
    %848 = vector.load %arg5[%847, %c0_180, %c0_181] : memref<8x16x128xbf16, #tpu.memory_space<vmem>>, vector<1x16x128xbf16>
    %849 = vector.shape_cast %848 : vector<1x16x128xbf16> to vector<16x128xbf16>
    %850 = vector.shape_cast %846 : vector<16x128xbf16> to vector<1x16x128xbf16>
    tpu.vector_store %arg5[%847, %c0_180, %c0_181], %850 {strides = array<i32>} : memref<8x16x128xbf16, #tpu.memory_space<vmem>>, vector<1x16x128xbf16>,
    %c4_i32_182 = arith.constant 4 : i32
    %851 = arith.index_cast %c4_i32_182 : i32 to index
    %c0_183 = arith.constant 0 : index
    %c0_184 = arith.constant 0 : index
    %852 = vector.load %arg7[%851, %c0_183, %c0_184] : memref<8x16x384xbf16, #tpu.memory_space<vmem>>, vector<1x16x384xbf16>
    %853 = vector.shape_cast %852 : vector<1x16x384xbf16> to vector<16x384xbf16>
    %854 = arith.extf %853 : vector<16x384xbf16> to vector<16x384xf32>
    %855 = arith.truncf %817 : vector<8x128xf32> to vector<8x128xbf16>
    %cst_185 = arith.constant dense<0.000000e+00> : vector<8x384xf32>
    %856 = tpu.matmul %855, %574, %cst_185 {dimension_numbers = #tpu.dot_dimension_numbers<[1], [0], [0], [1], [0, 0, 1, 1], [], []>} : vector<8x128xbf16>, vector<128x384xbf16>, vector<8x384xf32> -> vector<8x384xf32>
    %857 = arith.truncf %844 : vector<8x128xf32> to vector<8x128xbf16>
    %cst_186 = arith.constant dense<0.000000e+00> : vector<8x384xf32>
    %858 = tpu.matmul %857, %574, %cst_186 {dimension_numbers = #tpu.dot_dimension_numbers<[1], [0], [0], [1], [0, 0, 1, 1], [], []>} : vector<8x128xbf16>, vector<128x384xbf16>, vector<8x384xf32> -> vector<8x384xf32>
    %859 = vector.extract_strided_slice %854 {offsets = [0, 0], sizes = [8, 384], strides = [1, 1]} : vector<16x384xf32> to vector<8x384xf32>
    %860 = vector.extract_strided_slice %859 {offsets = [0, 0], sizes = [8, 128], strides = [1, 1]} : vector<8x384xf32> to vector<8x128xf32>
    %861 = vector.extract_strided_slice %859 {offsets = [0, 128], sizes = [8, 128], strides = [1, 1]} : vector<8x384xf32> to vector<8x128xf32>
    %862 = vector.extract_strided_slice %859 {offsets = [0, 256], sizes = [8, 128], strides = [1, 1]} : vector<8x384xf32> to vector<8x128xf32>
    %863 = vector.extract_strided_slice %856 {offsets = [0, 0], sizes = [8, 128], strides = [1, 1]} : vector<8x384xf32> to vector<8x128xf32>
    %864 = vector.extract_strided_slice %856 {offsets = [0, 128], sizes = [8, 128], strides = [1, 1]} : vector<8x384xf32> to vector<8x128xf32>
    %865 = vector.extract_strided_slice %856 {offsets = [0, 256], sizes = [8, 128], strides = [1, 1]} : vector<8x384xf32> to vector<8x128xf32>
    %866 = arith.addf %860, %863 : vector<8x128xf32>
    %867 = arith.negf %866 : vector<8x128xf32>
    %868 = math.exp %867 : vector<8x128xf32>
    %cst_187 = arith.constant 1.000000e+00 : f32
    %869 = vector.broadcast %cst_187 : f32 to vector<8x128xf32>
    %870 = arith.addf %869, %868 : vector<8x128xf32>
    %871 = arith.divf %869, %870 : vector<8x128xf32>
    %872 = arith.addf %861, %864 : vector<8x128xf32>
    %873 = arith.negf %872 : vector<8x128xf32>
    %874 = math.exp %873 : vector<8x128xf32>
    %cst_188 = arith.constant 1.000000e+00 : f32
    %875 = vector.broadcast %cst_188 : f32 to vector<8x128xf32>
    %876 = arith.addf %875, %874 : vector<8x128xf32>
    %877 = arith.divf %875, %876 : vector<8x128xf32>
    %878 = arith.mulf %871, %865 : vector<8x128xf32>
    %879 = arith.addf %862, %878 : vector<8x128xf32>
    %880 = math.tanh %879 : vector<8x128xf32>
    %cst_189 = arith.constant 1.000000e+00 : f32
    %881 = vector.broadcast %cst_189 : f32 to vector<8x128xf32>
    %882 = arith.subf %881, %877 : vector<8x128xf32>
    %883 = arith.mulf %882, %880 : vector<8x128xf32>
    %884 = arith.mulf %877, %817 : vector<8x128xf32>
    %885 = arith.addf %883, %884 : vector<8x128xf32>
    %886 = vector.extract_strided_slice %854 {offsets = [8, 0], sizes = [8, 384], strides = [1, 1]} : vector<16x384xf32> to vector<8x384xf32>
    %887 = vector.extract_strided_slice %886 {offsets = [0, 0], sizes = [8, 128], strides = [1, 1]} : vector<8x384xf32> to vector<8x128xf32>
    %888 = vector.extract_strided_slice %886 {offsets = [0, 128], sizes = [8, 128], strides = [1, 1]} : vector<8x384xf32> to vector<8x128xf32>
    %889 = vector.extract_strided_slice %886 {offsets = [0, 256], sizes = [8, 128], strides = [1, 1]} : vector<8x384xf32> to vector<8x128xf32>
    %890 = vector.extract_strided_slice %858 {offsets = [0, 0], sizes = [8, 128], strides = [1, 1]} : vector<8x384xf32> to vector<8x128xf32>
    %891 = vector.extract_strided_slice %858 {offsets = [0, 128], sizes = [8, 128], strides = [1, 1]} : vector<8x384xf32> to vector<8x128xf32>
    %892 = vector.extract_strided_slice %858 {offsets = [0, 256], sizes = [8, 128], strides = [1, 1]} : vector<8x384xf32> to vector<8x128xf32>
    %893 = arith.addf %887, %890 : vector<8x128xf32>
    %894 = arith.negf %893 : vector<8x128xf32>
    %895 = math.exp %894 : vector<8x128xf32>
    %cst_190 = arith.constant 1.000000e+00 : f32
    %896 = vector.broadcast %cst_190 : f32 to vector<8x128xf32>
    %897 = arith.addf %896, %895 : vector<8x128xf32>
    %898 = arith.divf %896, %897 : vector<8x128xf32>
    %899 = arith.addf %888, %891 : vector<8x128xf32>
    %900 = arith.negf %899 : vector<8x128xf32>
    %901 = math.exp %900 : vector<8x128xf32>
    %cst_191 = arith.constant 1.000000e+00 : f32
    %902 = vector.broadcast %cst_191 : f32 to vector<8x128xf32>
    %903 = arith.addf %902, %901 : vector<8x128xf32>
    %904 = arith.divf %902, %903 : vector<8x128xf32>
    %905 = arith.mulf %898, %892 : vector<8x128xf32>
    %906 = arith.addf %889, %905 : vector<8x128xf32>
    %907 = math.tanh %906 : vector<8x128xf32>
    %cst_192 = arith.constant 1.000000e+00 : f32
    %908 = vector.broadcast %cst_192 : f32 to vector<8x128xf32>
    %909 = arith.subf %908, %904 : vector<8x128xf32>
    %910 = arith.mulf %909, %907 : vector<8x128xf32>
    %911 = arith.mulf %904, %844 : vector<8x128xf32>
    %912 = arith.addf %910, %911 : vector<8x128xf32>
    %913 = tpu.concatenate %885, %912 in 0 : vector<8x128xf32>, vector<8x128xf32> -> vector<16x128xf32>
    %914 = arith.truncf %913 : vector<16x128xf32> to vector<16x128xbf16>
    %915 = arith.index_cast %c4_i32_182 : i32 to index
    %c0_193 = arith.constant 0 : index
    %c0_194 = arith.constant 0 : index
    %916 = vector.load %arg5[%915, %c0_193, %c0_194] : memref<8x16x128xbf16, #tpu.memory_space<vmem>>, vector<1x16x128xbf16>
    %917 = vector.shape_cast %916 : vector<1x16x128xbf16> to vector<16x128xbf16>
    %918 = vector.shape_cast %914 : vector<16x128xbf16> to vector<1x16x128xbf16>
    tpu.vector_store %arg5[%915, %c0_193, %c0_194], %918 {strides = array<i32>} : memref<8x16x128xbf16, #tpu.memory_space<vmem>>, vector<1x16x128xbf16>,
    %c5_i32_195 = arith.constant 5 : i32
    %919 = arith.index_cast %c5_i32_195 : i32 to index
    %c0_196 = arith.constant 0 : index
    %c0_197 = arith.constant 0 : index
    %920 = vector.load %arg7[%919, %c0_196, %c0_197] : memref<8x16x384xbf16, #tpu.memory_space<vmem>>, vector<1x16x384xbf16>
    %921 = vector.shape_cast %920 : vector<1x16x384xbf16> to vector<16x384xbf16>
    %922 = arith.extf %921 : vector<16x384xbf16> to vector<16x384xf32>
    %923 = arith.truncf %885 : vector<8x128xf32> to vector<8x128xbf16>
    %cst_198 = arith.constant dense<0.000000e+00> : vector<8x384xf32>
    %924 = tpu.matmul %923, %574, %cst_198 {dimension_numbers = #tpu.dot_dimension_numbers<[1], [0], [0], [1], [0, 0, 1, 1], [], []>} : vector<8x128xbf16>, vector<128x384xbf16>, vector<8x384xf32> -> vector<8x384xf32>
    %925 = arith.truncf %912 : vector<8x128xf32> to vector<8x128xbf16>
    %cst_199 = arith.constant dense<0.000000e+00> : vector<8x384xf32>
    %926 = tpu.matmul %925, %574, %cst_199 {dimension_numbers = #tpu.dot_dimension_numbers<[1], [0], [0], [1], [0, 0, 1, 1], [], []>} : vector<8x128xbf16>, vector<128x384xbf16>, vector<8x384xf32> -> vector<8x384xf32>
    %927 = vector.extract_strided_slice %922 {offsets = [0, 0], sizes = [8, 384], strides = [1, 1]} : vector<16x384xf32> to vector<8x384xf32>
    %928 = vector.extract_strided_slice %927 {offsets = [0, 0], sizes = [8, 128], strides = [1, 1]} : vector<8x384xf32> to vector<8x128xf32>
    %929 = vector.extract_strided_slice %927 {offsets = [0, 128], sizes = [8, 128], strides = [1, 1]} : vector<8x384xf32> to vector<8x128xf32>
    %930 = vector.extract_strided_slice %927 {offsets = [0, 256], sizes = [8, 128], strides = [1, 1]} : vector<8x384xf32> to vector<8x128xf32>
    %931 = vector.extract_strided_slice %924 {offsets = [0, 0], sizes = [8, 128], strides = [1, 1]} : vector<8x384xf32> to vector<8x128xf32>
    %932 = vector.extract_strided_slice %924 {offsets = [0, 128], sizes = [8, 128], strides = [1, 1]} : vector<8x384xf32> to vector<8x128xf32>
    %933 = vector.extract_strided_slice %924 {offsets = [0, 256], sizes = [8, 128], strides = [1, 1]} : vector<8x384xf32> to vector<8x128xf32>
    %934 = arith.addf %928, %931 : vector<8x128xf32>
    %935 = arith.negf %934 : vector<8x128xf32>
    %936 = math.exp %935 : vector<8x128xf32>
    %cst_200 = arith.constant 1.000000e+00 : f32
    %937 = vector.broadcast %cst_200 : f32 to vector<8x128xf32>
    %938 = arith.addf %937, %936 : vector<8x128xf32>
    %939 = arith.divf %937, %938 : vector<8x128xf32>
    %940 = arith.addf %929, %932 : vector<8x128xf32>
    %941 = arith.negf %940 : vector<8x128xf32>
    %942 = math.exp %941 : vector<8x128xf32>
    %cst_201 = arith.constant 1.000000e+00 : f32
    %943 = vector.broadcast %cst_201 : f32 to vector<8x128xf32>
    %944 = arith.addf %943, %942 : vector<8x128xf32>
    %945 = arith.divf %943, %944 : vector<8x128xf32>
    %946 = arith.mulf %939, %933 : vector<8x128xf32>
    %947 = arith.addf %930, %946 : vector<8x128xf32>
    %948 = math.tanh %947 : vector<8x128xf32>
    %cst_202 = arith.constant 1.000000e+00 : f32
    %949 = vector.broadcast %cst_202 : f32 to vector<8x128xf32>
    %950 = arith.subf %949, %945 : vector<8x128xf32>
    %951 = arith.mulf %950, %948 : vector<8x128xf32>
    %952 = arith.mulf %945, %885 : vector<8x128xf32>
    %953 = arith.addf %951, %952 : vector<8x128xf32>
    %954 = vector.extract_strided_slice %922 {offsets = [8, 0], sizes = [8, 384], strides = [1, 1]} : vector<16x384xf32> to vector<8x384xf32>
    %955 = vector.extract_strided_slice %954 {offsets = [0, 0], sizes = [8, 128], strides = [1, 1]} : vector<8x384xf32> to vector<8x128xf32>
    %956 = vector.extract_strided_slice %954 {offsets = [0, 128], sizes = [8, 128], strides = [1, 1]} : vector<8x384xf32> to vector<8x128xf32>
    %957 = vector.extract_strided_slice %954 {offsets = [0, 256], sizes = [8, 128], strides = [1, 1]} : vector<8x384xf32> to vector<8x128xf32>
    %958 = vector.extract_strided_slice %926 {offsets = [0, 0], sizes = [8, 128], strides = [1, 1]} : vector<8x384xf32> to vector<8x128xf32>
    %959 = vector.extract_strided_slice %926 {offsets = [0, 128], sizes = [8, 128], strides = [1, 1]} : vector<8x384xf32> to vector<8x128xf32>
    %960 = vector.extract_strided_slice %926 {offsets = [0, 256], sizes = [8, 128], strides = [1, 1]} : vector<8x384xf32> to vector<8x128xf32>
    %961 = arith.addf %955, %958 : vector<8x128xf32>
    %962 = arith.negf %961 : vector<8x128xf32>
    %963 = math.exp %962 : vector<8x128xf32>
    %cst_203 = arith.constant 1.000000e+00 : f32
    %964 = vector.broadcast %cst_203 : f32 to vector<8x128xf32>
    %965 = arith.addf %964, %963 : vector<8x128xf32>
    %966 = arith.divf %964, %965 : vector<8x128xf32>
    %967 = arith.addf %956, %959 : vector<8x128xf32>
    %968 = arith.negf %967 : vector<8x128xf32>
    %969 = math.exp %968 : vector<8x128xf32>
    %cst_204 = arith.constant 1.000000e+00 : f32
    %970 = vector.broadcast %cst_204 : f32 to vector<8x128xf32>
    %971 = arith.addf %970, %969 : vector<8x128xf32>
    %972 = arith.divf %970, %971 : vector<8x128xf32>
    %973 = arith.mulf %966, %960 : vector<8x128xf32>
    %974 = arith.addf %957, %973 : vector<8x128xf32>
    %975 = math.tanh %974 : vector<8x128xf32>
    %cst_205 = arith.constant 1.000000e+00 : f32
    %976 = vector.broadcast %cst_205 : f32 to vector<8x128xf32>
    %977 = arith.subf %976, %972 : vector<8x128xf32>
    %978 = arith.mulf %977, %975 : vector<8x128xf32>
    %979 = arith.mulf %972, %912 : vector<8x128xf32>
    %980 = arith.addf %978, %979 : vector<8x128xf32>
    %981 = tpu.concatenate %953, %980 in 0 : vector<8x128xf32>, vector<8x128xf32> -> vector<16x128xf32>
    %982 = arith.truncf %981 : vector<16x128xf32> to vector<16x128xbf16>
    %983 = arith.index_cast %c5_i32_195 : i32 to index
    %c0_206 = arith.constant 0 : index
    %c0_207 = arith.constant 0 : index
    %984 = vector.load %arg5[%983, %c0_206, %c0_207] : memref<8x16x128xbf16, #tpu.memory_space<vmem>>, vector<1x16x128xbf16>
    %985 = vector.shape_cast %984 : vector<1x16x128xbf16> to vector<16x128xbf16>
    %986 = vector.shape_cast %982 : vector<16x128xbf16> to vector<1x16x128xbf16>
    tpu.vector_store %arg5[%983, %c0_206, %c0_207], %986 {strides = array<i32>} : memref<8x16x128xbf16, #tpu.memory_space<vmem>>, vector<1x16x128xbf16>,
    %c6_i32_208 = arith.constant 6 : i32
    %987 = arith.index_cast %c6_i32_208 : i32 to index
    %c0_209 = arith.constant 0 : index
    %c0_210 = arith.constant 0 : index
    %988 = vector.load %arg7[%987, %c0_209, %c0_210] : memref<8x16x384xbf16, #tpu.memory_space<vmem>>, vector<1x16x384xbf16>
    %989 = vector.shape_cast %988 : vector<1x16x384xbf16> to vector<16x384xbf16>
    %990 = arith.extf %989 : vector<16x384xbf16> to vector<16x384xf32>
    %991 = arith.truncf %953 : vector<8x128xf32> to vector<8x128xbf16>
    %cst_211 = arith.constant dense<0.000000e+00> : vector<8x384xf32>
    %992 = tpu.matmul %991, %574, %cst_211 {dimension_numbers = #tpu.dot_dimension_numbers<[1], [0], [0], [1], [0, 0, 1, 1], [], []>} : vector<8x128xbf16>, vector<128x384xbf16>, vector<8x384xf32> -> vector<8x384xf32>
    %993 = arith.truncf %980 : vector<8x128xf32> to vector<8x128xbf16>
    %cst_212 = arith.constant dense<0.000000e+00> : vector<8x384xf32>
    %994 = tpu.matmul %993, %574, %cst_212 {dimension_numbers = #tpu.dot_dimension_numbers<[1], [0], [0], [1], [0, 0, 1, 1], [], []>} : vector<8x128xbf16>, vector<128x384xbf16>, vector<8x384xf32> -> vector<8x384xf32>
    %995 = vector.extract_strided_slice %990 {offsets = [0, 0], sizes = [8, 384], strides = [1, 1]} : vector<16x384xf32> to vector<8x384xf32>
    %996 = vector.extract_strided_slice %995 {offsets = [0, 0], sizes = [8, 128], strides = [1, 1]} : vector<8x384xf32> to vector<8x128xf32>
    %997 = vector.extract_strided_slice %995 {offsets = [0, 128], sizes = [8, 128], strides = [1, 1]} : vector<8x384xf32> to vector<8x128xf32>
    %998 = vector.extract_strided_slice %995 {offsets = [0, 256], sizes = [8, 128], strides = [1, 1]} : vector<8x384xf32> to vector<8x128xf32>
    %999 = vector.extract_strided_slice %992 {offsets = [0, 0], sizes = [8, 128], strides = [1, 1]} : vector<8x384xf32> to vector<8x128xf32>
    %1000 = vector.extract_strided_slice %992 {offsets = [0, 128], sizes = [8, 128], strides = [1, 1]} : vector<8x384xf32> to vector<8x128xf32>
    %1001 = vector.extract_strided_slice %992 {offsets = [0, 256], sizes = [8, 128], strides = [1, 1]} : vector<8x384xf32> to vector<8x128xf32>
    %1002 = arith.addf %996, %999 : vector<8x128xf32>
    %1003 = arith.negf %1002 : vector<8x128xf32>
    %1004 = math.exp %1003 : vector<8x128xf32>
    %cst_213 = arith.constant 1.000000e+00 : f32
    %1005 = vector.broadcast %cst_213 : f32 to vector<8x128xf32>
    %1006 = arith.addf %1005, %1004 : vector<8x128xf32>
    %1007 = arith.divf %1005, %1006 : vector<8x128xf32>
    %1008 = arith.addf %997, %1000 : vector<8x128xf32>
    %1009 = arith.negf %1008 : vector<8x128xf32>
    %1010 = math.exp %1009 : vector<8x128xf32>
    %cst_214 = arith.constant 1.000000e+00 : f32
    %1011 = vector.broadcast %cst_214 : f32 to vector<8x128xf32>
    %1012 = arith.addf %1011, %1010 : vector<8x128xf32>
    %1013 = arith.divf %1011, %1012 : vector<8x128xf32>
    %1014 = arith.mulf %1007, %1001 : vector<8x128xf32>
    %1015 = arith.addf %998, %1014 : vector<8x128xf32>
    %1016 = math.tanh %1015 : vector<8x128xf32>
    %cst_215 = arith.constant 1.000000e+00 : f32
    %1017 = vector.broadcast %cst_215 : f32 to vector<8x128xf32>
    %1018 = arith.subf %1017, %1013 : vector<8x128xf32>
    %1019 = arith.mulf %1018, %1016 : vector<8x128xf32>
    %1020 = arith.mulf %1013, %953 : vector<8x128xf32>
    %1021 = arith.addf %1019, %1020 : vector<8x128xf32>
    %1022 = vector.extract_strided_slice %990 {offsets = [8, 0], sizes = [8, 384], strides = [1, 1]} : vector<16x384xf32> to vector<8x384xf32>
    %1023 = vector.extract_strided_slice %1022 {offsets = [0, 0], sizes = [8, 128], strides = [1, 1]} : vector<8x384xf32> to vector<8x128xf32>
    %1024 = vector.extract_strided_slice %1022 {offsets = [0, 128], sizes = [8, 128], strides = [1, 1]} : vector<8x384xf32> to vector<8x128xf32>
    %1025 = vector.extract_strided_slice %1022 {offsets = [0, 256], sizes = [8, 128], strides = [1, 1]} : vector<8x384xf32> to vector<8x128xf32>
    %1026 = vector.extract_strided_slice %994 {offsets = [0, 0], sizes = [8, 128], strides = [1, 1]} : vector<8x384xf32> to vector<8x128xf32>
    %1027 = vector.extract_strided_slice %994 {offsets = [0, 128], sizes = [8, 128], strides = [1, 1]} : vector<8x384xf32> to vector<8x128xf32>
    %1028 = vector.extract_strided_slice %994 {offsets = [0, 256], sizes = [8, 128], strides = [1, 1]} : vector<8x384xf32> to vector<8x128xf32>
    %1029 = arith.addf %1023, %1026 : vector<8x128xf32>
    %1030 = arith.negf %1029 : vector<8x128xf32>
    %1031 = math.exp %1030 : vector<8x128xf32>
    %cst_216 = arith.constant 1.000000e+00 : f32
    %1032 = vector.broadcast %cst_216 : f32 to vector<8x128xf32>
    %1033 = arith.addf %1032, %1031 : vector<8x128xf32>
    %1034 = arith.divf %1032, %1033 : vector<8x128xf32>
    %1035 = arith.addf %1024, %1027 : vector<8x128xf32>
    %1036 = arith.negf %1035 : vector<8x128xf32>
    %1037 = math.exp %1036 : vector<8x128xf32>
    %cst_217 = arith.constant 1.000000e+00 : f32
    %1038 = vector.broadcast %cst_217 : f32 to vector<8x128xf32>
    %1039 = arith.addf %1038, %1037 : vector<8x128xf32>
    %1040 = arith.divf %1038, %1039 : vector<8x128xf32>
    %1041 = arith.mulf %1034, %1028 : vector<8x128xf32>
    %1042 = arith.addf %1025, %1041 : vector<8x128xf32>
    %1043 = math.tanh %1042 : vector<8x128xf32>
    %cst_218 = arith.constant 1.000000e+00 : f32
    %1044 = vector.broadcast %cst_218 : f32 to vector<8x128xf32>
    %1045 = arith.subf %1044, %1040 : vector<8x128xf32>
    %1046 = arith.mulf %1045, %1043 : vector<8x128xf32>
    %1047 = arith.mulf %1040, %980 : vector<8x128xf32>
    %1048 = arith.addf %1046, %1047 : vector<8x128xf32>
    %1049 = tpu.concatenate %1021, %1048 in 0 : vector<8x128xf32>, vector<8x128xf32> -> vector<16x128xf32>
    %1050 = arith.truncf %1049 : vector<16x128xf32> to vector<16x128xbf16>
    %1051 = arith.index_cast %c6_i32_208 : i32 to index
    %c0_219 = arith.constant 0 : index
    %c0_220 = arith.constant 0 : index
    %1052 = vector.load %arg5[%1051, %c0_219, %c0_220] : memref<8x16x128xbf16, #tpu.memory_space<vmem>>, vector<1x16x128xbf16>
    %1053 = vector.shape_cast %1052 : vector<1x16x128xbf16> to vector<16x128xbf16>
    %1054 = vector.shape_cast %1050 : vector<16x128xbf16> to vector<1x16x128xbf16>
    tpu.vector_store %arg5[%1051, %c0_219, %c0_220], %1054 {strides = array<i32>} : memref<8x16x128xbf16, #tpu.memory_space<vmem>>, vector<1x16x128xbf16>,
    %c7_i32_221 = arith.constant 7 : i32
    %1055 = arith.index_cast %c7_i32_221 : i32 to index
    %c0_222 = arith.constant 0 : index
    %c0_223 = arith.constant 0 : index
    %1056 = vector.load %arg7[%1055, %c0_222, %c0_223] : memref<8x16x384xbf16, #tpu.memory_space<vmem>>, vector<1x16x384xbf16>
    %1057 = vector.shape_cast %1056 : vector<1x16x384xbf16> to vector<16x384xbf16>
    %1058 = arith.extf %1057 : vector<16x384xbf16> to vector<16x384xf32>
    %1059 = arith.truncf %1021 : vector<8x128xf32> to vector<8x128xbf16>
    %cst_224 = arith.constant dense<0.000000e+00> : vector<8x384xf32>
    %1060 = tpu.matmul %1059, %574, %cst_224 {dimension_numbers = #tpu.dot_dimension_numbers<[1], [0], [0], [1], [0, 0, 1, 1], [], []>} : vector<8x128xbf16>, vector<128x384xbf16>, vector<8x384xf32> -> vector<8x384xf32>
    %1061 = arith.truncf %1048 : vector<8x128xf32> to vector<8x128xbf16>
    %cst_225 = arith.constant dense<0.000000e+00> : vector<8x384xf32>
    %1062 = tpu.matmul %1061, %574, %cst_225 {dimension_numbers = #tpu.dot_dimension_numbers<[1], [0], [0], [1], [0, 0, 1, 1], [], []>} : vector<8x128xbf16>, vector<128x384xbf16>, vector<8x384xf32> -> vector<8x384xf32>
    %1063 = vector.extract_strided_slice %1058 {offsets = [0, 0], sizes = [8, 384], strides = [1, 1]} : vector<16x384xf32> to vector<8x384xf32>
    %1064 = vector.extract_strided_slice %1063 {offsets = [0, 0], sizes = [8, 128], strides = [1, 1]} : vector<8x384xf32> to vector<8x128xf32>
    %1065 = vector.extract_strided_slice %1063 {offsets = [0, 128], sizes = [8, 128], strides = [1, 1]} : vector<8x384xf32> to vector<8x128xf32>
    %1066 = vector.extract_strided_slice %1063 {offsets = [0, 256], sizes = [8, 128], strides = [1, 1]} : vector<8x384xf32> to vector<8x128xf32>
    %1067 = vector.extract_strided_slice %1060 {offsets = [0, 0], sizes = [8, 128], strides = [1, 1]} : vector<8x384xf32> to vector<8x128xf32>
    %1068 = vector.extract_strided_slice %1060 {offsets = [0, 128], sizes = [8, 128], strides = [1, 1]} : vector<8x384xf32> to vector<8x128xf32>
    %1069 = vector.extract_strided_slice %1060 {offsets = [0, 256], sizes = [8, 128], strides = [1, 1]} : vector<8x384xf32> to vector<8x128xf32>
    %1070 = arith.addf %1064, %1067 : vector<8x128xf32>
    %1071 = arith.negf %1070 : vector<8x128xf32>
    %1072 = math.exp %1071 : vector<8x128xf32>
    %cst_226 = arith.constant 1.000000e+00 : f32
    %1073 = vector.broadcast %cst_226 : f32 to vector<8x128xf32>
    %1074 = arith.addf %1073, %1072 : vector<8x128xf32>
    %1075 = arith.divf %1073, %1074 : vector<8x128xf32>
    %1076 = arith.addf %1065, %1068 : vector<8x128xf32>
    %1077 = arith.negf %1076 : vector<8x128xf32>
    %1078 = math.exp %1077 : vector<8x128xf32>
    %cst_227 = arith.constant 1.000000e+00 : f32
    %1079 = vector.broadcast %cst_227 : f32 to vector<8x128xf32>
    %1080 = arith.addf %1079, %1078 : vector<8x128xf32>
    %1081 = arith.divf %1079, %1080 : vector<8x128xf32>
    %1082 = arith.mulf %1075, %1069 : vector<8x128xf32>
    %1083 = arith.addf %1066, %1082 : vector<8x128xf32>
    %1084 = math.tanh %1083 : vector<8x128xf32>
    %cst_228 = arith.constant 1.000000e+00 : f32
    %1085 = vector.broadcast %cst_228 : f32 to vector<8x128xf32>
    %1086 = arith.subf %1085, %1081 : vector<8x128xf32>
    %1087 = arith.mulf %1086, %1084 : vector<8x128xf32>
    %1088 = arith.mulf %1081, %1021 : vector<8x128xf32>
    %1089 = arith.addf %1087, %1088 : vector<8x128xf32>
    %1090 = vector.extract_strided_slice %1058 {offsets = [8, 0], sizes = [8, 384], strides = [1, 1]} : vector<16x384xf32> to vector<8x384xf32>
    %1091 = vector.extract_strided_slice %1090 {offsets = [0, 0], sizes = [8, 128], strides = [1, 1]} : vector<8x384xf32> to vector<8x128xf32>
    %1092 = vector.extract_strided_slice %1090 {offsets = [0, 128], sizes = [8, 128], strides = [1, 1]} : vector<8x384xf32> to vector<8x128xf32>
    %1093 = vector.extract_strided_slice %1090 {offsets = [0, 256], sizes = [8, 128], strides = [1, 1]} : vector<8x384xf32> to vector<8x128xf32>
    %1094 = vector.extract_strided_slice %1062 {offsets = [0, 0], sizes = [8, 128], strides = [1, 1]} : vector<8x384xf32> to vector<8x128xf32>
    %1095 = vector.extract_strided_slice %1062 {offsets = [0, 128], sizes = [8, 128], strides = [1, 1]} : vector<8x384xf32> to vector<8x128xf32>
    %1096 = vector.extract_strided_slice %1062 {offsets = [0, 256], sizes = [8, 128], strides = [1, 1]} : vector<8x384xf32> to vector<8x128xf32>
    %1097 = arith.addf %1091, %1094 : vector<8x128xf32>
    %1098 = arith.negf %1097 : vector<8x128xf32>
    %1099 = math.exp %1098 : vector<8x128xf32>
    %cst_229 = arith.constant 1.000000e+00 : f32
    %1100 = vector.broadcast %cst_229 : f32 to vector<8x128xf32>
    %1101 = arith.addf %1100, %1099 : vector<8x128xf32>
    %1102 = arith.divf %1100, %1101 : vector<8x128xf32>
    %1103 = arith.addf %1092, %1095 : vector<8x128xf32>
    %1104 = arith.negf %1103 : vector<8x128xf32>
    %1105 = math.exp %1104 : vector<8x128xf32>
    %cst_230 = arith.constant 1.000000e+00 : f32
    %1106 = vector.broadcast %cst_230 : f32 to vector<8x128xf32>
    %1107 = arith.addf %1106, %1105 : vector<8x128xf32>
    %1108 = arith.divf %1106, %1107 : vector<8x128xf32>
    %1109 = arith.mulf %1102, %1096 : vector<8x128xf32>
    %1110 = arith.addf %1093, %1109 : vector<8x128xf32>
    %1111 = math.tanh %1110 : vector<8x128xf32>
    %cst_231 = arith.constant 1.000000e+00 : f32
    %1112 = vector.broadcast %cst_231 : f32 to vector<8x128xf32>
    %1113 = arith.subf %1112, %1108 : vector<8x128xf32>
    %1114 = arith.mulf %1113, %1111 : vector<8x128xf32>
    %1115 = arith.mulf %1108, %1048 : vector<8x128xf32>
    %1116 = arith.addf %1114, %1115 : vector<8x128xf32>
    %1117 = tpu.concatenate %1089, %1116 in 0 : vector<8x128xf32>, vector<8x128xf32> -> vector<16x128xf32>
    %1118 = arith.truncf %1117 : vector<16x128xf32> to vector<16x128xbf16>
    %1119 = arith.index_cast %c7_i32_221 : i32 to index
    %c0_232 = arith.constant 0 : index
    %c0_233 = arith.constant 0 : index
    %1120 = vector.load %arg5[%1119, %c0_232, %c0_233] : memref<8x16x128xbf16, #tpu.memory_space<vmem>>, vector<1x16x128xbf16>
    %1121 = vector.shape_cast %1120 : vector<1x16x128xbf16> to vector<16x128xbf16>
    %1122 = vector.shape_cast %1118 : vector<16x128xbf16> to vector<1x16x128xbf16>
    tpu.vector_store %arg5[%1119, %c0_232, %c0_233], %1122 {strides = array<i32>} : memref<8x16x128xbf16, #tpu.memory_space<vmem>>, vector<1x16x128xbf16>,
    %c8_i32_234 = arith.constant 8 : i32
    %1123 = tpu.concatenate %1089, %1116 in 0 : vector<8x128xf32>, vector<8x128xf32> -> vector<16x128xf32>
    %c1_235 = arith.constant 1 : index
    %c0_236 = arith.constant 0 : index
    %c0_237 = arith.constant 0 : index
    %1124 = vector.load %arg6[%c1_235, %c0_236, %c0_237] : memref<2x16x128xf32, #tpu.memory_space<vmem>>, vector<1x16x128xf32>
    %1125 = vector.shape_cast %1124 : vector<1x16x128xf32> to vector<16x128xf32>
    %1126 = vector.shape_cast %1123 : vector<16x128xf32> to vector<1x16x128xf32>
    tpu.vector_store %arg6[%c1_235, %c0_236, %c0_237], %1126 {strides = array<i32>} : memref<2x16x128xf32, #tpu.memory_space<vmem>>, vector<1x16x128xf32>,
    return
  }
  func.func @transform_0(%arg0: i32, %arg1: i32) -> (i32, i32, i32) {
    %c0_i32 = arith.constant 0 : i32
    %c0_i32_0 = arith.constant 0 : i32
    return %arg1, %arg0, %c0_i32 : i32, i32, i32
  }
  func.func @transform_1(%arg0: i32, %arg1: i32) -> (i32, i32, i32) {
    %c0_i32 = arith.constant 0 : i32
    %c0_i32_0 = arith.constant 0 : i32
    %c0_i32_1 = arith.constant 0 : i32
    %c0_i32_2 = arith.constant 0 : i32
    return %c0_i32, %c0_i32_0, %c0_i32_1 : i32, i32, i32
  }
  func.func @transform_2(%arg0: i32, %arg1: i32) -> (i32, i32, i32) {
    %c0_i32 = arith.constant 0 : i32
    %c0_i32_0 = arith.constant 0 : i32
    %c0_i32_1 = arith.constant 0 : i32
    %c0_i32_2 = arith.constant 0 : i32
    return %c0_i32, %c0_i32_0, %c0_i32_1 : i32, i32, i32
  }
  func.func @transform_3(%arg0: i32, %arg1: i32) -> (i32, i32, i32) {
    %c0_i32 = arith.constant 0 : i32
    %c0_i32_0 = arith.constant 0 : i32
    return %arg1, %arg0, %c0_i32 : i32, i32, i32
  }
}

</mosaic_0001>

<bundles_post_ra>
// kernel: tpu_custom_call.1
= control target key start
LH: loop header
LB: loop body
LE: loop exit
PB: predicated region body
PF: predicated region fallthrough
CT: control target
= control target key end

     0   :  { %8 = vsyncpa [#allocation6], 0  ;;  %s8626_s0 = inlined_call_operand.hbm [shape: bf16[8,16,128], index: 0, kind: input, shape index: {}]   ;;  %s8627_s1 = inlined_call_operand.hbm [shape: bf16[2,128,384], index: 1, kind: input, shape index: {}]   ;;  %s8628_s2 = inlined_call_operand.hbm [shape: bf16[2,128,384], index: 2, kind: input, shape index: {}]   ;;  %s8629_s3 = inlined_call_operand.hbm [shape: bf16[8,16,128], index: 3, kind: output, shape index: {}]  }
   0x1   :  { %9 = vsyncpa [#allocation9], 0 }
   0x2   :  { %10 = vsyncpa [#allocation7], 0  ;;  %s6801_s12 = smov [#allocation8]   ;;  %s6707_s16 = scalar_lea.hbm %s8627_s1, 6144 }
   0x3   :  { %s28_s13 = sshll.u32 %s6801_s12, 4  ;;  %p6708_p0 = scmp.ne.s32.totalorder %s8627_s1, %s6707_s16  ;;  %s29_s13 = int_to_ptr.vmem [resolvable:$true] %s28_s13 }
   0x4   :  { %p6711_p1 = scmp.lt.u32.totalorder %s6707_s16, %s8627_s1 }
   0x6   :  { %p6713_p2 = pnand %p6711_p1, %p6708_p0 }
   0x8   :  { %6716 = shalt.err (!%p6713_p2)
}
   0x9   :  { %s6717_s21 = scalar_lea.vmem %s29_s13, 6144  ;;  %p6722_p4 = scmp.lt.s32.totalorder %s29_s13, %s29_s13 }
   0xa   :  { %p6718_p3 = scmp.ne.s32.totalorder %s29_s13, %s6717_s21  ;;  %p6723_p5 = scmp.lt.s32.totalorder %s6717_s21, %s6717_s21 }
   0xc   :  { %p6724_p6 = por %p6723_p5, %p6722_p4 }
   0xe   :  { %p6725_p7 = pnand %p6724_p6, %p6718_p3 }
  0x10   :  { %6728 = shalt.err (!%p6725_p7)
}
  0x11   :  { %s6802_s22 = smov 192   ;;  %s6803_s23 = smov 12  }
  0x12   :  { %34 = dma.hbm_to_vmem [thread:$0]  %s8627_s1, 6144, %s29_s13, [#allocation9], %s6802_s22, %s6802_s22, %s6803_s23  }
  0x13   :  { %s6804_s26 = smov [#allocation5]   ;;  %s6729_s30 = scalar_lea.hbm %s8626_s0, 1024 }
  0x14   :  { %s16_s27 = sshll.u32 %s6804_s26, 4  ;;  %p6730_p8 = scmp.ne.s32.totalorder %s8626_s0, %s6729_s30  ;;  %s17_s27 = int_to_ptr.vmem [resolvable:$true] %s16_s27 }
  0x15   :  { %p6733_p9 = scmp.lt.u32.totalorder %s6729_s30, %s8626_s0 }
  0x17   :  { %p6735_p10 = pnand %p6733_p9, %p6730_p8 }
  0x19   :  { %6738 = shalt.err (!%p6735_p10)
}
  0x1a   :  { %s6739_s8 = scalar_lea.vmem %s17_s27, 1024  ;;  %p6744_p12 = scmp.lt.s32.totalorder %s17_s27, %s17_s27 }
  0x1b   :  { %p6740_p11 = scmp.ne.s32.totalorder %s17_s27, %s6739_s8  ;;  %p6745_p13 = scmp.lt.s32.totalorder %s6739_s8, %s6739_s8 }
  0x1d   :  { %p6746_p0 = por %p6745_p13, %p6744_p12 }
  0x1f   :  { %p6747_p1 = pnand %p6746_p0, %p6740_p11 }
  0x21   :  { %6750 = shalt.err (!%p6747_p1)
}
  0x22   :  { %s6805_s1 = smov 64   ;;  %s6806_s9 = smov 4  }
  0x23   :  { %22 = dma.hbm_to_vmem [thread:$0]  %s8626_s0, 1024, %s17_s27, [#allocation6], %s6805_s1, %s6805_s1, %s6806_s9  }
  0x24   :  { %s6807_s12 = smov [#allocation10]   ;;  %s6751_s16 = scalar_lea.hbm %s8628_s2, 6144 }
  0x25   :  { %s40_s13 = sshll.u32 %s6807_s12, 4  ;;  %p6752_p2 = scmp.ne.s32.totalorder %s8628_s2, %s6751_s16  ;;  %s41_s13 = int_to_ptr.vmem [resolvable:$true] %s40_s13 }
  0x26   :  { %p6755_p3 = scmp.lt.u32.totalorder %s6751_s16, %s8628_s2 }
  0x28   :  { %p6757_p4 = pnand %p6755_p3, %p6752_p2 }
  0x2a   :  { %6760 = shalt.err (!%p6757_p4)
}
  0x2b   :  { %s6761_s21 = scalar_lea.vmem %s41_s13, 6144  ;;  %p6766_p6 = scmp.lt.s32.totalorder %s41_s13, %s41_s13 }
  0x2c   :  { %p6762_p5 = scmp.ne.s32.totalorder %s41_s13, %s6761_s21  ;;  %p6767_p7 = scmp.lt.s32.totalorder %s6761_s21, %s6761_s21 }
  0x2e   :  { %p6768_p8 = por %p6767_p7, %p6766_p6 }
  0x30   :  { %p6769_p9 = pnand %p6768_p8, %p6762_p5 }
  0x32   :  { %6772 = shalt.err (!%p6769_p9)
}
  0x33   :  { %46 = dma.hbm_to_vmem [thread:$0]  %s8628_s2, 6144, %s41_s13, [#allocation9], %s6802_s22, %s6802_s22, %s6803_s23  }
  0x34   :  { %6795 = dma.done.wait [#allocation6], 1024  }
  0x35   :  { %6796 = vsyncadd [#allocation6], 4294966272 }
  0x36   :  { %6797 = dma.done.wait [#allocation9], 12288  }
  0x37   :  { %6798 = vsyncadd [#allocation9], 4294955008  ;;  %v8632_v0 = vmov 0   ;;  %v6155_v1 = vld [vmem:[#allocation8 + $0x4] ss:$12 sps:$4 sm:$0xff]   ;;  %v6188_v27 = vld [vmem:[#allocation5 + $0x8] sm:$0xff]  }
  0x38   :  { %321 = vmatprep.mubr.bf16.mxu0 %v8632_v0  ;;  %v6157_v2 = vld [vmem:[#allocation8 + $0x8] ss:$12 sps:$4 sm:$0xff]   ;;  %289 = vmatprep.subr.bf16.mxu0 %v6155_v1  ;;  %v6158_v3 = vld [vmem:[#allocation8] ss:$12 sps:$4 sm:$0xff]   ;;  %v6162_v6 = vld [vmem:[#allocation8 + $0x18] ss:$12 sps:$4 sm:$0xff]  }
  0x39   :  { %5439 = vmatprep.subr.bf16.mxu1 %v6157_v2  ;;  %v6159_v4 = vld [vmem:[#allocation8 + $0x1c] ss:$12 sps:$4 sm:$0xff]   ;;  %290 = vmatpush1.bf16.msra.mxu0 %v6158_v3  ;;  %v6161_v5 = vld [vmem:[#allocation8 + $0x20] ss:$12 sps:$4 sm:$0xff]   ;;  %v6165_v8 = vld [vmem:[#allocation8 + $0x38] ss:$12 sps:$4 sm:$0xff]  }
  0x3a   :  { %5440 = vmatpush3.bf16.msra.mxu1 %v6157_v2  ;;  %291 = vmatprep.subr.bf16.mxu0 %v6159_v4  ;;  %v6163_v7 = vld [vmem:[#allocation8 + $0x34] ss:$12 sps:$4 sm:$0xff]   ;;  %v6166_v9 = vld [vmem:[#allocation8 + $0x30] ss:$12 sps:$4 sm:$0xff]   ;;  %v6167_v10 = vld [vmem:[#allocation8 + $0x4c] ss:$12 sps:$4 sm:$0xff]  }
  0x3b   :  { %5441 = vmatprep.subr.bf16.mxu1 %v6161_v5  ;;  %v6169_v11 = vld [vmem:[#allocation8 + $0x50] ss:$12 sps:$4 sm:$0xff]   ;;  %v6170_v12 = vld [vmem:[#allocation8 + $0x48] ss:$12 sps:$4 sm:$0xff]   ;;  %v6174_v15 = vld [vmem:[#allocation8 + $0x60] ss:$12 sps:$4 sm:$0xff]  }
  0x3c   :  { %v6171_v13 = vld [vmem:[#allocation8 + $0x64] ss:$12 sps:$4 sm:$0xff]   ;;  %v6173_v14 = vld [vmem:[#allocation8 + $0x68] ss:$12 sps:$4 sm:$0xff]   ;;  %v6177_v17 = vld [vmem:[#allocation8 + $0x80] ss:$12 sps:$4 sm:$0xff]  }
  0x3d   :  { %292 = vmatpush1.bf16.msra.mxu0 %v6162_v6  ;;  %v6175_v16 = vld [vmem:[#allocation8 + $0x7c] ss:$12 sps:$4 sm:$0xff]   ;;  %v6187_v18 = vld [vmem:[#allocation5] sm:$0xff]   ;;  %v6183_v23 = vld [vmem:[#allocation8 + $0xac] ss:$12 sps:$4 sm:$0xff]   ;;  %v8634_v30 = vmov 0.0  }
  0x3e   :  { %5442 = vmatpush3.bf16.msra.mxu1 %v6161_v5  ;;  %293 = vmatprep.subr.bf16.mxu0 %v6163_v7  ;;  %v6178_v19 = vld [vmem:[#allocation8 + $0x78] ss:$12 sps:$4 sm:$0xff]   ;;  %v6179_v20 = vld [vmem:[#allocation8 + $0x94] ss:$12 sps:$4 sm:$0xff]   ;;  %v6182_v22 = vld [vmem:[#allocation8 + $0x90] ss:$12 sps:$4 sm:$0xff]  }
  0x3f   :  { %5443 = vmatprep.subr.bf16.mxu1 %v6165_v8  ;;  %v6181_v21 = vld [vmem:[#allocation8 + $0x98] ss:$12 sps:$4 sm:$0xff]   ;;  %5455 = vmatprep.mubr.bf16.mxu1 %v6187_v18  ;;  %v6185_v24 = vld [vmem:[#allocation8 + $0xb0] ss:$12 sps:$4 sm:$0xff]   ;;  %v6186_v25 = vld [vmem:[#allocation8 + $0xa8] ss:$12 sps:$4 sm:$0xff]  }
  0x40   :  { %v6879_v26 = vld [vmem:[#allocation10 + $0x4] ss:$12 sps:$4 sm:$0xff]   ;;  %v6881_v28 = vld [vmem:[#allocation10] ss:$12 sps:$4 sm:$0xff]   ;;  %v6883_v29 = vld [vmem:[#allocation10 + $0x8] ss:$12 sps:$4 sm:$0xff]  }
  0x41   :  { %294 = vmatpush1.bf16.msra.mxu0 %v6166_v9  ;;  %v6887_v31 = vld [vmem:[#allocation10 + $0x1c] ss:$12 sps:$4 sm:$0xff]   ;;  %v6196_v32 = vld [vmem:[#allocation5 + $0x10] sm:$0xff]   ;;  %v6889_v33 = vld [vmem:[#allocation10 + $0x18] ss:$12 sps:$4 sm:$0xff]   ;;  %v8630_v58 = vmov 0.0|0.0  }
  0x42   :  { %5444 = vmatpush3.bf16.msra.mxu1 %v6165_v8  ;;  %295 = vmatprep.subr.bf16.mxu0 %v6167_v10  ;;  %v6893_v34 = vld [vmem:[#allocation10 + $0x20] ss:$12 sps:$4 sm:$0xff]   ;;  %v6197_v36 = vld [vmem:[#allocation5 + $0x18] sm:$0xff]   ;;  %v6910_v41 = vld [vmem:[#allocation10 + $0x48] ss:$12 sps:$4 sm:$0xff]   ;;  %vm6811_vm0 = vmmov 0  }
  0x43   :  { %5445 = vmatprep.subr.bf16.mxu1 %v6169_v11  ;;  %v6897_v35 = vld [vmem:[#allocation10 + $0x34] ss:$12 sps:$4 sm:$0xff]   ;;  %v6900_v37 = vld [vmem:[#allocation10 + $0x30] ss:$12 sps:$4 sm:$0xff]   ;;  %v6904_v38 = vld [vmem:[#allocation10 + $0x4c] ss:$12 sps:$4 sm:$0xff]  }
  0x44   :  { %v6205_v39 = vld [vmem:[#allocation5 + $0x20] sm:$0xff]   ;;  %v6206_v43 = vld [vmem:[#allocation5 + $0x28] sm:$0xff]   ;;  %v6917_v44 = vld [vmem:[#allocation10 + $0x50] ss:$12 sps:$4 sm:$0xff]   ;;  %s6812_s2 = smov [#allocation11]  }
  0x45   :  { %296 = vmatpush1.bf16.msra.mxu0 %v6170_v12  ;;  %v6908_v40 = vld [vmem:[#allocation10 + $0x38] ss:$12 sps:$4 sm:$0xff]   ;;  %v6919_v45 = vld [vmem:[#allocation10 + $0x60] ss:$12 sps:$4 sm:$0xff]   ;;  %v6922_v46 = vld [vmem:[#allocation10 + $0x7c] ss:$12 sps:$4 sm:$0xff]  }
  0x46   :  { %5446 = vmatpush3.bf16.msra.mxu1 %v6169_v11  ;;  %297 = vmatprep.subr.bf16.mxu0 %v6171_v13  ;;  %v6914_v42 = vld [vmem:[#allocation10 + $0x64] ss:$12 sps:$4 sm:$0xff]   ;;  %v6927_v48 = vld [vmem:[#allocation10 + $0x68] ss:$12 sps:$4 sm:$0xff]   ;;  %v6215_v51 = vld [vmem:[#allocation5 + $0x38] sm:$0xff]   ;;  %s4866_s22 = sshll.u32 %s6812_s2, 4  ;;  %s4867_s22 = int_to_ptr.vmem [resolvable:$true] %s4866_s22 }
  0x47   :  { %5447 = vmatprep.subr.bf16.mxu1 %v6173_v14  ;;  %v6214_v47 = vld [vmem:[#allocation5 + $0x30] sm:$0xff]   ;;  %v6929_v49 = vld [vmem:[#allocation10 + $0x78] ss:$12 sps:$4 sm:$0xff]   ;;  %v6945_v54 = vld [vmem:[#allocation10 + $0x80] ss:$12 sps:$4 sm:$0xff]   ;;  %s6773_s23 = scalar_lea.vmem %s4867_s22, 1024  ;;  %p6778_p11 = scmp.lt.s32.totalorder %s4867_s22, %s4867_s22 }
  0x48   :  { %v6932_v50 = vld [vmem:[#allocation10 + $0x94] ss:$12 sps:$4 sm:$0xff]   ;;  %v6937_v52 = vld [vmem:[#allocation10 + $0x90] ss:$12 sps:$4 sm:$0xff]   ;;  %v6940_v53 = vld [vmem:[#allocation10 + $0xac] ss:$12 sps:$4 sm:$0xff]   ;;  %p6774_p10 = scmp.ne.s32.totalorder %s4867_s22, %s6773_s23  ;;  %p6779_p12 = scmp.lt.s32.totalorder %s6773_s23, %s6773_s23 }
  0x49   :  { %298 = vmatpush1.bf16.msra.mxu0 %v6174_v15  ;;  %v6948_v55 = vld [vmem:[#allocation10 + $0xa8] ss:$12 sps:$4 sm:$0xff]   ;;  %v6952_v56 = vld [vmem:[#allocation10 + $0x98] ss:$12 sps:$4 sm:$0xff]   ;;  %v6961_v57 = vld [vmem:[#allocation10 + $0xb0] ss:$12 sps:$4 sm:$0xff]  }
  0x4a   :  { %5448 = vmatpush3.bf16.msra.mxu1 %v6173_v14  ;;  %299 = vmatprep.subr.bf16.mxu0 %v6175_v16  ;;  %p6780_p13 = por %p6779_p12, %p6778_p11 }
  0x4b   :  { %5449 = vmatprep.subr.bf16.mxu1 %v6177_v17 }
  0x4c   :  { %p6781_p0 = pnand %p6780_p13, %p6774_p10 }
  0x4d   :  { %300 = vmatpush1.bf16.msra.mxu0 %v6178_v19 }
  0x4e   :  { %5450 = vmatpush3.bf16.msra.mxu1 %v6177_v17  ;;  %301 = vmatprep.subr.bf16.mxu0 %v6179_v20 }
  0x4f   :  { %5451 = vmatprep.subr.bf16.mxu1 %v6181_v21 }
  0x51   :  { %302 = vmatpush1.bf16.msra.mxu0 %v6182_v22 }
  0x52   :  { %5452 = vmatpush3.bf16.msra.mxu1 %v6181_v21  ;;  %303 = vmatprep.subr.bf16.mxu0 %v6183_v23 }
  0x53   :  { %5453 = vmatprep.subr.bf16.mxu1 %v6185_v24 }
  0x55   :  { %304 = vmatpush1.bf16.msra.mxu0 %v6186_v25 }
  0x56   :  { %5454 = vmatpush3.bf16.msra.mxu1 %v6185_v24  ;;  %5471 = vmatprep.subr.bf16.mxu0 %v8634_v30 }
  0x57   :  { %719 = vmatprep.subr.bf16.mxu1 %v6879_v26 }
  0x58   :  { %322 = vmatmul.mubr.bf16.vlgmr.msra.gmra.mrb[0].mxu0 %v6187_v18 }
  0x59   :  { %5456 = vmatmul.mubr.bf16.vlgmr.msra.gmra.mrb[0].mxu1 %v6188_v27  ;;  %5472 = vmatpush3.bf16.msra.mxu0 %v6883_v29 }
  0x5a   :  { %720 = vmatpush1.bf16.msra.mxu1 %v6881_v28  ;;  %331 = vmatprep.mubr.bf16.mxu0 %v8632_v0 }
  0x5b   :  { %721 = vmatprep.subr.bf16.mxu1 %v6887_v31  ;;  %5459 = vmatprep.mubr.bf16.mxu1 %v6196_v32 }
  0x5c   :  { %5473 = vmatprep.subr.bf16.mxu0 %v8634_v30 }
  0x5d   :  { %5474 = vmatpush3.bf16.msra.mxu0 %v6893_v34 }
  0x5e   :  { %722 = vmatpush1.bf16.msra.mxu1 %v6889_v33  ;;  %5475 = vmatprep.subr.bf16.mxu0 %v8634_v30 }
  0x5f   :  { %723 = vmatprep.subr.bf16.mxu1 %v6897_v35 }
  0x60   :  { %332 = vmatmul.mubr.bf16.gmra.mrb[4].mxu0 %v6188_v27 }
  0x61   :  { %5460 = vmatmul.mubr.bf16.gmra.mrb[4].mxu1 %v6197_v36  ;;  %341 = vmatprep.mubr.bf16.mxu0 %v8632_v0 }
  0x62   :  { %724 = vmatpush1.bf16.msra.mxu1 %v6900_v37  ;;  %5463 = vmatprep.mubr.bf16.mxu1 %v6205_v39 }
  0x63   :  { %725 = vmatprep.subr.bf16.mxu1 %v6904_v38  ;;  %5476 = vmatpush3.bf16.msra.mxu0 %v6908_v40 }
  0x64   :  { %5477 = vmatprep.subr.bf16.mxu0 %v8634_v30 }
  0x66   :  { %726 = vmatpush1.bf16.msra.mxu1 %v6910_v41 }
  0x67   :  { %727 = vmatprep.subr.bf16.mxu1 %v6914_v42  ;;  %5478 = vmatpush3.bf16.msra.mxu0 %v6917_v44 }
  0x68   :  { %342 = vmatmul.mubr.bf16.gmra.mrb[8].mxu0 %v6196_v32  ;;  %5479 = vmatprep.subr.bf16.mxu0 %v8634_v30 }
  0x69   :  { %5464 = vmatmul.mubr.bf16.gmra.mrb[8].mxu1 %v6206_v43  ;;  %351 = vmatprep.mubr.bf16.mxu0 %v8632_v0 }
  0x6a   :  { %728 = vmatpush1.bf16.msra.mxu1 %v6919_v45  ;;  %5467 = vmatprep.mubr.bf16.mxu1 %v6214_v47 }
  0x6b   :  { %729 = vmatprep.subr.bf16.mxu1 %v6922_v46  ;;  %5480 = vmatpush3.bf16.msra.mxu0 %v6927_v48 }
  0x6c   :  { %5481 = vmatprep.subr.bf16.mxu0 %v8634_v30 }
  0x6e   :  { %730 = vmatpush1.bf16.msra.mxu1 %v6929_v49 }
  0x6f   :  { %731 = vmatprep.subr.bf16.mxu1 %v6932_v50  ;;  %5482 = vmatpush3.bf16.msra.mxu0 %v6945_v54 }
  0x70   :  { %352 = vmatmul.mubr.bf16.gmra.mrb[12].mxu0 %v6197_v36  ;;  %5483 = vmatprep.subr.bf16.mxu0 %v8634_v30 }
  0x71   :  { %5468 = vmatmul.mubr.bf16.gmra.mrb[12].mxu1 %v6215_v51  ;;  %361 = vmatprep.mubr.bf16.mxu0 %v8632_v0 }
  0x72   :  { %732 = vmatpush1.bf16.msra.mxu1 %v6937_v52  ;;  %751 = vmatprep.mubr.bf16.mxu1 %v8632_v0 }
  0x73   :  { %733 = vmatprep.subr.bf16.mxu1 %v6940_v53  ;;  %5484 = vmatpush3.bf16.msra.mxu0 %v6952_v56 }
  0x74   :  { %5485 = vmatprep.subr.bf16.mxu0 %v8634_v30 }
  0x76   :  { %734 = vmatpush1.bf16.msra.mxu1 %v6948_v55 }
  0x77   :  { %801 = vmatprep.subr.bf16.mxu1 %v6879_v26  ;;  %5486 = vmatpush3.bf16.msra.mxu0 %v6961_v57 }
  0x78   :  { %362 = vmatmul.mubr.bf16.gmra.mrb[16].mxu0 %v6205_v39  ;;  %5491 = vmatprep.subr.bf16.mxu0 %v8634_v30 }
  0x79   :  { %752 = vmatmul.mubr.bf16.vlgmr.msra.gmra.mrb[16].mxu1 %v8630_v58  ;;  %371 = vmatprep.mubr.bf16.mxu0 %v8632_v0 }
  0x7a   :  { %802 = vmatpush1.bf16.msra.mxu1 %v6881_v28  ;;  %833 = vmatprep.mubr.bf16.mxu1 %v8632_v0 }
  0x7b   :  { %803 = vmatprep.subr.bf16.mxu1 %v6887_v31 }
  0x7e   :  { %804 = vmatpush1.bf16.msra.mxu1 %v6889_v33 }
  0x7f   :  { %805 = vmatprep.subr.bf16.mxu1 %v6897_v35 }
  0x80   :  { %372 = vmatmul.mubr.bf16.gmra.mrb[20].mxu0 %v6206_v43 }
  0x81   :  { %381 = vmatprep.mubr.bf16.mxu0 %v8632_v0 }
  0x82   :  { %806 = vmatpush1.bf16.msra.mxu1 %v6900_v37 }
  0x83   :  { %807 = vmatprep.subr.bf16.mxu1 %v6904_v38 }
  0x86   :  { %808 = vmatpush1.bf16.msra.mxu1 %v6910_v41 }
  0x87   :  { %809 = vmatprep.subr.bf16.mxu1 %v6914_v42 }
  0x88   :  { %382 = vmatmul.mubr.bf16.gmra.mrb[24].mxu0 %v6214_v47 }
  0x89   :  { %391 = vmatprep.mubr.bf16.mxu0 %v8632_v0 }
  0x8a   :  { %810 = vmatpush1.bf16.msra.mxu1 %v6919_v45 }
  0x8b   :  { %811 = vmatprep.subr.bf16.mxu1 %v6922_v46 }
  0x8e   :  { %812 = vmatpush1.bf16.msra.mxu1 %v6929_v49 }
  0x8f   :  { %813 = vmatprep.subr.bf16.mxu1 %v6932_v50 }
  0x90   :  { %392 = vmatmul.mubr.bf16.gmra.mrb[28].mxu0 %v6215_v51 }
  0x91   :  { %5487 = vmatprep.mubr.msk.bf16.mxu0 %vm6811_vm0, %v8634_v30 }
  0x92   :  { %814 = vmatpush1.bf16.msra.mxu1 %v6937_v52 }
  0x93   :  { %815 = vmatprep.subr.bf16.mxu1 %v6940_v53 }
  0x96   :  { %816 = vmatpush1.bf16.msra.mxu1 %v6948_v55 }
  0x97   :  { %937 = vmatprep.subr.bf16.mxu1 %v6879_v26 }
  0x98   :  { %5488 = vmatmul.mubr.bf16.vlgmr.msra.gmra.mrb[32].mxu0 %v8630_v58 }
  0x99   :  { %834 = vmatmul.mubr.bf16.vlgmr.msra.gmra.mrb[20].mxu1 %v8630_v58  ;;  %5492 = vmatpush3.bf16.msra.mxu0 %v6883_v29 }
  0x9a   :  { %5507 = vmatprep.mubr.msk.bf16.mxu0 %vm6811_vm0, %v8634_v30  ;;  %5493 = vmatprep.subr.bf16.mxu0 %v8634_v30 }
  0x9b   :  { %938 = vmatpush1.bf16.msra.mxu1 %v6881_v28  ;;  %969 = vmatprep.mubr.bf16.mxu1 %v8632_v0 }
  0x9c   :  { %939 = vmatprep.subr.bf16.mxu1 %v6887_v31 }
  0x9d   :  { %5494 = vmatpush3.bf16.msra.mxu0 %v6893_v34 }
  0x9e   :  { %5495 = vmatprep.subr.bf16.mxu0 %v8634_v30 }
  0x9f   :  { %940 = vmatpush1.bf16.msra.mxu1 %v6889_v33 }
  0xa0   :  { %941 = vmatprep.subr.bf16.mxu1 %v6897_v35 }
  0xa1   :  { %5496 = vmatpush3.bf16.msra.mxu0 %v6908_v40 }
  0xa2   :  { %5497 = vmatprep.subr.bf16.mxu0 %v8634_v30 }
  0xa3   :  { %942 = vmatpush1.bf16.msra.mxu1 %v6900_v37 }
  0xa4   :  { %943 = vmatprep.subr.bf16.mxu1 %v6904_v38 }
  0xa5   :  { %5498 = vmatpush3.bf16.msra.mxu0 %v6917_v44 }
  0xa6   :  { %5499 = vmatprep.subr.bf16.mxu0 %v8634_v30 }
  0xa7   :  { %944 = vmatpush1.bf16.msra.mxu1 %v6910_v41 }
  0xa8   :  { %945 = vmatprep.subr.bf16.mxu1 %v6914_v42 }
  0xa9   :  { %5500 = vmatpush3.bf16.msra.mxu0 %v6927_v48 }
  0xaa   :  { %5501 = vmatprep.subr.bf16.mxu0 %v8634_v30 }
  0xab   :  { %946 = vmatpush1.bf16.msra.mxu1 %v6919_v45 }
  0xac   :  { %947 = vmatprep.subr.bf16.mxu1 %v6922_v46 }
  0xad   :  { %5502 = vmatpush3.bf16.msra.mxu0 %v6945_v54 }
  0xae   :  { %5503 = vmatprep.subr.bf16.mxu0 %v8634_v30 }
  0xaf   :  { %948 = vmatpush1.bf16.msra.mxu1 %v6929_v49 }
  0xb0   :  { %949 = vmatprep.subr.bf16.mxu1 %v6932_v50 }
  0xb1   :  { %5504 = vmatpush3.bf16.msra.mxu0 %v6952_v56 }
  0xb2   :  { %5505 = vmatprep.subr.bf16.mxu0 %v8634_v30 }
  0xb3   :  { %950 = vmatpush1.bf16.msra.mxu1 %v6937_v52 }
  0xb4   :  { %951 = vmatprep.subr.bf16.mxu1 %v6940_v53 }
  0xb5   :  { %5506 = vmatpush3.bf16.msra.mxu0 %v6961_v57 }
  0xb6   :  { %5511 = vmatprep.subr.bf16.mxu0 %v8634_v30 }
  0xb7   :  { %952 = vmatpush1.bf16.msra.mxu1 %v6948_v55 }
  0xb8   :  { %1019 = vmatprep.subr.bf16.mxu1 %v6879_v26  ;;  %5508 = vmatmul.mubr.bf16.vlgmr.msra.gmra.mrb[36].mxu0 %v8630_v58 }
  0xb9   :  { %5512 = vmatpush3.bf16.msra.mxu0 %v6883_v29  ;;  %5527 = vmatprep.mubr.msk.bf16.mxu0 %vm6811_vm0, %v8634_v30 }
  0xba   :  { %5513 = vmatprep.subr.bf16.mxu0 %v8634_v30 }
  0xbd   :  { %5514 = vmatpush3.bf16.msra.mxu0 %v6893_v34 }
  0xbe   :  { %5515 = vmatprep.subr.bf16.mxu0 %v8634_v30 }
  0xc1   :  { %5516 = vmatpush3.bf16.msra.mxu0 %v6908_v40 }
  0xc2   :  { %5517 = vmatprep.subr.bf16.mxu0 %v8634_v30 }
  0xc5   :  { %5518 = vmatpush3.bf16.msra.mxu0 %v6917_v44 }
  0xc6   :  { %5519 = vmatprep.subr.bf16.mxu0 %v8634_v30 }
  0xc9   :  { %5520 = vmatpush3.bf16.msra.mxu0 %v6927_v48 }
  0xca   :  { %5521 = vmatprep.subr.bf16.mxu0 %v8634_v30 }
  0xcd   :  { %5522 = vmatpush3.bf16.msra.mxu0 %v6945_v54 }
  0xce   :  { %5523 = vmatprep.subr.bf16.mxu0 %v8634_v30 }
  0xd1   :  { %5524 = vmatpush3.bf16.msra.mxu0 %v6952_v56 }
  0xd2   :  { %5525 = vmatprep.subr.bf16.mxu0 %v8634_v30 }
  0xd5   :  { %5526 = vmatpush3.bf16.msra.mxu0 %v6961_v57 }
  0xd6   :  { %5531 = vmatprep.subr.bf16.mxu0 %v8634_v30 }
 0x12b   :  { %v323_v59 = vpop.f32.mrb[0].mxu0 }
 0x12c   :  { %v5457_v60 = vpop.f32.mrb[0].mxu1  ;;  %v325_v61 = vpop.f32.mrb[1].mxu0 }
 0x12d   :  { %v436_v62 = vpop.f32.mrb[1].mxu1  ;;  %v327_v63 = vpop.f32.mrb[2].mxu0 }
 0x12e   :  { %v5458_v1 = vpop.f32.mrb[2].mxu1  ;;  %v7045_v2 = vpack.c.bf16 %v327_v63, %v323_v59  ;;  %v329_v3 = vpop.f32.mrb[3].mxu0 }
 0x12f   :  { %v7047_v4 = vpack.c.bf16 %v5458_v1, %v5457_v60  ;;  %v439_v5 = vpop.f32.mrb[3].mxu1  ;;  %v7049_v6 = vpack.c.bf16 %v329_v3, %v325_v61 }
 0x130   :  { %v7051_v7 = vpack.c.bf16 %v439_v5, %v436_v62 }
 0x133   :  { %v333_v8 = vpop.f32.mrb[4].mxu0 }
 0x134   :  { %v5461_v9 = vpop.f32.mrb[4].mxu1  ;;  %v335_v10 = vpop.f32.mrb[5].mxu0 }
 0x135   :  { %v452_v11 = vpop.f32.mrb[5].mxu1  ;;  %v337_v12 = vpop.f32.mrb[6].mxu0 }
 0x136   :  { %v5462_v13 = vpop.f32.mrb[6].mxu1  ;;  %v7053_v14 = vpack.c.bf16 %v337_v12, %v333_v8  ;;  %v339_v15 = vpop.f32.mrb[7].mxu0 }
 0x137   :  { %v7055_v16 = vpack.c.bf16 %v5462_v13, %v5461_v9  ;;  %v455_v17 = vpop.f32.mrb[7].mxu1  ;;  %v7057_v18 = vpack.c.bf16 %v339_v15, %v335_v10  ;;  %v585_v15 = vunpack.c.l.bf16 %v7049_v6 }
 0x138   :  { %v7059_v19 = vpack.c.bf16 %v455_v17, %v452_v11  ;;  %v584_v11 = vunpack.c.l.bf16 %v7045_v2 }
 0x13b   :  { %v343_v20 = vpop.f32.mrb[8].mxu0 }
 0x13c   :  { %v5465_v21 = vpop.f32.mrb[8].mxu1  ;;  %v345_v22 = vpop.f32.mrb[9].mxu0 }
 0x13d   :  { %v468_v23 = vpop.f32.mrb[9].mxu1  ;;  %v347_v24 = vpop.f32.mrb[10].mxu0 }
 0x13e   :  { %v5466_v25 = vpop.f32.mrb[10].mxu1  ;;  %v7061_v27 = vpack.c.bf16 %v347_v24, %v343_v20  ;;  %v349_v32 = vpop.f32.mrb[11].mxu0 }
 0x13f   :  { %v7063_v36 = vpack.c.bf16 %v5466_v25, %v5465_v21  ;;  %v471_v39 = vpop.f32.mrb[11].mxu1  ;;  %v7065_v43 = vpack.c.bf16 %v349_v32, %v345_v22 }
 0x140   :  { %v7067_v47 = vpack.c.bf16 %v471_v39, %v468_v23 }
 0x143   :  { %v353_v51 = vpop.f32.mrb[12].mxu0 }
 0x144   :  { %v5469_v59 = vpop.f32.mrb[12].mxu1  ;;  %v355_v60 = vpop.f32.mrb[13].mxu0 }
 0x145   :  { %v484_v61 = vpop.f32.mrb[13].mxu1  ;;  %v357_v62 = vpop.f32.mrb[14].mxu0 }
 0x146   :  { %v5470_v63 = vpop.f32.mrb[14].mxu1  ;;  %v7069_v1 = vpack.c.bf16 %v357_v62, %v353_v51  ;;  %v359_v3 = vpop.f32.mrb[15].mxu0 }
 0x147   :  { %v7071_v5 = vpack.c.bf16 %v5470_v63, %v5469_v59  ;;  %v487_v8 = vpop.f32.mrb[15].mxu1  ;;  %v7073_v9 = vpack.c.bf16 %v359_v3, %v355_v60 }
 0x148   :  { %v7075_v10 = vpack.c.bf16 %v487_v8, %v484_v61 }
 0x149   :  { %8647 = vst [vmem:[#allocation15_spill] sm:$0xff] %v7071_v5 }
 0x14a   :  { %8648 = vst [vmem:[#allocation16_spill] sm:$0xff] %v7075_v10 }
 0x14b   :  { %v363_v12 = vpop.f32.mrb[16].mxu0 }
 0x14c   :  { %v753_v13 = vpop.f32.mrb[16].mxu1  ;;  %v365_v20 = vpop.f32.mrb[17].mxu0 }
 0x14d   :  { %v882_v17 = vadd.f32 %v753_v13, %v584_v11  ;;  %v755_v21 = vpop.f32.mrb[17].mxu1  ;;  %v367_v23 = vpop.f32.mrb[18].mxu0 }
 0x14e   :  { %v889_v22 = vadd.f32 %v755_v21, %v585_v15  ;;  %v757_v24 = vpop.f32.mrb[18].mxu1  ;;  %v7079_v32 = vpack.c.bf16 %v367_v23, %v363_v12  ;;  %v369_v39 = vpop.f32.mrb[19].mxu0 }
 0x14f   :  { %v4935_v25 = vmul.f32 -1.442695, %v882_v17  ;;  %v758_v51 = vpop.f32.mrb[19].mxu1  ;;  %v7081_v59 = vpack.c.bf16 %v369_v39, %v365_v20 }
 0x150   :  { %v4936_v8 = vmul.f32 -1.442695, %v889_v22 }
 0x151   :  { %6291 = vpow2.f32 %v4935_v25 }
 0x152   :  { %6293 = vpow2.f32 %v4936_v8  ;;  %v587_v8 = vunpack.c.h.bf16 %v7045_v2 }
 0x153   :  { %v373_v60 = vpop.f32.mrb[20].mxu0 }
 0x154   :  { %v375_v61 = vpop.f32.mrb[21].mxu0 }
 0x155   :  { %v377_v62 = vpop.f32.mrb[22].mxu0 }
 0x156   :  { %v7083_v63 = vpack.c.bf16 %v377_v62, %v373_v60  ;;  %v379_v3 = vpop.f32.mrb[23].mxu0 }
 0x157   :  { %v7085_v11 = vpack.c.bf16 %v379_v3, %v375_v61 }
 0x15b   :  { %v6292_v13 = vpop.eup %6291  ;;  %v383_v15 = vpop.f32.mrb[24].mxu0 }
 0x15c   :  { %v385_v17 = vpop.f32.mrb[25].mxu0  ;;  %v886_v12 = vadd.f32 1.0, %v6292_v13  ;;  %v6294_v51 = vpop.eup %6293 }
 0x15d   :  { %v387_v21 = vpop.f32.mrb[26].mxu0  ;;  %v893_v3 = vadd.f32 1.0, %v6294_v51 }
 0x15e   :  { %v7087_v23 = vpack.c.bf16 %v387_v21, %v383_v15  ;;  %v389_v20 = vpop.f32.mrb[27].mxu0  ;;  %6295 = vrcp.f32 %v886_v12  ;;  %v588_v21 = vunpack.c.h.bf16 %v7049_v6 }
 0x15f   :  { %v7089_v24 = vpack.c.bf16 %v389_v20, %v385_v17  ;;  %v586_v17 = vunpack.c.l.bf16 %v7051_v7  ;;  %6297 = vrcp.f32 %v893_v3 }
 0x161   :  { %8649 = vst [vmem:[#allocation17_spill] sm:$0xff] %v7089_v24 }
 0x163   :  { %v393_v25 = vpop.f32.mrb[28].mxu0 }
 0x164   :  { %v395_v39 = vpop.f32.mrb[29].mxu0 }
 0x165   :  { %v397_v60 = vpop.f32.mrb[30].mxu0 }
 0x166   :  { %v7091_v62 = vpack.c.bf16 %v397_v60, %v393_v25  ;;  %v399_v22 = vpop.f32.mrb[31].mxu0 }
 0x167   :  { %v7093_v61 = vpack.c.bf16 %v399_v22, %v395_v39 }
 0x168   :  { %8650 = vst [vmem:[#allocation18_spill] sm:$0xff] %v7091_v62  ;;  %v6296_v13 = vpop.eup %6295 }
 0x169   :  { %8651 = vst [vmem:[#allocation19_spill] sm:$0xff] %v7093_v61  ;;  %v6298_v2 = vpop.eup %6297 }
 0x16a   :  { %v899_v10 = vsub.f32 1.0, %v6298_v2 }
 0x16b   :  { %v794_v58 = vpop.f32.mrb[32].mxu0 }
 0x16c   :  { %v835_v15 = vpop.f32.mrb[20].mxu1  ;;  %v896_v12 = vmul.f32 %v6296_v13, %v794_v58  ;;  %v5489_v0 = vpop.f32.mrb[33].mxu0  ;;  %v901_v58 = vmul.f32 0.0, %v6298_v2 }
 0x16d   :  { %v903_v20 = vadd.f32 %v835_v15, %v587_v8  ;;  %v837_v30 = vpop.f32.mrb[21].mxu1  ;;  %v797_v60 = vpop.f32.mrb[34].mxu0  ;;  %v589_v15 = vunpack.c.h.bf16 %v7051_v7 }
 0x16e   :  { %v910_v25 = vadd.f32 %v837_v30, %v588_v21  ;;  %v839_v5 = vpop.f32.mrb[22].mxu1  ;;  %v897_v39 = vadd.f32 %v896_v12, %v586_v17  ;;  %v5490_v51 = vpop.f32.mrb[35].mxu0 }
 0x16f   :  { %v4937_v22 = vmul.f32 -1.442695, %v903_v20  ;;  %v840_v61 = vpop.f32.mrb[23].mxu1  ;;  %v8652_v5 = vmov 0.0  }
 0x170   :  { %6299 = vtanh.f32 %v897_v39  ;;  %v4938_v62 = vmul.f32 -1.442695, %v910_v25 }
 0x171   :  { %6301 = vpow2.f32 %v4937_v22 }
 0x172   :  { %6303 = vpow2.f32 %v4938_v62  ;;  %v8653_v62 = vmov 0  }
 0x17a   :  { %v6300_v6 = vpop.eup %6299 }
 0x17b   :  { %v6302_v24 = vpop.eup %6301  ;;  %v900_v3 = vmul.f32 %v6300_v6, %v899_v10 }
 0x17c   :  { %v907_v8 = vadd.f32 1.0, %v6302_v24  ;;  %v6304_v10 = vpop.eup %6303 }
 0x17d   :  { %v7098_v0 = vadd.f32 %v901_v58, %v900_v3  ;;  %v914_v24 = vadd.f32 1.0, %v6304_v10  ;;  %v931_v3 = vunpack.c.l.bf16 %v7057_v18 }
 0x17e   :  { %6305 = vrcp.f32 %v907_v8 }
 0x17f   :  { %v936_v30 = vpack.c.bf16 %v7098_v0, %v7098_v0  ;;  %6307 = vrcp.f32 %v914_v24 }
 0x181   :  { %970 = vmatmul.mubr.bf16.vlgmr.msra.gmra.mrb[24].mxu1 %v936_v30  ;;  %5528 = vmatmul.mubr.bf16.vlgmr.msra.gmra.mrb[40].mxu0 %v936_v30 }
 0x182   :  { %1020 = vmatpush1.bf16.msra.mxu1 %v6881_v28  ;;  %5532 = vmatpush3.bf16.msra.mxu0 %v6883_v29 }
 0x183   :  { %1021 = vmatprep.subr.bf16.mxu1 %v6887_v31  ;;  %5533 = vmatprep.subr.bf16.mxu0 %v8652_v5 }
 0x184   :  { %1051 = vmatprep.mubr.bf16.mxu1 %v8653_v62  ;;  %5547 = vmatprep.mubr.msk.bf16.mxu0 %vm6811_vm0, %v8652_v5 }
 0x186   :  { %1022 = vmatpush1.bf16.msra.mxu1 %v6889_v33  ;;  %5534 = vmatpush3.bf16.msra.mxu0 %v6893_v34 }
 0x187   :  { %1023 = vmatprep.subr.bf16.mxu1 %v6897_v35  ;;  %5535 = vmatprep.subr.bf16.mxu0 %v8652_v5 }
 0x188   :  { %v6306_v61 = vpop.eup %6305 }
 0x189   :  { %v6308_v7 = vpop.eup %6307 }
 0x18a   :  { %1024 = vmatpush1.bf16.msra.mxu1 %v6900_v37  ;;  %5536 = vmatpush3.bf16.msra.mxu0 %v6908_v40  ;;  %v920_v60 = vsub.f32 1.0, %v6308_v7  ;;  %v922_v51 = vmul.f32 0.0, %v6308_v7 }
 0x18b   :  { %v876_v13 = vpop.f32.mrb[36].mxu0  ;;  %1025 = vmatprep.subr.bf16.mxu1 %v6904_v38  ;;  %5537 = vmatprep.subr.bf16.mxu0 %v8652_v5 }
 0x18c   :  { %v917_v21 = vmul.f32 %v6306_v61, %v876_v13  ;;  %v5509_v17 = vpop.f32.mrb[37].mxu0 }
 0x18d   :  { %v879_v12 = vpop.f32.mrb[38].mxu0 }
 0x18e   :  { %v918_v20 = vadd.f32 %v917_v21, %v589_v15  ;;  %v5510_v25 = vpop.f32.mrb[39].mxu0  ;;  %1026 = vmatpush1.bf16.msra.mxu1 %v6910_v41  ;;  %5538 = vmatpush3.bf16.msra.mxu0 %v6917_v44 }
 0x18f   :  { %1027 = vmatprep.subr.bf16.mxu1 %v6914_v42  ;;  %5539 = vmatprep.subr.bf16.mxu0 %v8652_v5 }
 0x190   :  { %6309 = vtanh.f32 %v918_v20 }
 0x192   :  { %1028 = vmatpush1.bf16.msra.mxu1 %v6919_v45  ;;  %5540 = vmatpush3.bf16.msra.mxu0 %v6927_v48 }
 0x193   :  { %1029 = vmatprep.subr.bf16.mxu1 %v6922_v46  ;;  %5541 = vmatprep.subr.bf16.mxu0 %v8652_v5 }
 0x196   :  { %1030 = vmatpush1.bf16.msra.mxu1 %v6929_v49  ;;  %5542 = vmatpush3.bf16.msra.mxu0 %v6945_v54 }
 0x197   :  { %1031 = vmatprep.subr.bf16.mxu1 %v6932_v50  ;;  %5543 = vmatprep.subr.bf16.mxu0 %v8652_v5 }
 0x19a   :  { %v6310_v39 = vpop.eup %6309  ;;  %1032 = vmatpush1.bf16.msra.mxu1 %v6937_v52  ;;  %5544 = vmatpush3.bf16.msra.mxu0 %v6952_v56 }
 0x19b   :  { %1033 = vmatprep.subr.bf16.mxu1 %v6940_v53  ;;  %5545 = vmatprep.subr.bf16.mxu0 %v8652_v5  ;;  %v921_v22 = vmul.f32 %v6310_v39, %v920_v60  ;;  %v932_v60 = vunpack.c.l.bf16 %v7047_v4 }
 0x19d   :  { %v7134_v2 = vadd.f32 %v922_v51, %v921_v22  ;;  %v933_v51 = vunpack.c.h.bf16 %v7053_v14 }
 0x19e   :  { %1034 = vmatpush1.bf16.msra.mxu1 %v6948_v55  ;;  %5546 = vmatpush3.bf16.msra.mxu0 %v6961_v57 }
 0x19f   :  { %v1018_v6 = vpack.c.bf16 %v7134_v2, %v7134_v2  ;;  %1156 = vmatprep.subr.bf16.mxu1 %v6879_v26  ;;  %5551 = vmatprep.subr.bf16.mxu0 %v8652_v5 }
 0x1a1   :  { %1052 = vmatmul.mubr.bf16.vlgmr.msra.gmra.mrb[28].mxu1 %v1018_v6  ;;  %5548 = vmatmul.mubr.bf16.vlgmr.msra.gmra.mrb[44].mxu0 %v1018_v6 }
 0x1a2   :  { %1157 = vmatpush1.bf16.msra.mxu1 %v6881_v28  ;;  %5552 = vmatpush3.bf16.msra.mxu0 %v6883_v29  ;;  %v930_v28 = vunpack.c.l.bf16 %v7053_v14 }
 0x1a3   :  { %1158 = vmatprep.subr.bf16.mxu1 %v6887_v31  ;;  %5553 = vmatprep.subr.bf16.mxu0 %v8652_v5 }
 0x1a4   :  { %1188 = vmatprep.mubr.bf16.mxu1 %v8653_v62  ;;  %5567 = vmatprep.mubr.msk.bf16.mxu0 %vm6811_vm0, %v8652_v5 }
 0x1a6   :  { %1159 = vmatpush1.bf16.msra.mxu1 %v6889_v33  ;;  %5554 = vmatpush3.bf16.msra.mxu0 %v6893_v34 }
 0x1a7   :  { %1160 = vmatprep.subr.bf16.mxu1 %v6897_v35  ;;  %5555 = vmatprep.subr.bf16.mxu0 %v8652_v5 }
 0x1aa   :  { %1161 = vmatpush1.bf16.msra.mxu1 %v6900_v37  ;;  %5556 = vmatpush3.bf16.msra.mxu0 %v6908_v40 }
 0x1ab   :  { %1162 = vmatprep.subr.bf16.mxu1 %v6904_v38  ;;  %5557 = vmatprep.subr.bf16.mxu0 %v8652_v5 }
 0x1ae   :  { %1163 = vmatpush1.bf16.msra.mxu1 %v6910_v41  ;;  %5558 = vmatpush3.bf16.msra.mxu0 %v6917_v44 }
 0x1af   :  { %1164 = vmatprep.subr.bf16.mxu1 %v6914_v42  ;;  %5559 = vmatprep.subr.bf16.mxu0 %v8652_v5 }
 0x1b2   :  { %1165 = vmatpush1.bf16.msra.mxu1 %v6919_v45  ;;  %5560 = vmatpush3.bf16.msra.mxu0 %v6927_v48 }
 0x1b3   :  { %1166 = vmatprep.subr.bf16.mxu1 %v6922_v46  ;;  %5561 = vmatprep.subr.bf16.mxu0 %v8652_v5 }
 0x1b6   :  { %1167 = vmatpush1.bf16.msra.mxu1 %v6929_v49  ;;  %5562 = vmatpush3.bf16.msra.mxu0 %v6945_v54 }
 0x1b7   :  { %1168 = vmatprep.subr.bf16.mxu1 %v6932_v50  ;;  %5563 = vmatprep.subr.bf16.mxu0 %v8652_v5 }
 0x1ba   :  { %1169 = vmatpush1.bf16.msra.mxu1 %v6937_v52  ;;  %5564 = vmatpush3.bf16.msra.mxu0 %v6952_v56 }
 0x1bb   :  { %1170 = vmatprep.subr.bf16.mxu1 %v6940_v53  ;;  %5565 = vmatprep.subr.bf16.mxu0 %v8652_v5 }
 0x1be   :  { %1171 = vmatpush1.bf16.msra.mxu1 %v6948_v55  ;;  %5566 = vmatpush3.bf16.msra.mxu0 %v6961_v57 }
 0x1bf   :  { %1238 = vmatprep.subr.bf16.mxu1 %v6879_v26  ;;  %5571 = vmatprep.subr.bf16.mxu0 %v8652_v5 }
 0x254   :  { %v971_v29 = vpop.f32.mrb[24].mxu1  ;;  %v1012_v31 = vpop.f32.mrb[40].mxu0 }
 0x255   :  { %v1100_v58 = vadd.f32 %v971_v29, %v930_v28  ;;  %v973_v8 = vpop.f32.mrb[25].mxu1  ;;  %v5529_v30 = vpop.f32.mrb[41].mxu0  ;;  %v934_v29 = vunpack.c.h.bf16 %v7057_v18 }
 0x256   :  { %v1107_v10 = vadd.f32 %v973_v8, %v931_v3  ;;  %v975_v24 = vpop.f32.mrb[26].mxu1  ;;  %v1015_v61 = vpop.f32.mrb[42].mxu0 }
 0x257   :  { %v4939_v13 = vmul.f32 -1.442695, %v1100_v58  ;;  %v976_v15 = vpop.f32.mrb[27].mxu1  ;;  %v5530_v21 = vpop.f32.mrb[43].mxu0 }
 0x258   :  { %v4940_v17 = vmul.f32 -1.442695, %v1107_v10 }
 0x259   :  { %6311 = vpow2.f32 %v4939_v13 }
 0x25a   :  { %6313 = vpow2.f32 %v4940_v17 }
 0x263   :  { %v6312_v26 = vpop.eup %6311 }
 0x264   :  { %v1104_v12 = vadd.f32 1.0, %v6312_v26  ;;  %v6314_v20 = vpop.eup %6313 }
 0x265   :  { %v1111_v25 = vadd.f32 1.0, %v6314_v20 }
 0x266   :  { %6315 = vrcp.f32 %v1104_v12 }
 0x267   :  { %6317 = vrcp.f32 %v1111_v25 }
 0x270   :  { %v6316_v7 = vpop.eup %6315 }
 0x271   :  { %v1114_v39 = vmul.f32 %v6316_v7, %v1012_v31  ;;  %v6318_v31 = vpop.eup %6317 }
 0x272   :  { %v1117_v17 = vsub.f32 1.0, %v6318_v31  ;;  %v1119_v12 = vmul.f32 %v6318_v31, %v7098_v0 }
 0x273   :  { %v1115_v22 = vadd.f32 %v1114_v39, %v932_v60  ;;  %v7187_v60 = vld [vmem:[#allocation10] ss:$12 sps:$4 sm:$0xff]   ;;  %v7190_v39 = vld [vmem:[#allocation10 + $0x8] ss:$12 sps:$4 sm:$0xff]  }
 0x274   :  { %v1053_v6 = vpop.f32.mrb[28].mxu1  ;;  %v1094_v28 = vpop.f32.mrb[44].mxu0 }
 0x275   :  { %6319 = vtanh.f32 %v1115_v22  ;;  %v1121_v3 = vadd.f32 %v1053_v6, %v933_v51  ;;  %v1055_v58 = vpop.f32.mrb[29].mxu1  ;;  %v5549_v8 = vpop.f32.mrb[45].mxu0  ;;  %v7193_v22 = vld [vmem:[#allocation10 + $0x1c] ss:$12 sps:$4 sm:$0xff]  }
 0x276   :  { %v1128_v30 = vadd.f32 %v1055_v58, %v934_v29  ;;  %v1057_v10 = vpop.f32.mrb[30].mxu1  ;;  %v1097_v24 = vpop.f32.mrb[46].mxu0  ;;  %v7256_v8 = vld [vmem:[#allocation10 + $0x38] ss:$12 sps:$4 sm:$0xff]  }
 0x277   :  { %v4941_v61 = vmul.f32 -1.442695, %v1121_v3  ;;  %v1058_v13 = vpop.f32.mrb[31].mxu1  ;;  %v5550_v15 = vpop.f32.mrb[47].mxu0  ;;  %v935_v3 = vunpack.c.h.bf16 %v7047_v4  ;;  %v7249_v4 = vld [vmem:[#allocation10 + $0x34] ss:$12 sps:$4 sm:$0xff]  }
 0x278   :  { %v4942_v21 = vmul.f32 -1.442695, %v1128_v30  ;;  %v7259_v30 = vld [vmem:[#allocation10 + $0x4c] ss:$12 sps:$4 sm:$0xff]   ;;  %v7263_v10 = vld [vmem:[#allocation10 + $0x48] ss:$12 sps:$4 sm:$0xff]  }
 0x279   :  { %6321 = vpow2.f32 %v4941_v61  ;;  %v7266_v24 = vld [vmem:[#allocation10 + $0x50] ss:$12 sps:$4 sm:$0xff]   ;;  %v7273_v13 = vld [vmem:[#allocation10 + $0x60] ss:$12 sps:$4 sm:$0xff]  }
 0x27a   :  { %6323 = vpow2.f32 %v4942_v21  ;;  %v7269_v61 = vld [vmem:[#allocation10 + $0x64] ss:$12 sps:$4 sm:$0xff]   ;;  %v7277_v15 = vld [vmem:[#allocation10 + $0x7c] ss:$12 sps:$4 sm:$0xff]  }
 0x27f   :  { %v6320_v26 = vpop.eup %6319 }
 0x280   :  { %v1118_v14 = vmul.f32 %v6320_v26, %v1117_v17 }
 0x282   :  { %v7183_v18 = vadd.f32 %v1119_v12, %v1118_v14 }
 0x283   :  { %v6322_v20 = vpop.eup %6321 }
 0x284   :  { %v1125_v25 = vadd.f32 1.0, %v6322_v20  ;;  %v1155_v7 = vpack.c.bf16 %v7183_v18, %v7183_v18  ;;  %v6324_v51 = vpop.eup %6323 }
 0x285   :  { %v1132_v6 = vadd.f32 1.0, %v6324_v51 }
 0x286   :  { %6325 = vrcp.f32 %v1125_v25  ;;  %1189 = vmatmul.mubr.bf16.vlgmr.msra.gmra.mrb[32].mxu1 %v1155_v7  ;;  %5568 = vmatmul.mubr.bf16.vlgmr.msra.gmra.mrb[48].mxu0 %v1155_v7 }
 0x287   :  { %1239 = vmatpush1.bf16.msra.mxu1 %v7187_v60  ;;  %5572 = vmatpush3.bf16.msra.mxu0 %v7190_v39  ;;  %6327 = vrcp.f32 %v1132_v6  ;;  %v1151_v6 = vunpack.c.l.bf16 %v7059_v19 }
 0x288   :  { %1240 = vmatprep.subr.bf16.mxu1 %v7193_v22  ;;  %5573 = vmatprep.subr.bf16.mxu0 %v8652_v5 }
 0x289   :  { %1270 = vmatprep.mubr.bf16.mxu1 %v8653_v62  ;;  %5587 = vmatprep.mubr.msk.bf16.mxu0 %vm6811_vm0, %v8652_v5 }
 0x28b   :  { %1241 = vmatpush1.bf16.msra.mxu1 %v6889_v33  ;;  %5574 = vmatpush3.bf16.msra.mxu0 %v6893_v34 }
 0x28c   :  { %1242 = vmatprep.subr.bf16.mxu1 %v6897_v35  ;;  %5575 = vmatprep.subr.bf16.mxu0 %v8652_v5 }
 0x28f   :  { %1243 = vmatpush1.bf16.msra.mxu1 %v6900_v37  ;;  %5576 = vmatpush3.bf16.msra.mxu0 %v6908_v40 }
 0x290   :  { %v6326_v29 = vpop.eup %6325  ;;  %1244 = vmatprep.subr.bf16.mxu1 %v6904_v38  ;;  %5577 = vmatprep.subr.bf16.mxu0 %v8652_v5 }
 0x291   :  { %v1135_v58 = vmul.f32 %v6326_v29, %v1094_v28  ;;  %v6328_v34 = vpop.eup %6327  ;;  %v7253_v28 = vld [vmem:[#allocation10 + $0x30] ss:$12 sps:$4 sm:$0xff]  }
 0x292   :  { %v1138_v35 = vsub.f32 1.0, %v6328_v34  ;;  %v1140_v40 = vmul.f32 %v6328_v34, %v7134_v2 }
 0x293   :  { %v1136_v33 = vadd.f32 %v1135_v58, %v935_v3  ;;  %1245 = vmatpush1.bf16.msra.mxu1 %v6910_v41  ;;  %5578 = vmatpush3.bf16.msra.mxu0 %v6917_v44  ;;  %v7232_v44 = vld [vmem:[#allocation10 + $0x4] ss:$12 sps:$4 sm:$0xff]   ;;  %v1152_v58 = vunpack.c.h.bf16 %v7061_v27 }
 0x294   :  { %1246 = vmatprep.subr.bf16.mxu1 %v6914_v42  ;;  %5579 = vmatprep.subr.bf16.mxu0 %v8652_v5 }
 0x295   :  { %6329 = vtanh.f32 %v1136_v33 }
 0x297   :  { %1247 = vmatpush1.bf16.msra.mxu1 %v6919_v45  ;;  %5580 = vmatpush3.bf16.msra.mxu0 %v6927_v48  ;;  %v7243_v45 = vld [vmem:[#allocation10 + $0x18] ss:$12 sps:$4 sm:$0xff]  }
 0x298   :  { %1248 = vmatprep.subr.bf16.mxu1 %v6922_v46  ;;  %5581 = vmatprep.subr.bf16.mxu0 %v8652_v5  ;;  %v7246_v46 = vld [vmem:[#allocation10 + $0x20] ss:$12 sps:$4 sm:$0xff]  }
 0x29b   :  { %1249 = vmatpush1.bf16.msra.mxu1 %v6929_v49  ;;  %5582 = vmatpush3.bf16.msra.mxu0 %v6945_v54 }
 0x29c   :  { %1250 = vmatprep.subr.bf16.mxu1 %v6932_v50  ;;  %5583 = vmatprep.subr.bf16.mxu0 %v8652_v5 }
 0x29f   :  { %v6330_v37 = vpop.eup %6329  ;;  %1251 = vmatpush1.bf16.msra.mxu1 %v6937_v52  ;;  %5584 = vmatpush3.bf16.msra.mxu0 %v6952_v56 }
 0x2a0   :  { %1252 = vmatprep.subr.bf16.mxu1 %v6940_v53  ;;  %5585 = vmatprep.subr.bf16.mxu0 %v8652_v5  ;;  %v1139_v38 = vmul.f32 %v6330_v37, %v1138_v35  ;;  %v1153_v35 = vunpack.c.h.bf16 %v7065_v43 }
 0x2a2   :  { %v7226_v41 = vadd.f32 %v1140_v40, %v1139_v38 }
 0x2a3   :  { %1253 = vmatpush1.bf16.msra.mxu1 %v6948_v55  ;;  %5586 = vmatpush3.bf16.msra.mxu0 %v6961_v57 }
 0x2a4   :  { %v1237_v42 = vpack.c.bf16 %v7226_v41, %v7226_v41  ;;  %1375 = vmatprep.subr.bf16.mxu1 %v7232_v44  ;;  %5591 = vmatprep.subr.bf16.mxu0 %v8652_v5 }
 0x2a6   :  { %1271 = vmatmul.mubr.bf16.vlgmr.msra.gmra.mrb[36].mxu1 %v1237_v42  ;;  %5588 = vmatmul.mubr.bf16.vlgmr.msra.gmra.mrb[52].mxu0 %v1237_v42 }
 0x2a7   :  { %1376 = vmatpush1.bf16.msra.mxu1 %v7187_v60  ;;  %5592 = vmatpush3.bf16.msra.mxu0 %v7190_v39 }
 0x2a8   :  { %1377 = vmatprep.subr.bf16.mxu1 %v7193_v22  ;;  %5593 = vmatprep.subr.bf16.mxu0 %v8652_v5 }
 0x2a9   :  { %1407 = vmatprep.mubr.bf16.mxu1 %v8653_v62  ;;  %5607 = vmatprep.mubr.msk.bf16.mxu0 %vm6811_vm0, %v8652_v5 }
 0x2ab   :  { %1378 = vmatpush1.bf16.msra.mxu1 %v7243_v45  ;;  %5594 = vmatpush3.bf16.msra.mxu0 %v7246_v46 }
 0x2ac   :  { %1379 = vmatprep.subr.bf16.mxu1 %v7249_v4  ;;  %5595 = vmatprep.subr.bf16.mxu0 %v8652_v5 }
 0x2af   :  { %1380 = vmatpush1.bf16.msra.mxu1 %v7253_v28  ;;  %5596 = vmatpush3.bf16.msra.mxu0 %v7256_v8 }
 0x2b0   :  { %1381 = vmatprep.subr.bf16.mxu1 %v7259_v30  ;;  %5597 = vmatprep.subr.bf16.mxu0 %v8652_v5 }
 0x2b3   :  { %1382 = vmatpush1.bf16.msra.mxu1 %v7263_v10  ;;  %5598 = vmatpush3.bf16.msra.mxu0 %v7266_v24 }
 0x2b4   :  { %1383 = vmatprep.subr.bf16.mxu1 %v7269_v61  ;;  %5599 = vmatprep.subr.bf16.mxu0 %v8652_v5 }
 0x2b7   :  { %1384 = vmatpush1.bf16.msra.mxu1 %v7273_v13  ;;  %5600 = vmatpush3.bf16.msra.mxu0 %v6927_v48  ;;  %v1149_v48 = vunpack.c.l.bf16 %v7061_v27 }
 0x2b8   :  { %1385 = vmatprep.subr.bf16.mxu1 %v7277_v15  ;;  %5601 = vmatprep.subr.bf16.mxu0 %v8652_v5 }
 0x2bb   :  { %1386 = vmatpush1.bf16.msra.mxu1 %v6929_v49  ;;  %5602 = vmatpush3.bf16.msra.mxu0 %v6945_v54 }
 0x2bc   :  { %1387 = vmatprep.subr.bf16.mxu1 %v6932_v50  ;;  %5603 = vmatprep.subr.bf16.mxu0 %v8652_v5 }
 0x2bf   :  { %1388 = vmatpush1.bf16.msra.mxu1 %v6937_v52  ;;  %5604 = vmatpush3.bf16.msra.mxu0 %v6952_v56  ;;  %v1150_v52 = vunpack.c.l.bf16 %v7065_v43 }
 0x2c0   :  { %1389 = vmatprep.subr.bf16.mxu1 %v6940_v53  ;;  %5605 = vmatprep.subr.bf16.mxu0 %v8652_v5 }
 0x2c3   :  { %1390 = vmatpush1.bf16.msra.mxu1 %v6948_v55  ;;  %5606 = vmatpush3.bf16.msra.mxu0 %v6961_v57 }
 0x2c4   :  { %1457 = vmatprep.subr.bf16.mxu1 %v7232_v44  ;;  %5611 = vmatprep.subr.bf16.mxu0 %v8652_v5 }
 0x359   :  { %v1190_v49 = vpop.f32.mrb[32].mxu1  ;;  %v1231_v50 = vpop.f32.mrb[48].mxu0 }
 0x35a   :  { %v1319_v54 = vadd.f32 %v1190_v49, %v1149_v48  ;;  %v1192_v56 = vpop.f32.mrb[33].mxu1  ;;  %v5569_v31 = vpop.f32.mrb[49].mxu0 }
 0x35b   :  { %v1326_v53 = vadd.f32 %v1192_v56, %v1150_v52  ;;  %v1194_v21 = vpop.f32.mrb[34].mxu1  ;;  %v1234_v17 = vpop.f32.mrb[50].mxu0 }
 0x35c   :  { %v4943_v26 = vmul.f32 -1.442695, %v1319_v54  ;;  %v1195_v55 = vpop.f32.mrb[35].mxu1  ;;  %v5570_v14 = vpop.f32.mrb[51].mxu0 }
 0x35d   :  { %v4944_v57 = vmul.f32 -1.442695, %v1326_v53 }
 0x35e   :  { %6331 = vpow2.f32 %v4943_v26 }
 0x35f   :  { %6333 = vpow2.f32 %v4944_v57 }
 0x368   :  { %v6332_v12 = vpop.eup %6331 }
 0x369   :  { %v1323_v20 = vadd.f32 1.0, %v6332_v12  ;;  %v6334_v25 = vpop.eup %6333 }
 0x36a   :  { %v1330_v7 = vadd.f32 1.0, %v6334_v25  ;;  %v1154_v25 = vunpack.c.h.bf16 %v7059_v19 }
 0x36b   :  { %6335 = vrcp.f32 %v1323_v20 }
 0x36c   :  { %6337 = vrcp.f32 %v1330_v7 }
 0x375   :  { %v6336_v51 = vpop.eup %6335 }
 0x376   :  { %v1333_v29 = vmul.f32 %v6336_v51, %v1231_v50  ;;  %v6338_v50 = vpop.eup %6337 }
 0x377   :  { %v1336_v53 = vsub.f32 1.0, %v6338_v50  ;;  %v1338_v17 = vmul.f32 %v6338_v50, %v7183_v18 }
 0x378   :  { %v1334_v3 = vadd.f32 %v1333_v29, %v1151_v6  ;;  %v7324_v6 = vld [vmem:[#allocation10 + $0x68] ss:$12 sps:$4 sm:$0xff]   ;;  %v7329_v29 = vld [vmem:[#allocation10 + $0x78] ss:$12 sps:$4 sm:$0xff]  }
 0x379   :  { %v1272_v33 = vpop.f32.mrb[36].mxu1  ;;  %v1313_v34 = vpop.f32.mrb[52].mxu0 }
 0x37a   :  { %6339 = vtanh.f32 %v1334_v3  ;;  %v1340_v37 = vadd.f32 %v1272_v33, %v1152_v58  ;;  %v1274_v38 = vpop.f32.mrb[37].mxu1  ;;  %v5589_v40 = vpop.f32.mrb[53].mxu0  ;;  %v7332_v3 = vld [vmem:[#allocation10 + $0x80] ss:$12 sps:$4 sm:$0xff]  }
 0x37b   :  { %v1347_v42 = vadd.f32 %v1274_v38, %v1153_v35  ;;  %v1276_v48 = vpop.f32.mrb[38].mxu1  ;;  %v1316_v49 = vpop.f32.mrb[54].mxu0  ;;  %v7335_v58 = vld [vmem:[#allocation10 + $0x94] ss:$12 sps:$4 sm:$0xff]   ;;  %v7339_v35 = vld [vmem:[#allocation10 + $0x90] ss:$12 sps:$4 sm:$0xff]  }
 0x37c   :  { %v4945_v52 = vmul.f32 -1.442695, %v1340_v37  ;;  %v1277_v54 = vpop.f32.mrb[39].mxu1  ;;  %v5590_v56 = vpop.f32.mrb[55].mxu0  ;;  %v7342_v37 = vld [vmem:[#allocation10 + $0x98] ss:$12 sps:$4 sm:$0xff]  }
 0x37d   :  { %v4946_v31 = vmul.f32 -1.442695, %v1347_v42  ;;  %v7345_v38 = vld [vmem:[#allocation10 + $0xac] ss:$12 sps:$4 sm:$0xff]   ;;  %v7352_v49 = vld [vmem:[#allocation10 + $0xa8] ss:$12 sps:$4 sm:$0xff]   ;;  %v1368_v56 = vunpack.c.l.bf16 %v7069_v1 }
 0x37e   :  { %6341 = vpow2.f32 %v4945_v52  ;;  %v7355_v52 = vld [vmem:[#allocation10 + $0xb0] ss:$12 sps:$4 sm:$0xff]  }
 0x37f   :  { %6343 = vpow2.f32 %v4946_v31 }
 0x384   :  { %v6340_v21 = vpop.eup %6339 }
 0x385   :  { %v1337_v27 = vmul.f32 %v6340_v21, %v1336_v53  ;;  %v1369_v53 = vunpack.c.l.bf16 %v7073_v9 }
 0x387   :  { %v7299_v43 = vadd.f32 %v1338_v17, %v1337_v27 }
 0x388   :  { %v6342_v26 = vpop.eup %6341 }
 0x389   :  { %v1344_v55 = vadd.f32 1.0, %v6342_v26  ;;  %v1374_v14 = vpack.c.bf16 %v7299_v43, %v7299_v43  ;;  %v6344_v57 = vpop.eup %6343 }
 0x38a   :  { %v1351_v12 = vadd.f32 1.0, %v6344_v57 }
 0x38b   :  { %6345 = vrcp.f32 %v1344_v55  ;;  %1408 = vmatmul.mubr.bf16.vlgmr.msra.gmra.mrb[40].mxu1 %v1374_v14  ;;  %5608 = vmatmul.mubr.bf16.vlgmr.msra.gmra.mrb[56].mxu0 %v1374_v14 }
 0x38c   :  { %1458 = vmatpush1.bf16.msra.mxu1 %v7187_v60  ;;  %5612 = vmatpush3.bf16.msra.mxu0 %v7190_v39  ;;  %6347 = vrcp.f32 %v1351_v12 }
 0x38d   :  { %1459 = vmatprep.subr.bf16.mxu1 %v7193_v22  ;;  %5613 = vmatprep.subr.bf16.mxu0 %v8652_v5 }
 0x38e   :  { %1489 = vmatprep.mubr.bf16.mxu1 %v8653_v62  ;;  %5627 = vmatprep.mubr.msk.bf16.mxu0 %vm6811_vm0, %v8652_v5 }
 0x390   :  { %1460 = vmatpush1.bf16.msra.mxu1 %v7243_v45  ;;  %5614 = vmatpush3.bf16.msra.mxu0 %v7246_v46 }
 0x391   :  { %1461 = vmatprep.subr.bf16.mxu1 %v7249_v4  ;;  %5615 = vmatprep.subr.bf16.mxu0 %v8652_v5 }
 0x394   :  { %1462 = vmatpush1.bf16.msra.mxu1 %v7253_v28  ;;  %5616 = vmatpush3.bf16.msra.mxu0 %v7256_v8 }
 0x395   :  { %v6346_v20 = vpop.eup %6345  ;;  %1463 = vmatprep.subr.bf16.mxu1 %v7259_v30  ;;  %5617 = vmatprep.subr.bf16.mxu0 %v8652_v5 }
 0x396   :  { %v1354_v7 = vmul.f32 %v6346_v20, %v1313_v34  ;;  %v6348_v19 = vpop.eup %6347 }
 0x397   :  { %v1357_v33 = vsub.f32 1.0, %v6348_v19  ;;  %v1359_v42 = vmul.f32 %v6348_v19, %v7226_v41 }
 0x398   :  { %v1355_v51 = vadd.f32 %v1354_v7, %v1154_v25  ;;  %1464 = vmatpush1.bf16.msra.mxu1 %v7263_v10  ;;  %5618 = vmatpush3.bf16.msra.mxu0 %v7266_v24 }
 0x399   :  { %1465 = vmatprep.subr.bf16.mxu1 %v7269_v61  ;;  %5619 = vmatprep.subr.bf16.mxu0 %v8652_v5 }
 0x39a   :  { %6349 = vtanh.f32 %v1355_v51 }
 0x39c   :  { %1466 = vmatpush1.bf16.msra.mxu1 %v7273_v13  ;;  %5620 = vmatpush3.bf16.msra.mxu0 %v7324_v6 }
 0x39d   :  { %1467 = vmatprep.subr.bf16.mxu1 %v7277_v15  ;;  %5621 = vmatprep.subr.bf16.mxu0 %v8652_v5 }
 0x3a0   :  { %1468 = vmatpush1.bf16.msra.mxu1 %v7329_v29  ;;  %5622 = vmatpush3.bf16.msra.mxu0 %v7332_v3 }
 0x3a1   :  { %1469 = vmatprep.subr.bf16.mxu1 %v7335_v58  ;;  %5623 = vmatprep.subr.bf16.mxu0 %v8652_v5 }
 0x3a4   :  { %v6350_v34 = vpop.eup %6349  ;;  %1470 = vmatpush1.bf16.msra.mxu1 %v7339_v35  ;;  %5624 = vmatpush3.bf16.msra.mxu0 %v7342_v37 }
 0x3a5   :  { %1471 = vmatprep.subr.bf16.mxu1 %v7345_v38  ;;  %5625 = vmatprep.subr.bf16.mxu0 %v8652_v5  ;;  %v1358_v40 = vmul.f32 %v6350_v34, %v1357_v33 }
 0x3a7   :  { %v7350_v48 = vadd.f32 %v1359_v42, %v1358_v40  ;;  %v1370_v40 = vunpack.c.l.bf16 %v7055_v16 }
 0x3a8   :  { %1472 = vmatpush1.bf16.msra.mxu1 %v7352_v49  ;;  %5626 = vmatpush3.bf16.msra.mxu0 %v7355_v52 }
 0x3a9   :  { %v1456_v54 = vpack.c.bf16 %v7350_v48, %v7350_v48  ;;  %1594 = vmatprep.subr.bf16.mxu1 %v7232_v44  ;;  %5631 = vmatprep.subr.bf16.mxu0 %v8652_v5 }
 0x3ab   :  { %1490 = vmatmul.mubr.bf16.vlgmr.msra.gmra.mrb[44].mxu1 %v1456_v54  ;;  %5628 = vmatmul.mubr.bf16.vlgmr.msra.gmra.mrb[60].mxu0 %v1456_v54 }
 0x3ac   :  { %1595 = vmatpush1.bf16.msra.mxu1 %v7187_v60  ;;  %5632 = vmatpush3.bf16.msra.mxu0 %v7190_v39 }
 0x3ad   :  { %1596 = vmatprep.subr.bf16.mxu1 %v7193_v22  ;;  %5633 = vmatprep.subr.bf16.mxu0 %v8652_v5 }
 0x3ae   :  { %1626 = vmatprep.mubr.bf16.mxu1 %v8653_v62  ;;  %5647 = vmatprep.mubr.msk.bf16.mxu0 %vm6811_vm0, %v8652_v5 }
 0x3b0   :  { %1597 = vmatpush1.bf16.msra.mxu1 %v7243_v45  ;;  %5634 = vmatpush3.bf16.msra.mxu0 %v7246_v46 }
 0x3b1   :  { %1598 = vmatprep.subr.bf16.mxu1 %v7249_v4  ;;  %5635 = vmatprep.subr.bf16.mxu0 %v8652_v5 }
 0x3b4   :  { %1599 = vmatpush1.bf16.msra.mxu1 %v7253_v28  ;;  %5636 = vmatpush3.bf16.msra.mxu0 %v7256_v8 }
 0x3b5   :  { %1600 = vmatprep.subr.bf16.mxu1 %v7259_v30  ;;  %5637 = vmatprep.subr.bf16.mxu0 %v8652_v5 }
 0x3b8   :  { %1601 = vmatpush1.bf16.msra.mxu1 %v7263_v10  ;;  %5638 = vmatpush3.bf16.msra.mxu0 %v7266_v24 }
 0x3b9   :  { %1602 = vmatprep.subr.bf16.mxu1 %v7269_v61  ;;  %5639 = vmatprep.subr.bf16.mxu0 %v8652_v5 }
 0x3bc   :  { %1603 = vmatpush1.bf16.msra.mxu1 %v7273_v13  ;;  %5640 = vmatpush3.bf16.msra.mxu0 %v7324_v6 }
 0x3bd   :  { %1604 = vmatprep.subr.bf16.mxu1 %v7277_v15  ;;  %5641 = vmatprep.subr.bf16.mxu0 %v8652_v5 }
 0x3c0   :  { %1605 = vmatpush1.bf16.msra.mxu1 %v7329_v29  ;;  %5642 = vmatpush3.bf16.msra.mxu0 %v7332_v3 }
 0x3c1   :  { %1606 = vmatprep.subr.bf16.mxu1 %v7335_v58  ;;  %5643 = vmatprep.subr.bf16.mxu0 %v8652_v5 }
 0x3c4   :  { %1607 = vmatpush1.bf16.msra.mxu1 %v7339_v35  ;;  %5644 = vmatpush3.bf16.msra.mxu0 %v7342_v37 }
 0x3c5   :  { %1608 = vmatprep.subr.bf16.mxu1 %v7345_v38  ;;  %5645 = vmatprep.subr.bf16.mxu0 %v8652_v5 }
 0x3c8   :  { %1609 = vmatpush1.bf16.msra.mxu1 %v7352_v49  ;;  %5646 = vmatpush3.bf16.msra.mxu0 %v7355_v52 }
 0x3c9   :  { %1676 = vmatprep.subr.bf16.mxu1 %v7232_v44  ;;  %5651 = vmatprep.subr.bf16.mxu0 %v8652_v5 }
 0x45e   :  { %v1409_v50 = vpop.f32.mrb[40].mxu1  ;;  %v1450_v31 = vpop.f32.mrb[56].mxu0 }
 0x45f   :  { %v1538_v21 = vadd.f32 %v1409_v50, %v1368_v56  ;;  %v1411_v27 = vpop.f32.mrb[41].mxu1  ;;  %v5609_v17 = vpop.f32.mrb[57].mxu0  ;;  %v1371_v56 = vunpack.c.h.bf16 %v7069_v1 }
 0x460   :  { %v1545_v26 = vadd.f32 %v1411_v27, %v1369_v53  ;;  %v1413_v55 = vpop.f32.mrb[42].mxu1  ;;  %v1453_v14 = vpop.f32.mrb[58].mxu0 }
 0x461   :  { %v4947_v57 = vmul.f32 -1.442695, %v1538_v21  ;;  %v1414_v12 = vpop.f32.mrb[43].mxu1  ;;  %v5610_v20 = vpop.f32.mrb[59].mxu0  ;;  %v1372_v21 = vunpack.c.h.bf16 %v7073_v9 }
 0x462   :  { %v4948_v25 = vmul.f32 -1.442695, %v1545_v26 }
 0x463   :  { %6351 = vpow2.f32 %v4947_v57 }
 0x464   :  { %6353 = vpow2.f32 %v4948_v25 }
 0x46d   :  { %v6352_v7 = vpop.eup %6351 }
 0x46e   :  { %v1542_v51 = vadd.f32 1.0, %v6352_v7  ;;  %v6354_v19 = vpop.eup %6353 }
 0x46f   :  { %v1549_v33 = vadd.f32 1.0, %v6354_v19 }
 0x470   :  { %6355 = vrcp.f32 %v1542_v51 }
 0x471   :  { %6357 = vrcp.f32 %v1549_v33 }
 0x47a   :  { %v6356_v34 = vpop.eup %6355 }
 0x47b   :  { %v1552_v42 = vmul.f32 %v6356_v34, %v1450_v31  ;;  %v6358_v31 = vpop.eup %6357 }
 0x47c   :  { %v1555_v51 = vsub.f32 1.0, %v6358_v31  ;;  %v1557_v33 = vmul.f32 %v6358_v31, %v7299_v43 }
 0x47d   :  { %v1553_v54 = vadd.f32 %v1552_v42, %v1370_v40 }
 0x47e   :  { %v1491_v50 = vpop.f32.mrb[44].mxu1  ;;  %v1532_v53 = vpop.f32.mrb[60].mxu0 }
 0x47f   :  { %6359 = vtanh.f32 %v1553_v54  ;;  %v1559_v27 = vadd.f32 %v1491_v50, %v1371_v56  ;;  %v1493_v17 = vpop.f32.mrb[45].mxu1  ;;  %v5629_v26 = vpop.f32.mrb[61].mxu0 }
 0x480   :  { %v1566_v55 = vadd.f32 %v1493_v17, %v1372_v21  ;;  %v1495_v14 = vpop.f32.mrb[46].mxu1  ;;  %v1535_v57 = vpop.f32.mrb[62].mxu0  ;;  %v1373_v21 = vunpack.c.h.bf16 %v7055_v16 }
 0x481   :  { %v4949_v12 = vmul.f32 -1.442695, %v1559_v27  ;;  %v1496_v20 = vpop.f32.mrb[47].mxu1  ;;  %v5630_v25 = vpop.f32.mrb[63].mxu0 }
 0x482   :  { %v4950_v7 = vmul.f32 -1.442695, %v1566_v55  ;;  %v1587_v20 = vunpack.c.l.bf16 %v7079_v32 }
 0x483   :  { %6361 = vpow2.f32 %v4949_v12 }
 0x484   :  { %6363 = vpow2.f32 %v4950_v7  ;;  %v1588_v7 = vunpack.c.l.bf16 %v7081_v59 }
 0x489   :  { %v6360_v19 = vpop.eup %6359 }
 0x48a   :  { %v1556_v1 = vmul.f32 %v6360_v19, %v1555_v51 }
 0x48c   :  { %v7403_v9 = vadd.f32 %v1557_v33, %v1556_v1 }
 0x48d   :  { %v6362_v34 = vpop.eup %6361 }
 0x48e   :  { %v1563_v40 = vadd.f32 1.0, %v6362_v34  ;;  %v1593_v42 = vpack.c.bf16 %v7403_v9, %v7403_v9  ;;  %v6364_v54 = vpop.eup %6363 }
 0x48f   :  { %v1570_v56 = vadd.f32 1.0, %v6364_v54 }
 0x490   :  { %6365 = vrcp.f32 %v1563_v40  ;;  %1627 = vmatmul.mubr.bf16.vlgmr.msra.gmra.mrb[48].mxu1 %v1593_v42  ;;  %5648 = vmatmul.mubr.bf16.vlgmr.msra.gmra.mrb[64].mxu0 %v1593_v42 }
 0x491   :  { %1677 = vmatpush1.bf16.msra.mxu1 %v7187_v60  ;;  %5652 = vmatpush3.bf16.msra.mxu0 %v7190_v39  ;;  %6367 = vrcp.f32 %v1570_v56 }
 0x492   :  { %1678 = vmatprep.subr.bf16.mxu1 %v7193_v22  ;;  %5653 = vmatprep.subr.bf16.mxu0 %v8652_v5 }
 0x493   :  { %1708 = vmatprep.mubr.bf16.mxu1 %v8653_v62  ;;  %5667 = vmatprep.mubr.msk.bf16.mxu0 %vm6811_vm0, %v8652_v5 }
 0x495   :  { %1679 = vmatpush1.bf16.msra.mxu1 %v7243_v45  ;;  %5654 = vmatpush3.bf16.msra.mxu0 %v7246_v46 }
 0x496   :  { %1680 = vmatprep.subr.bf16.mxu1 %v7249_v4  ;;  %5655 = vmatprep.subr.bf16.mxu0 %v8652_v5 }
 0x499   :  { %1681 = vmatpush1.bf16.msra.mxu1 %v7253_v28  ;;  %5656 = vmatpush3.bf16.msra.mxu0 %v7256_v8 }
 0x49a   :  { %v6366_v50 = vpop.eup %6365  ;;  %1682 = vmatprep.subr.bf16.mxu1 %v7259_v30  ;;  %5657 = vmatprep.subr.bf16.mxu0 %v8652_v5 }
 0x49b   :  { %v1573_v27 = vmul.f32 %v6366_v50, %v1532_v53  ;;  %v6368_v16 = vpop.eup %6367 }
 0x49c   :  { %v1576_v53 = vsub.f32 1.0, %v6368_v16  ;;  %v1578_v14 = vmul.f32 %v6368_v16, %v7350_v48 }
 0x49d   :  { %v1574_v17 = vadd.f32 %v1573_v27, %v1373_v21  ;;  %1683 = vmatpush1.bf16.msra.mxu1 %v7263_v10  ;;  %5658 = vmatpush3.bf16.msra.mxu0 %v7266_v24 }
 0x49e   :  { %1684 = vmatprep.subr.bf16.mxu1 %v7269_v61  ;;  %5659 = vmatprep.subr.bf16.mxu0 %v8652_v5 }
 0x49f   :  { %6369 = vtanh.f32 %v1574_v17 }
 0x4a1   :  { %1685 = vmatpush1.bf16.msra.mxu1 %v7273_v13  ;;  %5660 = vmatpush3.bf16.msra.mxu0 %v7324_v6 }
 0x4a2   :  { %1686 = vmatprep.subr.bf16.mxu1 %v7277_v15  ;;  %5661 = vmatprep.subr.bf16.mxu0 %v8652_v5 }
 0x4a5   :  { %1687 = vmatpush1.bf16.msra.mxu1 %v7329_v29  ;;  %5662 = vmatpush3.bf16.msra.mxu0 %v7332_v3 }
 0x4a6   :  { %1688 = vmatprep.subr.bf16.mxu1 %v7335_v58  ;;  %5663 = vmatprep.subr.bf16.mxu0 %v8652_v5 }
 0x4a9   :  { %v6370_v26 = vpop.eup %6369  ;;  %1689 = vmatpush1.bf16.msra.mxu1 %v7339_v35  ;;  %5664 = vmatpush3.bf16.msra.mxu0 %v7342_v37 }
 0x4aa   :  { %1690 = vmatprep.subr.bf16.mxu1 %v7345_v38  ;;  %5665 = vmatprep.subr.bf16.mxu0 %v8652_v5  ;;  %v1577_v55 = vmul.f32 %v6370_v26, %v1576_v53  ;;  %v1589_v26 = vunpack.c.l.bf16 %v7067_v47 }
 0x4ac   :  { %v7440_v57 = vadd.f32 %v1578_v14, %v1577_v55 }
 0x4ad   :  { %1691 = vmatpush1.bf16.msra.mxu1 %v7352_v49  ;;  %5666 = vmatpush3.bf16.msra.mxu0 %v7355_v52 }
 0x4ae   :  { %v1675_v12 = vpack.c.bf16 %v7440_v57, %v7440_v57  ;;  %1813 = vmatprep.subr.bf16.mxu1 %v7232_v44  ;;  %5671 = vmatprep.subr.bf16.mxu0 %v8652_v5 }
 0x4b0   :  { %1709 = vmatmul.mubr.bf16.vlgmr.msra.gmra.mrb[52].mxu1 %v1675_v12  ;;  %5668 = vmatmul.mubr.bf16.vlgmr.msra.gmra.mrb[68].mxu0 %v1675_v12  ;;  %v1590_v12 = vunpack.c.h.bf16 %v7079_v32 }
 0x4b1   :  { %1814 = vmatpush1.bf16.msra.mxu1 %v7187_v60  ;;  %5672 = vmatpush3.bf16.msra.mxu0 %v7190_v39 }
 0x4b2   :  { %1815 = vmatprep.subr.bf16.mxu1 %v7193_v22  ;;  %5673 = vmatprep.subr.bf16.mxu0 %v8652_v5 }
 0x4b3   :  { %1845 = vmatprep.mubr.bf16.mxu1 %v8653_v62  ;;  %5687 = vmatprep.mubr.msk.bf16.mxu0 %vm6811_vm0, %v8652_v5 }
 0x4b5   :  { %1816 = vmatpush1.bf16.msra.mxu1 %v7243_v45  ;;  %5674 = vmatpush3.bf16.msra.mxu0 %v7246_v46 }
 0x4b6   :  { %1817 = vmatprep.subr.bf16.mxu1 %v7249_v4  ;;  %5675 = vmatprep.subr.bf16.mxu0 %v8652_v5 }
 0x4b9   :  { %1818 = vmatpush1.bf16.msra.mxu1 %v7253_v28  ;;  %5676 = vmatpush3.bf16.msra.mxu0 %v7256_v8 }
 0x4ba   :  { %1819 = vmatprep.subr.bf16.mxu1 %v7259_v30  ;;  %5677 = vmatprep.subr.bf16.mxu0 %v8652_v5 }
 0x4bd   :  { %1820 = vmatpush1.bf16.msra.mxu1 %v7263_v10  ;;  %5678 = vmatpush3.bf16.msra.mxu0 %v7266_v24 }
 0x4be   :  { %1821 = vmatprep.subr.bf16.mxu1 %v7269_v61  ;;  %5679 = vmatprep.subr.bf16.mxu0 %v8652_v5 }
 0x4c1   :  { %1822 = vmatpush1.bf16.msra.mxu1 %v7273_v13  ;;  %5680 = vmatpush3.bf16.msra.mxu0 %v7324_v6 }
 0x4c2   :  { %1823 = vmatprep.subr.bf16.mxu1 %v7277_v15  ;;  %5681 = vmatprep.subr.bf16.mxu0 %v8652_v5 }
 0x4c5   :  { %1824 = vmatpush1.bf16.msra.mxu1 %v7329_v29  ;;  %5682 = vmatpush3.bf16.msra.mxu0 %v7332_v3 }
 0x4c6   :  { %1825 = vmatprep.subr.bf16.mxu1 %v7335_v58  ;;  %5683 = vmatprep.subr.bf16.mxu0 %v8652_v5 }
 0x4c9   :  { %1826 = vmatpush1.bf16.msra.mxu1 %v7339_v35  ;;  %5684 = vmatpush3.bf16.msra.mxu0 %v7342_v37 }
 0x4ca   :  { %1827 = vmatprep.subr.bf16.mxu1 %v7345_v38  ;;  %5685 = vmatprep.subr.bf16.mxu0 %v8652_v5 }
 0x4cd   :  { %1828 = vmatpush1.bf16.msra.mxu1 %v7352_v49  ;;  %5686 = vmatpush3.bf16.msra.mxu0 %v7355_v52 }
 0x4ce   :  { %1895 = vmatprep.subr.bf16.mxu1 %v7232_v44  ;;  %5691 = vmatprep.subr.bf16.mxu0 %v8652_v5 }
 0x563   :  { %v1628_v25 = vpop.f32.mrb[48].mxu1  ;;  %v1669_v31 = vpop.f32.mrb[64].mxu0 }
 0x564   :  { %v1757_v51 = vadd.f32 %v1628_v25, %v1587_v20  ;;  %v1630_v19 = vpop.f32.mrb[49].mxu1  ;;  %v5649_v1 = vpop.f32.mrb[65].mxu0 }
 0x565   :  { %v1764_v33 = vadd.f32 %v1630_v19, %v1588_v7  ;;  %v1632_v34 = vpop.f32.mrb[50].mxu1  ;;  %v1672_v40 = vpop.f32.mrb[66].mxu0  ;;  %v1591_v7 = vunpack.c.h.bf16 %v7081_v59 }
 0x566   :  { %v4951_v42 = vmul.f32 -1.442695, %v1757_v51  ;;  %v1633_v54 = vpop.f32.mrb[51].mxu1  ;;  %v5650_v56 = vpop.f32.mrb[67].mxu0 }
 0x567   :  { %v4952_v50 = vmul.f32 -1.442695, %v1764_v33 }
 0x568   :  { %6371 = vpow2.f32 %v4951_v42 }
 0x569   :  { %6373 = vpow2.f32 %v4952_v50 }
 0x572   :  { %v6372_v21 = vpop.eup %6371 }
 0x573   :  { %v1761_v27 = vadd.f32 1.0, %v6372_v21  ;;  %v6374_v17 = vpop.eup %6373 }
 0x574   :  { %v1768_v16 = vadd.f32 1.0, %v6374_v17 }
 0x575   :  { %6375 = vrcp.f32 %v1761_v27 }
 0x576   :  { %6377 = vrcp.f32 %v1768_v16 }
 0x57f   :  { %v6376_v53 = vpop.eup %6375 }
 0x580   :  { %v1771_v55 = vmul.f32 %v6376_v53, %v1669_v31  ;;  %v6378_v31 = vpop.eup %6377 }
 0x581   :  { %v1774_v21 = vsub.f32 1.0, %v6378_v31  ;;  %v1776_v17 = vmul.f32 %v6378_v31, %v7403_v9 }
 0x582   :  { %v1772_v14 = vadd.f32 %v1771_v55, %v1589_v26 }
 0x583   :  { %v1710_v20 = vpop.f32.mrb[52].mxu1  ;;  %v1751_v25 = vpop.f32.mrb[68].mxu0 }
 0x584   :  { %6379 = vtanh.f32 %v1772_v14  ;;  %v1778_v51 = vadd.f32 %v1710_v20, %v1590_v12  ;;  %v1712_v19 = vpop.f32.mrb[53].mxu1  ;;  %v5669_v1 = vpop.f32.mrb[69].mxu0  ;;  %v1592_v20 = vunpack.c.h.bf16 %v7067_v47 }
 0x585   :  { %v1785_v33 = vadd.f32 %v1712_v19, %v1591_v7  ;;  %v1714_v34 = vpop.f32.mrb[54].mxu1  ;;  %v1754_v40 = vpop.f32.mrb[70].mxu0 }
 0x586   :  { %v4953_v42 = vmul.f32 -1.442695, %v1778_v51  ;;  %v1715_v54 = vpop.f32.mrb[55].mxu1  ;;  %v5670_v56 = vpop.f32.mrb[71].mxu0 }
 0x587   :  { %v4954_v50 = vmul.f32 -1.442695, %v1785_v33 }
 0x588   :  { %6381 = vpow2.f32 %v4953_v42 }
 0x589   :  { %6383 = vpow2.f32 %v4954_v50 }
 0x58e   :  { %v6380_v27 = vpop.eup %6379 }
 0x58f   :  { %v1775_v32 = vmul.f32 %v6380_v27, %v1774_v21 }
 0x591   :  { %v7489_v59 = vadd.f32 %v1776_v17, %v1775_v32 }
 0x592   :  { %v6382_v16 = vpop.eup %6381 }
 0x593   :  { %v1782_v53 = vadd.f32 1.0, %v6382_v16  ;;  %v1812_v26 = vpack.c.bf16 %v7489_v59, %v7489_v59  ;;  %v6384_v55 = vpop.eup %6383  ;;  %v1808_v16 = vunpack.c.l.bf16 %v7063_v36 }
 0x594   :  { %v1789_v14 = vadd.f32 1.0, %v6384_v55  ;;  %v1809_v55 = vunpack.c.h.bf16 %v7083_v63 }
 0x595   :  { %6385 = vrcp.f32 %v1782_v53  ;;  %1846 = vmatmul.mubr.bf16.vlgmr.msra.gmra.mrb[56].mxu1 %v1812_v26  ;;  %5688 = vmatmul.mubr.bf16.vlgmr.msra.gmra.mrb[72].mxu0 %v1812_v26 }
 0x596   :  { %1896 = vmatpush1.bf16.msra.mxu1 %v7187_v60  ;;  %5692 = vmatpush3.bf16.msra.mxu0 %v7190_v39  ;;  %6387 = vrcp.f32 %v1789_v14 }
 0x597   :  { %1897 = vmatprep.subr.bf16.mxu1 %v7193_v22  ;;  %5693 = vmatprep.subr.bf16.mxu0 %v8652_v5 }
 0x598   :  { %1927 = vmatprep.mubr.bf16.mxu1 %v8653_v62  ;;  %5707 = vmatprep.mubr.msk.bf16.mxu0 %vm6811_vm0, %v8652_v5 }
 0x59a   :  { %1898 = vmatpush1.bf16.msra.mxu1 %v7243_v45  ;;  %5694 = vmatpush3.bf16.msra.mxu0 %v7246_v46 }
 0x59b   :  { %1899 = vmatprep.subr.bf16.mxu1 %v7249_v4  ;;  %5695 = vmatprep.subr.bf16.mxu0 %v8652_v5 }
 0x59e   :  { %1900 = vmatpush1.bf16.msra.mxu1 %v7253_v28  ;;  %5696 = vmatpush3.bf16.msra.mxu0 %v7256_v8 }
 0x59f   :  { %v6386_v12 = vpop.eup %6385  ;;  %1901 = vmatprep.subr.bf16.mxu1 %v7259_v30  ;;  %5697 = vmatprep.subr.bf16.mxu0 %v8652_v5 }
 0x5a0   :  { %v1792_v7 = vmul.f32 %v6386_v12, %v1751_v25  ;;  %v6388_v47 = vpop.eup %6387 }
 0x5a1   :  { %v1795_v25 = vsub.f32 1.0, %v6388_v47  ;;  %v1797_v33 = vmul.f32 %v6388_v47, %v7440_v57 }
 0x5a2   :  { %v1793_v51 = vadd.f32 %v1792_v7, %v1592_v20  ;;  %1902 = vmatpush1.bf16.msra.mxu1 %v7263_v10  ;;  %5698 = vmatpush3.bf16.msra.mxu0 %v7266_v24  ;;  %v1810_v20 = vunpack.c.h.bf16 %v7085_v11 }
 0x5a3   :  { %1903 = vmatprep.subr.bf16.mxu1 %v7269_v61  ;;  %5699 = vmatprep.subr.bf16.mxu0 %v8652_v5 }
 0x5a4   :  { %6389 = vtanh.f32 %v1793_v51 }
 0x5a6   :  { %1904 = vmatpush1.bf16.msra.mxu1 %v7273_v13  ;;  %5700 = vmatpush3.bf16.msra.mxu0 %v7324_v6 }
 0x5a7   :  { %1905 = vmatprep.subr.bf16.mxu1 %v7277_v15  ;;  %5701 = vmatprep.subr.bf16.mxu0 %v8652_v5 }
 0x5aa   :  { %1906 = vmatpush1.bf16.msra.mxu1 %v7329_v29  ;;  %5702 = vmatpush3.bf16.msra.mxu0 %v7332_v3 }
 0x5ab   :  { %1907 = vmatprep.subr.bf16.mxu1 %v7335_v58  ;;  %5703 = vmatprep.subr.bf16.mxu0 %v8652_v5 }
 0x5ae   :  { %v6390_v19 = vpop.eup %6389  ;;  %1908 = vmatpush1.bf16.msra.mxu1 %v7339_v35  ;;  %5704 = vmatpush3.bf16.msra.mxu0 %v7342_v37 }
 0x5af   :  { %1909 = vmatprep.subr.bf16.mxu1 %v7345_v38  ;;  %5705 = vmatprep.subr.bf16.mxu0 %v8652_v5  ;;  %v1796_v1 = vmul.f32 %v6390_v19, %v1795_v25 }
 0x5b1   :  { %v7526_v34 = vadd.f32 %v1797_v33, %v1796_v1 }
 0x5b2   :  { %1910 = vmatpush1.bf16.msra.mxu1 %v7352_v49  ;;  %5706 = vmatpush3.bf16.msra.mxu0 %v7355_v52 }
 0x5b3   :  { %v1894_v40 = vpack.c.bf16 %v7526_v34, %v7526_v34  ;;  %2032 = vmatprep.subr.bf16.mxu1 %v7232_v44  ;;  %5711 = vmatprep.subr.bf16.mxu0 %v8652_v5 }
 0x5b5   :  { %1928 = vmatmul.mubr.bf16.vlgmr.msra.gmra.mrb[60].mxu1 %v1894_v40  ;;  %5708 = vmatmul.mubr.bf16.vlgmr.msra.gmra.mrb[76].mxu0 %v1894_v40 }
 0x5b6   :  { %2033 = vmatpush1.bf16.msra.mxu1 %v7187_v60  ;;  %5712 = vmatpush3.bf16.msra.mxu0 %v7190_v39  ;;  %v1806_v60 = vunpack.c.l.bf16 %v7083_v63 }
 0x5b7   :  { %2034 = vmatprep.subr.bf16.mxu1 %v7193_v22  ;;  %5713 = vmatprep.subr.bf16.mxu0 %v8652_v5 }
 0x5b8   :  { %2064 = vmatprep.mubr.bf16.mxu1 %v8653_v62  ;;  %5727 = vmatprep.mubr.msk.bf16.mxu0 %vm6811_vm0, %v8652_v5 }
 0x5ba   :  { %2035 = vmatpush1.bf16.msra.mxu1 %v7243_v45  ;;  %5714 = vmatpush3.bf16.msra.mxu0 %v7246_v46 }
 0x5bb   :  { %2036 = vmatprep.subr.bf16.mxu1 %v7249_v4  ;;  %5715 = vmatprep.subr.bf16.mxu0 %v8652_v5 }
 0x5be   :  { %2037 = vmatpush1.bf16.msra.mxu1 %v7253_v28  ;;  %5716 = vmatpush3.bf16.msra.mxu0 %v7256_v8 }
 0x5bf   :  { %2038 = vmatprep.subr.bf16.mxu1 %v7259_v30  ;;  %5717 = vmatprep.subr.bf16.mxu0 %v8652_v5  ;;  %v1807_v30 = vunpack.c.l.bf16 %v7085_v11 }
 0x5c2   :  { %2039 = vmatpush1.bf16.msra.mxu1 %v7263_v10  ;;  %5718 = vmatpush3.bf16.msra.mxu0 %v7266_v24 }
 0x5c3   :  { %2040 = vmatprep.subr.bf16.mxu1 %v7269_v61  ;;  %5719 = vmatprep.subr.bf16.mxu0 %v8652_v5 }
 0x5c6   :  { %2041 = vmatpush1.bf16.msra.mxu1 %v7273_v13  ;;  %5720 = vmatpush3.bf16.msra.mxu0 %v7324_v6 }
 0x5c7   :  { %2042 = vmatprep.subr.bf16.mxu1 %v7277_v15  ;;  %5721 = vmatprep.subr.bf16.mxu0 %v8652_v5 }
 0x5ca   :  { %2043 = vmatpush1.bf16.msra.mxu1 %v7329_v29  ;;  %5722 = vmatpush3.bf16.msra.mxu0 %v7332_v3 }
 0x5cb   :  { %2044 = vmatprep.subr.bf16.mxu1 %v7335_v58  ;;  %5723 = vmatprep.subr.bf16.mxu0 %v8652_v5 }
 0x5ce   :  { %2045 = vmatpush1.bf16.msra.mxu1 %v7339_v35  ;;  %5724 = vmatpush3.bf16.msra.mxu0 %v7342_v37 }
 0x5cf   :  { %2046 = vmatprep.subr.bf16.mxu1 %v7345_v38  ;;  %5725 = vmatprep.subr.bf16.mxu0 %v8652_v5 }
 0x5d2   :  { %2047 = vmatpush1.bf16.msra.mxu1 %v7352_v49  ;;  %5726 = vmatpush3.bf16.msra.mxu0 %v7355_v52 }
 0x5d3   :  { %2114 = vmatprep.subr.bf16.mxu1 %v7232_v44  ;;  %5731 = vmatprep.subr.bf16.mxu0 %v8652_v5 }
 0x668   :  { %v1847_v39 = vpop.f32.mrb[56].mxu1  ;;  %v1888_v22 = vpop.f32.mrb[72].mxu0 }
 0x669   :  { %v1976_v10 = vadd.f32 %v1847_v39, %v1806_v60  ;;  %v1849_v24 = vpop.f32.mrb[57].mxu1  ;;  %v5689_v61 = vpop.f32.mrb[73].mxu0 }
 0x66a   :  { %v1983_v13 = vadd.f32 %v1849_v24, %v1807_v30  ;;  %v1851_v15 = vpop.f32.mrb[58].mxu1  ;;  %v1891_v42 = vpop.f32.mrb[74].mxu0 }
 0x66b   :  { %v4955_v54 = vmul.f32 -1.442695, %v1976_v10  ;;  %v1852_v56 = vpop.f32.mrb[59].mxu1  ;;  %v5690_v31 = vpop.f32.mrb[75].mxu0  ;;  %v7579_v42 = vld [vmem:[#allocation10] ss:$12 sps:$4 sm:$0xff]  }
 0x66c   :  { %v4956_v50 = vmul.f32 -1.442695, %v1983_v13  ;;  %v7585_v56 = vld [vmem:[#allocation10 + $0x1c] ss:$12 sps:$4 sm:$0xff]  }
 0x66d   :  { %6391 = vpow2.f32 %v4955_v54  ;;  %v7582_v54 = vld [vmem:[#allocation10 + $0x8] ss:$12 sps:$4 sm:$0xff]  }
 0x66e   :  { %6393 = vpow2.f32 %v4956_v50 }
 0x677   :  { %v6392_v44 = vpop.eup %6391 }
 0x678   :  { %v1980_v21 = vadd.f32 1.0, %v6392_v44  ;;  %v6394_v27 = vpop.eup %6393 }
 0x679   :  { %v1987_v32 = vadd.f32 1.0, %v6394_v27 }
 0x67a   :  { %6395 = vrcp.f32 %v1980_v21  ;;  %v7598_v21 = vld [vmem:[#allocation10 + $0x4c] ss:$12 sps:$4 sm:$0xff]  }
 0x67b   :  { %6397 = vrcp.f32 %v1987_v32  ;;  %v7606_v32 = vld [vmem:[#allocation10 + $0x50] ss:$12 sps:$4 sm:$0xff]  }
 0x684   :  { %v6396_v17 = vpop.eup %6395 }
 0x685   :  { %v1990_v53 = vmul.f32 %v6396_v17, %v1888_v22  ;;  %v6398_v39 = vpop.eup %6397 }
 0x686   :  { %v1993_v30 = vsub.f32 1.0, %v6398_v39  ;;  %v1995_v24 = vmul.f32 %v6398_v39, %v7489_v59 }
 0x687   :  { %v1991_v26 = vadd.f32 %v1990_v53, %v1808_v16 }
 0x688   :  { %v1929_v14 = vpop.f32.mrb[60].mxu1  ;;  %v1970_v12 = vpop.f32.mrb[76].mxu0 }
 0x689   :  { %6399 = vtanh.f32 %v1991_v26  ;;  %v1997_v7 = vadd.f32 %v1929_v14, %v1809_v55  ;;  %v1931_v51 = vpop.f32.mrb[61].mxu1  ;;  %v5709_v47 = vpop.f32.mrb[77].mxu0 }
 0x68a   :  { %v2004_v25 = vadd.f32 %v1931_v51, %v1810_v20  ;;  %v1933_v19 = vpop.f32.mrb[62].mxu1  ;;  %v1973_v1 = vpop.f32.mrb[78].mxu0  ;;  %v6644_v20 = vld [vmem:[#allocation10 + $0x4] ss:$12 sps:$4 sm:$0xff]   ;;  %v7647_v51 = vld [vmem:[#allocation10 + $0x20] ss:$12 sps:$4 sm:$0xff]  }
 0x68b   :  { %v4957_v33 = vmul.f32 -1.442695, %v1997_v7  ;;  %v1934_v40 = vpop.f32.mrb[63].mxu1  ;;  %v5710_v60 = vpop.f32.mrb[79].mxu0  ;;  %v7644_v7 = vld [vmem:[#allocation10 + $0x18] ss:$12 sps:$4 sm:$0xff]  }
 0x68c   :  { %v4958_v22 = vmul.f32 -1.442695, %v2004_v25  ;;  %v7650_v47 = vld [vmem:[#allocation10 + $0x34] ss:$12 sps:$4 sm:$0xff]   ;;  %v7654_v25 = vld [vmem:[#allocation10 + $0x30] ss:$12 sps:$4 sm:$0xff]  }
 0x68d   :  { %6401 = vpow2.f32 %v4957_v33  ;;  %v7657_v19 = vld [vmem:[#allocation10 + $0x38] ss:$12 sps:$4 sm:$0xff]  }
 0x68e   :  { %6403 = vpow2.f32 %v4958_v22 }
 0x693   :  { %v6400_v10 = vpop.eup %6399 }
 0x694   :  { %v1994_v63 = vmul.f32 %v6400_v10, %v1993_v30 }
 0x696   :  { %v7575_v11 = vadd.f32 %v1995_v24, %v1994_v63 }
 0x697   :  { %v6402_v61 = vpop.eup %6401 }
 0x698   :  { %v2001_v13 = vadd.f32 1.0, %v6402_v61  ;;  %v2031_v15 = vpack.c.bf16 %v7575_v11, %v7575_v11  ;;  %v6404_v31 = vpop.eup %6403 }
 0x699   :  { %v2008_v50 = vadd.f32 1.0, %v6404_v31 }
 0x69a   :  { %6405 = vrcp.f32 %v2001_v13  ;;  %2065 = vmatmul.mubr.bf16.vlgmr.msra.gmra.mrb[64].mxu1 %v2031_v15  ;;  %5728 = vmatmul.mubr.bf16.vlgmr.msra.gmra.mrb[80].mxu0 %v2031_v15  ;;  %v8655_v13 = vld [vmem:[#allocation16_spill] sm:$0xff] }
 0x69b   :  { %2115 = vmatpush1.bf16.msra.mxu1 %v7579_v42  ;;  %5732 = vmatpush3.bf16.msra.mxu0 %v7582_v54  ;;  %6407 = vrcp.f32 %v2008_v50  ;;  %v2027_v15 = vunpack.c.l.bf16 %v8655_v13 }
 0x69c   :  { %2116 = vmatprep.subr.bf16.mxu1 %v7585_v56  ;;  %5733 = vmatprep.subr.bf16.mxu0 %v8652_v5 }
 0x69d   :  { %2146 = vmatprep.mubr.bf16.mxu1 %v8653_v62  ;;  %5747 = vmatprep.mubr.msk.bf16.mxu0 %vm6811_vm0, %v8652_v5 }
 0x69f   :  { %2117 = vmatpush1.bf16.msra.mxu1 %v7243_v45  ;;  %5734 = vmatpush3.bf16.msra.mxu0 %v7246_v46  ;;  %v1811_v45 = vunpack.c.h.bf16 %v7063_v36  ;;  %v7617_v36 = vld [vmem:[#allocation10 + $0x7c] ss:$12 sps:$4 sm:$0xff]  }
 0x6a0   :  { %2118 = vmatprep.subr.bf16.mxu1 %v7249_v4  ;;  %5735 = vmatprep.subr.bf16.mxu0 %v8652_v5  ;;  %v7603_v4 = vld [vmem:[#allocation10 + $0x48] ss:$12 sps:$4 sm:$0xff]  }
 0x6a3   :  { %2119 = vmatpush1.bf16.msra.mxu1 %v7253_v28  ;;  %5736 = vmatpush3.bf16.msra.mxu0 %v7256_v8  ;;  %v7609_v28 = vld [vmem:[#allocation10 + $0x64] ss:$12 sps:$4 sm:$0xff]   ;;  %v7613_v8 = vld [vmem:[#allocation10 + $0x60] ss:$12 sps:$4 sm:$0xff]  }
 0x6a4   :  { %v6406_v44 = vpop.eup %6405  ;;  %2120 = vmatprep.subr.bf16.mxu1 %v7598_v21  ;;  %5737 = vmatprep.subr.bf16.mxu0 %v8652_v5 }
 0x6a5   :  { %v2011_v27 = vmul.f32 %v6406_v44, %v1970_v12  ;;  %v6408_v17 = vpop.eup %6407  ;;  %v2028_v44 = vunpack.c.h.bf16 %v7087_v23 }
 0x6a6   :  { %v2014_v16 = vsub.f32 1.0, %v6408_v17  ;;  %v2016_v55 = vmul.f32 %v6408_v17, %v7526_v34 }
 0x6a7   :  { %v2012_v46 = vadd.f32 %v2011_v27, %v1811_v45  ;;  %2121 = vmatpush1.bf16.msra.mxu1 %v7603_v4  ;;  %5738 = vmatpush3.bf16.msra.mxu0 %v7606_v32 }
 0x6a8   :  { %2122 = vmatprep.subr.bf16.mxu1 %v7609_v28  ;;  %5739 = vmatprep.subr.bf16.mxu0 %v8652_v5 }
 0x6a9   :  { %6409 = vtanh.f32 %v2012_v46 }
 0x6ab   :  { %2123 = vmatpush1.bf16.msra.mxu1 %v7613_v8  ;;  %5740 = vmatpush3.bf16.msra.mxu0 %v7324_v6 }
 0x6ac   :  { %2124 = vmatprep.subr.bf16.mxu1 %v7617_v36  ;;  %5741 = vmatprep.subr.bf16.mxu0 %v8652_v5 }
 0x6af   :  { %2125 = vmatpush1.bf16.msra.mxu1 %v7329_v29  ;;  %5742 = vmatpush3.bf16.msra.mxu0 %v7332_v3 }
 0x6b0   :  { %2126 = vmatprep.subr.bf16.mxu1 %v7335_v58  ;;  %5743 = vmatprep.subr.bf16.mxu0 %v8652_v5 }
 0x6b3   :  { %v6410_v53 = vpop.eup %6409  ;;  %2127 = vmatpush1.bf16.msra.mxu1 %v7339_v35  ;;  %5744 = vmatpush3.bf16.msra.mxu0 %v7342_v37 }
 0x6b4   :  { %2128 = vmatprep.subr.bf16.mxu1 %v7345_v38  ;;  %5745 = vmatprep.subr.bf16.mxu0 %v8652_v5  ;;  %v2015_v26 = vmul.f32 %v6410_v53, %v2014_v16 }
 0x6b6   :  { %v7630_v14 = vadd.f32 %v2016_v55, %v2015_v26 }
 0x6b7   :  { %2129 = vmatpush1.bf16.msra.mxu1 %v7352_v49  ;;  %5746 = vmatpush3.bf16.msra.mxu0 %v7355_v52 }
 0x6b8   :  { %v2113_v12 = vpack.c.bf16 %v7630_v14, %v7630_v14  ;;  %2251 = vmatprep.subr.bf16.mxu1 %v6644_v20  ;;  %5751 = vmatprep.subr.bf16.mxu0 %v8652_v5 }
 0x6ba   :  { %2147 = vmatmul.mubr.bf16.vlgmr.msra.gmra.mrb[68].mxu1 %v2113_v12  ;;  %5748 = vmatmul.mubr.bf16.vlgmr.msra.gmra.mrb[84].mxu0 %v2113_v12 }
 0x6bb   :  { %2252 = vmatpush1.bf16.msra.mxu1 %v7579_v42  ;;  %5752 = vmatpush3.bf16.msra.mxu0 %v7582_v54 }
 0x6bc   :  { %2253 = vmatprep.subr.bf16.mxu1 %v7585_v56  ;;  %5753 = vmatprep.subr.bf16.mxu0 %v8652_v5 }
 0x6bd   :  { %2283 = vmatprep.mubr.bf16.mxu1 %v8653_v62  ;;  %5767 = vmatprep.mubr.msk.bf16.mxu0 %vm6811_vm0, %v8652_v5 }
 0x6bf   :  { %2254 = vmatpush1.bf16.msra.mxu1 %v7644_v7  ;;  %5754 = vmatpush3.bf16.msra.mxu0 %v7647_v51 }
 0x6c0   :  { %2255 = vmatprep.subr.bf16.mxu1 %v7650_v47  ;;  %5755 = vmatprep.subr.bf16.mxu0 %v8652_v5 }
 0x6c3   :  { %2256 = vmatpush1.bf16.msra.mxu1 %v7654_v25  ;;  %5756 = vmatpush3.bf16.msra.mxu0 %v7657_v19 }
 0x6c4   :  { %2257 = vmatprep.subr.bf16.mxu1 %v7598_v21  ;;  %5757 = vmatprep.subr.bf16.mxu0 %v8652_v5 }
 0x6c7   :  { %2258 = vmatpush1.bf16.msra.mxu1 %v7603_v4  ;;  %5758 = vmatpush3.bf16.msra.mxu0 %v7606_v32 }
 0x6c8   :  { %2259 = vmatprep.subr.bf16.mxu1 %v7609_v28  ;;  %5759 = vmatprep.subr.bf16.mxu0 %v8652_v5 }
 0x6cb   :  { %2260 = vmatpush1.bf16.msra.mxu1 %v7613_v8  ;;  %5760 = vmatpush3.bf16.msra.mxu0 %v7324_v6  ;;  %v2025_v6 = vunpack.c.l.bf16 %v7087_v23 }
 0x6cc   :  { %2261 = vmatprep.subr.bf16.mxu1 %v7617_v36  ;;  %5761 = vmatprep.subr.bf16.mxu0 %v8652_v5 }
 0x6cf   :  { %2262 = vmatpush1.bf16.msra.mxu1 %v7329_v29  ;;  %5762 = vmatpush3.bf16.msra.mxu0 %v7332_v3 }
 0x6d0   :  { %2263 = vmatprep.subr.bf16.mxu1 %v7335_v58  ;;  %5763 = vmatprep.subr.bf16.mxu0 %v8652_v5  ;;  %v8654_v58 = vld [vmem:[#allocation17_spill] sm:$0xff] }
 0x6d1   :  { %v2026_v1 = vunpack.c.l.bf16 %v8654_v58  ;;  %v2029_v46 = vunpack.c.h.bf16 %v8654_v58 }
 0x6d3   :  { %2264 = vmatpush1.bf16.msra.mxu1 %v7339_v35  ;;  %5764 = vmatpush3.bf16.msra.mxu0 %v7342_v37 }
 0x6d4   :  { %2265 = vmatprep.subr.bf16.mxu1 %v7345_v38  ;;  %5765 = vmatprep.subr.bf16.mxu0 %v8652_v5 }
 0x6d7   :  { %2266 = vmatpush1.bf16.msra.mxu1 %v7352_v49  ;;  %5766 = vmatpush3.bf16.msra.mxu0 %v7355_v52 }
 0x6d8   :  { %2333 = vmatprep.subr.bf16.mxu1 %v6644_v20  ;;  %5771 = vmatprep.subr.bf16.mxu0 %v8652_v5 }
 0x76d   :  { %v2066_v29 = vpop.f32.mrb[64].mxu1  ;;  %v2107_v3 = vpop.f32.mrb[80].mxu0 }
 0x76e   :  { %v2195_v35 = vadd.f32 %v2066_v29, %v2025_v6  ;;  %v2068_v33 = vpop.f32.mrb[65].mxu1  ;;  %v5729_v37 = vpop.f32.mrb[81].mxu0 }
 0x76f   :  { %v2202_v40 = vadd.f32 %v2068_v33, %v2026_v1  ;;  %v2070_v38 = vpop.f32.mrb[66].mxu1  ;;  %v2110_v60 = vpop.f32.mrb[82].mxu0 }
 0x770   :  { %v4959_v39 = vmul.f32 -1.442695, %v2195_v35  ;;  %v2071_v22 = vpop.f32.mrb[67].mxu1  ;;  %v5730_v49 = vpop.f32.mrb[83].mxu0 }
 0x771   :  { %v4960_v52 = vmul.f32 -1.442695, %v2202_v40  ;;  %v6656_v49 = vld [vmem:[#allocation10 + $0xac] ss:$12 sps:$4 sm:$0xff]  }
 0x772   :  { %6411 = vpow2.f32 %v4959_v39 }
 0x773   :  { %6413 = vpow2.f32 %v4960_v52 }
 0x77c   :  { %v6412_v30 = vpop.eup %6411 }
 0x77d   :  { %v2199_v10 = vadd.f32 1.0, %v6412_v30  ;;  %v6414_v63 = vpop.eup %6413  ;;  %v6229_v30 = vld [vmem:[#allocation8 + $0xc4] ss:$12 sps:$4 sm:$0xff]  }
 0x77e   :  { %v2206_v24 = vadd.f32 1.0, %v6414_v63 }
 0x77f   :  { %6415 = vrcp.f32 %v2199_v10  ;;  %v6230_v10 = vld [vmem:[#allocation8 + $0xc8] ss:$12 sps:$4 sm:$0xff]  }
 0x780   :  { %6417 = vrcp.f32 %v2206_v24  ;;  %v6657_v24 = vld [vmem:[#allocation10 + $0xa8] ss:$12 sps:$4 sm:$0xff]  }
 0x789   :  { %v6416_v61 = vpop.eup %6415 }
 0x78a   :  { %v2209_v31 = vmul.f32 %v6416_v61, %v2107_v3  ;;  %v6418_v3 = vpop.eup %6417  ;;  %v6658_v61 = vld [vmem:[#allocation10 + $0xb0] ss:$12 sps:$4 sm:$0xff]  }
 0x78b   :  { %v2212_v35 = vsub.f32 1.0, %v6418_v3  ;;  %v2214_v37 = vmul.f32 %v6418_v3, %v7575_v11  ;;  %v6254_v3 = vld [vmem:[#allocation8 + $0x158] ss:$12 sps:$4 sm:$0xff]  }
 0x78c   :  { %v2210_v50 = vadd.f32 %v2209_v31, %v2027_v15  ;;  %v6233_v31 = vld [vmem:[#allocation8 + $0xdc] ss:$12 sps:$4 sm:$0xff]  }
 0x78d   :  { %v2148_v45 = vpop.f32.mrb[68].mxu1  ;;  %v2189_v27 = vpop.f32.mrb[84].mxu0 }
 0x78e   :  { %6419 = vtanh.f32 %v2210_v50  ;;  %v2216_v17 = vadd.f32 %v2148_v45, %v2028_v44  ;;  %v2150_v16 = vpop.f32.mrb[69].mxu1  ;;  %v5749_v53 = vpop.f32.mrb[85].mxu0  ;;  %v6234_v50 = vld [vmem:[#allocation8 + $0xe0] ss:$12 sps:$4 sm:$0xff]   ;;  %v924_v44 = vpack.c.bf16 %v7134_v2, %v7098_v0  ;;  %v6231_v45 = vld [vmem:[#allocation8 + $0xd8] ss:$12 sps:$4 sm:$0xff]  }
 0x78f   :  { %v2223_v26 = vadd.f32 %v2150_v16, %v2029_v46  ;;  %v2152_v55 = vpop.f32.mrb[70].mxu1  ;;  %v2192_v12 = vpop.f32.mrb[86].mxu0  ;;  %v6238_v46 = vld [vmem:[#allocation8 + $0xf8] ss:$12 sps:$4 sm:$0xff]   ;;  %v6242_v53 = vld [vmem:[#allocation8 + $0x110] ss:$12 sps:$4 sm:$0xff]  }
 0x790   :  { %v4961_v20 = vmul.f32 -1.442695, %v2216_v17  ;;  %v2153_v6 = vpop.f32.mrb[71].mxu1  ;;  %v5750_v29 = vpop.f32.mrb[87].mxu0  ;;  %v6235_v17 = vld [vmem:[#allocation8 + $0xf0] ss:$12 sps:$4 sm:$0xff]  }
 0x791   :  { %v4962_v1 = vmul.f32 -1.442695, %v2223_v26  ;;  %v6241_v16 = vld [vmem:[#allocation8 + $0x10c] ss:$12 sps:$4 sm:$0xff]   ;;  %v6239_v0 = vld [vmem:[#allocation8 + $0x108] ss:$12 sps:$4 sm:$0xff]  }
 0x792   :  { %6421 = vpow2.f32 %v4961_v20  ;;  %v6245_v2 = vld [vmem:[#allocation8 + $0x124] ss:$12 sps:$4 sm:$0xff]   ;;  %v6246_v26 = vld [vmem:[#allocation8 + $0x128] ss:$12 sps:$4 sm:$0xff]   ;;  %v6243_v55 = vld [vmem:[#allocation8 + $0x120] ss:$12 sps:$4 sm:$0xff]  }
 0x793   :  { %6423 = vpow2.f32 %v4962_v1  ;;  %v6249_v12 = vld [vmem:[#allocation8 + $0x13c] ss:$12 sps:$4 sm:$0xff]   ;;  %v6250_v20 = vld [vmem:[#allocation8 + $0x140] ss:$12 sps:$4 sm:$0xff]   ;;  %v6247_v6 = vld [vmem:[#allocation8 + $0x138] ss:$12 sps:$4 sm:$0xff]  }
 0x794   :  { %v6253_v29 = vld [vmem:[#allocation8 + $0x154] ss:$12 sps:$4 sm:$0xff]   ;;  %v6251_v1 = vld [vmem:[#allocation8 + $0x150] ss:$12 sps:$4 sm:$0xff]  }
 0x798   :  { %v6420_v33 = vpop.eup %6419 }
 0x799   :  { %v2213_v23 = vmul.f32 %v6420_v33, %v2212_v35  ;;  %v6257_v35 = vld [vmem:[#allocation8 + $0x16c] ss:$12 sps:$4 sm:$0xff]   ;;  %v6258_v33 = vld [vmem:[#allocation8 + $0x170] ss:$12 sps:$4 sm:$0xff]  }
 0x79b   :  { %v7687_v58 = vadd.f32 %v2214_v37, %v2213_v23  ;;  %v6255_v23 = vld [vmem:[#allocation8 + $0x168] ss:$12 sps:$4 sm:$0xff]   ;;  %v1142_v37 = vpack.c.bf16 %v7226_v41, %v7183_v18  ;;  %v2018_v18 = vpack.c.bf16 %v7630_v14, %v7575_v11  ;;  %v7760_v11 = vld [vmem:[#allocation10 + $0xf0] ss:$12 sps:$4 sm:$0xff]  }
 0x79c   :  { %v6422_v40 = vpop.eup %6421 }
 0x79d   :  { %v2220_v38 = vadd.f32 1.0, %v6422_v40  ;;  %v2250_v60 = vpack.c.bf16 %v7687_v58, %v7687_v58  ;;  %v6424_v39 = vpop.eup %6423  ;;  %v1361_v40 = vpack.c.bf16 %v7350_v48, %v7299_v43  ;;  %v7744_v43 = vld [vmem:[#allocation10 + $0xc4] ss:$12 sps:$4 sm:$0xff]   ;;  %v7746_v48 = vld [vmem:[#allocation10 + $0xc0] ss:$12 sps:$4 sm:$0xff]  }
 0x79f   :  { %6425 = vrcp.f32 %v2220_v38  ;;  %2284 = vmatmul.mubr.bf16.vlgmr.msra.gmra.mrb[72].mxu1 %v2250_v60  ;;  %5768 = vmatmul.mubr.bf16.vlgmr.msra.gmra.mrb[88].mxu0 %v2250_v60  ;;  %v1580_v38 = vpack.c.bf16 %v7440_v57, %v7403_v9  ;;  %v1799_v60 = vpack.c.bf16 %v7526_v34, %v7489_v59  ;;  %v7750_v9 = vld [vmem:[#allocation10 + $0xdc] ss:$12 sps:$4 sm:$0xff]   ;;  %v7752_v57 = vld [vmem:[#allocation10 + $0xd8] ss:$12 sps:$4 sm:$0xff]   ;;  %v7756_v59 = vld [vmem:[#allocation10 + $0xf4] ss:$12 sps:$4 sm:$0xff]  }
 0x7a0   :  { %2334 = vmatpush1.bf16.msra.mxu1 %v7579_v42  ;;  %5772 = vmatpush3.bf16.msra.mxu0 %v7582_v54  ;;  %v2227_v42 = vadd.f32 1.0, %v6424_v39  ;;  %v7758_v34 = vld [vmem:[#allocation10 + $0xc8] ss:$12 sps:$4 sm:$0xff]   ;;  %v7768_v39 = vld [vmem:[#allocation10 + $0x10c] ss:$12 sps:$4 sm:$0xff]  }
 0x7a1   :  { %2335 = vmatprep.subr.bf16.mxu1 %v7585_v56  ;;  %5773 = vmatprep.subr.bf16.mxu0 %v8652_v5  ;;  %v2030_v56 = vunpack.c.h.bf16 %v8655_v13  ;;  %v6227_v13 = vld [vmem:[#allocation8 + $0xc0] ss:$12 sps:$4 sm:$0xff]  }
 0x7a2   :  { %2365 = vmatprep.mubr.bf16.mxu1 %v8653_v62  ;;  %5787 = vmatprep.mubr.msk.bf16.mxu0 %vm6811_vm0, %v8652_v5  ;;  %6427 = vrcp.f32 %v2227_v42  ;;  %v7770_v42 = vld [vmem:[#allocation10 + $0x108] ss:$12 sps:$4 sm:$0xff]  }
 0x7a4   :  { %2336 = vmatpush1.bf16.msra.mxu1 %v7644_v7  ;;  %5774 = vmatpush3.bf16.msra.mxu0 %v7647_v51  ;;  %v6650_v51 = vld [vmem:[#allocation10 + $0x68] ss:$12 sps:$4 sm:$0xff]  }
 0x7a5   :  { %2337 = vmatprep.subr.bf16.mxu1 %v7650_v47  ;;  %5775 = vmatprep.subr.bf16.mxu0 %v8652_v5  ;;  %v6651_v47 = vld [vmem:[#allocation10 + $0x78] ss:$12 sps:$4 sm:$0xff]  }
 0x7a8   :  { %2338 = vmatpush1.bf16.msra.mxu1 %v7654_v25  ;;  %5776 = vmatpush3.bf16.msra.mxu0 %v7657_v19  ;;  %v6652_v25 = vld [vmem:[#allocation10 + $0x80] ss:$12 sps:$4 sm:$0xff]   ;;  %v6654_v19 = vld [vmem:[#allocation10 + $0x90] ss:$12 sps:$4 sm:$0xff]  }
 0x7a9   :  { %v6426_v54 = vpop.eup %6425  ;;  %2339 = vmatprep.subr.bf16.mxu1 %v7598_v21  ;;  %5777 = vmatprep.subr.bf16.mxu0 %v8652_v5 }
 0x7aa   :  { %v2230_v22 = vmul.f32 %v6426_v54, %v2189_v27  ;;  %v6237_v27 = vld [vmem:[#allocation8 + $0xf4] ss:$12 sps:$4 sm:$0xff]   ;;  %v7775_v54 = vld [vmem:[#allocation10 + $0xf8] ss:$12 sps:$4 sm:$0xff]  }
 0x7ac   :  { %v2231_v7 = vadd.f32 %v2230_v22, %v2030_v56  ;;  %2340 = vmatpush1.bf16.msra.mxu1 %v7603_v4  ;;  %5778 = vmatpush3.bf16.msra.mxu0 %v7606_v32  ;;  %v6428_v21 = vpop.eup %6427  ;;  %v6653_v4 = vld [vmem:[#allocation10 + $0x94] ss:$12 sps:$4 sm:$0xff]   ;;  %v7778_v56 = vld [vmem:[#allocation10 + $0x124] ss:$12 sps:$4 sm:$0xff]  }
 0x7ad   :  { %2341 = vmatprep.subr.bf16.mxu1 %v7609_v28  ;;  %5779 = vmatprep.subr.bf16.mxu0 %v8652_v5  ;;  %v2233_v32 = vsub.f32 1.0, %v6428_v21  ;;  %v2235_v52 = vmul.f32 %v6428_v21, %v7630_v14  ;;  %v7764_v14 = vld [vmem:[#allocation10 + $0xe0] ss:$12 sps:$4 sm:$0xff]   ;;  %v7791_v21 = vld [vmem:[#allocation10 + $0x110] ss:$12 sps:$4 sm:$0xff]  }
 0x7ae   :  { %6429 = vtanh.f32 %v2231_v7  ;;  %v7780_v22 = vld [vmem:[#allocation10 + $0x120] ss:$12 sps:$4 sm:$0xff]   ;;  %v7785_v7 = vld [vmem:[#allocation10 + $0x13c] ss:$12 sps:$4 sm:$0xff]  }
 0x7b0   :  { %2342 = vmatpush1.bf16.msra.mxu1 %v7613_v8  ;;  %5780 = vmatpush3.bf16.msra.mxu0 %v6650_v51  ;;  %v6655_v8 = vld [vmem:[#allocation10 + $0x98] ss:$12 sps:$4 sm:$0xff]  }
 0x7b1   :  { %2343 = vmatprep.subr.bf16.mxu1 %v7617_v36  ;;  %5781 = vmatprep.subr.bf16.mxu0 %v8652_v5  ;;  %v7788_v51 = vld [vmem:[#allocation10 + $0x138] ss:$12 sps:$4 sm:$0xff]  }
 0x7b4   :  { %2344 = vmatpush1.bf16.msra.mxu1 %v6651_v47  ;;  %5782 = vmatpush3.bf16.msra.mxu0 %v6652_v25  ;;  %v7795_v47 = vld [vmem:[#allocation10 + $0x154] ss:$12 sps:$4 sm:$0xff]   ;;  %v7797_v25 = vld [vmem:[#allocation10 + $0x150] ss:$12 sps:$4 sm:$0xff]  }
 0x7b5   :  { %2345 = vmatprep.subr.bf16.mxu1 %v6653_v4  ;;  %5783 = vmatprep.subr.bf16.mxu0 %v8652_v5  ;;  %v7802_v4 = vld [vmem:[#allocation10 + $0x16c] ss:$12 sps:$4 sm:$0xff]  }
 0x7b8   :  { %v6430_v28 = vpop.eup %6429  ;;  %2346 = vmatpush1.bf16.msra.mxu1 %v6654_v19  ;;  %5784 = vmatpush3.bf16.msra.mxu0 %v6655_v8  ;;  %v7813_v19 = vld [vmem:[#allocation10 + $0x140] ss:$12 sps:$4 sm:$0xff]   ;;  %v7817_v8 = vld [vmem:[#allocation10 + $0x158] ss:$12 sps:$4 sm:$0xff]  }
 0x7b9   :  { %2347 = vmatprep.subr.bf16.mxu1 %v6656_v49  ;;  %5785 = vmatprep.subr.bf16.mxu0 %v8652_v5  ;;  %v2234_v36 = vmul.f32 %v6430_v28, %v2233_v32  ;;  %v7804_v32 = vld [vmem:[#allocation10 + $0x168] ss:$12 sps:$4 sm:$0xff]   ;;  %v7821_v49 = vld [vmem:[#allocation10 + $0x170] ss:$12 sps:$4 sm:$0xff]  }
 0x7ba   :  { %v7807_v28 = vld [vmem:[#allocation10 + $0x128] ss:$12 sps:$4 sm:$0xff]  }
 0x7bb   :  { %v7717_v63 = vadd.f32 %v2235_v52, %v2234_v36  ;;  %v8656_v36 = vld [vmem:[#allocation18_spill] sm:$0xff] }
 0x7bc   :  { %2348 = vmatpush1.bf16.msra.mxu1 %v6657_v24  ;;  %5786 = vmatpush3.bf16.msra.mxu0 %v6658_v61  ;;  %v2244_v52 = vunpack.c.l.bf16 %v8656_v36  ;;  %v8657_v24 = vld [vmem:[#allocation19_spill] sm:$0xff] }
 0x7bd   :  { %v2332_v15 = vpack.c.bf16 %v7717_v63, %v7717_v63  ;;  %2630 = vmatprep.subr.bf16.mxu1 %v6229_v30  ;;  %5791 = vmatprep.subr.bf16.mxu0 %v6230_v10  ;;  %v2237_v41 = vpack.c.bf16 %v7717_v63, %v7687_v58  ;;  %v2245_v61 = vunpack.c.l.bf16 %v8657_v24 }
 0x7bf   :  { %2366 = vmatmul.mubr.bf16.vlgmr.msra.gmra.mrb[76].mxu1 %v2332_v15  ;;  %5788 = vmatmul.mubr.bf16.vlgmr.msra.gmra.mrb[92].mxu0 %v2332_v15 }
 0x7c0   :  { %2631 = vmatpush1.bf16.msra.mxu1 %v6227_v13  ;;  %5792 = vmatpush3.bf16.msra.mxu0 %v6230_v10 }
 0x7c1   :  { %5807 = vmatprep.mubr.bf16.mxu0 %v924_v44  ;;  %2632 = vmatprep.subr.bf16.mxu1 %v6233_v31 }
 0x7c2   :  { %5793 = vmatprep.subr.bf16.mxu0 %v6234_v50  ;;  %2662 = vmatprep.mubr.bf16.mxu1 %v8653_v62 }
 0x7c4   :  { %2633 = vmatpush1.bf16.msra.mxu1 %v6231_v45  ;;  %5794 = vmatpush3.bf16.msra.mxu0 %v6234_v50 }
 0x7c5   :  { %2634 = vmatprep.subr.bf16.mxu1 %v6237_v27  ;;  %5795 = vmatprep.subr.bf16.mxu0 %v6238_v46 }
 0x7c8   :  { %2635 = vmatpush1.bf16.msra.mxu1 %v6235_v17  ;;  %5796 = vmatpush3.bf16.msra.mxu0 %v6238_v46 }
 0x7c9   :  { %2636 = vmatprep.subr.bf16.mxu1 %v6241_v16  ;;  %5797 = vmatprep.subr.bf16.mxu0 %v6242_v53 }
 0x7cc   :  { %2637 = vmatpush1.bf16.msra.mxu1 %v6239_v0  ;;  %5798 = vmatpush3.bf16.msra.mxu0 %v6242_v53 }
 0x7cd   :  { %2638 = vmatprep.subr.bf16.mxu1 %v6245_v2  ;;  %5799 = vmatprep.subr.bf16.mxu0 %v6246_v26 }
 0x7d0   :  { %2639 = vmatpush1.bf16.msra.mxu1 %v6243_v55  ;;  %5800 = vmatpush3.bf16.msra.mxu0 %v6246_v26 }
 0x7d1   :  { %2640 = vmatprep.subr.bf16.mxu1 %v6249_v12  ;;  %5801 = vmatprep.subr.bf16.mxu0 %v6250_v20  ;;  %v8658_v12 = vld [vmem:[#allocation15_spill] sm:$0xff] }
 0x7d4   :  { %2641 = vmatpush1.bf16.msra.mxu1 %v6247_v6  ;;  %5802 = vmatpush3.bf16.msra.mxu0 %v6250_v20  ;;  %v2246_v20 = vunpack.c.l.bf16 %v8658_v12 }
 0x7d5   :  { %2642 = vmatprep.subr.bf16.mxu1 %v6253_v29  ;;  %5803 = vmatprep.subr.bf16.mxu0 %v6254_v3 }
 0x7d8   :  { %2643 = vmatpush1.bf16.msra.mxu1 %v6251_v1  ;;  %5804 = vmatpush3.bf16.msra.mxu0 %v6254_v3  ;;  %v2247_v3 = vunpack.c.h.bf16 %v8656_v36 }
 0x7d9   :  { %2644 = vmatprep.subr.bf16.mxu1 %v6257_v35  ;;  %5805 = vmatprep.subr.bf16.mxu0 %v6258_v33 }
 0x7dc   :  { %2645 = vmatpush1.bf16.msra.mxu1 %v6255_v23  ;;  %5806 = vmatpush3.bf16.msra.mxu0 %v6258_v33  ;;  %v2248_v33 = vunpack.c.h.bf16 %v8657_v24 }
 0x7dd   :  { %5823 = vmatprep.subr.bf16.mxu1 %v8652_v5  ;;  %3062 = vmatprep.subr.bf16.mxu0 %v7744_v43 }
 0x7df   :  { %2663 = vmatmul.mubr.bf16.vlgmr.msra.gmra.mrb[80].mxu1 %v924_v44  ;;  %5808 = vmatmul.mubr.bf16.vlgmr.msra.gmra.mrb[96].mxu0 %v1142_v37 }
 0x7e0   :  { %5811 = vmatprep.mubr.bf16.mxu0 %v1361_v40  ;;  %2672 = vmatprep.mubr.bf16.mxu1 %v8653_v62 }
 0x7e1   :  { %3063 = vmatpush1.bf16.msra.mxu0 %v7746_v48  ;;  %5824 = vmatpush3.bf16.msra.mxu1 %v7758_v34 }
 0x7e2   :  { %3064 = vmatprep.subr.bf16.mxu0 %v7750_v9  ;;  %5825 = vmatprep.subr.bf16.mxu1 %v8652_v5 }
 0x7e5   :  { %3065 = vmatpush1.bf16.msra.mxu0 %v7752_v57  ;;  %5826 = vmatpush3.bf16.msra.mxu1 %v7764_v14 }
 0x7e6   :  { %3066 = vmatprep.subr.bf16.mxu0 %v7756_v59  ;;  %5827 = vmatprep.subr.bf16.mxu1 %v8652_v5 }
 0x7e7   :  { %2673 = vmatmul.mubr.bf16.gmra.mrb[84].mxu1 %v1142_v37  ;;  %5812 = vmatmul.mubr.bf16.gmra.mrb[100].mxu0 %v1580_v38 }
 0x7e8   :  { %5815 = vmatprep.mubr.bf16.mxu0 %v1799_v60  ;;  %2682 = vmatprep.mubr.bf16.mxu1 %v8653_v62 }
 0x7e9   :  { %3067 = vmatpush1.bf16.msra.mxu0 %v7760_v11  ;;  %5828 = vmatpush3.bf16.msra.mxu1 %v7775_v54 }
 0x7ea   :  { %3068 = vmatprep.subr.bf16.mxu0 %v7768_v39  ;;  %5829 = vmatprep.subr.bf16.mxu1 %v8652_v5 }
 0x7ed   :  { %3069 = vmatpush1.bf16.msra.mxu0 %v7770_v42  ;;  %5830 = vmatpush3.bf16.msra.mxu1 %v7791_v21 }
 0x7ee   :  { %3070 = vmatprep.subr.bf16.mxu0 %v7778_v56  ;;  %5831 = vmatprep.subr.bf16.mxu1 %v8652_v5 }
 0x7ef   :  { %2683 = vmatmul.mubr.bf16.gmra.mrb[88].mxu1 %v1361_v40  ;;  %5816 = vmatmul.mubr.bf16.gmra.mrb[104].mxu0 %v2018_v18 }
 0x7f0   :  { %5819 = vmatprep.mubr.bf16.mxu0 %v2237_v41  ;;  %2692 = vmatprep.mubr.bf16.mxu1 %v8653_v62 }
 0x7f1   :  { %3071 = vmatpush1.bf16.msra.mxu0 %v7780_v22  ;;  %5832 = vmatpush3.bf16.msra.mxu1 %v7807_v28 }
 0x7f2   :  { %3072 = vmatprep.subr.bf16.mxu0 %v7785_v7  ;;  %5833 = vmatprep.subr.bf16.mxu1 %v8652_v5 }
 0x7f5   :  { %3073 = vmatpush1.bf16.msra.mxu0 %v7788_v51  ;;  %5834 = vmatpush3.bf16.msra.mxu1 %v7813_v19 }
 0x7f6   :  { %3074 = vmatprep.subr.bf16.mxu0 %v7795_v47  ;;  %5835 = vmatprep.subr.bf16.mxu1 %v8652_v5 }
 0x7f7   :  { %2693 = vmatmul.mubr.bf16.gmra.mrb[92].mxu1 %v1580_v38 }
 0x7f8   :  { %2702 = vmatprep.mubr.bf16.mxu1 %v8653_v62 }
 0x7f9   :  { %3075 = vmatpush1.bf16.msra.mxu0 %v7797_v25  ;;  %5836 = vmatpush3.bf16.msra.mxu1 %v7817_v8 }
 0x7fa   :  { %3076 = vmatprep.subr.bf16.mxu0 %v7802_v4  ;;  %5837 = vmatprep.subr.bf16.mxu1 %v8652_v5 }
 0x7fd   :  { %3077 = vmatpush1.bf16.msra.mxu0 %v7804_v32  ;;  %5838 = vmatpush3.bf16.msra.mxu1 %v7821_v49 }
 0x7fe   :  { %3144 = vmatprep.subr.bf16.mxu0 %v7744_v43  ;;  %5843 = vmatprep.subr.bf16.mxu1 %v8652_v5 }
 0x7ff   :  { %2703 = vmatmul.mubr.bf16.gmra.mrb[96].mxu1 %v1799_v60 }
 0x800   :  { %2712 = vmatprep.mubr.bf16.mxu1 %v8653_v62 }
 0x807   :  { %2713 = vmatmul.mubr.bf16.gmra.mrb[100].mxu1 %v2018_v18 }
 0x808   :  { %2722 = vmatprep.mubr.bf16.mxu1 %v8653_v62 }
 0x80f   :  { %2723 = vmatmul.mubr.bf16.gmra.mrb[104].mxu1 %v2237_v41 }
 0x810   :  { %2732 = vmatprep.mubr.bf16.mxu1 %v8653_v62 }
 0x872   :  { %v2285_v30 = vpop.f32.mrb[72].mxu1  ;;  %v2326_v10 = vpop.f32.mrb[88].mxu0 }
 0x873   :  { %v2414_v13 = vadd.f32 %v2285_v30, %v2244_v52  ;;  %v2287_v15 = vpop.f32.mrb[73].mxu1  ;;  %v5769_v31 = vpop.f32.mrb[89].mxu0 }
 0x874   :  { %v2421_v50 = vadd.f32 %v2287_v15, %v2245_v61  ;;  %v2289_v44 = vpop.f32.mrb[74].mxu1  ;;  %v2329_v45 = vpop.f32.mrb[90].mxu0 }
 0x875   :  { %v4963_v27 = vmul.f32 -1.442695, %v2414_v13  ;;  %v2290_v46 = vpop.f32.mrb[75].mxu1  ;;  %v5770_v17 = vpop.f32.mrb[91].mxu0 }
 0x876   :  { %v4964_v16 = vmul.f32 -1.442695, %v2421_v50  ;;  %v2249_v17 = vunpack.c.h.bf16 %v8658_v12 }
 0x877   :  { %6431 = vpow2.f32 %v4963_v27 }
 0x878   :  { %6433 = vpow2.f32 %v4964_v16 }
 0x881   :  { %v6432_v53 = vpop.eup %6431 }
 0x882   :  { %v2418_v0 = vadd.f32 1.0, %v6432_v53  ;;  %v6434_v2 = vpop.eup %6433 }
 0x883   :  { %v2425_v26 = vadd.f32 1.0, %v6434_v2 }
 0x884   :  { %6435 = vrcp.f32 %v2418_v0 }
 0x885   :  { %6437 = vrcp.f32 %v2425_v26 }
 0x88e   :  { %v6436_v55 = vpop.eup %6435 }
 0x88f   :  { %v2428_v6 = vmul.f32 %v6436_v55, %v2326_v10  ;;  %v6438_v10 = vpop.eup %6437 }
 0x890   :  { %v2431_v13 = vsub.f32 1.0, %v6438_v10  ;;  %v2433_v31 = vmul.f32 %v6438_v10, %v7687_v58 }
 0x891   :  { %v2429_v29 = vadd.f32 %v2428_v6, %v2246_v20 }
 0x892   :  { %v2367_v1 = vpop.f32.mrb[76].mxu1  ;;  %v2408_v35 = vpop.f32.mrb[92].mxu0 }
 0x893   :  { %6439 = vtanh.f32 %v2429_v29  ;;  %v2435_v23 = vadd.f32 %v2367_v1, %v2247_v3  ;;  %v2369_v37 = vpop.f32.mrb[77].mxu1  ;;  %v5789_v40 = vpop.f32.mrb[93].mxu0 }
 0x894   :  { %v2442_v38 = vadd.f32 %v2369_v37, %v2248_v33  ;;  %v2371_v60 = vpop.f32.mrb[78].mxu1  ;;  %v2411_v18 = vpop.f32.mrb[94].mxu0 }
 0x895   :  { %v4965_v41 = vmul.f32 -1.442695, %v2435_v23  ;;  %v2372_v52 = vpop.f32.mrb[79].mxu1  ;;  %v5790_v30 = vpop.f32.mrb[95].mxu0 }
 0x896   :  { %v4966_v61 = vmul.f32 -1.442695, %v2442_v38 }
 0x897   :  { %6441 = vpow2.f32 %v4965_v41 }
 0x898   :  { %6443 = vpow2.f32 %v4966_v61 }
 0x89d   :  { %v6440_v15 = vpop.eup %6439 }
 0x89e   :  { %v2432_v36 = vmul.f32 %v6440_v15, %v2431_v13 }
 0x8a0   :  { %v2434_v24 = vadd.f32 %v2433_v31, %v2432_v36 }
 0x8a1   :  { %v6442_v50 = vpop.eup %6441 }
 0x8a2   :  { %v2439_v44 = vadd.f32 1.0, %v6442_v50  ;;  %v6444_v45 = vpop.eup %6443 }
 0x8a3   :  { %v2446_v27 = vadd.f32 1.0, %v6444_v45 }
 0x8a4   :  { %6445 = vrcp.f32 %v2439_v44 }
 0x8a5   :  { %6447 = vrcp.f32 %v2446_v27 }
 0x8ae   :  { %v6446_v46 = vpop.eup %6445 }
 0x8af   :  { %v2449_v16 = vmul.f32 %v6446_v46, %v2408_v35  ;;  %v6448_v12 = vpop.eup %6447 }
 0x8b0   :  { %v2452_v41 = vsub.f32 1.0, %v6448_v12  ;;  %v2454_v50 = vmul.f32 %v6448_v12, %v7717_v63  ;;  %v8659_v12 = vmov 0.0|0.0  }
 0x8b1   :  { %v2450_v53 = vadd.f32 %v2449_v16, %v2249_v17 }
 0x8b2   :  { %v2664_v0 = vpop.f32.mrb[80].mxu1  ;;  %v5809_v2 = vpop.f32.mrb[96].mxu0 }
 0x8b3   :  { %6449 = vtanh.f32 %v2450_v53  ;;  %v2666_v26 = vpop.f32.mrb[81].mxu1  ;;  %v2777_v55 = vpop.f32.mrb[97].mxu0 }
 0x8b4   :  { %v2668_v20 = vpop.f32.mrb[82].mxu1  ;;  %v5810_v6 = vpop.f32.mrb[98].mxu0 }
 0x8b5   :  { %v7832_v58 = vpack.c.bf16 %v2668_v20, %v2664_v0  ;;  %v7834_v29 = vpack.c.bf16 %v5810_v6, %v5809_v2  ;;  %v2670_v3 = vpop.f32.mrb[83].mxu1  ;;  %v2780_v1 = vpop.f32.mrb[99].mxu0 }
 0x8b6   :  { %v7836_v33 = vpack.c.bf16 %v2670_v3, %v2666_v26  ;;  %v7838_v23 = vpack.c.bf16 %v2780_v1, %v2777_v55 }
 0x8ba   :  { %v2674_v35 = vpop.f32.mrb[84].mxu1  ;;  %v5813_v37 = vpop.f32.mrb[100].mxu0 }
 0x8bb   :  { %v2676_v40 = vpop.f32.mrb[85].mxu1  ;;  %v2793_v38 = vpop.f32.mrb[101].mxu0 }
 0x8bc   :  { %v2678_v60 = vpop.f32.mrb[86].mxu1  ;;  %v5814_v18 = vpop.f32.mrb[102].mxu0 }
 0x8bd   :  { %v6450_v52 = vpop.eup %6449  ;;  %v7840_v30 = vpack.c.bf16 %v2678_v60, %v2674_v35  ;;  %v7842_v10 = vpack.c.bf16 %v5814_v18, %v5813_v37  ;;  %v2680_v61 = vpop.f32.mrb[87].mxu1 }
 0x8be   :  { %v2796_v13 = vpop.f32.mrb[103].mxu0  ;;  %v7844_v15 = vpack.c.bf16 %v2680_v61, %v2676_v40  ;;  %v2453_v31 = vmul.f32 %v6450_v52, %v2452_v41 }
 0x8bf   :  { %v7846_v36 = vpack.c.bf16 %v2796_v13, %v2793_v38 }
 0x8c0   :  { %v2455_v44 = vadd.f32 %v2454_v50, %v2453_v31 }
 0x8c2   :  { %v2684_v45 = vpop.f32.mrb[88].mxu1  ;;  %v5817_v27 = vpop.f32.mrb[104].mxu0  ;;  %v2456_v46 = vpack.c.bf16 %v2455_v44, %v2434_v24 }
 0x8c3   :  { %v2686_v17 = vpop.f32.mrb[89].mxu1  ;;  %v2809_v16 = vpop.f32.mrb[105].mxu0 }
 0x8c4   :  { %v2688_v53 = vpop.f32.mrb[90].mxu1  ;;  %2733 = vmatmul.mubr.bf16.gmra.mrb[108].mxu1 %v2456_v46  ;;  %v5818_v0 = vpop.f32.mrb[106].mxu0  ;;  %5820 = vmatmul.mubr.bf16.gmra.mrb[108].mxu0 %v2456_v46 }
 0x8c5   :  { %v7849_v2 = vpack.c.bf16 %v2688_v53, %v2684_v45  ;;  %v7851_v26 = vpack.c.bf16 %v5818_v0, %v5817_v27  ;;  %v2690_v55 = vpop.f32.mrb[91].mxu1  ;;  %v2812_v20 = vpop.f32.mrb[107].mxu0  ;;  %3094 = vmatprep.mubr.bf16.mxu0 %v8653_v62  ;;  %5839 = vmatprep.mubr.msk.bf16.mxu1 %vm6811_vm0, %v8652_v5 }
 0x8c6   :  { %v7856_v63 = vpack.c.bf16 %v2690_v55, %v2686_v17  ;;  %v7858_v24 = vpack.c.bf16 %v2812_v20, %v2809_v16 }
 0x8ca   :  { %v2694_v6 = vpop.f32.mrb[92].mxu1 }
 0x8cb   :  { %v2696_v3 = vpop.f32.mrb[93].mxu1 }
 0x8cc   :  { %v2698_v1 = vpop.f32.mrb[94].mxu1  ;;  %3095 = vmatmul.mubr.bf16.vlgmr.msra.gmra.mrb[112].mxu0 %v8659_v12  ;;  %5840 = vmatmul.mubr.bf16.vlgmr.msra.gmra.mrb[112].mxu1 %v8659_v12 }
 0x8cd   :  { %v7862_v35 = vpack.c.bf16 %v2698_v1, %v2694_v6  ;;  %3145 = vmatpush1.bf16.msra.mxu0 %v7746_v48  ;;  %v2700_v37 = vpop.f32.mrb[95].mxu1  ;;  %5844 = vmatpush3.bf16.msra.mxu1 %v7758_v34 }
 0x8ce   :  { %v7866_v40 = vpack.c.bf16 %v2700_v37, %v2696_v3  ;;  %3146 = vmatprep.subr.bf16.mxu0 %v7750_v9  ;;  %5845 = vmatprep.subr.bf16.mxu1 %v8652_v5 }
 0x8cf   :  { %3176 = vmatprep.mubr.bf16.mxu0 %v8653_v62  ;;  %5859 = vmatprep.mubr.msk.bf16.mxu1 %vm6811_vm0, %v8652_v5 }
 0x8d1   :  { %3147 = vmatpush1.bf16.msra.mxu0 %v7752_v57  ;;  %5846 = vmatpush3.bf16.msra.mxu1 %v7764_v14 }
 0x8d2   :  { %v2704_v38 = vpop.f32.mrb[96].mxu1  ;;  %3148 = vmatprep.subr.bf16.mxu0 %v7756_v59  ;;  %5847 = vmatprep.subr.bf16.mxu1 %v8652_v5 }
 0x8d3   :  { %v2706_v60 = vpop.f32.mrb[97].mxu1 }
 0x8d4   :  { %v2708_v18 = vpop.f32.mrb[98].mxu1 }
 0x8d5   :  { %v7877_v41 = vpack.c.bf16 %v2708_v18, %v2704_v38  ;;  %3149 = vmatpush1.bf16.msra.mxu0 %v7760_v11  ;;  %v2710_v52 = vpop.f32.mrb[99].mxu1  ;;  %5848 = vmatpush3.bf16.msra.mxu1 %v7775_v54 }
 0x8d6   :  { %v7881_v61 = vpack.c.bf16 %v2710_v52, %v2706_v60  ;;  %3150 = vmatprep.subr.bf16.mxu0 %v7768_v39  ;;  %5849 = vmatprep.subr.bf16.mxu1 %v8652_v5 }
 0x8d9   :  { %3151 = vmatpush1.bf16.msra.mxu0 %v7770_v42  ;;  %5850 = vmatpush3.bf16.msra.mxu1 %v7791_v21 }
 0x8da   :  { %v2714_v13 = vpop.f32.mrb[100].mxu1  ;;  %3152 = vmatprep.subr.bf16.mxu0 %v7778_v56  ;;  %5851 = vmatprep.subr.bf16.mxu1 %v8652_v5 }
 0x8db   :  { %v2716_v31 = vpop.f32.mrb[101].mxu1 }
 0x8dc   :  { %v2718_v50 = vpop.f32.mrb[102].mxu1 }
 0x8dd   :  { %v7889_v44 = vpack.c.bf16 %v2718_v50, %v2714_v13  ;;  %3153 = vmatpush1.bf16.msra.mxu0 %v7780_v22  ;;  %v2720_v45 = vpop.f32.mrb[103].mxu1  ;;  %5852 = vmatpush3.bf16.msra.mxu1 %v7807_v28  ;;  %v2927_v50 = vunpack.c.l.bf16 %v7832_v58 }
 0x8de   :  { %v7893_v27 = vpack.c.bf16 %v2720_v45, %v2716_v31  ;;  %3154 = vmatprep.subr.bf16.mxu0 %v7785_v7  ;;  %5853 = vmatprep.subr.bf16.mxu1 %v8652_v5 }
 0x8e1   :  { %3155 = vmatpush1.bf16.msra.mxu0 %v7788_v51  ;;  %5854 = vmatpush3.bf16.msra.mxu1 %v7813_v19 }
 0x8e2   :  { %v2724_v46 = vpop.f32.mrb[104].mxu1  ;;  %3156 = vmatprep.subr.bf16.mxu0 %v7795_v47  ;;  %5855 = vmatprep.subr.bf16.mxu1 %v8652_v5 }
 0x8e3   :  { %v2726_v17 = vpop.f32.mrb[105].mxu1 }
 0x8e4   :  { %v2728_v16 = vpop.f32.mrb[106].mxu1 }
 0x8e5   :  { %v7901_v53 = vpack.c.bf16 %v2728_v16, %v2724_v46  ;;  %3157 = vmatpush1.bf16.msra.mxu0 %v7797_v25  ;;  %v2730_v0 = vpop.f32.mrb[107].mxu1  ;;  %5856 = vmatpush3.bf16.msra.mxu1 %v7817_v8  ;;  %v2928_v46 = vunpack.c.l.bf16 %v7836_v33 }
 0x8e6   :  { %v7905_v55 = vpack.c.bf16 %v2730_v0, %v2726_v17  ;;  %3158 = vmatprep.subr.bf16.mxu0 %v7802_v4  ;;  %5857 = vmatprep.subr.bf16.mxu1 %v8652_v5 }
 0x8e7   :  { %8660 = vst [vmem:[#allocation17_spill] sm:$0xff] %v7901_v53 }
 0x8e8   :  { %8661 = vst [vmem:[#allocation16_spill] sm:$0xff] %v7905_v55 }
 0x8e9   :  { %3159 = vmatpush1.bf16.msra.mxu0 %v7804_v32  ;;  %5858 = vmatpush3.bf16.msra.mxu1 %v7821_v49 }
 0x8ea   :  { %3287 = vmatprep.subr.bf16.mxu0 %v7744_v43  ;;  %5863 = vmatprep.subr.bf16.mxu1 %v8652_v5 }
 0x8ec   :  { %3177 = vmatmul.mubr.bf16.vlgmr.msra.gmra.mrb[116].mxu0 %v8659_v12  ;;  %5860 = vmatmul.mubr.bf16.vlgmr.msra.gmra.mrb[116].mxu1 %v8659_v12 }
 0x8ed   :  { %3288 = vmatpush1.bf16.msra.mxu0 %v7746_v48  ;;  %5864 = vmatpush3.bf16.msra.mxu1 %v7758_v34 }
 0x8ee   :  { %3289 = vmatprep.subr.bf16.mxu0 %v7750_v9  ;;  %5865 = vmatprep.subr.bf16.mxu1 %v8652_v5 }
 0x8ef   :  { %3319 = vmatprep.mubr.bf16.mxu0 %v8653_v62  ;;  %5879 = vmatprep.mubr.msk.bf16.mxu1 %vm6811_vm0, %v8652_v5 }
 0x8f1   :  { %3290 = vmatpush1.bf16.msra.mxu0 %v7752_v57  ;;  %5866 = vmatpush3.bf16.msra.mxu1 %v7764_v14 }
 0x8f2   :  { %3291 = vmatprep.subr.bf16.mxu0 %v7756_v59  ;;  %5867 = vmatprep.subr.bf16.mxu1 %v8652_v5 }
 0x8f5   :  { %3292 = vmatpush1.bf16.msra.mxu0 %v7760_v11  ;;  %5868 = vmatpush3.bf16.msra.mxu1 %v7775_v54 }
 0x8f6   :  { %3293 = vmatprep.subr.bf16.mxu0 %v7768_v39  ;;  %5869 = vmatprep.subr.bf16.mxu1 %v8652_v5 }
 0x8f9   :  { %3294 = vmatpush1.bf16.msra.mxu0 %v7770_v42  ;;  %5870 = vmatpush3.bf16.msra.mxu1 %v7791_v21 }
 0x8fa   :  { %3295 = vmatprep.subr.bf16.mxu0 %v7778_v56  ;;  %5871 = vmatprep.subr.bf16.mxu1 %v8652_v5 }
 0x8fd   :  { %3296 = vmatpush1.bf16.msra.mxu0 %v7780_v22  ;;  %5872 = vmatpush3.bf16.msra.mxu1 %v7807_v28 }
 0x8fe   :  { %3297 = vmatprep.subr.bf16.mxu0 %v7785_v7  ;;  %5873 = vmatprep.subr.bf16.mxu1 %v8652_v5 }
 0x901   :  { %3298 = vmatpush1.bf16.msra.mxu0 %v7788_v51  ;;  %5874 = vmatpush3.bf16.msra.mxu1 %v7813_v19 }
 0x902   :  { %3299 = vmatprep.subr.bf16.mxu0 %v7795_v47  ;;  %5875 = vmatprep.subr.bf16.mxu1 %v8652_v5 }
 0x905   :  { %3300 = vmatpush1.bf16.msra.mxu0 %v7797_v25  ;;  %5876 = vmatpush3.bf16.msra.mxu1 %v7817_v8 }
 0x906   :  { %3301 = vmatprep.subr.bf16.mxu0 %v7802_v4  ;;  %5877 = vmatprep.subr.bf16.mxu1 %v8652_v5 }
 0x909   :  { %3302 = vmatpush1.bf16.msra.mxu0 %v7804_v32  ;;  %5878 = vmatpush3.bf16.msra.mxu1 %v7821_v49 }
 0x90a   :  { %3369 = vmatprep.subr.bf16.mxu0 %v7744_v43  ;;  %5883 = vmatprep.subr.bf16.mxu1 %v8652_v5 }
 0x997   :  { %v2734_v20 = vpop.f32.mrb[108].mxu1  ;;  %v5821_v6 = vpop.f32.mrb[108].mxu0 }
 0x998   :  { %v2736_v3 = vpop.f32.mrb[109].mxu1  ;;  %v2825_v1 = vpop.f32.mrb[109].mxu0 }
 0x999   :  { %v2738_v12 = vpop.f32.mrb[110].mxu1  ;;  %v5822_v37 = vpop.f32.mrb[110].mxu0 }
 0x99a   :  { %v7950_v38 = vpack.c.bf16 %v2738_v12, %v2734_v20  ;;  %v7952_v60 = vpack.c.bf16 %v5822_v37, %v5821_v6  ;;  %v2740_v18 = vpop.f32.mrb[111].mxu1  ;;  %v2828_v52 = vpop.f32.mrb[111].mxu0 }
 0x99b   :  { %v7954_v13 = vpack.c.bf16 %v2740_v18, %v2736_v3  ;;  %v7956_v31 = vpack.c.bf16 %v2828_v52, %v2825_v1 }
 0x99c   :  { %8662 = vst [vmem:[#allocation18_spill] sm:$0xff] %v7950_v38  ;;  %8663 = vst [vmem:[#allocation19_spill] sm:$0xff] %v7952_v60 }
 0x99d   :  { %8664 = vst [vmem:[#allocation15_spill] sm:$0xff] %v7954_v13  ;;  %8665 = vst [vmem:[#allocation20_spill] sm:$0xff] %v7956_v31  ;;  %v2929_v31 = vunpack.c.l.bf16 %v7838_v23 }
 0x99f   :  { %v3096_v45 = vpop.f32.mrb[112].mxu0  ;;  %v3137_v17 = vpop.f32.mrb[112].mxu1 }
 0x9a0   :  { %v3225_v16 = vadd.f32 %v3096_v45, %v2927_v50  ;;  %v3098_v0 = vpop.f32.mrb[113].mxu0  ;;  %v5841_v55 = vpop.f32.mrb[113].mxu1  ;;  %v2930_v45 = vunpack.c.h.bf16 %v7832_v58 }
 0x9a1   :  { %v3232_v53 = vadd.f32 %v3098_v0, %v2928_v46  ;;  %v3100_v20 = vpop.f32.mrb[114].mxu0  ;;  %v3140_v12 = vpop.f32.mrb[114].mxu1 }
 0x9a2   :  { %v5015_v6 = vmul.f32 -1.442695, %v3225_v16  ;;  %v3101_v37 = vpop.f32.mrb[115].mxu0  ;;  %v5842_v60 = vpop.f32.mrb[115].mxu1  ;;  %v2931_v16 = vunpack.c.h.bf16 %v7836_v33 }
 0x9a3   :  { %v5016_v3 = vmul.f32 -1.442695, %v3232_v53 }
 0x9a4   :  { %6451 = vpow2.f32 %v5015_v6 }
 0x9a5   :  { %6453 = vpow2.f32 %v5016_v3 }
 0x9ae   :  { %v6452_v1 = vpop.eup %6451 }
 0x9af   :  { %v3229_v18 = vadd.f32 1.0, %v6452_v1  ;;  %v6454_v52 = vpop.eup %6453 }
 0x9b0   :  { %v3236_v13 = vadd.f32 1.0, %v6454_v52 }
 0x9b1   :  { %6455 = vrcp.f32 %v3229_v18 }
 0x9b2   :  { %6457 = vrcp.f32 %v3236_v13 }
 0x9bb   :  { %v6456_v38 = vpop.eup %6455 }
 0x9bc   :  { %v3239_v50 = vmul.f32 %v6456_v38, %v3137_v17  ;;  %v6458_v13 = vpop.eup %6457 }
 0x9bd   :  { %v3244_v52 = vmul.f32 0.0, %v6458_v13 }
 0x9be   :  { %v3240_v55 = vadd.f32 %v3239_v50, %v2929_v31  ;;  %v3242_v31 = vsub.f32 1.0, %v6458_v13 }
 0x9bf   :  { %v3178_v46 = vpop.f32.mrb[116].mxu0  ;;  %v3219_v60 = vpop.f32.mrb[116].mxu1 }
 0x9c0   :  { %6459 = vtanh.f32 %v3240_v55  ;;  %v3246_v53 = vadd.f32 %v3178_v46, %v2930_v45  ;;  %v3180_v0 = vpop.f32.mrb[117].mxu0  ;;  %v5861_v20 = vpop.f32.mrb[117].mxu1 }
 0x9c1   :  { %v3253_v12 = vadd.f32 %v3180_v0, %v2931_v16  ;;  %v3182_v6 = vpop.f32.mrb[118].mxu0  ;;  %v3222_v37 = vpop.f32.mrb[118].mxu1  ;;  %v2932_v0 = vunpack.c.h.bf16 %v7838_v23 }
 0x9c2   :  { %v5017_v3 = vmul.f32 -1.442695, %v3246_v53  ;;  %v3183_v1 = vpop.f32.mrb[119].mxu0  ;;  %v5862_v18 = vpop.f32.mrb[119].mxu1 }
 0x9c3   :  { %v5018_v38 = vmul.f32 -1.442695, %v3253_v12 }
 0x9c4   :  { %6461 = vpow2.f32 %v5017_v3 }
 0x9c5   :  { %6463 = vpow2.f32 %v5018_v38  ;;  %v3280_v38 = vunpack.c.l.bf16 %v7840_v30 }
 0x9ca   :  { %v6460_v17 = vpop.eup %6459 }
 0x9cb   :  { %v3243_v58 = vmul.f32 %v6460_v17, %v3242_v31 }
 0x9cd   :  { %v7963_v33 = vadd.f32 %v3244_v52, %v3243_v58  ;;  %v3281_v58 = vunpack.c.l.bf16 %v7844_v15 }
 0x9ce   :  { %v6462_v50 = vpop.eup %6461 }
 0x9cf   :  { %v3250_v55 = vadd.f32 1.0, %v6462_v50  ;;  %v3286_v45 = vpack.c.bf16 %v7963_v33, %v7963_v33  ;;  %v6464_v46 = vpop.eup %6463 }
 0x9d0   :  { %v3257_v16 = vadd.f32 1.0, %v6464_v46 }
 0x9d1   :  { %6465 = vrcp.f32 %v3250_v55  ;;  %3320 = vmatmul.mubr.bf16.vlgmr.msra.gmra.mrb[120].mxu0 %v3286_v45  ;;  %5880 = vmatmul.mubr.bf16.vlgmr.msra.gmra.mrb[120].mxu1 %v3286_v45 }
 0x9d2   :  { %3370 = vmatpush1.bf16.msra.mxu0 %v7746_v48  ;;  %5884 = vmatpush3.bf16.msra.mxu1 %v7758_v34  ;;  %6467 = vrcp.f32 %v3257_v16 }
 0x9d3   :  { %3371 = vmatprep.subr.bf16.mxu0 %v7750_v9  ;;  %5885 = vmatprep.subr.bf16.mxu1 %v8652_v5 }
 0x9d4   :  { %3401 = vmatprep.mubr.bf16.mxu0 %v8653_v62  ;;  %5899 = vmatprep.mubr.msk.bf16.mxu1 %vm6811_vm0, %v8652_v5 }
 0x9d6   :  { %3372 = vmatpush1.bf16.msra.mxu0 %v7752_v57  ;;  %5886 = vmatpush3.bf16.msra.mxu1 %v7764_v14 }
 0x9d7   :  { %3373 = vmatprep.subr.bf16.mxu0 %v7756_v59  ;;  %5887 = vmatprep.subr.bf16.mxu1 %v8652_v5 }
 0x9da   :  { %3374 = vmatpush1.bf16.msra.mxu0 %v7760_v11  ;;  %5888 = vmatpush3.bf16.msra.mxu1 %v7775_v54 }
 0x9db   :  { %v6466_v53 = vpop.eup %6465  ;;  %3375 = vmatprep.subr.bf16.mxu0 %v7768_v39  ;;  %5889 = vmatprep.subr.bf16.mxu1 %v8652_v5 }
 0x9dc   :  { %v3260_v20 = vmul.f32 %v6466_v53, %v3219_v60  ;;  %v6468_v23 = vpop.eup %6467 }
 0x9dd   :  { %v3263_v60 = vsub.f32 1.0, %v6468_v23  ;;  %v3265_v3 = vmul.f32 0.0, %v6468_v23 }
 0x9de   :  { %v3261_v12 = vadd.f32 %v3260_v20, %v2932_v0  ;;  %3376 = vmatpush1.bf16.msra.mxu0 %v7770_v42  ;;  %5890 = vmatpush3.bf16.msra.mxu1 %v7791_v21 }
 0x9df   :  { %3377 = vmatprep.subr.bf16.mxu0 %v7778_v56  ;;  %5891 = vmatprep.subr.bf16.mxu1 %v8652_v5 }
 0x9e0   :  { %6469 = vtanh.f32 %v3261_v12 }
 0x9e2   :  { %3378 = vmatpush1.bf16.msra.mxu0 %v7780_v22  ;;  %5892 = vmatpush3.bf16.msra.mxu1 %v7807_v28 }
 0x9e3   :  { %3379 = vmatprep.subr.bf16.mxu0 %v7785_v7  ;;  %5893 = vmatprep.subr.bf16.mxu1 %v8652_v5 }
 0x9e6   :  { %3380 = vmatpush1.bf16.msra.mxu0 %v7788_v51  ;;  %5894 = vmatpush3.bf16.msra.mxu1 %v7813_v19 }
 0x9e7   :  { %3381 = vmatprep.subr.bf16.mxu0 %v7795_v47  ;;  %5895 = vmatprep.subr.bf16.mxu1 %v8652_v5 }
 0x9ea   :  { %v6470_v6 = vpop.eup %6469  ;;  %3382 = vmatpush1.bf16.msra.mxu0 %v7797_v25  ;;  %5896 = vmatpush3.bf16.msra.mxu1 %v7817_v8 }
 0x9eb   :  { %3383 = vmatprep.subr.bf16.mxu0 %v7802_v4  ;;  %5897 = vmatprep.subr.bf16.mxu1 %v8652_v5  ;;  %v3264_v37 = vmul.f32 %v6470_v6, %v3263_v60 }
 0x9ed   :  { %v7999_v1 = vadd.f32 %v3265_v3, %v3264_v37  ;;  %v3282_v3 = vunpack.c.l.bf16 %v7834_v29 }
 0x9ee   :  { %3384 = vmatpush1.bf16.msra.mxu0 %v7804_v32  ;;  %5898 = vmatpush3.bf16.msra.mxu1 %v7821_v49 }
 0x9ef   :  { %v5082_v18 = vpack.c.bf16 %v7999_v1, %v7963_v33  ;;  %v3368_v13 = vpack.c.bf16 %v7999_v1, %v7999_v1  ;;  %3513 = vmatprep.subr.bf16.mxu0 %v7744_v43  ;;  %5903 = vmatprep.subr.bf16.mxu1 %v8652_v5 }
 0x9f1   :  { %5083 = vst [vmem:[#allocation11] sm:$0xff] %v5082_v18   ;;  %3402 = vmatmul.mubr.bf16.vlgmr.msra.gmra.mrb[124].mxu0 %v3368_v13  ;;  %5900 = vmatmul.mubr.bf16.vlgmr.msra.gmra.mrb[124].mxu1 %v3368_v13 }
 0x9f2   :  { %3514 = vmatpush1.bf16.msra.mxu0 %v7746_v48  ;;  %5904 = vmatpush3.bf16.msra.mxu1 %v7758_v34 }
 0x9f3   :  { %3515 = vmatprep.subr.bf16.mxu0 %v7750_v9  ;;  %5905 = vmatprep.subr.bf16.mxu1 %v8652_v5 }
 0x9f4   :  { %3545 = vmatprep.mubr.bf16.mxu0 %v8653_v62  ;;  %5919 = vmatprep.mubr.msk.bf16.mxu1 %vm6811_vm0, %v8652_v5 }
 0x9f6   :  { %3516 = vmatpush1.bf16.msra.mxu0 %v7752_v57  ;;  %5906 = vmatpush3.bf16.msra.mxu1 %v7764_v14 }
 0x9f7   :  { %3517 = vmatprep.subr.bf16.mxu0 %v7756_v59  ;;  %5907 = vmatprep.subr.bf16.mxu1 %v8652_v5 }
 0x9fa   :  { %3518 = vmatpush1.bf16.msra.mxu0 %v7760_v11  ;;  %5908 = vmatpush3.bf16.msra.mxu1 %v7775_v54 }
 0x9fb   :  { %3519 = vmatprep.subr.bf16.mxu0 %v7768_v39  ;;  %5909 = vmatprep.subr.bf16.mxu1 %v8652_v5 }
 0x9fe   :  { %3520 = vmatpush1.bf16.msra.mxu0 %v7770_v42  ;;  %5910 = vmatpush3.bf16.msra.mxu1 %v7791_v21 }
 0x9ff   :  { %3521 = vmatprep.subr.bf16.mxu0 %v7778_v56  ;;  %5911 = vmatprep.subr.bf16.mxu1 %v8652_v5 }
 0xa02   :  { %3522 = vmatpush1.bf16.msra.mxu0 %v7780_v22  ;;  %5912 = vmatpush3.bf16.msra.mxu1 %v7807_v28 }
 0xa03   :  { %3523 = vmatprep.subr.bf16.mxu0 %v7785_v7  ;;  %5913 = vmatprep.subr.bf16.mxu1 %v8652_v5 }
 0xa06   :  { %3524 = vmatpush1.bf16.msra.mxu0 %v7788_v51  ;;  %5914 = vmatpush3.bf16.msra.mxu1 %v7813_v19 }
 0xa07   :  { %3525 = vmatprep.subr.bf16.mxu0 %v7795_v47  ;;  %5915 = vmatprep.subr.bf16.mxu1 %v8652_v5 }
 0xa0a   :  { %3526 = vmatpush1.bf16.msra.mxu0 %v7797_v25  ;;  %5916 = vmatpush3.bf16.msra.mxu1 %v7817_v8 }
 0xa0b   :  { %3527 = vmatprep.subr.bf16.mxu0 %v7802_v4  ;;  %5917 = vmatprep.subr.bf16.mxu1 %v8652_v5 }
 0xa0e   :  { %3528 = vmatpush1.bf16.msra.mxu0 %v7804_v32  ;;  %5918 = vmatpush3.bf16.msra.mxu1 %v7821_v49 }
 0xa0f   :  { %3595 = vmatprep.subr.bf16.mxu0 %v7744_v43  ;;  %5923 = vmatprep.subr.bf16.mxu1 %v8652_v5 }
 0xaa4   :  { %v3321_v31 = vpop.f32.mrb[120].mxu0  ;;  %v3362_v17 = vpop.f32.mrb[120].mxu1 }
 0xaa5   :  { %v3450_v52 = vadd.f32 %v3321_v31, %v3280_v38  ;;  %v3323_v50 = vpop.f32.mrb[121].mxu0  ;;  %v5881_v55 = vpop.f32.mrb[121].mxu1  ;;  %v3283_v38 = vunpack.c.h.bf16 %v7840_v30 }
 0xaa6   :  { %v3457_v45 = vadd.f32 %v3323_v50, %v3281_v58  ;;  %v3325_v46 = vpop.f32.mrb[122].mxu0  ;;  %v3365_v16 = vpop.f32.mrb[122].mxu1 }
 0xaa7   :  { %v5021_v53 = vmul.f32 -1.442695, %v3450_v52  ;;  %v3326_v0 = vpop.f32.mrb[123].mxu0  ;;  %v5882_v20 = vpop.f32.mrb[123].mxu1  ;;  %v3284_v52 = vunpack.c.h.bf16 %v7844_v15 }
 0xaa8   :  { %v5022_v12 = vmul.f32 -1.442695, %v3457_v45 }
 0xaa9   :  { %6471 = vpow2.f32 %v5021_v53 }
 0xaaa   :  { %6473 = vpow2.f32 %v5022_v12 }
 0xab3   :  { %v6472_v43 = vpop.eup %6471 }
 0xab4   :  { %v3454_v23 = vadd.f32 1.0, %v6472_v43  ;;  %v6474_v60 = vpop.eup %6473 }
 0xab5   :  { %v3461_v6 = vadd.f32 1.0, %v6474_v60 }
 0xab6   :  { %6475 = vrcp.f32 %v3454_v23 }
 0xab7   :  { %6477 = vrcp.f32 %v3461_v6 }
 0xac0   :  { %v6476_v37 = vpop.eup %6475 }
 0xac1   :  { %v3464_v18 = vmul.f32 %v6476_v37, %v3362_v17  ;;  %v6478_v17 = vpop.eup %6477 }
 0xac2   :  { %v3467_v23 = vsub.f32 1.0, %v6478_v17  ;;  %v3469_v6 = vmul.f32 %v6478_v17, %v7963_v33 }
 0xac3   :  { %v3465_v13 = vadd.f32 %v3464_v18, %v3282_v3 }
 0xac4   :  { %v3403_v31 = vpop.f32.mrb[124].mxu0  ;;  %v3444_v58 = vpop.f32.mrb[124].mxu1 }
 0xac5   :  { %6479 = vtanh.f32 %v3465_v13  ;;  %v3471_v50 = vadd.f32 %v3403_v31, %v3283_v38  ;;  %v3405_v55 = vpop.f32.mrb[125].mxu0  ;;  %v5901_v45 = vpop.f32.mrb[125].mxu1  ;;  %v8115_v38 = vld [vmem:[#allocation10 + $0xe0] ss:$12 sps:$4 sm:$0xff]  }
 0xac6   :  { %v3478_v46 = vadd.f32 %v3405_v55, %v3284_v52  ;;  %v3407_v16 = vpop.f32.mrb[126].mxu0  ;;  %v3447_v53 = vpop.f32.mrb[126].mxu1  ;;  %v8118_v31 = vld [vmem:[#allocation10 + $0xf4] ss:$12 sps:$4 sm:$0xff]   ;;  %v8125_v52 = vld [vmem:[#allocation10 + $0xf8] ss:$12 sps:$4 sm:$0xff]  }
 0xac7   :  { %v5023_v0 = vmul.f32 -1.442695, %v3471_v50  ;;  %v3408_v20 = vpop.f32.mrb[127].mxu0  ;;  %v5902_v12 = vpop.f32.mrb[127].mxu1  ;;  %v8128_v50 = vld [vmem:[#allocation10 + $0x10c] ss:$12 sps:$4 sm:$0xff]  }
 0xac8   :  { %v5024_v43 = vmul.f32 -1.442695, %v3478_v46  ;;  %v8132_v55 = vld [vmem:[#allocation10 + $0x108] ss:$12 sps:$4 sm:$0xff]   ;;  %v8136_v45 = vld [vmem:[#allocation10 + $0x124] ss:$12 sps:$4 sm:$0xff]  }
 0xac9   :  { %6481 = vpow2.f32 %v5023_v0  ;;  %v8140_v46 = vld [vmem:[#allocation10 + $0x120] ss:$12 sps:$4 sm:$0xff]   ;;  %v8144_v16 = vld [vmem:[#allocation10 + $0x13c] ss:$12 sps:$4 sm:$0xff]   ;;  %v8148_v53 = vld [vmem:[#allocation10 + $0x138] ss:$12 sps:$4 sm:$0xff]   ;;  %v3507_v0 = vunpack.c.l.bf16 %v7856_v63 }
 0xaca   :  { %6483 = vpow2.f32 %v5024_v43 }
 0xacf   :  { %v6480_v60 = vpop.eup %6479 }
 0xad0   :  { %v3468_v30 = vmul.f32 %v6480_v60, %v3467_v23 }
 0xad2   :  { %v8050_v15 = vadd.f32 %v3469_v6, %v3468_v30 }
 0xad3   :  { %v6482_v37 = vpop.eup %6481 }
 0xad4   :  { %v3475_v3 = vadd.f32 1.0, %v6482_v37  ;;  %v3512_v18 = vpack.c.bf16 %v8050_v15, %v8050_v15  ;;  %v6484_v33 = vpop.eup %6483 }
 0xad6   :  { %6485 = vrcp.f32 %v3475_v3  ;;  %3546 = vmatmul.mubr.bf16.vlgmr.msra.gmra.mrb[128].mxu0 %v3512_v18  ;;  %5920 = vmatmul.mubr.bf16.vlgmr.msra.gmra.mrb[128].mxu1 %v3512_v18 }
 0xad7   :  { %3596 = vmatpush1.bf16.msra.mxu0 %v7746_v48  ;;  %5924 = vmatpush3.bf16.msra.mxu1 %v7758_v34  ;;  %v3482_v48 = vadd.f32 1.0, %v6484_v33  ;;  %v3285_v34 = vunpack.c.h.bf16 %v7834_v29  ;;  %v8105_v29 = vld [vmem:[#allocation10 + $0xdc] ss:$12 sps:$4 sm:$0xff]   ;;  %v3508_v33 = vunpack.c.l.bf16 %v7846_v36 }
 0xad8   :  { %3597 = vmatprep.subr.bf16.mxu0 %v7750_v9  ;;  %5925 = vmatprep.subr.bf16.mxu1 %v8652_v5 }
 0xad9   :  { %3627 = vmatprep.mubr.bf16.mxu0 %v8653_v62  ;;  %5939 = vmatprep.mubr.msk.bf16.mxu1 %vm6811_vm0, %v8652_v5  ;;  %6487 = vrcp.f32 %v3482_v48 }
 0xadb   :  { %3598 = vmatpush1.bf16.msra.mxu0 %v7752_v57  ;;  %5926 = vmatpush3.bf16.msra.mxu1 %v7764_v14 }
 0xadc   :  { %3599 = vmatprep.subr.bf16.mxu0 %v7756_v59  ;;  %5927 = vmatprep.subr.bf16.mxu1 %v8652_v5 }
 0xadf   :  { %3600 = vmatpush1.bf16.msra.mxu0 %v7760_v11  ;;  %5928 = vmatpush3.bf16.msra.mxu1 %v7775_v54 }
 0xae0   :  { %v6486_v9 = vpop.eup %6485  ;;  %3601 = vmatprep.subr.bf16.mxu0 %v7768_v39  ;;  %5929 = vmatprep.subr.bf16.mxu1 %v8652_v5 }
 0xae1   :  { %v3485_v13 = vmul.f32 %v6486_v9, %v3444_v58  ;;  %v8122_v58 = vld [vmem:[#allocation10 + $0xf0] ss:$12 sps:$4 sm:$0xff]  }
 0xae3   :  { %v3486_v57 = vadd.f32 %v3485_v13, %v3285_v34  ;;  %3602 = vmatpush1.bf16.msra.mxu0 %v7770_v42  ;;  %5930 = vmatpush3.bf16.msra.mxu1 %v7791_v21  ;;  %v6488_v59 = vpop.eup %6487  ;;  %v3509_v34 = vunpack.c.h.bf16 %v7849_v2 }
 0xae4   :  { %3603 = vmatprep.subr.bf16.mxu0 %v7778_v56  ;;  %5931 = vmatprep.subr.bf16.mxu1 %v8652_v5  ;;  %v3488_v11 = vsub.f32 1.0, %v6488_v59  ;;  %v3490_v42 = vmul.f32 %v6488_v59, %v7999_v1  ;;  %v8112_v1 = vld [vmem:[#allocation10 + $0xd8] ss:$12 sps:$4 sm:$0xff]   ;;  %v3510_v59 = vunpack.c.h.bf16 %v7856_v63 }
 0xae5   :  { %6489 = vtanh.f32 %v3486_v57 }
 0xae7   :  { %3604 = vmatpush1.bf16.msra.mxu0 %v7780_v22  ;;  %5932 = vmatpush3.bf16.msra.mxu1 %v7807_v28 }
 0xae8   :  { %3605 = vmatprep.subr.bf16.mxu0 %v7785_v7  ;;  %5933 = vmatprep.subr.bf16.mxu1 %v8652_v5  ;;  %v8095_v7 = vld [vmem:[#allocation10 + $0xc4] ss:$12 sps:$4 sm:$0xff]  }
 0xaeb   :  { %3606 = vmatpush1.bf16.msra.mxu0 %v7788_v51  ;;  %5934 = vmatpush3.bf16.msra.mxu1 %v7813_v19  ;;  %v8099_v51 = vld [vmem:[#allocation10 + $0xc0] ss:$12 sps:$4 sm:$0xff]  }
 0xaec   :  { %3607 = vmatprep.subr.bf16.mxu0 %v7795_v47  ;;  %5935 = vmatprep.subr.bf16.mxu1 %v8652_v5 }
 0xaef   :  { %v6490_v14 = vpop.eup %6489  ;;  %3608 = vmatpush1.bf16.msra.mxu0 %v7797_v25  ;;  %5936 = vmatpush3.bf16.msra.mxu1 %v7817_v8  ;;  %v8102_v25 = vld [vmem:[#allocation10 + $0xc8] ss:$12 sps:$4 sm:$0xff]  }
 0xaf0   :  { %3609 = vmatprep.subr.bf16.mxu0 %v7802_v4  ;;  %5937 = vmatprep.subr.bf16.mxu1 %v8652_v5  ;;  %v3489_v39 = vmul.f32 %v6490_v14, %v3488_v11 }
 0xaf2   :  { %v8087_v54 = vadd.f32 %v3490_v42, %v3489_v39 }
 0xaf3   :  { %3610 = vmatpush1.bf16.msra.mxu0 %v7804_v32  ;;  %5938 = vmatpush3.bf16.msra.mxu1 %v7821_v49 }
 0xaf4   :  { %v5087_v56 = vpack.c.bf16 %v8087_v54, %v8050_v15  ;;  %v3594_v22 = vpack.c.bf16 %v8087_v54, %v8087_v54  ;;  %3739 = vmatprep.subr.bf16.mxu0 %v8095_v7  ;;  %5943 = vmatprep.subr.bf16.mxu1 %v8652_v5 }
 0xaf6   :  { %5088 = vst [vmem:[#allocation11 + $0x8] sm:$0xff] %v5087_v56   ;;  %3628 = vmatmul.mubr.bf16.vlgmr.msra.gmra.mrb[132].mxu0 %v3594_v22  ;;  %5940 = vmatmul.mubr.bf16.vlgmr.msra.gmra.mrb[132].mxu1 %v3594_v22 }
 0xaf7   :  { %3740 = vmatpush1.bf16.msra.mxu0 %v8099_v51  ;;  %5944 = vmatpush3.bf16.msra.mxu1 %v8102_v25 }
 0xaf8   :  { %3741 = vmatprep.subr.bf16.mxu0 %v8105_v29  ;;  %5945 = vmatprep.subr.bf16.mxu1 %v8652_v5 }
 0xaf9   :  { %3771 = vmatprep.mubr.bf16.mxu0 %v8653_v62  ;;  %5959 = vmatprep.mubr.msk.bf16.mxu1 %vm6811_vm0, %v8652_v5 }
 0xafb   :  { %3742 = vmatpush1.bf16.msra.mxu0 %v8112_v1  ;;  %5946 = vmatpush3.bf16.msra.mxu1 %v8115_v38 }
 0xafc   :  { %3743 = vmatprep.subr.bf16.mxu0 %v8118_v31  ;;  %5947 = vmatprep.subr.bf16.mxu1 %v8652_v5 }
 0xaff   :  { %3744 = vmatpush1.bf16.msra.mxu0 %v8122_v58  ;;  %5948 = vmatpush3.bf16.msra.mxu1 %v8125_v52 }
 0xb00   :  { %3745 = vmatprep.subr.bf16.mxu0 %v8128_v50  ;;  %5949 = vmatprep.subr.bf16.mxu1 %v8652_v5 }
 0xb03   :  { %3746 = vmatpush1.bf16.msra.mxu0 %v8132_v55  ;;  %5950 = vmatpush3.bf16.msra.mxu1 %v7791_v21  ;;  %v8154_v21 = vld [vmem:[#allocation10 + $0x150] ss:$12 sps:$4 sm:$0xff]  }
 0xb04   :  { %3747 = vmatprep.subr.bf16.mxu0 %v8136_v45  ;;  %5951 = vmatprep.subr.bf16.mxu1 %v8652_v5 }
 0xb07   :  { %3748 = vmatpush1.bf16.msra.mxu0 %v8140_v46  ;;  %5952 = vmatpush3.bf16.msra.mxu1 %v7807_v28 }
 0xb08   :  { %3749 = vmatprep.subr.bf16.mxu0 %v8144_v16  ;;  %5953 = vmatprep.subr.bf16.mxu1 %v8652_v5 }
 0xb0b   :  { %3750 = vmatpush1.bf16.msra.mxu0 %v8148_v53  ;;  %5954 = vmatpush3.bf16.msra.mxu1 %v7813_v19 }
 0xb0c   :  { %3751 = vmatprep.subr.bf16.mxu0 %v7795_v47  ;;  %5955 = vmatprep.subr.bf16.mxu1 %v8652_v5  ;;  %v3506_v47 = vunpack.c.l.bf16 %v7849_v2 }
 0xb0f   :  { %3752 = vmatpush1.bf16.msra.mxu0 %v8154_v21  ;;  %5956 = vmatpush3.bf16.msra.mxu1 %v7817_v8 }
 0xb10   :  { %3753 = vmatprep.subr.bf16.mxu0 %v7802_v4  ;;  %5957 = vmatprep.subr.bf16.mxu1 %v8652_v5 }
 0xb13   :  { %3754 = vmatpush1.bf16.msra.mxu0 %v7804_v32  ;;  %5958 = vmatpush3.bf16.msra.mxu1 %v7821_v49 }
 0xb14   :  { %3821 = vmatprep.subr.bf16.mxu0 %v8095_v7  ;;  %5963 = vmatprep.subr.bf16.mxu1 %v8652_v5 }
 0xba9   :  { %v3547_v28 = vpop.f32.mrb[128].mxu0  ;;  %v3588_v19 = vpop.f32.mrb[128].mxu1 }
 0xbaa   :  { %v3676_v20 = vadd.f32 %v3547_v28, %v3506_v47  ;;  %v3549_v8 = vpop.f32.mrb[129].mxu0  ;;  %v5921_v12 = vpop.f32.mrb[129].mxu1 }
 0xbab   :  { %v3683_v4 = vadd.f32 %v3549_v8, %v3507_v0  ;;  %v3551_v17 = vpop.f32.mrb[130].mxu0  ;;  %v3591_v43 = vpop.f32.mrb[130].mxu1 }
 0xbac   :  { %v5027_v23 = vmul.f32 -1.442695, %v3676_v20  ;;  %v3552_v32 = vpop.f32.mrb[131].mxu0  ;;  %v5922_v60 = vpop.f32.mrb[131].mxu1 }
 0xbad   :  { %v5028_v49 = vmul.f32 -1.442695, %v3683_v4 }
 0xbae   :  { %6491 = vpow2.f32 %v5027_v23 }
 0xbaf   :  { %6493 = vpow2.f32 %v5028_v49  ;;  %v3511_v49 = vunpack.c.h.bf16 %v7846_v36 }
 0xbb8   :  { %v6492_v30 = vpop.eup %6491 }
 0xbb9   :  { %v3680_v6 = vadd.f32 1.0, %v6492_v30  ;;  %v6494_v37 = vpop.eup %6493 }
 0xbba   :  { %v3687_v3 = vadd.f32 1.0, %v6494_v37  ;;  %v8191_v37 = vld [vmem:[#allocation10 + $0x110] ss:$12 sps:$4 sm:$0xff]  }
 0xbbb   :  { %6495 = vrcp.f32 %v3680_v6 }
 0xbbc   :  { %6497 = vrcp.f32 %v3687_v3  ;;  %v8197_v3 = vld [vmem:[#allocation10 + $0x128] ss:$12 sps:$4 sm:$0xff]  }
 0xbc5   :  { %v6496_v18 = vpop.eup %6495 }
 0xbc6   :  { %v3690_v48 = vmul.f32 %v6496_v18, %v3588_v19  ;;  %v6498_v19 = vpop.eup %6497  ;;  %v8203_v18 = vld [vmem:[#allocation10 + $0x140] ss:$12 sps:$4 sm:$0xff]  }
 0xbc7   :  { %v3693_v8 = vsub.f32 1.0, %v6498_v19  ;;  %v3695_v4 = vmul.f32 %v6498_v19, %v8050_v15 }
 0xbc8   :  { %v3691_v9 = vadd.f32 %v3690_v48, %v3508_v33  ;;  %v8206_v33 = vld [vmem:[#allocation10 + $0x154] ss:$12 sps:$4 sm:$0xff]  }
 0xbc9   :  { %v3629_v13 = vpop.f32.mrb[132].mxu0  ;;  %v3670_v57 = vpop.f32.mrb[132].mxu1 }
 0xbca   :  { %6499 = vtanh.f32 %v3691_v9  ;;  %v3697_v11 = vadd.f32 %v3629_v13, %v3509_v34  ;;  %v3631_v14 = vpop.f32.mrb[133].mxu0  ;;  %v5941_v39 = vpop.f32.mrb[133].mxu1  ;;  %v8211_v34 = vld [vmem:[#allocation10 + $0x158] ss:$12 sps:$4 sm:$0xff]  }
 0xbcb   :  { %v3704_v42 = vadd.f32 %v3631_v14, %v3510_v59  ;;  %v3633_v56 = vpop.f32.mrb[134].mxu0  ;;  %v3673_v22 = vpop.f32.mrb[134].mxu1  ;;  %v8214_v13 = vld [vmem:[#allocation10 + $0x16c] ss:$12 sps:$4 sm:$0xff]   ;;  %v8221_v14 = vld [vmem:[#allocation10 + $0x168] ss:$12 sps:$4 sm:$0xff]  }
 0xbcc   :  { %v5029_v47 = vmul.f32 -1.442695, %v3697_v11  ;;  %v3634_v28 = vpop.f32.mrb[135].mxu0  ;;  %v5942_v0 = vpop.f32.mrb[135].mxu1  ;;  %v8224_v39 = vld [vmem:[#allocation10 + $0x170] ss:$12 sps:$4 sm:$0xff]  }
 0xbcd   :  { %v5030_v20 = vmul.f32 -1.442695, %v3704_v42  ;;  %v3733_v28 = vunpack.c.l.bf16 %v7866_v40 }
 0xbce   :  { %6501 = vpow2.f32 %v5029_v47 }
 0xbcf   :  { %6503 = vpow2.f32 %v5030_v20 }
 0xbd4   :  { %v6500_v12 = vpop.eup %6499 }
 0xbd5   :  { %v3694_v2 = vmul.f32 %v6500_v12, %v3693_v8 }
 0xbd7   :  { %v8170_v63 = vadd.f32 %v3695_v4, %v3694_v2 }
 0xbd8   :  { %v6502_v17 = vpop.eup %6501 }
 0xbd9   :  { %v3701_v43 = vadd.f32 1.0, %v6502_v17  ;;  %v3738_v23 = vpack.c.bf16 %v8170_v63, %v8170_v63  ;;  %v6504_v15 = vpop.eup %6503 }
 0xbda   :  { %v3708_v32 = vadd.f32 1.0, %v6504_v15 }
 0xbdb   :  { %6505 = vrcp.f32 %v3701_v43  ;;  %3772 = vmatmul.mubr.bf16.vlgmr.msra.gmra.mrb[136].mxu0 %v3738_v23  ;;  %5960 = vmatmul.mubr.bf16.vlgmr.msra.gmra.mrb[136].mxu1 %v3738_v23 }
 0xbdc   :  { %3822 = vmatpush1.bf16.msra.mxu0 %v8099_v51  ;;  %5964 = vmatpush3.bf16.msra.mxu1 %v8102_v25  ;;  %6507 = vrcp.f32 %v3708_v32 }
 0xbdd   :  { %3823 = vmatprep.subr.bf16.mxu0 %v8105_v29  ;;  %5965 = vmatprep.subr.bf16.mxu1 %v8652_v5 }
 0xbde   :  { %3853 = vmatprep.mubr.bf16.mxu0 %v8653_v62  ;;  %5979 = vmatprep.mubr.msk.bf16.mxu1 %vm6811_vm0, %v8652_v5 }
 0xbe0   :  { %3824 = vmatpush1.bf16.msra.mxu0 %v8112_v1  ;;  %5966 = vmatpush3.bf16.msra.mxu1 %v8115_v38 }
 0xbe1   :  { %3825 = vmatprep.subr.bf16.mxu0 %v8118_v31  ;;  %5967 = vmatprep.subr.bf16.mxu1 %v8652_v5 }
 0xbe4   :  { %3826 = vmatpush1.bf16.msra.mxu0 %v8122_v58  ;;  %5968 = vmatpush3.bf16.msra.mxu1 %v8125_v52 }
 0xbe5   :  { %v6506_v60 = vpop.eup %6505  ;;  %3827 = vmatprep.subr.bf16.mxu0 %v8128_v50  ;;  %5969 = vmatprep.subr.bf16.mxu1 %v8652_v5 }
 0xbe6   :  { %v3711_v30 = vmul.f32 %v6506_v60, %v3670_v57  ;;  %v6508_v36 = vpop.eup %6507 }
 0xbe7   :  { %v3714_v48 = vsub.f32 1.0, %v6508_v36  ;;  %v3716_v59 = vmul.f32 %v6508_v36, %v8087_v54  ;;  %v3732_v54 = vunpack.c.l.bf16 %v7862_v35 }
 0xbe8   :  { %v3712_v6 = vadd.f32 %v3711_v30, %v3511_v49  ;;  %3828 = vmatpush1.bf16.msra.mxu0 %v8132_v55  ;;  %5970 = vmatpush3.bf16.msra.mxu1 %v8191_v37 }
 0xbe9   :  { %3829 = vmatprep.subr.bf16.mxu0 %v8136_v45  ;;  %5971 = vmatprep.subr.bf16.mxu1 %v8652_v5 }
 0xbea   :  { %6509 = vtanh.f32 %v3712_v6  ;;  %v3734_v6 = vunpack.c.l.bf16 %v7842_v10 }
 0xbec   :  { %3830 = vmatpush1.bf16.msra.mxu0 %v8140_v46  ;;  %5972 = vmatpush3.bf16.msra.mxu1 %v8197_v3 }
 0xbed   :  { %3831 = vmatprep.subr.bf16.mxu0 %v8144_v16  ;;  %5973 = vmatprep.subr.bf16.mxu1 %v8652_v5 }
 0xbf0   :  { %3832 = vmatpush1.bf16.msra.mxu0 %v8148_v53  ;;  %5974 = vmatpush3.bf16.msra.mxu1 %v8203_v18 }
 0xbf1   :  { %3833 = vmatprep.subr.bf16.mxu0 %v8206_v33  ;;  %5975 = vmatprep.subr.bf16.mxu1 %v8652_v5 }
 0xbf4   :  { %v6510_v9 = vpop.eup %6509  ;;  %3834 = vmatpush1.bf16.msra.mxu0 %v8154_v21  ;;  %5976 = vmatpush3.bf16.msra.mxu1 %v8211_v34 }
 0xbf5   :  { %3835 = vmatprep.subr.bf16.mxu0 %v8214_v13  ;;  %5977 = vmatprep.subr.bf16.mxu1 %v8652_v5  ;;  %v3715_v57 = vmul.f32 %v6510_v9, %v3714_v48  ;;  %v3735_v9 = vunpack.c.h.bf16 %v7862_v35 }
 0xbf7   :  { %v8219_v11 = vadd.f32 %v3716_v59, %v3715_v57 }
 0xbf8   :  { %3836 = vmatpush1.bf16.msra.mxu0 %v8221_v14  ;;  %5978 = vmatpush3.bf16.msra.mxu1 %v8224_v39 }
 0xbf9   :  { %v5092_v42 = vpack.c.bf16 %v8219_v11, %v8170_v63  ;;  %v3820_v56 = vpack.c.bf16 %v8219_v11, %v8219_v11  ;;  %3965 = vmatprep.subr.bf16.mxu0 %v8095_v7  ;;  %5983 = vmatprep.subr.bf16.mxu1 %v8652_v5 }
 0xbfb   :  { %5093 = vst [vmem:[#allocation11 + $0x10] sm:$0xff] %v5092_v42   ;;  %3854 = vmatmul.mubr.bf16.vlgmr.msra.gmra.mrb[140].mxu0 %v3820_v56  ;;  %5980 = vmatmul.mubr.bf16.vlgmr.msra.gmra.mrb[140].mxu1 %v3820_v56  ;;  %v3736_v42 = vunpack.c.h.bf16 %v7866_v40 }
 0xbfc   :  { %3966 = vmatpush1.bf16.msra.mxu0 %v8099_v51  ;;  %5984 = vmatpush3.bf16.msra.mxu1 %v8102_v25 }
 0xbfd   :  { %3967 = vmatprep.subr.bf16.mxu0 %v8105_v29  ;;  %5985 = vmatprep.subr.bf16.mxu1 %v8652_v5 }
 0xbfe   :  { %3997 = vmatprep.mubr.bf16.mxu0 %v8653_v62  ;;  %5999 = vmatprep.mubr.msk.bf16.mxu1 %vm6811_vm0, %v8652_v5 }
 0xc00   :  { %3968 = vmatpush1.bf16.msra.mxu0 %v8112_v1  ;;  %5986 = vmatpush3.bf16.msra.mxu1 %v8115_v38 }
 0xc01   :  { %3969 = vmatprep.subr.bf16.mxu0 %v8118_v31  ;;  %5987 = vmatprep.subr.bf16.mxu1 %v8652_v5 }
 0xc04   :  { %3970 = vmatpush1.bf16.msra.mxu0 %v8122_v58  ;;  %5988 = vmatpush3.bf16.msra.mxu1 %v8125_v52 }
 0xc05   :  { %3971 = vmatprep.subr.bf16.mxu0 %v8128_v50  ;;  %5989 = vmatprep.subr.bf16.mxu1 %v8652_v5 }
 0xc08   :  { %3972 = vmatpush1.bf16.msra.mxu0 %v8132_v55  ;;  %5990 = vmatpush3.bf16.msra.mxu1 %v8191_v37 }
 0xc09   :  { %3973 = vmatprep.subr.bf16.mxu0 %v8136_v45  ;;  %5991 = vmatprep.subr.bf16.mxu1 %v8652_v5 }
 0xc0c   :  { %3974 = vmatpush1.bf16.msra.mxu0 %v8140_v46  ;;  %5992 = vmatpush3.bf16.msra.mxu1 %v8197_v3 }
 0xc0d   :  { %3975 = vmatprep.subr.bf16.mxu0 %v8144_v16  ;;  %5993 = vmatprep.subr.bf16.mxu1 %v8652_v5 }
 0xc10   :  { %3976 = vmatpush1.bf16.msra.mxu0 %v8148_v53  ;;  %5994 = vmatpush3.bf16.msra.mxu1 %v8203_v18 }
 0xc11   :  { %3977 = vmatprep.subr.bf16.mxu0 %v8206_v33  ;;  %5995 = vmatprep.subr.bf16.mxu1 %v8652_v5 }
 0xc14   :  { %3978 = vmatpush1.bf16.msra.mxu0 %v8154_v21  ;;  %5996 = vmatpush3.bf16.msra.mxu1 %v8211_v34 }
 0xc15   :  { %3979 = vmatprep.subr.bf16.mxu0 %v8214_v13  ;;  %5997 = vmatprep.subr.bf16.mxu1 %v8652_v5 }
 0xc18   :  { %3980 = vmatpush1.bf16.msra.mxu0 %v8221_v14  ;;  %5998 = vmatpush3.bf16.msra.mxu1 %v8224_v39 }
 0xc19   :  { %4047 = vmatprep.subr.bf16.mxu0 %v8095_v7  ;;  %6003 = vmatprep.subr.bf16.mxu1 %v8652_v5 }
 0xcae   :  { %v3773_v22 = vpop.f32.mrb[136].mxu0  ;;  %v3814_v47 = vpop.f32.mrb[136].mxu1 }
 0xcaf   :  { %v3902_v0 = vadd.f32 %v3773_v22, %v3732_v54  ;;  %v3775_v19 = vpop.f32.mrb[137].mxu0  ;;  %v5961_v20 = vpop.f32.mrb[137].mxu1 }
 0xcb0   :  { %v3909_v8 = vadd.f32 %v3775_v19, %v3733_v28  ;;  %v3777_v12 = vpop.f32.mrb[138].mxu0  ;;  %v3817_v2 = vpop.f32.mrb[138].mxu1 }
 0xcb1   :  { %v5033_v4 = vmul.f32 -1.442695, %v3902_v0  ;;  %v3778_v17 = vpop.f32.mrb[139].mxu0  ;;  %v5962_v43 = vpop.f32.mrb[139].mxu1 }
 0xcb2   :  { %v5034_v23 = vmul.f32 -1.442695, %v3909_v8 }
 0xcb3   :  { %6511 = vpow2.f32 %v5033_v4 }
 0xcb4   :  { %6513 = vpow2.f32 %v5034_v23 }
 0xcbd   :  { %v6512_v15 = vpop.eup %6511 }
 0xcbe   :  { %v3906_v32 = vadd.f32 1.0, %v6512_v15  ;;  %v6514_v60 = vpop.eup %6513 }
 0xcbf   :  { %v3913_v49 = vadd.f32 1.0, %v6514_v60 }
 0xcc0   :  { %6515 = vrcp.f32 %v3906_v32 }
 0xcc1   :  { %6517 = vrcp.f32 %v3913_v49 }
 0xcca   :  { %v6516_v30 = vpop.eup %6515 }
 0xccb   :  { %v3916_v36 = vmul.f32 %v6516_v30, %v3814_v47  ;;  %v6518_v47 = vpop.eup %6517  ;;  %v3737_v30 = vunpack.c.h.bf16 %v7842_v10 }
 0xccc   :  { %v3919_v4 = vsub.f32 1.0, %v6518_v47  ;;  %v3921_v43 = vmul.f32 %v6518_v47, %v8170_v63 }
 0xccd   :  { %v3917_v48 = vadd.f32 %v3916_v36, %v3734_v6 }
 0xcce   :  { %v3855_v57 = vpop.f32.mrb[140].mxu0  ;;  %v3896_v59 = vpop.f32.mrb[140].mxu1 }
 0xccf   :  { %6519 = vtanh.f32 %v3917_v48  ;;  %v3923_v56 = vadd.f32 %v3855_v57, %v3735_v9  ;;  %v3857_v54 = vpop.f32.mrb[141].mxu0  ;;  %v5981_v22 = vpop.f32.mrb[141].mxu1 }
 0xcd0   :  { %v3930_v28 = vadd.f32 %v3857_v54, %v3736_v42  ;;  %v3859_v0 = vpop.f32.mrb[142].mxu0  ;;  %v3899_v19 = vpop.f32.mrb[142].mxu1 }
 0xcd1   :  { %v5035_v20 = vmul.f32 -1.442695, %v3923_v56  ;;  %v3860_v8 = vpop.f32.mrb[143].mxu0  ;;  %v5982_v12 = vpop.f32.mrb[143].mxu1  ;;  %v3959_v0 = vunpack.c.l.bf16 %v7881_v61 }
 0xcd2   :  { %v5036_v2 = vmul.f32 -1.442695, %v3930_v28 }
 0xcd3   :  { %6521 = vpow2.f32 %v5035_v20 }
 0xcd4   :  { %6523 = vpow2.f32 %v5036_v2 }
 0xcd9   :  { %v6520_v17 = vpop.eup %6519 }
 0xcda   :  { %v3920_v35 = vmul.f32 %v6520_v17, %v3919_v4 }
 0xcdc   :  { %v8274_v40 = vadd.f32 %v3921_v43, %v3920_v35 }
 0xcdd   :  { %v6522_v23 = vpop.eup %6521 }
 0xcde   :  { %v3927_v15 = vadd.f32 1.0, %v6522_v23  ;;  %v3964_v32 = vpack.c.bf16 %v8274_v40, %v8274_v40  ;;  %v6524_v63 = vpop.eup %6523 }
 0xcdf   :  { %v3934_v60 = vadd.f32 1.0, %v6524_v63 }
 0xce0   :  { %6525 = vrcp.f32 %v3927_v15  ;;  %3998 = vmatmul.mubr.bf16.vlgmr.msra.gmra.mrb[144].mxu0 %v3964_v32  ;;  %6000 = vmatmul.mubr.bf16.vlgmr.msra.gmra.mrb[144].mxu1 %v3964_v32 }
 0xce1   :  { %4048 = vmatpush1.bf16.msra.mxu0 %v8099_v51  ;;  %6004 = vmatpush3.bf16.msra.mxu1 %v8102_v25  ;;  %6527 = vrcp.f32 %v3934_v60 }
 0xce2   :  { %4049 = vmatprep.subr.bf16.mxu0 %v8105_v29  ;;  %6005 = vmatprep.subr.bf16.mxu1 %v8652_v5 }
 0xce3   :  { %4079 = vmatprep.mubr.bf16.mxu0 %v8653_v62  ;;  %6019 = vmatprep.mubr.msk.bf16.mxu1 %vm6811_vm0, %v8652_v5 }
 0xce5   :  { %4050 = vmatpush1.bf16.msra.mxu0 %v8112_v1  ;;  %6006 = vmatpush3.bf16.msra.mxu1 %v8115_v38 }
 0xce6   :  { %4051 = vmatprep.subr.bf16.mxu0 %v8118_v31  ;;  %6007 = vmatprep.subr.bf16.mxu1 %v8652_v5 }
 0xce9   :  { %4052 = vmatpush1.bf16.msra.mxu0 %v8122_v58  ;;  %6008 = vmatpush3.bf16.msra.mxu1 %v8125_v52 }
 0xcea   :  { %v6526_v49 = vpop.eup %6525  ;;  %4053 = vmatprep.subr.bf16.mxu0 %v8128_v50  ;;  %6009 = vmatprep.subr.bf16.mxu1 %v8652_v5 }
 0xceb   :  { %v3937_v6 = vmul.f32 %v6526_v49, %v3896_v59  ;;  %v6528_v10 = vpop.eup %6527  ;;  %v3960_v49 = vunpack.c.l.bf16 %v7858_v24 }
 0xcec   :  { %v3940_v48 = vsub.f32 1.0, %v6528_v10  ;;  %v3942_v59 = vmul.f32 %v6528_v10, %v8219_v11  ;;  %v3958_v11 = vunpack.c.l.bf16 %v7877_v41 }
 0xced   :  { %v3938_v36 = vadd.f32 %v3937_v6, %v3737_v30  ;;  %4054 = vmatpush1.bf16.msra.mxu0 %v8132_v55  ;;  %6010 = vmatpush3.bf16.msra.mxu1 %v8191_v37 }
 0xcee   :  { %4055 = vmatprep.subr.bf16.mxu0 %v8136_v45  ;;  %6011 = vmatprep.subr.bf16.mxu1 %v8652_v5 }
 0xcef   :  { %6529 = vtanh.f32 %v3938_v36  ;;  %v3961_v36 = vunpack.c.h.bf16 %v7877_v41 }
 0xcf1   :  { %4056 = vmatpush1.bf16.msra.mxu0 %v8140_v46  ;;  %6012 = vmatpush3.bf16.msra.mxu1 %v8197_v3 }
 0xcf2   :  { %4057 = vmatprep.subr.bf16.mxu0 %v8144_v16  ;;  %6013 = vmatprep.subr.bf16.mxu1 %v8652_v5 }
 0xcf5   :  { %4058 = vmatpush1.bf16.msra.mxu0 %v8148_v53  ;;  %6014 = vmatpush3.bf16.msra.mxu1 %v8203_v18 }
 0xcf6   :  { %4059 = vmatprep.subr.bf16.mxu0 %v8206_v33  ;;  %6015 = vmatprep.subr.bf16.mxu1 %v8652_v5 }
 0xcf9   :  { %v6530_v9 = vpop.eup %6529  ;;  %4060 = vmatpush1.bf16.msra.mxu0 %v8154_v21  ;;  %6016 = vmatpush3.bf16.msra.mxu1 %v8211_v34 }
 0xcfa   :  { %4061 = vmatprep.subr.bf16.mxu0 %v8214_v13  ;;  %6017 = vmatprep.subr.bf16.mxu1 %v8652_v5  ;;  %v3941_v57 = vmul.f32 %v6530_v9, %v3940_v48  ;;  %v3962_v9 = vunpack.c.h.bf16 %v7881_v61 }
 0xcfc   :  { %v8311_v42 = vadd.f32 %v3942_v59, %v3941_v57 }
 0xcfd   :  { %4062 = vmatpush1.bf16.msra.mxu0 %v8221_v14  ;;  %6018 = vmatpush3.bf16.msra.mxu1 %v8224_v39 }
 0xcfe   :  { %v5097_v56 = vpack.c.bf16 %v8311_v42, %v8274_v40  ;;  %v4046_v54 = vpack.c.bf16 %v8311_v42, %v8311_v42  ;;  %4191 = vmatprep.subr.bf16.mxu0 %v8095_v7  ;;  %6023 = vmatprep.subr.bf16.mxu1 %v8652_v5 }
 0xd00   :  { %5098 = vst [vmem:[#allocation11 + $0x18] sm:$0xff] %v5097_v56   ;;  %4080 = vmatmul.mubr.bf16.vlgmr.msra.gmra.mrb[148].mxu0 %v4046_v54  ;;  %6020 = vmatmul.mubr.bf16.vlgmr.msra.gmra.mrb[148].mxu1 %v4046_v54 }
 0xd01   :  { %4192 = vmatpush1.bf16.msra.mxu0 %v8099_v51  ;;  %6024 = vmatpush3.bf16.msra.mxu1 %v8102_v25 }
 0xd02   :  { %4193 = vmatprep.subr.bf16.mxu0 %v8105_v29  ;;  %6025 = vmatprep.subr.bf16.mxu1 %v8652_v5 }
 0xd03   :  { %4223 = vmatprep.mubr.bf16.mxu0 %v8653_v62  ;;  %6039 = vmatprep.mubr.msk.bf16.mxu1 %vm6811_vm0, %v8652_v5 }
 0xd05   :  { %4194 = vmatpush1.bf16.msra.mxu0 %v8112_v1  ;;  %6026 = vmatpush3.bf16.msra.mxu1 %v8115_v38 }
 0xd06   :  { %4195 = vmatprep.subr.bf16.mxu0 %v8118_v31  ;;  %6027 = vmatprep.subr.bf16.mxu1 %v8652_v5 }
 0xd09   :  { %4196 = vmatpush1.bf16.msra.mxu0 %v8122_v58  ;;  %6028 = vmatpush3.bf16.msra.mxu1 %v8125_v52 }
 0xd0a   :  { %4197 = vmatprep.subr.bf16.mxu0 %v8128_v50  ;;  %6029 = vmatprep.subr.bf16.mxu1 %v8652_v5 }
 0xd0d   :  { %4198 = vmatpush1.bf16.msra.mxu0 %v8132_v55  ;;  %6030 = vmatpush3.bf16.msra.mxu1 %v8191_v37 }
 0xd0e   :  { %4199 = vmatprep.subr.bf16.mxu0 %v8136_v45  ;;  %6031 = vmatprep.subr.bf16.mxu1 %v8652_v5 }
 0xd11   :  { %4200 = vmatpush1.bf16.msra.mxu0 %v8140_v46  ;;  %6032 = vmatpush3.bf16.msra.mxu1 %v8197_v3 }
 0xd12   :  { %4201 = vmatprep.subr.bf16.mxu0 %v8144_v16  ;;  %6033 = vmatprep.subr.bf16.mxu1 %v8652_v5 }
 0xd15   :  { %4202 = vmatpush1.bf16.msra.mxu0 %v8148_v53  ;;  %6034 = vmatpush3.bf16.msra.mxu1 %v8203_v18 }
 0xd16   :  { %4203 = vmatprep.subr.bf16.mxu0 %v8206_v33  ;;  %6035 = vmatprep.subr.bf16.mxu1 %v8652_v5 }
 0xd19   :  { %4204 = vmatpush1.bf16.msra.mxu0 %v8154_v21  ;;  %6036 = vmatpush3.bf16.msra.mxu1 %v8211_v34 }
 0xd1a   :  { %4205 = vmatprep.subr.bf16.mxu0 %v8214_v13  ;;  %6037 = vmatprep.subr.bf16.mxu1 %v8652_v5 }
 0xd1d   :  { %4206 = vmatpush1.bf16.msra.mxu0 %v8221_v14  ;;  %6038 = vmatpush3.bf16.msra.mxu1 %v8224_v39 }
 0xd1e   :  { %4273 = vmatprep.subr.bf16.mxu0 %v8095_v7  ;;  %6043 = vmatprep.subr.bf16.mxu1 %v8652_v5 }
 0xdb3   :  { %v3999_v22 = vpop.f32.mrb[144].mxu0  ;;  %v4040_v28 = vpop.f32.mrb[144].mxu1 }
 0xdb4   :  { %v4128_v19 = vadd.f32 %v3999_v22, %v3958_v11  ;;  %v4001_v20 = vpop.f32.mrb[145].mxu0  ;;  %v6001_v8 = vpop.f32.mrb[145].mxu1 }
 0xdb5   :  { %v4135_v12 = vadd.f32 %v4001_v20, %v3959_v0  ;;  %v4003_v47 = vpop.f32.mrb[146].mxu0  ;;  %v4043_v2 = vpop.f32.mrb[146].mxu1 }
 0xdb6   :  { %v5039_v4 = vmul.f32 -1.442695, %v4128_v19  ;;  %v4004_v17 = vpop.f32.mrb[147].mxu0  ;;  %v6002_v35 = vpop.f32.mrb[147].mxu1 }
 0xdb7   :  { %v5040_v43 = vmul.f32 -1.442695, %v4135_v12 }
 0xdb8   :  { %6531 = vpow2.f32 %v5039_v4 }
 0xdb9   :  { %6533 = vpow2.f32 %v5040_v43 }
 0xdc2   :  { %v6532_v23 = vpop.eup %6531 }
 0xdc3   :  { %v4132_v15 = vadd.f32 1.0, %v6532_v23  ;;  %v6534_v32 = vpop.eup %6533 }
 0xdc4   :  { %v4139_v63 = vadd.f32 1.0, %v6534_v32 }
 0xdc5   :  { %6535 = vrcp.f32 %v4132_v15  ;;  %v3963_v15 = vunpack.c.h.bf16 %v7858_v24 }
 0xdc6   :  { %6537 = vrcp.f32 %v4139_v63 }
 0xdcf   :  { %v6536_v60 = vpop.eup %6535 }
 0xdd0   :  { %v4142_v30 = vmul.f32 %v6536_v60, %v4040_v28  ;;  %v6538_v28 = vpop.eup %6537 }
 0xdd1   :  { %v4145_v12 = vsub.f32 1.0, %v6538_v28  ;;  %v4147_v2 = vmul.f32 %v6538_v28, %v8274_v40 }
 0xdd2   :  { %v4143_v6 = vadd.f32 %v4142_v30, %v3960_v49 }
 0xdd3   :  { %v4081_v10 = vpop.f32.mrb[148].mxu0  ;;  %v4122_v48 = vpop.f32.mrb[148].mxu1 }
 0xdd4   :  { %6539 = vtanh.f32 %v4143_v6  ;;  %v4149_v57 = vadd.f32 %v4081_v10, %v3961_v36  ;;  %v4083_v59 = vpop.f32.mrb[149].mxu0  ;;  %v6021_v56 = vpop.f32.mrb[149].mxu1 }
 0xdd5   :  { %v4156_v54 = vadd.f32 %v4083_v59, %v3962_v9  ;;  %v4085_v11 = vpop.f32.mrb[150].mxu0  ;;  %v4125_v22 = vpop.f32.mrb[150].mxu1  ;;  %v4186_v59 = vunpack.c.l.bf16 %v7851_v26 }
 0xdd6   :  { %v5041_v0 = vmul.f32 -1.442695, %v4149_v57  ;;  %v4086_v19 = vpop.f32.mrb[151].mxu0  ;;  %v6022_v20 = vpop.f32.mrb[151].mxu1  ;;  %v4187_v11 = vunpack.c.h.bf16 %v7889_v44 }
 0xdd7   :  { %v5042_v8 = vmul.f32 -1.442695, %v4156_v54  ;;  %v4188_v19 = vunpack.c.h.bf16 %v7893_v27 }
 0xdd8   :  { %6541 = vpow2.f32 %v5041_v0 }
 0xdd9   :  { %6543 = vpow2.f32 %v5042_v8 }
 0xdde   :  { %v6540_v47 = vpop.eup %6539 }
 0xddf   :  { %v4146_v41 = vmul.f32 %v6540_v47, %v4145_v12 }
 0xde1   :  { %v8362_v61 = vadd.f32 %v4147_v2, %v4146_v41 }
 0xde2   :  { %v6542_v4 = vpop.eup %6541 }
 0xde3   :  { %v4153_v17 = vadd.f32 1.0, %v6542_v4  ;;  %v4190_v35 = vpack.c.bf16 %v8362_v61, %v8362_v61  ;;  %v6544_v40 = vpop.eup %6543 }
 0xde4   :  { %v4160_v43 = vadd.f32 1.0, %v6544_v40 }
 0xde5   :  { %6545 = vrcp.f32 %v4153_v17  ;;  %4224 = vmatmul.mubr.bf16.vlgmr.msra.gmra.mrb[152].mxu0 %v4190_v35  ;;  %6040 = vmatmul.mubr.bf16.vlgmr.msra.gmra.mrb[152].mxu1 %v4190_v35 }
 0xde6   :  { %4274 = vmatpush1.bf16.msra.mxu0 %v8099_v51  ;;  %6044 = vmatpush3.bf16.msra.mxu1 %v8102_v25  ;;  %6547 = vrcp.f32 %v4160_v43 }
 0xde7   :  { %4275 = vmatprep.subr.bf16.mxu0 %v8105_v29  ;;  %6045 = vmatprep.subr.bf16.mxu1 %v8652_v5 }
 0xde8   :  { %4305 = vmatprep.mubr.bf16.mxu0 %v8653_v62  ;;  %6059 = vmatprep.mubr.msk.bf16.mxu1 %vm6811_vm0, %v8652_v5 }
 0xdea   :  { %4276 = vmatpush1.bf16.msra.mxu0 %v8112_v1  ;;  %6046 = vmatpush3.bf16.msra.mxu1 %v8115_v38 }
 0xdeb   :  { %4277 = vmatprep.subr.bf16.mxu0 %v8118_v31  ;;  %6047 = vmatprep.subr.bf16.mxu1 %v8652_v5 }
 0xdee   :  { %4278 = vmatpush1.bf16.msra.mxu0 %v8122_v58  ;;  %6048 = vmatpush3.bf16.msra.mxu1 %v8125_v52 }
 0xdef   :  { %v6546_v23 = vpop.eup %6545  ;;  %4279 = vmatprep.subr.bf16.mxu0 %v8128_v50  ;;  %6049 = vmatprep.subr.bf16.mxu1 %v8652_v5 }
 0xdf0   :  { %v4163_v32 = vmul.f32 %v6546_v23, %v4122_v48  ;;  %v6548_v24 = vpop.eup %6547 }
 0xdf1   :  { %v4166_v60 = vsub.f32 1.0, %v6548_v24  ;;  %v4168_v6 = vmul.f32 %v6548_v24, %v8311_v42 }
 0xdf2   :  { %v4164_v63 = vadd.f32 %v4163_v32, %v3963_v15  ;;  %4280 = vmatpush1.bf16.msra.mxu0 %v8132_v55  ;;  %6050 = vmatpush3.bf16.msra.mxu1 %v8191_v37 }
 0xdf3   :  { %4281 = vmatprep.subr.bf16.mxu0 %v8136_v45  ;;  %6051 = vmatprep.subr.bf16.mxu1 %v8652_v5 }
 0xdf4   :  { %6549 = vtanh.f32 %v4164_v63 }
 0xdf6   :  { %4282 = vmatpush1.bf16.msra.mxu0 %v8140_v46  ;;  %6052 = vmatpush3.bf16.msra.mxu1 %v8197_v3 }
 0xdf7   :  { %4283 = vmatprep.subr.bf16.mxu0 %v8144_v16  ;;  %6053 = vmatprep.subr.bf16.mxu1 %v8652_v5 }
 0xdfa   :  { %4284 = vmatpush1.bf16.msra.mxu0 %v8148_v53  ;;  %6054 = vmatpush3.bf16.msra.mxu1 %v8203_v18 }
 0xdfb   :  { %4285 = vmatprep.subr.bf16.mxu0 %v8206_v33  ;;  %6055 = vmatprep.subr.bf16.mxu1 %v8652_v5 }
 0xdfe   :  { %v6550_v49 = vpop.eup %6549  ;;  %4286 = vmatpush1.bf16.msra.mxu0 %v8154_v21  ;;  %6056 = vmatpush3.bf16.msra.mxu1 %v8211_v34 }
 0xdff   :  { %4287 = vmatprep.subr.bf16.mxu0 %v8214_v13  ;;  %6057 = vmatprep.subr.bf16.mxu1 %v8652_v5  ;;  %v4167_v30 = vmul.f32 %v6550_v49, %v4166_v60  ;;  %v8454_v60 = vld [vmem:[#allocation10 + $0xc0] ss:$12 sps:$4 sm:$0xff]   ;;  %v8457_v49 = vld [vmem:[#allocation10 + $0xc8] ss:$12 sps:$4 sm:$0xff]  }
 0xe01   :  { %v8399_v36 = vadd.f32 %v4168_v6, %v4167_v30  ;;  %v8460_v30 = vld [vmem:[#allocation10 + $0xdc] ss:$12 sps:$4 sm:$0xff]   ;;  %v8467_v6 = vld [vmem:[#allocation10 + $0xd8] ss:$12 sps:$4 sm:$0xff]  }
 0xe02   :  { %4288 = vmatpush1.bf16.msra.mxu0 %v8221_v14  ;;  %6058 = vmatpush3.bf16.msra.mxu1 %v8224_v39 }
 0xe03   :  { %v5102_v10 = vpack.c.bf16 %v8399_v36, %v8362_v61  ;;  %v4272_v48 = vpack.c.bf16 %v8399_v36, %v8399_v36  ;;  %4417 = vmatprep.subr.bf16.mxu0 %v8095_v7  ;;  %6063 = vmatprep.subr.bf16.mxu1 %v8652_v5 }
 0xe05   :  { %5103 = vst [vmem:[#allocation11 + $0x20] sm:$0xff] %v5102_v10   ;;  %4306 = vmatmul.mubr.bf16.vlgmr.msra.gmra.mrb[156].mxu0 %v4272_v48  ;;  %6060 = vmatmul.mubr.bf16.vlgmr.msra.gmra.mrb[156].mxu1 %v4272_v48  ;;  %v8470_v10 = vld [vmem:[#allocation10 + $0xe0] ss:$12 sps:$4 sm:$0xff]  }
 0xe06   :  { %4418 = vmatpush1.bf16.msra.mxu0 %v8099_v51  ;;  %6064 = vmatpush3.bf16.msra.mxu1 %v8102_v25  ;;  %v4184_v51 = vunpack.c.l.bf16 %v7889_v44  ;;  %v8473_v48 = vld [vmem:[#allocation10 + $0xf4] ss:$12 sps:$4 sm:$0xff]  }
 0xe07   :  { %4419 = vmatprep.subr.bf16.mxu0 %v8105_v29  ;;  %6065 = vmatprep.subr.bf16.mxu1 %v8652_v5 }
 0xe08   :  { %4449 = vmatprep.mubr.bf16.mxu0 %v8653_v62  ;;  %6079 = vmatprep.mubr.msk.bf16.mxu1 %vm6811_vm0, %v8652_v5 }
 0xe0a   :  { %4420 = vmatpush1.bf16.msra.mxu0 %v8112_v1  ;;  %6066 = vmatpush3.bf16.msra.mxu1 %v8115_v38  ;;  %v4185_v1 = vunpack.c.l.bf16 %v7893_v27 }
 0xe0b   :  { %4421 = vmatprep.subr.bf16.mxu0 %v8118_v31  ;;  %6067 = vmatprep.subr.bf16.mxu1 %v8652_v5 }
 0xe0e   :  { %4422 = vmatpush1.bf16.msra.mxu0 %v8122_v58  ;;  %6068 = vmatpush3.bf16.msra.mxu1 %v8125_v52 }
 0xe0f   :  { %4423 = vmatprep.subr.bf16.mxu0 %v8128_v50  ;;  %6069 = vmatprep.subr.bf16.mxu1 %v8652_v5 }
 0xe12   :  { %4424 = vmatpush1.bf16.msra.mxu0 %v8132_v55  ;;  %6070 = vmatpush3.bf16.msra.mxu1 %v8191_v37 }
 0xe13   :  { %4425 = vmatprep.subr.bf16.mxu0 %v8136_v45  ;;  %6071 = vmatprep.subr.bf16.mxu1 %v8652_v5 }
 0xe16   :  { %4426 = vmatpush1.bf16.msra.mxu0 %v8140_v46  ;;  %6072 = vmatpush3.bf16.msra.mxu1 %v8197_v3 }
 0xe17   :  { %4427 = vmatprep.subr.bf16.mxu0 %v8144_v16  ;;  %6073 = vmatprep.subr.bf16.mxu1 %v8652_v5 }
 0xe1a   :  { %4428 = vmatpush1.bf16.msra.mxu0 %v8148_v53  ;;  %6074 = vmatpush3.bf16.msra.mxu1 %v8203_v18 }
 0xe1b   :  { %4429 = vmatprep.subr.bf16.mxu0 %v8206_v33  ;;  %6075 = vmatprep.subr.bf16.mxu1 %v8652_v5 }
 0xe1e   :  { %4430 = vmatpush1.bf16.msra.mxu0 %v8154_v21  ;;  %6076 = vmatpush3.bf16.msra.mxu1 %v8211_v34 }
 0xe1f   :  { %4431 = vmatprep.subr.bf16.mxu0 %v8214_v13  ;;  %6077 = vmatprep.subr.bf16.mxu1 %v8652_v5 }
 0xe22   :  { %4432 = vmatpush1.bf16.msra.mxu0 %v8221_v14  ;;  %6078 = vmatpush3.bf16.msra.mxu1 %v8224_v39 }
 0xe23   :  { %4499 = vmatprep.subr.bf16.mxu0 %v8095_v7  ;;  %6083 = vmatprep.subr.bf16.mxu1 %v8652_v5 }
 0xeb8   :  { %v4225_v25 = vpop.f32.mrb[152].mxu0  ;;  %v4266_v29 = vpop.f32.mrb[152].mxu1 }
 0xeb9   :  { %v4354_v38 = vadd.f32 %v4225_v25, %v4184_v51  ;;  %v4227_v31 = vpop.f32.mrb[153].mxu0  ;;  %v6041_v58 = vpop.f32.mrb[153].mxu1  ;;  %v8477_v25 = vld [vmem:[#allocation10 + $0xf0] ss:$12 sps:$4 sm:$0xff]  }
 0xeba   :  { %v4361_v52 = vadd.f32 %v4227_v31, %v4185_v1  ;;  %v4229_v50 = vpop.f32.mrb[154].mxu0  ;;  %v4269_v55 = vpop.f32.mrb[154].mxu1  ;;  %v4189_v31 = vunpack.c.h.bf16 %v7851_v26  ;;  %v8500_v26 = vld [vmem:[#allocation10 + $0x13c] ss:$12 sps:$4 sm:$0xff]  }
 0xebb   :  { %v5045_v45 = vmul.f32 -1.442695, %v4354_v38  ;;  %v4230_v46 = vpop.f32.mrb[155].mxu0  ;;  %v6042_v16 = vpop.f32.mrb[155].mxu1  ;;  %v8483_v38 = vld [vmem:[#allocation10 + $0x10c] ss:$12 sps:$4 sm:$0xff]  }
 0xebc   :  { %v5046_v53 = vmul.f32 -1.442695, %v4361_v52  ;;  %v8488_v50 = vld [vmem:[#allocation10 + $0x108] ss:$12 sps:$4 sm:$0xff]   ;;  %v8492_v55 = vld [vmem:[#allocation10 + $0x124] ss:$12 sps:$4 sm:$0xff]  }
 0xebd   :  { %6551 = vpow2.f32 %v5045_v45  ;;  %v8496_v45 = vld [vmem:[#allocation10 + $0x120] ss:$12 sps:$4 sm:$0xff]   ;;  %v8504_v16 = vld [vmem:[#allocation10 + $0x138] ss:$12 sps:$4 sm:$0xff]  }
 0xebe   :  { %6553 = vpow2.f32 %v5046_v53 }
 0xec7   :  { %v6552_v7 = vpop.eup %6551 }
 0xec8   :  { %v4358_v21 = vadd.f32 1.0, %v6552_v7  ;;  %v6554_v42 = vpop.eup %6553 }
 0xec9   :  { %v4365_v9 = vadd.f32 1.0, %v6554_v42 }
 0xeca   :  { %6555 = vrcp.f32 %v4358_v21  ;;  %v8510_v21 = vld [vmem:[#allocation10 + $0x150] ss:$12 sps:$4 sm:$0xff]  }
 0xecb   :  { %6557 = vrcp.f32 %v4365_v9 }
 0xed4   :  { %v6556_v57 = vpop.eup %6555 }
 0xed5   :  { %v4368_v56 = vmul.f32 %v6556_v57, %v4266_v29  ;;  %v6558_v35 = vpop.eup %6557  ;;  %v8480_v29 = vld [vmem:[#allocation10 + $0xf8] ss:$12 sps:$4 sm:$0xff]  }
 0xed6   :  { %v4371_v43 = vsub.f32 1.0, %v6558_v35  ;;  %v4373_v15 = vmul.f32 %v6558_v35, %v8362_v61 }
 0xed7   :  { %v4369_v54 = vadd.f32 %v4368_v56, %v4186_v59 }
 0xed8   :  { %v4307_v22 = vpop.f32.mrb[156].mxu0  ;;  %v4348_v0 = vpop.f32.mrb[156].mxu1 }
 0xed9   :  { %6559 = vtanh.f32 %v4369_v54  ;;  %v4375_v20 = vadd.f32 %v4307_v22, %v4187_v11  ;;  %v4309_v28 = vpop.f32.mrb[157].mxu0  ;;  %v6061_v8 = vpop.f32.mrb[157].mxu1  ;;  %v6698_v54 = vld [vmem:[#allocation10 + $0xc4] ss:$12 sps:$4 sm:$0xff]  }
 0xeda   :  { %v4382_v12 = vadd.f32 %v4309_v28, %v4188_v19  ;;  %v4311_v47 = vpop.f32.mrb[158].mxu0  ;;  %v4351_v41 = vpop.f32.mrb[158].mxu1 }
 0xedb   :  { %v5047_v2 = vmul.f32 -1.442695, %v4375_v20  ;;  %v4312_v4 = vpop.f32.mrb[159].mxu0  ;;  %v6062_v17 = vpop.f32.mrb[159].mxu1 }
 0xedc   :  { %v5048_v40 = vmul.f32 -1.442695, %v4382_v12  ;;  %v8668_v17 = vld [vmem:[#allocation20_spill] sm:$0xff] }
 0xedd   :  { %6561 = vpow2.f32 %v5047_v2  ;;  %v4412_v35 = vunpack.c.l.bf16 %v8668_v17 }
 0xede   :  { %6563 = vpow2.f32 %v5048_v40 }
 0xee3   :  { %v6560_v23 = vpop.eup %6559 }
 0xee4   :  { %v4372_v44 = vmul.f32 %v6560_v23, %v4371_v43 }
 0xee6   :  { %v8450_v27 = vadd.f32 %v4373_v15, %v4372_v44 }
 0xee7   :  { %v6562_v32 = vpop.eup %6561 }
 0xee8   :  { %v4379_v63 = vadd.f32 1.0, %v6562_v32  ;;  %v4416_v24 = vpack.c.bf16 %v8450_v27, %v8450_v27  ;;  %v6564_v61 = vpop.eup %6563 }
 0xee9   :  { %v4386_v51 = vadd.f32 1.0, %v6564_v61 }
 0xeea   :  { %6565 = vrcp.f32 %v4379_v63  ;;  %4450 = vmatmul.mubr.bf16.vlgmr.msra.gmra.mrb[160].mxu0 %v4416_v24  ;;  %6080 = vmatmul.mubr.bf16.vlgmr.msra.gmra.mrb[160].mxu1 %v4416_v24 }
 0xeeb   :  { %4500 = vmatpush1.bf16.msra.mxu0 %v8454_v60  ;;  %6084 = vmatpush3.bf16.msra.mxu1 %v8457_v49  ;;  %6567 = vrcp.f32 %v4386_v51 }
 0xeec   :  { %4501 = vmatprep.subr.bf16.mxu0 %v8460_v30  ;;  %6085 = vmatprep.subr.bf16.mxu1 %v8652_v5 }
 0xeed   :  { %4531 = vmatprep.mubr.bf16.mxu0 %v8653_v62  ;;  %6099 = vmatprep.mubr.msk.bf16.mxu1 %vm6811_vm0, %v8652_v5 }
 0xeef   :  { %4502 = vmatpush1.bf16.msra.mxu0 %v8467_v6  ;;  %6086 = vmatpush3.bf16.msra.mxu1 %v8470_v10 }
 0xef0   :  { %4503 = vmatprep.subr.bf16.mxu0 %v8473_v48  ;;  %6087 = vmatprep.subr.bf16.mxu1 %v8652_v5 }
 0xef3   :  { %4504 = vmatpush1.bf16.msra.mxu0 %v8477_v25  ;;  %6088 = vmatpush3.bf16.msra.mxu1 %v8480_v29 }
 0xef4   :  { %v6566_v1 = vpop.eup %6565  ;;  %4505 = vmatprep.subr.bf16.mxu0 %v8483_v38  ;;  %6089 = vmatprep.subr.bf16.mxu1 %v8652_v5 }
 0xef5   :  { %v4389_v58 = vmul.f32 %v6566_v1, %v4348_v0  ;;  %v6568_v46 = vpop.eup %6567 }
 0xef6   :  { %v4392_v53 = vsub.f32 1.0, %v6568_v46  ;;  %v4394_v9 = vmul.f32 %v6568_v46, %v8399_v36  ;;  %v8667_v36 = vld [vmem:[#allocation16_spill] sm:$0xff] }
 0xef7   :  { %v4390_v52 = vadd.f32 %v4389_v58, %v4189_v31  ;;  %4506 = vmatpush1.bf16.msra.mxu0 %v8488_v50  ;;  %6090 = vmatpush3.bf16.msra.mxu1 %v8191_v37  ;;  %v4411_v11 = vunpack.c.l.bf16 %v8667_v36  ;;  %v4414_v32 = vunpack.c.h.bf16 %v8667_v36 }
 0xef8   :  { %4507 = vmatprep.subr.bf16.mxu0 %v8492_v55  ;;  %6091 = vmatprep.subr.bf16.mxu1 %v8652_v5 }
 0xef9   :  { %6569 = vtanh.f32 %v4390_v52 }
 0xefb   :  { %4508 = vmatpush1.bf16.msra.mxu0 %v8496_v45  ;;  %6092 = vmatpush3.bf16.msra.mxu1 %v8197_v3 }
 0xefc   :  { %4509 = vmatprep.subr.bf16.mxu0 %v8500_v26  ;;  %6093 = vmatprep.subr.bf16.mxu1 %v8652_v5 }
 0xeff   :  { %4510 = vmatpush1.bf16.msra.mxu0 %v8504_v16  ;;  %6094 = vmatpush3.bf16.msra.mxu1 %v8203_v18 }
 0xf00   :  { %4511 = vmatprep.subr.bf16.mxu0 %v8206_v33  ;;  %6095 = vmatprep.subr.bf16.mxu1 %v8652_v5 }
 0xf03   :  { %v6570_v7 = vpop.eup %6569  ;;  %4512 = vmatpush1.bf16.msra.mxu0 %v8510_v21  ;;  %6096 = vmatpush3.bf16.msra.mxu1 %v8211_v34 }
 0xf04   :  { %4513 = vmatprep.subr.bf16.mxu0 %v8214_v13  ;;  %6097 = vmatprep.subr.bf16.mxu1 %v8652_v5  ;;  %v4393_v42 = vmul.f32 %v6570_v7, %v4392_v53 }
 0xf06   :  { %v8517_v57 = vadd.f32 %v4394_v9, %v4393_v42 }
 0xf07   :  { %4514 = vmatpush1.bf16.msra.mxu0 %v8221_v14  ;;  %6098 = vmatpush3.bf16.msra.mxu1 %v8224_v39 }
 0xf08   :  { %v5107_v59 = vpack.c.bf16 %v8517_v57, %v8450_v27  ;;  %v4498_v56 = vpack.c.bf16 %v8517_v57, %v8517_v57  ;;  %4643 = vmatprep.subr.bf16.mxu0 %v6698_v54  ;;  %6103 = vmatprep.subr.bf16.mxu1 %v8652_v5 }
 0xf0a   :  { %5108 = vst [vmem:[#allocation11 + $0x28] sm:$0xff] %v5107_v59   ;;  %4532 = vmatmul.mubr.bf16.vlgmr.msra.gmra.mrb[164].mxu0 %v4498_v56  ;;  %6100 = vmatmul.mubr.bf16.vlgmr.msra.gmra.mrb[164].mxu1 %v4498_v56 }
 0xf0b   :  { %4644 = vmatpush1.bf16.msra.mxu0 %v8454_v60  ;;  %6104 = vmatpush3.bf16.msra.mxu1 %v8457_v49 }
 0xf0c   :  { %4645 = vmatprep.subr.bf16.mxu0 %v8460_v30  ;;  %6105 = vmatprep.subr.bf16.mxu1 %v8652_v5 }
 0xf0d   :  { %4675 = vmatprep.mubr.bf16.mxu0 %v8653_v62  ;;  %6119 = vmatprep.mubr.msk.bf16.mxu1 %vm6811_vm0, %v8652_v5 }
 0xf0f   :  { %4646 = vmatpush1.bf16.msra.mxu0 %v8467_v6  ;;  %6106 = vmatpush3.bf16.msra.mxu1 %v8470_v10 }
 0xf10   :  { %4647 = vmatprep.subr.bf16.mxu0 %v8473_v48  ;;  %6107 = vmatprep.subr.bf16.mxu1 %v8652_v5 }
 0xf13   :  { %4648 = vmatpush1.bf16.msra.mxu0 %v8477_v25  ;;  %6108 = vmatpush3.bf16.msra.mxu1 %v8480_v29 }
 0xf14   :  { %4649 = vmatprep.subr.bf16.mxu0 %v8483_v38  ;;  %6109 = vmatprep.subr.bf16.mxu1 %v8652_v5 }
 0xf17   :  { %4650 = vmatpush1.bf16.msra.mxu0 %v8488_v50  ;;  %6110 = vmatpush3.bf16.msra.mxu1 %v8191_v37  ;;  %v8666_v37 = vld [vmem:[#allocation17_spill] sm:$0xff] }
 0xf18   :  { %4651 = vmatprep.subr.bf16.mxu0 %v8492_v55  ;;  %6111 = vmatprep.subr.bf16.mxu1 %v8652_v5  ;;  %v4413_v23 = vunpack.c.h.bf16 %v8666_v37 }
 0xf1b   :  { %4652 = vmatpush1.bf16.msra.mxu0 %v8496_v45  ;;  %6112 = vmatpush3.bf16.msra.mxu1 %v8197_v3  ;;  %v4410_v3 = vunpack.c.l.bf16 %v8666_v37 }
 0xf1c   :  { %4653 = vmatprep.subr.bf16.mxu0 %v8500_v26  ;;  %6113 = vmatprep.subr.bf16.mxu1 %v8652_v5 }
 0xf1f   :  { %4654 = vmatpush1.bf16.msra.mxu0 %v8504_v16  ;;  %6114 = vmatpush3.bf16.msra.mxu1 %v8203_v18 }
 0xf20   :  { %4655 = vmatprep.subr.bf16.mxu0 %v8206_v33  ;;  %6115 = vmatprep.subr.bf16.mxu1 %v8652_v5 }
 0xf23   :  { %4656 = vmatpush1.bf16.msra.mxu0 %v8510_v21  ;;  %6116 = vmatpush3.bf16.msra.mxu1 %v8211_v34 }
 0xf24   :  { %4657 = vmatprep.subr.bf16.mxu0 %v8214_v13  ;;  %6117 = vmatprep.subr.bf16.mxu1 %v8652_v5 }
 0xf27   :  { %4658 = vmatpush1.bf16.msra.mxu0 %v8221_v14  ;;  %6118 = vmatpush3.bf16.msra.mxu1 %v8224_v39 }
 0xf28   :  { %4725 = vmatprep.subr.bf16.mxu0 %v6698_v54  ;;  %6123 = vmatprep.subr.bf16.mxu1 %v8652_v5 }
 0xfbd   :  { %v4451_v18 = vpop.f32.mrb[160].mxu0  ;;  %v4492_v33 = vpop.f32.mrb[160].mxu1 }
 0xfbe   :  { %v4580_v22 = vadd.f32 %v4451_v18, %v4410_v3  ;;  %v4453_v0 = vpop.f32.mrb[161].mxu0  ;;  %v6081_v34 = vpop.f32.mrb[161].mxu1 }
 0xfbf   :  { %v4587_v19 = vadd.f32 %v4453_v0, %v4411_v11  ;;  %v4455_v13 = vpop.f32.mrb[162].mxu0  ;;  %v4495_v20 = vpop.f32.mrb[162].mxu1  ;;  %v6705_v11 = vld [vmem:[#allocation10 + $0x168] ss:$12 sps:$4 sm:$0xff]   ;;  %v8669_v34 = vld [vmem:[#allocation18_spill] sm:$0xff] }
 0xfc0   :  { %v5051_v28 = vmul.f32 -1.442695, %v4580_v22  ;;  %v4456_v8 = vpop.f32.mrb[163].mxu0  ;;  %v6082_v14 = vpop.f32.mrb[163].mxu1  ;;  %v6706_v22 = vld [vmem:[#allocation10 + $0x170] ss:$12 sps:$4 sm:$0xff]  }
 0xfc1   :  { %v5052_v39 = vmul.f32 -1.442695, %v4587_v19 }
 0xfc2   :  { %6571 = vpow2.f32 %v5051_v28 }
 0xfc3   :  { %6573 = vpow2.f32 %v5052_v39 }
 0xfcc   :  { %v6572_v12 = vpop.eup %6571 }
 0xfcd   :  { %v4584_v47 = vadd.f32 1.0, %v6572_v12  ;;  %v6574_v41 = vpop.eup %6573 }
 0xfce   :  { %v4591_v2 = vadd.f32 1.0, %v6574_v41 }
 0xfcf   :  { %6575 = vrcp.f32 %v4584_v47 }
 0xfd0   :  { %6577 = vrcp.f32 %v4591_v2 }
 0xfd9   :  { %v6576_v4 = vpop.eup %6575 }
 0xfda   :  { %v4594_v40 = vmul.f32 %v6576_v4, %v4492_v33  ;;  %v6578_v53 = vpop.eup %6577  ;;  %v6704_v33 = vld [vmem:[#allocation10 + $0x16c] ss:$12 sps:$4 sm:$0xff]  }
 0xfdb   :  { %v4597_v42 = vsub.f32 1.0, %v6578_v53  ;;  %v4599_v56 = vmul.f32 %v6578_v53, %v8450_v27 }
 0xfdc   :  { %v4595_v43 = vadd.f32 %v4594_v40, %v4412_v35 }
 0xfdd   :  { %v4533_v44 = vpop.f32.mrb[164].mxu0  ;;  %v4574_v15 = vpop.f32.mrb[164].mxu1 }
 0xfde   :  { %6579 = vtanh.f32 %v4595_v43  ;;  %v4601_v63 = vadd.f32 %v4533_v44, %v4413_v23  ;;  %v4535_v24 = vpop.f32.mrb[165].mxu0  ;;  %v6101_v61 = vpop.f32.mrb[165].mxu1 }
 0xfdf   :  { %v4608_v51 = vadd.f32 %v4535_v24, %v4414_v32  ;;  %v4537_v1 = vpop.f32.mrb[166].mxu0  ;;  %v4577_v31 = vpop.f32.mrb[166].mxu1  ;;  %v4639_v61 = vunpack.c.h.bf16 %v8669_v34 }
 0xfe0   :  { %v5053_v58 = vmul.f32 -1.442695, %v4601_v63  ;;  %v4538_v52 = vpop.f32.mrb[167].mxu0  ;;  %v6102_v46 = vpop.f32.mrb[167].mxu1 }
 0xfe1   :  { %v5054_v7 = vmul.f32 -1.442695, %v4608_v51 }
 0xfe2   :  { %6581 = vpow2.f32 %v5053_v58 }
 0xfe3   :  { %6583 = vpow2.f32 %v5054_v7 }
 0xfe8   :  { %v6580_v9 = vpop.eup %6579 }
 0xfe9   :  { %v4598_v59 = vmul.f32 %v6580_v9, %v4597_v42 }
 0xfeb   :  { %v8566_v54 = vadd.f32 %v4599_v56, %v4598_v59 }
 0xfec   :  { %v6582_v37 = vpop.eup %6581 }
 0xfed   :  { %v4605_v3 = vadd.f32 1.0, %v6582_v37  ;;  %v4642_v18 = vpack.c.bf16 %v8566_v54, %v8566_v54  ;;  %v6584_v27 = vpop.eup %6583 }
 0xfef   :  { %6585 = vrcp.f32 %v4605_v3  ;;  %4676 = vmatmul.mubr.bf16.vlgmr.msra.gmra.mrb[168].mxu0 %v4642_v18  ;;  %6120 = vmatmul.mubr.bf16.vlgmr.msra.gmra.mrb[168].mxu1 %v4642_v18 }
 0xff0   :  { %4726 = vmatpush1.bf16.msra.mxu0 %v8454_v60  ;;  %6124 = vmatpush3.bf16.msra.mxu1 %v8457_v49  ;;  %v4612_v60 = vadd.f32 1.0, %v6584_v27 }
 0xff1   :  { %4727 = vmatprep.subr.bf16.mxu0 %v8460_v30  ;;  %6125 = vmatprep.subr.bf16.mxu1 %v8652_v5 }
 0xff2   :  { %4757 = vmatprep.mubr.bf16.mxu0 %v8653_v62  ;;  %6139 = vmatprep.mubr.msk.bf16.mxu1 %vm6811_vm0, %v8652_v5  ;;  %v4415_v62 = vunpack.c.h.bf16 %v8668_v17  ;;  %6587 = vrcp.f32 %v4612_v60 }
 0xff4   :  { %4728 = vmatpush1.bf16.msra.mxu0 %v8467_v6  ;;  %6126 = vmatpush3.bf16.msra.mxu1 %v8470_v10  ;;  %v6699_v10 = vld [vmem:[#allocation10 + $0x110] ss:$12 sps:$4 sm:$0xff]  }
 0xff5   :  { %4729 = vmatprep.subr.bf16.mxu0 %v8473_v48  ;;  %6127 = vmatprep.subr.bf16.mxu1 %v8652_v5  ;;  %v6700_v48 = vld [vmem:[#allocation10 + $0x128] ss:$12 sps:$4 sm:$0xff]  }
 0xff8   :  { %4730 = vmatpush1.bf16.msra.mxu0 %v8477_v25  ;;  %6128 = vmatpush3.bf16.msra.mxu1 %v8480_v29  ;;  %v6701_v29 = vld [vmem:[#allocation10 + $0x140] ss:$12 sps:$4 sm:$0xff]  }
 0xff9   :  { %v6586_v49 = vpop.eup %6585  ;;  %4731 = vmatprep.subr.bf16.mxu0 %v8483_v38  ;;  %6129 = vmatprep.subr.bf16.mxu1 %v8652_v5  ;;  %v6702_v38 = vld [vmem:[#allocation10 + $0x154] ss:$12 sps:$4 sm:$0xff]  }
 0xffa   :  { %v4615_v30 = vmul.f32 %v6586_v49, %v4574_v15  ;;  %v8671_v15 = vld [vmem:[#allocation19_spill] sm:$0xff] }
 0xffb   :  { %v4638_v32 = vunpack.c.l.bf16 %v8671_v15 }
 0xffc   :  { %v4616_v6 = vadd.f32 %v4615_v30, %v4415_v62  ;;  %4732 = vmatpush1.bf16.msra.mxu0 %v8488_v50  ;;  %6130 = vmatpush3.bf16.msra.mxu1 %v6699_v10  ;;  %v6588_v25 = vpop.eup %6587 }
 0xffd   :  { %4733 = vmatprep.subr.bf16.mxu0 %v8492_v55  ;;  %6131 = vmatprep.subr.bf16.mxu1 %v8652_v5  ;;  %v4618_v50 = vsub.f32 1.0, %v6588_v25  ;;  %v4620_v36 = vmul.f32 %v6588_v25, %v8517_v57  ;;  %v8670_v57 = vld [vmem:[#allocation15_spill] sm:$0xff] }
 0xffe   :  { %6589 = vtanh.f32 %v4616_v6  ;;  %v4637_v20 = vunpack.c.l.bf16 %v8670_v57  ;;  %v4640_v31 = vunpack.c.h.bf16 %v8670_v57 }
0x1000   :  { %4734 = vmatpush1.bf16.msra.mxu0 %v8496_v45  ;;  %6132 = vmatpush3.bf16.msra.mxu1 %v6700_v48  ;;  %v6703_v45 = vld [vmem:[#allocation10 + $0x158] ss:$12 sps:$4 sm:$0xff]  }
0x1001   :  { %4735 = vmatprep.subr.bf16.mxu0 %v8500_v26  ;;  %6133 = vmatprep.subr.bf16.mxu1 %v8652_v5 }
0x1004   :  { %4736 = vmatpush1.bf16.msra.mxu0 %v8504_v16  ;;  %6134 = vmatpush3.bf16.msra.mxu1 %v6701_v29  ;;  %v4641_v29 = vunpack.c.h.bf16 %v8671_v15 }
0x1005   :  { %4737 = vmatprep.subr.bf16.mxu0 %v6702_v38  ;;  %6135 = vmatprep.subr.bf16.mxu1 %v8652_v5 }
0x1008   :  { %v6590_v55 = vpop.eup %6589  ;;  %4738 = vmatpush1.bf16.msra.mxu0 %v8510_v21  ;;  %6136 = vmatpush3.bf16.msra.mxu1 %v6703_v45 }
0x1009   :  { %4739 = vmatprep.subr.bf16.mxu0 %v6704_v33  ;;  %6137 = vmatprep.subr.bf16.mxu1 %v8652_v5  ;;  %v4619_v26 = vmul.f32 %v6590_v55, %v4618_v50  ;;  %v4636_v5 = vunpack.c.l.bf16 %v8669_v34 }
0x100b   :  { %v8597_v16 = vadd.f32 %v4620_v36, %v4619_v26 }
0x100c   :  { %4740 = vmatpush1.bf16.msra.mxu0 %v6705_v11  ;;  %6138 = vmatpush3.bf16.msra.mxu1 %v6706_v22 }
0x100d   :  { %v5112_v0 = vpack.c.bf16 %v8597_v16, %v8566_v54  ;;  %v4724_v21 = vpack.c.bf16 %v8597_v16, %v8597_v16 }
0x100f   :  { %5113 = vst [vmem:[#allocation11 + $0x30] sm:$0xff] %v5112_v0   ;;  %4758 = vmatmul.mubr.bf16.vlgmr.msra.gmra.mrb[172].mxu0 %v4724_v21  ;;  %6140 = vmatmul.mubr.bf16.vlgmr.msra.gmra.mrb[172].mxu1 %v4724_v21 }
0x10c2   :  { %v4677_v19 = vpop.f32.mrb[168].mxu0  ;;  %v4718_v13 = vpop.f32.mrb[168].mxu1 }
0x10c3   :  { %v4806_v28 = vadd.f32 %v4677_v19, %v4636_v5  ;;  %v4679_v8 = vpop.f32.mrb[169].mxu0  ;;  %v6121_v14 = vpop.f32.mrb[169].mxu1 }
0x10c4   :  { %v4813_v39 = vadd.f32 %v4679_v8, %v4637_v20  ;;  %v4681_v12 = vpop.f32.mrb[170].mxu0  ;;  %v4721_v47 = vpop.f32.mrb[170].mxu1 }
0x10c5   :  { %v5057_v41 = vmul.f32 -1.442695, %v4806_v28  ;;  %v4682_v2 = vpop.f32.mrb[171].mxu0  ;;  %v6122_v4 = vpop.f32.mrb[171].mxu1 }
0x10c6   :  { %v5058_v17 = vmul.f32 -1.442695, %v4813_v39 }
0x10c7   :  { %6591 = vpow2.f32 %v5057_v41 }
0x10c8   :  { %6593 = vpow2.f32 %v5058_v17 }
0x10d1   :  { %v6592_v35 = vpop.eup %6591 }
0x10d2   :  { %v4810_v40 = vadd.f32 1.0, %v6592_v35  ;;  %v6594_v43 = vpop.eup %6593 }
0x10d3   :  { %v4817_v23 = vadd.f32 1.0, %v6594_v43 }
0x10d4   :  { %6595 = vrcp.f32 %v4810_v40 }
0x10d5   :  { %6597 = vrcp.f32 %v4817_v23 }
0x10de   :  { %v6596_v44 = vpop.eup %6595 }
0x10df   :  { %v4820_v63 = vmul.f32 %v6596_v44, %v4718_v13  ;;  %v6598_v37 = vpop.eup %6597 }
0x10e0   :  { %v4823_v18 = vsub.f32 1.0, %v6598_v37  ;;  %v4825_v49 = vmul.f32 %v6598_v37, %v8566_v54 }
0x10e1   :  { %v4821_v24 = vadd.f32 %v4820_v63, %v4638_v32 }
0x10e2   :  { %v4759_v51 = vpop.f32.mrb[172].mxu0  ;;  %v4800_v1 = vpop.f32.mrb[172].mxu1 }
0x10e3   :  { %6599 = vtanh.f32 %v4821_v24  ;;  %v4827_v58 = vadd.f32 %v4759_v51, %v4639_v61  ;;  %v4761_v52 = vpop.f32.mrb[173].mxu0  ;;  %v6141_v46 = vpop.f32.mrb[173].mxu1 }
0x10e4   :  { %v4834_v53 = vadd.f32 %v4761_v52, %v4640_v31  ;;  %v4763_v7 = vpop.f32.mrb[174].mxu0  ;;  %v4803_v42 = vpop.f32.mrb[174].mxu1 }
0x10e5   :  { %v5059_v9 = vmul.f32 -1.442695, %v4827_v58  ;;  %v4764_v59 = vpop.f32.mrb[175].mxu0  ;;  %v6142_v56 = vpop.f32.mrb[175].mxu1 }
0x10e6   :  { %v5060_v3 = vmul.f32 -1.442695, %v4834_v53 }
0x10e7   :  { %6601 = vpow2.f32 %v5059_v9 }
0x10e8   :  { %6603 = vpow2.f32 %v5060_v3 }
0x10ed   :  { %v6600_v27 = vpop.eup %6599 }
0x10ee   :  { %v4824_v60 = vmul.f32 %v6600_v27, %v4823_v18 }
0x10f0   :  { %v4826_v62 = vadd.f32 %v4825_v49, %v4824_v60 }
0x10f1   :  { %v6602_v30 = vpop.eup %6601 }
0x10f2   :  { %v4831_v6 = vadd.f32 1.0, %v6602_v30  ;;  %v6604_v10 = vpop.eup %6603 }
0x10f3   :  { %v4838_v48 = vadd.f32 1.0, %v6604_v10 }
0x10f4   :  { %6605 = vrcp.f32 %v4831_v6 }
0x10f5   :  { %6607 = vrcp.f32 %v4838_v48 }
0x10fe   :  { %v6606_v25 = vpop.eup %6605 }
0x10ff   :  { %v4841_v38 = vmul.f32 %v6606_v25, %v4800_v1  ;;  %v6608_v55 = vpop.eup %6607 }
0x1100   :  { %v4844_v45 = vsub.f32 1.0, %v6608_v55  ;;  %v4846_v54 = vmul.f32 %v6608_v55, %v8597_v16 }
0x1101   :  { %v4842_v50 = vadd.f32 %v4841_v38, %v4641_v29 }
0x1103   :  { %6609 = vtanh.f32 %v4842_v50 }
0x110d   :  { %v6610_v33 = vpop.eup %6609 }
0x110e   :  { %v4845_v26 = vmul.f32 %v6610_v33, %v4844_v45 }
0x1110   :  { %v4847_v36 = vadd.f32 %v4846_v54, %v4845_v26 }
0x1112   :  { %v5117_v11 = vpack.c.bf16 %v4847_v36, %v4826_v62 }
0x1114   :  { %5118 = vst [vmem:[#allocation11 + $0x38] sm:$0xff] %v5117_v11  }
0x1115   :  { %6784 = shalt.err (!%p6781_p0)
}
0x1116   :  { %s6785_s27 = scalar_lea.hbm %s8629_s3, 1024 }
0x1117   :  { %p6786_p1 = scmp.ne.s32.totalorder %s8629_s3, %s6785_s27  ;;  %p6789_p2 = scmp.lt.u32.totalorder %s6785_s27, %s8629_s3 }
0x1119   :  { %p6791_p3 = pnand %p6789_p2, %p6786_p1 }
0x111b   :  { %6794 = shalt.err (!%p6791_p3)
}
0x111c   :  { %4872 = dma.vmem_to_hbm [thread:$0]  %s4867_s22, 1024, %s8629_s3, [#allocation7], %s6805_s1, %s6805_s1, %s6806_s9  }
0x111d   :  { %6799 = dma.done.wait [#allocation7], 1024  }
0x111e   :  { %6800 = vsyncadd [#allocation7], 4294966272 }
0x111f   :  { %4876 = vsyncpa [#allocation6], 1 }
0x1120   :  { %4877 = vsyncpa [#allocation9], 1 }
0x1121   :  { %4878 = vsyncpa [#allocation7], 1 }

</bundles_post_ra>
